<compile_context>
chip_gen: v7x
topology: tpu7x:2x2x1
jax: 0.10.0
libtpu: 0.0.40
codegen_flags: <defaults>
</compile_context>

<pallas_src>
import functools
import math

import jax
import jax.numpy as jnp
from jax import lax
from jax.experimental import pallas as pl
from jax.experimental.pallas import tpu as pltpu

EPS = 1e-5

# MXU operand dtype for the big (64->128, 128->1024) matmuls inside the fused chain kernel.
# f32 keeps the self-check tight on every generation; set to jnp.bfloat16 on v6e / v7x to
# feed the 918 / 996 TF/s bf16 MXU (accumulation stays f32 via preferred_element_type).
MXU_DTYPE = jnp.float32

# Raise for very large point counts (e.g. 64<<20 on v5e/v6e, <=48<<20 on v7x).  The default
# tile sizes below stay well inside every generation's default scoped-VMEM limit.
VMEM_LIMIT_BYTES = None

_VMEM = pl.BlockSpec(memory_space=pltpu.MemorySpace.VMEM)


def _compiler_params(dimension_semantics):
    kwargs = dict(dimension_semantics=dimension_semantics)
    if VMEM_LIMIT_BYTES is not None:
        kwargs["vmem_limit_bytes"] = VMEM_LIMIT_BYTES
    return pltpu.CompilerParams(**kwargs)


def _choose_tile_n(n, target=512):
    """Largest point-tile that divides N, is a multiple of 8 (layout rule) and <= target."""
    if n <= target:
        return n
    best = 0
    for t in range(8, target + 1, 8):
        if n % t == 0:
            best = t
    if best:
        return best
    # TODO(synk): N > target with no multiple-of-8 divisor (e.g. N=2500) falls back to
    # whole-N blocks; pad N to a multiple of 8 in the caller for such shapes.
    return n


def _conv_k3(x, w, b):
    # K=3 contraction unrolled on the VPU (a depth-3 matmul would waste the MXU).
    return (x[:, 0:1] * w[0:1, :] + x[:, 1:2] * w[1:2, :]
            + x[:, 2:3] * w[2:3, :] + b)


# --------------------------------------------------------------------------- #
# Kernel 1: fused conv chain + BN statistics + per-batch max/min of conv3     #
# --------------------------------------------------------------------------- #
def _chain_stats_kernel(x_ref, w1_ref, b1_ref, w2_ref, b2_ref, w3_ref, b3_ref,
                        g1_ref, be1_ref, g2_ref, be2_ref,
                        a1_ref, c1_ref, s3_ref, q3_ref, zmax_ref, zmin_ref,
                        s1_s, q1_s, s2_s, q2_s, a2_s, c2_s,
                        *, inv_n, mxu_dtype):
    phase = pl.program_id(0)
    b = pl.program_id(1)
    t = pl.program_id(2)
    first = (b == 0) & (t == 0)

    x = x_ref[...]                       # (TILE_N, 3)
    w1 = w1_ref[...]                     # (3, 64)  per-batch (T folded in for the main chain)
    z1 = _conv_k3(x, w1, b1_ref[...])    # (TILE_N, 64)

    # ---- phase 0: accumulate bn1 stats over z1 -------------------------------
    @pl.when(phase == 0)
    def _():
        @pl.when(first)
        def _():
            s1_s[...] = jnp.zeros_like(s1_s)
            q1_s[...] = jnp.zeros_like(q1_s)
        s1_s[...] += jnp.sum(z1, axis=0, keepdims=True)
        q1_s[...] += jnp.sum(z1 * z1, axis=0, keepdims=True)

    # ---- phase 1: finalize bn1, accumulate bn2 stats over z2 -----------------
    @pl.when(phase == 1)
    def _():
        @pl.when(first)
        def _():
            mean = s1_s[...] * inv_n
            var = jnp.maximum(q1_s[...] * inv_n - mean * mean, 0.0)
            a = g1_ref[...] * lax.rsqrt(var + EPS)
            a1_ref[...] = a
            c1_ref[...] = be1_ref[...] - a * mean
            s2_s[...] = jnp.zeros_like(s2_s)
            q2_s[...] = jnp.zeros_like(q2_s)
        h1 = jnp.maximum(a1_ref[...] * z1 + c1_ref[...], 0.0)
        z2 = jnp.dot(h1.astype(mxu_dtype), w2_ref[...].astype(mxu_dtype),
                     preferred_element_type=jnp.float32) + b2_ref[...]
        s2_s[...] += jnp.sum(z2, axis=0, keepdims=True)
        q2_s[...] += jnp.sum(z2 * z2, axis=0, keepdims=True)

    # ---- phase 2: finalize bn2, accumulate bn3 stats + per-batch max/min -----
    @pl.when(phase == 2)
    def _():
        @pl.when(first)
        def _():
            mean = s2_s[...] * inv_n
            var = jnp.maximum(q2_s[...] * inv_n - mean * mean, 0.0)
            a2_s[...] = g2_ref[...] * lax.rsqrt(var + EPS)
            c2_s[...] = be2_ref[...] - a2_s[...] * mean
            s3_ref[...] = jnp.zeros_like(s3_ref)
            q3_ref[...] = jnp.zeros_like(q3_ref)

        @pl.when(t == 0)                 # new batch element: reset its max/min block
        def _():
            zmax_ref[...] = jnp.full(zmax_ref.shape, -jnp.inf, zmax_ref.dtype)
            zmin_ref[...] = jnp.full(zmin_ref.shape, jnp.inf, zmin_ref.dtype)

        h1 = jnp.maximum(a1_ref[...] * z1 + c1_ref[...], 0.0)
        z2 = jnp.dot(h1.astype(mxu_dtype), w2_ref[...].astype(mxu_dtype),
                     preferred_element_type=jnp.float32) + b2_ref[...]
        h2 = jnp.maximum(a2_s[...] * z2 + c2_s[...], 0.0)
        z3 = jnp.dot(h2.astype(mxu_dtype), w3_ref[...].astype(mxu_dtype),
                     preferred_element_type=jnp.float32) + b3_ref[...]

        s3_ref[...] += jnp.sum(z3, axis=0, keepdims=True)
        q3_ref[...] += jnp.sum(z3 * z3, axis=0, keepdims=True)
        zmax_ref[...] = jnp.maximum(zmax_ref[...], jnp.max(z3, axis=0, keepdims=True))
        zmin_ref[...] = jnp.minimum(zmin_ref[...], jnp.min(z3, axis=0, keepdims=True))


def _chain_stats(x_bnc, w1, b1, w2, b2, w3, b3, g1, be1, g2, be2, *, tile_n):
    B, N, cin = x_bnc.shape
    assert N % tile_n == 0
    n_rows = B * N
    grid = (3, B, N // tile_n)

    kernel = functools.partial(_chain_stats_kernel,
                               inv_n=1.0 / float(n_rows), mxu_dtype=MXU_DTYPE)

    out_shape = (
        jax.ShapeDtypeStruct((1, 64), jnp.float32),        # a1 (bn1 scale)
        jax.ShapeDtypeStruct((1, 64), jnp.float32),        # c1 (bn1 shift)
        jax.ShapeDtypeStruct((1, 1024), jnp.float32),      # sum of z3
        jax.ShapeDtypeStruct((1, 1024), jnp.float32),      # sum of z3^2
        jax.ShapeDtypeStruct((B, 1, 1024), jnp.float32),   # per-batch max of z3
        jax.ShapeDtypeStruct((B, 1, 1024), jnp.float32),   # per-batch min of z3
    )
    in_specs = [
        pl.BlockSpec((None, tile_n, cin), lambda p, b, t: (b, t, 0)),
        pl.BlockSpec((None, cin, 64),     lambda p, b, t: (b, 0, 0)),
        pl.BlockSpec((1, 64),    lambda p, b, t: (0, 0)),
        pl.BlockSpec((64, 128),  lambda p, b, t: (0, 0)),
        pl.BlockSpec((1, 128),   lambda p, b, t: (0, 0)),
        pl.BlockSpec((128, 1024), lambda p, b, t: (0, 0)),
        pl.BlockSpec((1, 1024),  lambda p, b, t: (0, 0)),
        pl.BlockSpec((1, 64),    lambda p, b, t: (0, 0)),
        pl.BlockSpec((1, 64),    lambda p, b, t: (0, 0)),
        pl.BlockSpec((1, 128),   lambda p, b, t: (0, 0)),
        pl.BlockSpec((1, 128),   lambda p, b, t: (0, 0)),
    ]
    out_specs = (
        pl.BlockSpec((1, 64),    lambda p, b, t: (0, 0)),
        pl.BlockSpec((1, 64),    lambda p, b, t: (0, 0)),
        pl.BlockSpec((1, 1024),  lambda p, b, t: (0, 0)),
        pl.BlockSpec((1, 1024),  lambda p, b, t: (0, 0)),
        pl.BlockSpec((None, 1, 1024), lambda p, b, t: (b, 0, 0)),
        pl.BlockSpec((None, 1, 1024), lambda p, b, t: (b, 0, 0)),
    )
    scratch = [
        pltpu.VMEM((1, 64), jnp.float32),    # s1
        pltpu.VMEM((1, 64), jnp.float32),    # q1
        pltpu.VMEM((1, 128), jnp.float32),   # s2
        pltpu.VMEM((1, 128), jnp.float32),   # q2
        pltpu.VMEM((1, 128), jnp.float32),   # a2
        pltpu.VMEM((1, 128), jnp.float32),   # c2
    ]
    flops = int(2 * n_rows * (3 * cin * 64 + 2 * 64 * 128 + 128 * 1024))
    bytes_accessed = int(
        3 * n_rows * cin * 4
        + (B * cin * 64 + 64 * 128 + 128 * 1024 + 2 * 64 + 2 * 128 + 3 * 1024) * 4
        + (2 * 64 + 2 * 1024 + 2 * B * 1024) * 4)

    return pl.pallas_call(
        kernel,
        grid=grid,
        in_specs=in_specs,
        out_specs=out_specs,
        out_shape=out_shape,
        scratch_shapes=scratch,
        compiler_params=_compiler_params(("arbitrary", "arbitrary", "arbitrary")),
        cost_estimate=pl.CostEstimate(flops=flops, transcendentals=0,
                                      bytes_accessed=bytes_accessed),
    )(x_bnc, w1, b1, w2, b2, w3, b3, g1, be1, g2, be2)


def _finalize_global(s3, q3, zmax, zmin, gamma, beta, *, n_rows, relu):
    """bn3 is per-channel affine -> max over points from raw max/min of z3 (tiny glue)."""
    mean = s3 / n_rows
    var = jnp.maximum(q3 / n_rows - mean * mean, 0.0)
    a = gamma * lax.rsqrt(var + EPS)                      # (1, 1024)
    c = beta - a * mean
    g = jnp.where(a >= 0.0, a * zmax[:, 0, :], a * zmin[:, 0, :]) + c   # (B, 1024)
    return jnp.maximum(g, 0.0) if relu else g


# --------------------------------------------------------------------------- #
# Kernel 2: spatial-transformer head (fc1->bn4->relu->fc2->bn5->relu->fc3+I)  #
# --------------------------------------------------------------------------- #
def _st_head_kernel(g_ref, w1_ref, b1_ref, g4_ref, be4_ref,
                    w2_ref, b2_ref, g5_ref, be5_ref, w3_ref, b3_ref, o_ref):
    def bn_relu(z, gamma, beta):
        mean = jnp.mean(z, axis=0, keepdims=True)
        var = jnp.mean((z - mean) ** 2, axis=0, keepdims=True)   # biased variance
        return jnp.maximum(gamma * (z - mean) * lax.rsqrt(var + EPS) + beta, 0.0)

    h = jnp.dot(g_ref[...], w1_ref[...], preferred_element_type=jnp.float32) + b1_ref[...]
    h = bn_relu(h, g4_ref[...], be4_ref[...])
    h = jnp.dot(h, w2_ref[...], preferred_element_type=jnp.float32) + b2_ref[...]
    h = bn_relu(h, g5_ref[...], be5_ref[...])
    o_ref[...] = jnp.dot(h, w3_ref[...], preferred_element_type=jnp.float32) + b3_ref[...]


def _st_head(g_st, st):
    B = g_st.shape[0]
    # fold the flattened 3x3 identity into the fc_3 bias (out + I)
    bias_eff = st['fc3_b'] + jnp.eye(3, dtype=jnp.float32).reshape(1, 9)
    t_flat = pl.pallas_call(
        _st_head_kernel,
        out_shape=jax.ShapeDtypeStruct((B, 9), jnp.float32),
        in_specs=[_VMEM] * 11,
        out_specs=_VMEM,
    )(g_st, st['fc1_w'], st['fc1_b'], st['bn4_g'], st['bn4_b'],
      st['fc2_w'], st['fc2_b'], st['bn5_g'], st['bn5_b'],
      st['fc3_w'], bias_eff)
    return t_flat.reshape(B, 3, 3)


# --------------------------------------------------------------------------- #
# Kernel 3: output pass — lane-dense (B, N, 1088) slab [ global | h1 ]        #
# --------------------------------------------------------------------------- #
def _apply_kernel(x_ref, w1_ref, b1_ref, g_ref, o_ref):
    x = x_ref[...]                                   # (TILE_N, 3)
    w = w1_ref[...]                                  # (3, 64)   (T and bn1 folded in)
    h1 = jnp.maximum(_conv_k3(x, w, b1_ref[...]), 0.0)
    rows = x.shape[0]
    o_ref[:, :1024] = jnp.broadcast_to(g_ref[...], (rows, 1024))
    o_ref[:, 1024:] = h1


def _apply_out(x_bnc, w1_eff, b1_eff, g_b11, *, tile_n):
    B, N, cin = x_bnc.shape
    n_rows = B * N
    flops = int(2 * n_rows * cin * 64)
    bytes_accessed = int(n_rows * (cin + 1088) * 4 + B * (cin * 64 + 1024) * 4 + 2 * 64 * 4)
    return pl.pallas_call(
        _apply_kernel,
        grid=(B, N // tile_n),
        in_specs=[
            pl.BlockSpec((None, tile_n, cin), lambda b, t: (b, t, 0)),
            pl.BlockSpec((None, cin, 64),     lambda b, t: (b, 0, 0)),
            pl.BlockSpec((1, 64),             lambda b, t: (0, 0)),
            pl.BlockSpec((None, 1, 1024),     lambda b, t: (b, 0, 0)),
        ],
        out_specs=pl.BlockSpec((None, tile_n, 1088), lambda b, t: (b, t, 0)),
        out_shape=jax.ShapeDtypeStruct((B, N, 1088), jnp.float32),
        compiler_params=_compiler_params(("parallel", "parallel")),
        cost_estimate=pl.CostEstimate(flops=flops, transcendentals=0,
                                      bytes_accessed=bytes_accessed),
    )(x_bnc, w1_eff, b1_eff, g_b11)


# --------------------------------------------------------------------------- #
# Model forward (glue around the kernels)                                     #
# --------------------------------------------------------------------------- #
def pointnet_base(x, params):
    """x: (B, 3, N) — PyTorch layout.  Returns (B, 1088, N)."""
    B, C, N = x.shape
    tile_n = _choose_tile_n(N)
    x_bnc = jnp.transpose(x, (0, 2, 1))                  # (B, N, 3)
    n_rows = B * N

    # ---- spatial transformer: fused conv chain + max, then fused FC head ----
    st = params['st']
    w1_st = jnp.broadcast_to(st['c1_w'][None], (B, 3, 64))
    _, _, s3s, q3s, zmaxs, zmins = _chain_stats(
        x_bnc, w1_st, st['c1_b'], st['c2_w'], st['c2_b'], st['c3_w'], st['c3_b'],
        st['bn1_g'], st['bn1_b'], st['bn2_g'], st['bn2_b'], tile_n=tile_n)
    g_st = _finalize_global(s3s, q3s, zmaxs, zmins, st['bn3_g'], st['bn3_b'],
                            n_rows=n_rows, relu=True)    # (B, 1024)
    T = _st_head(g_st, st)                               # (B, 3, 3)

    # ---- main chain: fold T into conv_1  ((x @ T) @ W1 == x @ (T @ W1)) -----
    p = params
    w1_main = jnp.einsum('bij,jk->bik', T, p['c1_w'],
                         precision=lax.Precision.HIGHEST)        # (B, 3, 64)
    a1, c1, s3, q3, zmax, zmin = _chain_stats(
        x_bnc, w1_main, p['c1_b'], p['c2_w'], p['c2_b'], p['c3_w'], p['c3_b'],
        p['bn1_g'], p['bn1_b'], p['bn2_g'], p['bn2_b'], tile_n=tile_n)
    g = _finalize_global(s3, q3, zmax, zmin, p['bn3_g'], p['bn3_b'],
                         n_rows=n_rows, relu=False)              # (B, 1024)

    # fold the bn1 affine into the per-batch first conv weight for the output pass
    w1_eff = w1_main * a1[None, :, :]                            # (B, 3, 64)
    b1_eff = p['c1_b'] * a1 + c1                                 # (1, 64)

    out_bnc = _apply_out(x_bnc, w1_eff, b1_eff, g[:, None, :], tile_n=tile_n)  # (B,N,1088)
    return jnp.transpose(out_bnc, (0, 2, 1))                     # (B, 1088, N)


# --------------------------------------------------------------------------- #
# Pure-JAX reference (mirrors the PyTorch module, training-mode BN)           #
# --------------------------------------------------------------------------- #
def _ref_bn(z, gamma, beta):
    mean = z.mean(0, keepdims=True)
    var = ((z - mean) ** 2).mean(0, keepdims=True)
    return gamma * (z - mean) / jnp.sqrt(var + EPS) + beta


def ref_forward(x, params):
    hp = dict(precision=lax.Precision.HIGHEST)
    B, C, N = x.shape
    x_bnc = jnp.transpose(x, (0, 2, 1))
    xf = x_bnc.reshape(B * N, C)

    st = params['st']
    h = jnp.maximum(_ref_bn(jnp.dot(xf, st['c1_w'], **hp) + st['c1_b'],
                            st['bn1_g'], st['bn1_b']), 0.0)
    h = jnp.maximum(_ref_bn(jnp.dot(h, st['c2_w'], **hp) + st['c2_b'],
                            st['bn2_g'], st['bn2_b']), 0.0)
    h = jnp.maximum(_ref_bn(jnp.dot(h, st['c3_w'], **hp) + st['c3_b'],
                            st['bn3_g'], st['bn3_b']), 0.0)
    g = h.reshape(B, N, 1024).max(axis=1)
    g = jnp.maximum(_ref_bn(jnp.dot(g, st['fc1_w'], **hp) + st['fc1_b'],
                            st['bn4_g'], st['bn4_b']), 0.0)
    g = jnp.maximum(_ref_bn(jnp.dot(g, st['fc2_w'], **hp) + st['fc2_b'],
                            st['bn5_g'], st['bn5_b']), 0.0)
    T = (jnp.dot(g, st['fc3_w'], **hp) + st['fc3_b']
         + jnp.eye(3, dtype=jnp.float32).reshape(1, 9)).reshape(B, 3, 3)

    y = jnp.einsum('bnc,bck->bnk', x_bnc, T, **hp).reshape(B * N, C)
    p = params
    h1 = jnp.maximum(_ref_bn(jnp.dot(y, p['c1_w'], **hp) + p['c1_b'],
                             p['bn1_g'], p['bn1_b']), 0.0)
    h2 = jnp.maximum(_ref_bn(jnp.dot(h1, p['c2_w'], **hp) + p['c2_b'],
                             p['bn2_g'], p['bn2_b']), 0.0)
    h3 = _ref_bn(jnp.dot(h2, p['c3_w'], **hp) + p['c3_b'], p['bn3_g'], p['bn3_b'])
    gl = h3.reshape(B, N, 1024).max(axis=1)
    out = jnp.concatenate(
        [jnp.broadcast_to(gl[:, None, :], (B, N, 1024)), h1.reshape(B, N, 64)], axis=-1)
    return jnp.transpose(out, (0, 2, 1))


# --------------------------------------------------------------------------- #
# Deterministic parameter init (shapes from the module __init__)              #
# --------------------------------------------------------------------------- #
def init_params():
    keys = iter(jax.random.split(jax.random.PRNGKey(42), 64))

    def lin(cin, cout):
        kw, kb = jax.random.split(next(keys))
        bound = 1.0 / math.sqrt(cin)
        w = jax.random.uniform(kw, (cin, cout), jnp.float32, -bound, bound)
        b = jax.random.uniform(kb, (1, cout), jnp.float32, -bound, bound)
        return w, b

    def bn(c):
        kg, kb = jax.random.split(next(keys))
        g = 1.0 + 0.1 * jax.random.normal(kg, (1, c), jnp.float32)
        b = 0.1 * jax.random.normal(kb, (1, c), jnp.float32)
        return g, b

    st = {}
    st['c1_w'], st['c1_b'] = lin(3, 64)
    st['c2_w'], st['c2_b'] = lin(64, 128)
    st['c3_w'], st['c3_b'] = lin(128, 1024)
    st['fc1_w'], st['fc1_b'] = lin(1024, 512)
    st['fc2_w'], st['fc2_b'] = lin(512, 256)
    st['fc3_w'], st['fc3_b'] = lin(256, 9)
    st['bn1_g'], st['bn1_b'] = bn(64)
    st['bn2_g'], st['bn2_b'] = bn(128)
    st['bn3_g'], st['bn3_b'] = bn(1024)
    st['bn4_g'], st['bn4_b'] = bn(512)
    st['bn5_g'], st['bn5_b'] = bn(256)

    params = {'st': st}
    params['c1_w'], params['c1_b'] = lin(3, 64)
    params['c2_w'], params['c2_b'] = lin(64, 128)
    params['c3_w'], params['c3_b'] = lin(128, 1024)
    params['bn1_g'], params['bn1_b'] = bn(64)
    params['bn2_g'], params['bn2_b'] = bn(128)
    params['bn3_g'], params['bn3_b'] = bn(1024)
    return params


if __name__ == "__main__":
    B, C, N = 2, 3, 16                      # (batch, xyz channels, num points)
    x = jax.random.normal(jax.random.PRNGKey(0), (B, C, N), jnp.float32)
    params = init_params()

    fwd = jax.jit(pointnet_base)
    out = jax.block_until_ready(fwd(x, params))
    assert out.shape == (B, 1088, N), out.shape
    assert bool(jnp.all(jnp.isfinite(out)))

    ref = jax.block_until_ready(jax.jit(ref_forward)(x, params))
    err = float(jnp.max(jnp.abs(out - ref)))
    assert bool(jnp.allclose(out, ref, atol=5e-2, rtol=5e-2)), err

    print("KERNEL_OK")
</pallas_src>

<mosaic_0001>
module attributes {stable_mosaic.version = 11 : i64} {
  func.func @_st_head_kernel(%arg0: memref<2x1024xf32, #tpu.memory_space<vmem>>, %arg1: memref<1024x512xf32, #tpu.memory_space<vmem>>, %arg2: memref<1x512xf32, #tpu.memory_space<vmem>>, %arg3: memref<1x512xf32, #tpu.memory_space<vmem>>, %arg4: memref<1x512xf32, #tpu.memory_space<vmem>>, %arg5: memref<512x256xf32, #tpu.memory_space<vmem>>, %arg6: memref<1x256xf32, #tpu.memory_space<vmem>>, %arg7: memref<1x256xf32, #tpu.memory_space<vmem>>, %arg8: memref<1x256xf32, #tpu.memory_space<vmem>>, %arg9: memref<256x9xf32, #tpu.memory_space<vmem>>, %arg10: memref<1x9xf32, #tpu.memory_space<vmem>>, %arg11: memref<2x9xf32, #tpu.memory_space<vmem>>) attributes {dimension_semantics = [], scalar_prefetch = 0 : i64, scratch_operands = 0 : i64, tpu.core_type = #tpu.core_type<tc>} {
    %c0 = arith.constant 0 : index
    %c0_0 = arith.constant 0 : index
    %0 = vector.load %arg0[%c0, %c0_0] : memref<2x1024xf32, #tpu.memory_space<vmem>>, vector<2x1024xf32>
    %c0_1 = arith.constant 0 : index
    %c0_2 = arith.constant 0 : index
    %1 = vector.load %arg1[%c0_1, %c0_2] : memref<1024x512xf32, #tpu.memory_space<vmem>>, vector<1024x512xf32>
    %cst = arith.constant dense<0.000000e+00> : vector<2x512xf32>
    %2 = tpu.matmul %0, %1, %cst {dimension_numbers = #tpu.dot_dimension_numbers<[1], [0], [0], [1], [0, 0, 1, 1], [], []>} : vector<2x1024xf32>, vector<1024x512xf32>, vector<2x512xf32> -> vector<2x512xf32>
    %c0_3 = arith.constant 0 : index
    %c0_4 = arith.constant 0 : index
    %3 = vector.load %arg2[%c0_3, %c0_4] : memref<1x512xf32, #tpu.memory_space<vmem>>, vector<1x512xf32>
    %4 = vector.broadcast %3 : vector<1x512xf32> to vector<2x512xf32>
    %5 = arith.addf %2, %4 : vector<2x512xf32>
    %c0_5 = arith.constant 0 : index
    %c0_6 = arith.constant 0 : index
    %6 = vector.load %arg3[%c0_5, %c0_6] : memref<1x512xf32, #tpu.memory_space<vmem>>, vector<1x512xf32>
    %c0_7 = arith.constant 0 : index
    %c0_8 = arith.constant 0 : index
    %7 = vector.load %arg4[%c0_7, %c0_8] : memref<1x512xf32, #tpu.memory_space<vmem>>, vector<1x512xf32>
    %cst_9 = arith.constant dense<0.000000e+00> : vector<512xf32>
    %8 = vector.multi_reduction <add>, %5, %cst_9 [0] : vector<2x512xf32> to vector<512xf32>
    %9 = vector.shape_cast %8 : vector<512xf32> to vector<1x512xf32>
    %cst_10 = arith.constant 2.000000e+00 : f32
    %10 = vector.broadcast %cst_10 : f32 to vector<1x512xf32>
    %11 = arith.divf %9, %10 : vector<1x512xf32>
    %12 = vector.broadcast %11 : vector<1x512xf32> to vector<2x512xf32>
    %13 = arith.subf %5, %12 : vector<2x512xf32>
    %14 = arith.mulf %13, %13 : vector<2x512xf32>
    %cst_11 = arith.constant dense<0.000000e+00> : vector<512xf32>
    %15 = vector.multi_reduction <add>, %14, %cst_11 [0] : vector<2x512xf32> to vector<512xf32>
    %16 = vector.shape_cast %15 : vector<512xf32> to vector<1x512xf32>
    %cst_12 = arith.constant 2.000000e+00 : f32
    %17 = vector.broadcast %cst_12 : f32 to vector<1x512xf32>
    %18 = arith.divf %16, %17 : vector<1x512xf32>
    %19 = vector.broadcast %11 : vector<1x512xf32> to vector<2x512xf32>
    %20 = arith.subf %5, %19 : vector<2x512xf32>
    %21 = vector.broadcast %6 : vector<1x512xf32> to vector<2x512xf32>
    %22 = arith.mulf %21, %20 : vector<2x512xf32>
    %cst_13 = arith.constant 9.99999974E-6 : f32
    %23 = vector.broadcast %cst_13 : f32 to vector<1x512xf32>
    %24 = arith.addf %18, %23 : vector<1x512xf32>
    %25 = math.rsqrt %24 : vector<1x512xf32>
    %26 = vector.broadcast %25 : vector<1x512xf32> to vector<2x512xf32>
    %27 = arith.mulf %22, %26 : vector<2x512xf32>
    %28 = vector.broadcast %7 : vector<1x512xf32> to vector<2x512xf32>
    %29 = arith.addf %27, %28 : vector<2x512xf32>
    %cst_14 = arith.constant 0.000000e+00 : f32
    %30 = vector.broadcast %cst_14 : f32 to vector<2x512xf32>
    %31 = arith.maximumf %29, %30 : vector<2x512xf32>
    %c0_15 = arith.constant 0 : index
    %c0_16 = arith.constant 0 : index
    %32 = vector.load %arg5[%c0_15, %c0_16] : memref<512x256xf32, #tpu.memory_space<vmem>>, vector<512x256xf32>
    %cst_17 = arith.constant dense<0.000000e+00> : vector<2x256xf32>
    %33 = tpu.matmul %31, %32, %cst_17 {dimension_numbers = #tpu.dot_dimension_numbers<[1], [0], [0], [1], [0, 0, 1, 1], [], []>} : vector<2x512xf32>, vector<512x256xf32>, vector<2x256xf32> -> vector<2x256xf32>
    %c0_18 = arith.constant 0 : index
    %c0_19 = arith.constant 0 : index
    %34 = vector.load %arg6[%c0_18, %c0_19] : memref<1x256xf32, #tpu.memory_space<vmem>>, vector<1x256xf32>
    %35 = vector.broadcast %34 : vector<1x256xf32> to vector<2x256xf32>
    %36 = arith.addf %33, %35 : vector<2x256xf32>
    %c0_20 = arith.constant 0 : index
    %c0_21 = arith.constant 0 : index
    %37 = vector.load %arg7[%c0_20, %c0_21] : memref<1x256xf32, #tpu.memory_space<vmem>>, vector<1x256xf32>
    %c0_22 = arith.constant 0 : index
    %c0_23 = arith.constant 0 : index
    %38 = vector.load %arg8[%c0_22, %c0_23] : memref<1x256xf32, #tpu.memory_space<vmem>>, vector<1x256xf32>
    %cst_24 = arith.constant dense<0.000000e+00> : vector<256xf32>
    %39 = vector.multi_reduction <add>, %36, %cst_24 [0] : vector<2x256xf32> to vector<256xf32>
    %40 = vector.shape_cast %39 : vector<256xf32> to vector<1x256xf32>
    %cst_25 = arith.constant 2.000000e+00 : f32
    %41 = vector.broadcast %cst_25 : f32 to vector<1x256xf32>
    %42 = arith.divf %40, %41 : vector<1x256xf32>
    %43 = vector.broadcast %42 : vector<1x256xf32> to vector<2x256xf32>
    %44 = arith.subf %36, %43 : vector<2x256xf32>
    %45 = arith.mulf %44, %44 : vector<2x256xf32>
    %cst_26 = arith.constant dense<0.000000e+00> : vector<256xf32>
    %46 = vector.multi_reduction <add>, %45, %cst_26 [0] : vector<2x256xf32> to vector<256xf32>
    %47 = vector.shape_cast %46 : vector<256xf32> to vector<1x256xf32>
    %cst_27 = arith.constant 2.000000e+00 : f32
    %48 = vector.broadcast %cst_27 : f32 to vector<1x256xf32>
    %49 = arith.divf %47, %48 : vector<1x256xf32>
    %50 = vector.broadcast %42 : vector<1x256xf32> to vector<2x256xf32>
    %51 = arith.subf %36, %50 : vector<2x256xf32>
    %52 = vector.broadcast %37 : vector<1x256xf32> to vector<2x256xf32>
    %53 = arith.mulf %52, %51 : vector<2x256xf32>
    %cst_28 = arith.constant 9.99999974E-6 : f32
    %54 = vector.broadcast %cst_28 : f32 to vector<1x256xf32>
    %55 = arith.addf %49, %54 : vector<1x256xf32>
    %56 = math.rsqrt %55 : vector<1x256xf32>
    %57 = vector.broadcast %56 : vector<1x256xf32> to vector<2x256xf32>
    %58 = arith.mulf %53, %57 : vector<2x256xf32>
    %59 = vector.broadcast %38 : vector<1x256xf32> to vector<2x256xf32>
    %60 = arith.addf %58, %59 : vector<2x256xf32>
    %cst_29 = arith.constant 0.000000e+00 : f32
    %61 = vector.broadcast %cst_29 : f32 to vector<2x256xf32>
    %62 = arith.maximumf %60, %61 : vector<2x256xf32>
    %c0_30 = arith.constant 0 : index
    %c0_31 = arith.constant 0 : index
    %63 = vector.load %arg9[%c0_30, %c0_31] : memref<256x9xf32, #tpu.memory_space<vmem>>, vector<256x9xf32>
    %cst_32 = arith.constant dense<0.000000e+00> : vector<2x9xf32>
    %64 = tpu.matmul %62, %63, %cst_32 {dimension_numbers = #tpu.dot_dimension_numbers<[1], [0], [0], [1], [0, 0, 1, 1], [], []>} : vector<2x256xf32>, vector<256x9xf32>, vector<2x9xf32> -> vector<2x9xf32>
    %c0_33 = arith.constant 0 : index
    %c0_34 = arith.constant 0 : index
    %65 = vector.load %arg10[%c0_33, %c0_34] : memref<1x9xf32, #tpu.memory_space<vmem>>, vector<1x9xf32>
    %66 = vector.broadcast %65 : vector<1x9xf32> to vector<2x9xf32>
    %67 = arith.addf %64, %66 : vector<2x9xf32>
    %c0_35 = arith.constant 0 : index
    %c0_36 = arith.constant 0 : index
    %68 = vector.load %arg11[%c0_35, %c0_36] : memref<2x9xf32, #tpu.memory_space<vmem>>, vector<2x9xf32>
    tpu.vector_store %arg11[%c0_35, %c0_36], %67 {strides = array<i32>} : memref<2x9xf32, #tpu.memory_space<vmem>>, vector<2x9xf32>,
    return
  }
}

module attributes {stable_mosaic.version = 11 : i64} {
  func.func @_chain_stats_kernel(%arg0: i32, %arg1: i32, %arg2: i32, %arg3: memref<1x16x3xf32, #tpu.memory_space<vmem>>, %arg4: memref<1x3x64xf32, #tpu.memory_space<vmem>>, %arg5: memref<1x64xf32, #tpu.memory_space<vmem>>, %arg6: memref<64x128xf32, #tpu.memory_space<vmem>>, %arg7: memref<1x128xf32, #tpu.memory_space<vmem>>, %arg8: memref<128x1024xf32, #tpu.memory_space<vmem>>, %arg9: memref<1x1024xf32, #tpu.memory_space<vmem>>, %arg10: memref<1x64xf32, #tpu.memory_space<vmem>>, %arg11: memref<1x64xf32, #tpu.memory_space<vmem>>, %arg12: memref<1x128xf32, #tpu.memory_space<vmem>>, %arg13: memref<1x128xf32, #tpu.memory_space<vmem>>, %arg14: memref<1x64xf32, #tpu.memory_space<vmem>>, %arg15: memref<1x64xf32, #tpu.memory_space<vmem>>, %arg16: memref<1x1024xf32, #tpu.memory_space<vmem>>, %arg17: memref<1x1024xf32, #tpu.memory_space<vmem>>, %arg18: memref<1x1x1024xf32, #tpu.memory_space<vmem>>, %arg19: memref<1x1x1024xf32, #tpu.memory_space<vmem>>, %arg20: memref<1x64xf32, #tpu.memory_space<vmem>>, %arg21: memref<1x64xf32, #tpu.memory_space<vmem>>, %arg22: memref<1x128xf32, #tpu.memory_space<vmem>>, %arg23: memref<1x128xf32, #tpu.memory_space<vmem>>, %arg24: memref<1x128xf32, #tpu.memory_space<vmem>>, %arg25: memref<1x128xf32, #tpu.memory_space<vmem>>) attributes {dimension_semantics = [#tpu.dimension_semantics<arbitrary>, #tpu.dimension_semantics<arbitrary>, #tpu.dimension_semantics<arbitrary>], iteration_bounds = array<i64: 3, 2, 1>, scalar_prefetch = 0 : i64, scratch_operands = 6 : i64, tpu.core_type = #tpu.core_type<tc>, window_params = [{transform_indices = @transform_0, window_bounds = array<i64: 1, 16, 3>}, {transform_indices = @transform_1, window_bounds = array<i64: 1, 3, 64>}, {pipeline_mode = #tpu.pipeline_mode<synchronous>, transform_indices = @transform_2, window_bounds = array<i64: 1, 64>}, {pipeline_mode = #tpu.pipeline_mode<synchronous>, transform_indices = @transform_3, window_bounds = array<i64: 64, 128>}, {pipeline_mode = #tpu.pipeline_mode<synchronous>, transform_indices = @transform_4, window_bounds = array<i64: 1, 128>}, {pipeline_mode = #tpu.pipeline_mode<synchronous>, transform_indices = @transform_5, window_bounds = array<i64: 128, 1024>}, {pipeline_mode = #tpu.pipeline_mode<synchronous>, transform_indices = @transform_6, window_bounds = array<i64: 1, 1024>}, {pipeline_mode = #tpu.pipeline_mode<synchronous>, transform_indices = @transform_7, window_bounds = array<i64: 1, 64>}, {pipeline_mode = #tpu.pipeline_mode<synchronous>, transform_indices = @transform_8, window_bounds = array<i64: 1, 64>}, {pipeline_mode = #tpu.pipeline_mode<synchronous>, transform_indices = @transform_9, window_bounds = array<i64: 1, 128>}, {pipeline_mode = #tpu.pipeline_mode<synchronous>, transform_indices = @transform_10, window_bounds = array<i64: 1, 128>}, {pipeline_mode = #tpu.pipeline_mode<synchronous>, transform_indices = @transform_11, window_bounds = array<i64: 1, 64>}, {pipeline_mode = #tpu.pipeline_mode<synchronous>, transform_indices = @transform_12, window_bounds = array<i64: 1, 64>}, {pipeline_mode = #tpu.pipeline_mode<synchronous>, transform_indices = @transform_13, window_bounds = array<i64: 1, 1024>}, {pipeline_mode = #tpu.pipeline_mode<synchronous>, transform_indices = @transform_14, window_bounds = array<i64: 1, 1024>}, {transform_indices = @transform_15, window_bounds = array<i64: 1, 1, 1024>}, {transform_indices = @transform_16, window_bounds = array<i64: 1, 1, 1024>}]} {
    %c0_i32 = arith.constant 0 : i32
    %0 = arith.cmpi eq, %arg1, %c0_i32 : i32
    %c0_i32_0 = arith.constant 0 : i32
    %1 = arith.cmpi eq, %arg2, %c0_i32_0 : i32
    %2 = arith.andi %0, %1 : i1
    %c0 = arith.constant 0 : index
    %c0_1 = arith.constant 0 : index
    %c0_2 = arith.constant 0 : index
    %3 = vector.load %arg3[%c0, %c0_1, %c0_2] : memref<1x16x3xf32, #tpu.memory_space<vmem>>, vector<1x16x3xf32>
    %4 = vector.shape_cast %3 : vector<1x16x3xf32> to vector<16x3xf32>
    %c0_3 = arith.constant 0 : index
    %c0_4 = arith.constant 0 : index
    %c0_5 = arith.constant 0 : index
    %5 = vector.load %arg4[%c0_3, %c0_4, %c0_5] : memref<1x3x64xf32, #tpu.memory_space<vmem>>, vector<1x3x64xf32>
    %6 = vector.shape_cast %5 : vector<1x3x64xf32> to vector<3x64xf32>
    %c0_6 = arith.constant 0 : index
    %c0_7 = arith.constant 0 : index
    %7 = vector.load %arg5[%c0_6, %c0_7] : memref<1x64xf32, #tpu.memory_space<vmem>>, vector<1x64xf32>
    %8 = vector.extract_strided_slice %4 {offsets = [0, 0], sizes = [16, 1], strides = [1, 1]} : vector<16x3xf32> to vector<16x1xf32>
    %9 = vector.extract_strided_slice %6 {offsets = [0, 0], sizes = [1, 64], strides = [1, 1]} : vector<3x64xf32> to vector<1x64xf32>
    %10 = vector.broadcast %8 : vector<16x1xf32> to vector<16x64xf32>
    %11 = vector.broadcast %9 : vector<1x64xf32> to vector<16x64xf32>
    %12 = arith.mulf %10, %11 : vector<16x64xf32>
    %13 = vector.extract_strided_slice %4 {offsets = [0, 1], sizes = [16, 1], strides = [1, 1]} : vector<16x3xf32> to vector<16x1xf32>
    %14 = vector.extract_strided_slice %6 {offsets = [1, 0], sizes = [1, 64], strides = [1, 1]} : vector<3x64xf32> to vector<1x64xf32>
    %15 = vector.broadcast %13 : vector<16x1xf32> to vector<16x64xf32>
    %16 = vector.broadcast %14 : vector<1x64xf32> to vector<16x64xf32>
    %17 = arith.mulf %15, %16 : vector<16x64xf32>
    %18 = arith.addf %12, %17 : vector<16x64xf32>
    %19 = vector.extract_strided_slice %4 {offsets = [0, 2], sizes = [16, 1], strides = [1, 1]} : vector<16x3xf32> to vector<16x1xf32>
    %20 = vector.extract_strided_slice %6 {offsets = [2, 0], sizes = [1, 64], strides = [1, 1]} : vector<3x64xf32> to vector<1x64xf32>
    %21 = vector.broadcast %19 : vector<16x1xf32> to vector<16x64xf32>
    %22 = vector.broadcast %20 : vector<1x64xf32> to vector<16x64xf32>
    %23 = arith.mulf %21, %22 : vector<16x64xf32>
    %24 = arith.addf %18, %23 : vector<16x64xf32>
    %25 = vector.broadcast %7 : vector<1x64xf32> to vector<16x64xf32>
    %26 = arith.addf %24, %25 : vector<16x64xf32>
    %c0_i32_8 = arith.constant 0 : i32
    %27 = arith.cmpi eq, %arg0, %c0_i32_8 : i32
    %28 = arith.extui %27 : i1 to i32
    %c0_i32_9 = arith.constant 0 : i32
    %29 = arith.cmpi ne, %28, %c0_i32_9 : i32
    scf.if %29 {
      %36 = arith.extui %2 : i1 to i32
      %c0_i32_12 = arith.constant 0 : i32
      %37 = arith.cmpi ne, %36, %c0_i32_12 : i32
      scf.if %37 {
        %cst_22 = arith.constant 0.000000e+00 : f32
        %49 = vector.broadcast %cst_22 : f32 to vector<1x64xf32>
        %c0_23 = arith.constant 0 : index
        %c0_24 = arith.constant 0 : index
        %50 = vector.load %arg20[%c0_23, %c0_24] : memref<1x64xf32, #tpu.memory_space<vmem>>, vector<1x64xf32>
        tpu.vector_store %arg20[%c0_23, %c0_24], %49 {strides = array<i32>} : memref<1x64xf32, #tpu.memory_space<vmem>>, vector<1x64xf32>,
        %cst_25 = arith.constant 0.000000e+00 : f32
        %51 = vector.broadcast %cst_25 : f32 to vector<1x64xf32>
        %c0_26 = arith.constant 0 : index
        %c0_27 = arith.constant 0 : index
        %52 = vector.load %arg21[%c0_26, %c0_27] : memref<1x64xf32, #tpu.memory_space<vmem>>, vector<1x64xf32>
        tpu.vector_store %arg21[%c0_26, %c0_27], %51 {strides = array<i32>} : memref<1x64xf32, #tpu.memory_space<vmem>>, vector<1x64xf32>,
      } else {
      }
      %c0_13 = arith.constant 0 : index
      %c0_14 = arith.constant 0 : index
      %38 = vector.load %arg20[%c0_13, %c0_14] : memref<1x64xf32, #tpu.memory_space<vmem>>, vector<1x64xf32>
      %cst = arith.constant dense<0.000000e+00> : vector<64xf32>
      %39 = vector.multi_reduction <add>, %26, %cst [0] : vector<16x64xf32> to vector<64xf32>
      %40 = vector.shape_cast %39 : vector<64xf32> to vector<1x64xf32>
      %41 = arith.addf %38, %40 : vector<1x64xf32>
      %c0_15 = arith.constant 0 : index
      %c0_16 = arith.constant 0 : index
      %42 = vector.load %arg20[%c0_15, %c0_16] : memref<1x64xf32, #tpu.memory_space<vmem>>, vector<1x64xf32>
      tpu.vector_store %arg20[%c0_15, %c0_16], %41 {strides = array<i32>} : memref<1x64xf32, #tpu.memory_space<vmem>>, vector<1x64xf32>,
      %c0_17 = arith.constant 0 : index
      %c0_18 = arith.constant 0 : index
      %43 = vector.load %arg21[%c0_17, %c0_18] : memref<1x64xf32, #tpu.memory_space<vmem>>, vector<1x64xf32>
      %44 = arith.mulf %26, %26 : vector<16x64xf32>
      %cst_19 = arith.constant dense<0.000000e+00> : vector<64xf32>
      %45 = vector.multi_reduction <add>, %44, %cst_19 [0] : vector<16x64xf32> to vector<64xf32>
      %46 = vector.shape_cast %45 : vector<64xf32> to vector<1x64xf32>
      %47 = arith.addf %43, %46 : vector<1x64xf32>
      %c0_20 = arith.constant 0 : index
      %c0_21 = arith.constant 0 : index
      %48 = vector.load %arg21[%c0_20, %c0_21] : memref<1x64xf32, #tpu.memory_space<vmem>>, vector<1x64xf32>
      tpu.vector_store %arg21[%c0_20, %c0_21], %47 {strides = array<i32>} : memref<1x64xf32, #tpu.memory_space<vmem>>, vector<1x64xf32>,
    } else {
    }
    %c1_i32 = arith.constant 1 : i32
    %30 = arith.cmpi eq, %arg0, %c1_i32 : i32
    %31 = arith.extui %30 : i1 to i32
    %c0_i32_10 = arith.constant 0 : i32
    %32 = arith.cmpi ne, %31, %c0_i32_10 : i32
    scf.if %32 {
      %36 = arith.extui %2 : i1 to i32
      %c0_i32_12 = arith.constant 0 : i32
      %37 = arith.cmpi ne, %36, %c0_i32_12 : i32
      scf.if %37 {
        %c0_32 = arith.constant 0 : index
        %c0_33 = arith.constant 0 : index
        %62 = vector.load %arg20[%c0_32, %c0_33] : memref<1x64xf32, #tpu.memory_space<vmem>>, vector<1x64xf32>
        %cst_34 = arith.constant 3.125000e-02 : f32
        %63 = vector.broadcast %cst_34 : f32 to vector<1x64xf32>
        %64 = arith.mulf %62, %63 : vector<1x64xf32>
        %c0_35 = arith.constant 0 : index
        %c0_36 = arith.constant 0 : index
        %65 = vector.load %arg21[%c0_35, %c0_36] : memref<1x64xf32, #tpu.memory_space<vmem>>, vector<1x64xf32>
        %cst_37 = arith.constant 3.125000e-02 : f32
        %66 = vector.broadcast %cst_37 : f32 to vector<1x64xf32>
        %67 = arith.mulf %65, %66 : vector<1x64xf32>
        %68 = arith.mulf %64, %64 : vector<1x64xf32>
        %69 = arith.subf %67, %68 : vector<1x64xf32>
        %cst_38 = arith.constant 0.000000e+00 : f32
        %70 = vector.broadcast %cst_38 : f32 to vector<1x64xf32>
        %71 = arith.maximumf %69, %70 : vector<1x64xf32>
        %c0_39 = arith.constant 0 : index
        %c0_40 = arith.constant 0 : index
        %72 = vector.load %arg10[%c0_39, %c0_40] : memref<1x64xf32, #tpu.memory_space<vmem>>, vector<1x64xf32>
        %cst_41 = arith.constant 9.99999974E-6 : f32
        %73 = vector.broadcast %cst_41 : f32 to vector<1x64xf32>
        %74 = arith.addf %71, %73 : vector<1x64xf32>
        %75 = math.rsqrt %74 : vector<1x64xf32>
        %76 = arith.mulf %72, %75 : vector<1x64xf32>
        %c0_42 = arith.constant 0 : index
        %c0_43 = arith.constant 0 : index
        %77 = vector.load %arg14[%c0_42, %c0_43] : memref<1x64xf32, #tpu.memory_space<vmem>>, vector<1x64xf32>
        tpu.vector_store %arg14[%c0_42, %c0_43], %76 {strides = array<i32>} : memref<1x64xf32, #tpu.memory_space<vmem>>, vector<1x64xf32>,
        %c0_44 = arith.constant 0 : index
        %c0_45 = arith.constant 0 : index
        %78 = vector.load %arg11[%c0_44, %c0_45] : memref<1x64xf32, #tpu.memory_space<vmem>>, vector<1x64xf32>
        %79 = arith.mulf %76, %64 : vector<1x64xf32>
        %80 = arith.subf %78, %79 : vector<1x64xf32>
        %c0_46 = arith.constant 0 : index
        %c0_47 = arith.constant 0 : index
        %81 = vector.load %arg15[%c0_46, %c0_47] : memref<1x64xf32, #tpu.memory_space<vmem>>, vector<1x64xf32>
        tpu.vector_store %arg15[%c0_46, %c0_47], %80 {strides = array<i32>} : memref<1x64xf32, #tpu.memory_space<vmem>>, vector<1x64xf32>,
        %cst_48 = arith.constant 0.000000e+00 : f32
        %82 = vector.broadcast %cst_48 : f32 to vector<1x128xf32>
        %c0_49 = arith.constant 0 : index
        %c0_50 = arith.constant 0 : index
        %83 = vector.load %arg22[%c0_49, %c0_50] : memref<1x128xf32, #tpu.memory_space<vmem>>, vector<1x128xf32>
        tpu.vector_store %arg22[%c0_49, %c0_50], %82 {strides = array<i32>} : memref<1x128xf32, #tpu.memory_space<vmem>>, vector<1x128xf32>,
        %cst_51 = arith.constant 0.000000e+00 : f32
        %84 = vector.broadcast %cst_51 : f32 to vector<1x128xf32>
        %c0_52 = arith.constant 0 : index
        %c0_53 = arith.constant 0 : index
        %85 = vector.load %arg23[%c0_52, %c0_53] : memref<1x128xf32, #tpu.memory_space<vmem>>, vector<1x128xf32>
        tpu.vector_store %arg23[%c0_52, %c0_53], %84 {strides = array<i32>} : memref<1x128xf32, #tpu.memory_space<vmem>>, vector<1x128xf32>,
      } else {
      }
      %c0_13 = arith.constant 0 : index
      %c0_14 = arith.constant 0 : index
      %38 = vector.load %arg14[%c0_13, %c0_14] : memref<1x64xf32, #tpu.memory_space<vmem>>, vector<1x64xf32>
      %39 = vector.broadcast %38 : vector<1x64xf32> to vector<16x64xf32>
      %40 = arith.mulf %39, %26 : vector<16x64xf32>
      %c0_15 = arith.constant 0 : index
      %c0_16 = arith.constant 0 : index
      %41 = vector.load %arg15[%c0_15, %c0_16] : memref<1x64xf32, #tpu.memory_space<vmem>>, vector<1x64xf32>
      %42 = vector.broadcast %41 : vector<1x64xf32> to vector<16x64xf32>
      %43 = arith.addf %40, %42 : vector<16x64xf32>
      %cst = arith.constant 0.000000e+00 : f32
      %44 = vector.broadcast %cst : f32 to vector<16x64xf32>
      %45 = arith.maximumf %43, %44 : vector<16x64xf32>
      %c0_17 = arith.constant 0 : index
      %c0_18 = arith.constant 0 : index
      %46 = vector.load %arg6[%c0_17, %c0_18] : memref<64x128xf32, #tpu.memory_space<vmem>>, vector<64x128xf32>
      %cst_19 = arith.constant dense<0.000000e+00> : vector<16x128xf32>
      %47 = tpu.matmul %45, %46, %cst_19 {dimension_numbers = #tpu.dot_dimension_numbers<[1], [0], [0], [1], [0, 0, 1, 1], [], []>} : vector<16x64xf32>, vector<64x128xf32>, vector<16x128xf32> -> vector<16x128xf32>
      %c0_20 = arith.constant 0 : index
      %c0_21 = arith.constant 0 : index
      %48 = vector.load %arg7[%c0_20, %c0_21] : memref<1x128xf32, #tpu.memory_space<vmem>>, vector<1x128xf32>
      %49 = vector.broadcast %48 : vector<1x128xf32> to vector<16x128xf32>
      %50 = arith.addf %47, %49 : vector<16x128xf32>
      %c0_22 = arith.constant 0 : index
      %c0_23 = arith.constant 0 : index
      %51 = vector.load %arg22[%c0_22, %c0_23] : memref<1x128xf32, #tpu.memory_space<vmem>>, vector<1x128xf32>
      %cst_24 = arith.constant dense<0.000000e+00> : vector<128xf32>
      %52 = vector.multi_reduction <add>, %50, %cst_24 [0] : vector<16x128xf32> to vector<128xf32>
      %53 = vector.shape_cast %52 : vector<128xf32> to vector<1x128xf32>
      %54 = arith.addf %51, %53 : vector<1x128xf32>
      %c0_25 = arith.constant 0 : index
      %c0_26 = arith.constant 0 : index
      %55 = vector.load %arg22[%c0_25, %c0_26] : memref<1x128xf32, #tpu.memory_space<vmem>>, vector<1x128xf32>
      tpu.vector_store %arg22[%c0_25, %c0_26], %54 {strides = array<i32>} : memref<1x128xf32, #tpu.memory_space<vmem>>, vector<1x128xf32>,
      %c0_27 = arith.constant 0 : index
      %c0_28 = arith.constant 0 : index
      %56 = vector.load %arg23[%c0_27, %c0_28] : memref<1x128xf32, #tpu.memory_space<vmem>>, vector<1x128xf32>
      %57 = arith.mulf %50, %50 : vector<16x128xf32>
      %cst_29 = arith.constant dense<0.000000e+00> : vector<128xf32>
      %58 = vector.multi_reduction <add>, %57, %cst_29 [0] : vector<16x128xf32> to vector<128xf32>
      %59 = vector.shape_cast %58 : vector<128xf32> to vector<1x128xf32>
      %60 = arith.addf %56, %59 : vector<1x128xf32>
      %c0_30 = arith.constant 0 : index
      %c0_31 = arith.constant 0 : index
      %61 = vector.load %arg23[%c0_30, %c0_31] : memref<1x128xf32, #tpu.memory_space<vmem>>, vector<1x128xf32>
      tpu.vector_store %arg23[%c0_30, %c0_31], %60 {strides = array<i32>} : memref<1x128xf32, #tpu.memory_space<vmem>>, vector<1x128xf32>,
    } else {
    }
    %c2_i32 = arith.constant 2 : i32
    %33 = arith.cmpi eq, %arg0, %c2_i32 : i32
    %34 = arith.extui %33 : i1 to i32
    %c0_i32_11 = arith.constant 0 : i32
    %35 = arith.cmpi ne, %34, %c0_i32_11 : i32
    scf.if %35 {
      %36 = arith.extui %2 : i1 to i32
      %c0_i32_12 = arith.constant 0 : i32
      %37 = arith.cmpi ne, %36, %c0_i32_12 : i32
      scf.if %37 {
        %c0_58 = arith.constant 0 : index
        %c0_59 = arith.constant 0 : index
        %94 = vector.load %arg22[%c0_58, %c0_59] : memref<1x128xf32, #tpu.memory_space<vmem>>, vector<1x128xf32>
        %cst_60 = arith.constant 3.125000e-02 : f32
        %95 = vector.broadcast %cst_60 : f32 to vector<1x128xf32>
        %96 = arith.mulf %94, %95 : vector<1x128xf32>
        %c0_61 = arith.constant 0 : index
        %c0_62 = arith.constant 0 : index
        %97 = vector.load %arg23[%c0_61, %c0_62] : memref<1x128xf32, #tpu.memory_space<vmem>>, vector<1x128xf32>
        %cst_63 = arith.constant 3.125000e-02 : f32
        %98 = vector.broadcast %cst_63 : f32 to vector<1x128xf32>
        %99 = arith.mulf %97, %98 : vector<1x128xf32>
        %100 = arith.mulf %96, %96 : vector<1x128xf32>
        %101 = arith.subf %99, %100 : vector<1x128xf32>
        %cst_64 = arith.constant 0.000000e+00 : f32
        %102 = vector.broadcast %cst_64 : f32 to vector<1x128xf32>
        %103 = arith.maximumf %101, %102 : vector<1x128xf32>
        %c0_65 = arith.constant 0 : index
        %c0_66 = arith.constant 0 : index
        %104 = vector.load %arg12[%c0_65, %c0_66] : memref<1x128xf32, #tpu.memory_space<vmem>>, vector<1x128xf32>
        %cst_67 = arith.constant 9.99999974E-6 : f32
        %105 = vector.broadcast %cst_67 : f32 to vector<1x128xf32>
        %106 = arith.addf %103, %105 : vector<1x128xf32>
        %107 = math.rsqrt %106 : vector<1x128xf32>
        %108 = arith.mulf %104, %107 : vector<1x128xf32>
        %c0_68 = arith.constant 0 : index
        %c0_69 = arith.constant 0 : index
        %109 = vector.load %arg24[%c0_68, %c0_69] : memref<1x128xf32, #tpu.memory_space<vmem>>, vector<1x128xf32>
        tpu.vector_store %arg24[%c0_68, %c0_69], %108 {strides = array<i32>} : memref<1x128xf32, #tpu.memory_space<vmem>>, vector<1x128xf32>,
        %c0_70 = arith.constant 0 : index
        %c0_71 = arith.constant 0 : index
        %110 = vector.load %arg13[%c0_70, %c0_71] : memref<1x128xf32, #tpu.memory_space<vmem>>, vector<1x128xf32>
        %c0_72 = arith.constant 0 : index
        %c0_73 = arith.constant 0 : index
        %111 = vector.load %arg24[%c0_72, %c0_73] : memref<1x128xf32, #tpu.memory_space<vmem>>, vector<1x128xf32>
        %112 = arith.mulf %111, %96 : vector<1x128xf32>
        %113 = arith.subf %110, %112 : vector<1x128xf32>
        %c0_74 = arith.constant 0 : index
        %c0_75 = arith.constant 0 : index
        %114 = vector.load %arg25[%c0_74, %c0_75] : memref<1x128xf32, #tpu.memory_space<vmem>>, vector<1x128xf32>
        tpu.vector_store %arg25[%c0_74, %c0_75], %113 {strides = array<i32>} : memref<1x128xf32, #tpu.memory_space<vmem>>, vector<1x128xf32>,
        %cst_76 = arith.constant 0.000000e+00 : f32
        %115 = vector.broadcast %cst_76 : f32 to vector<1x1024xf32>
        %c0_77 = arith.constant 0 : index
        %c0_78 = arith.constant 0 : index
        %116 = vector.load %arg16[%c0_77, %c0_78] : memref<1x1024xf32, #tpu.memory_space<vmem>>, vector<1x1024xf32>
        tpu.vector_store %arg16[%c0_77, %c0_78], %115 {strides = array<i32>} : memref<1x1024xf32, #tpu.memory_space<vmem>>, vector<1x1024xf32>,
        %cst_79 = arith.constant 0.000000e+00 : f32
        %117 = vector.broadcast %cst_79 : f32 to vector<1x1024xf32>
        %c0_80 = arith.constant 0 : index
        %c0_81 = arith.constant 0 : index
        %118 = vector.load %arg17[%c0_80, %c0_81] : memref<1x1024xf32, #tpu.memory_space<vmem>>, vector<1x1024xf32>
        tpu.vector_store %arg17[%c0_80, %c0_81], %117 {strides = array<i32>} : memref<1x1024xf32, #tpu.memory_space<vmem>>, vector<1x1024xf32>,
      } else {
      }
      %c0_i32_13 = arith.constant 0 : i32
      %38 = arith.cmpi eq, %arg2, %c0_i32_13 : i32
      %39 = arith.extui %38 : i1 to i32
      %c0_i32_14 = arith.constant 0 : i32
      %40 = arith.cmpi ne, %39, %c0_i32_14 : i32
      scf.if %40 {
        %cst_58 = arith.constant 0xFF800000 : f32
        %94 = vector.broadcast %cst_58 : f32 to vector<1x1024xf32>
        %c0_59 = arith.constant 0 : index
        %c0_60 = arith.constant 0 : index
        %c0_61 = arith.constant 0 : index
        %95 = vector.load %arg18[%c0_59, %c0_60, %c0_61] : memref<1x1x1024xf32, #tpu.memory_space<vmem>>, vector<1x1x1024xf32>
        %96 = vector.shape_cast %95 : vector<1x1x1024xf32> to vector<1x1024xf32>
        %97 = vector.shape_cast %94 : vector<1x1024xf32> to vector<1x1x1024xf32>
        tpu.vector_store %arg18[%c0_59, %c0_60, %c0_61], %97 {strides = array<i32>} : memref<1x1x1024xf32, #tpu.memory_space<vmem>>, vector<1x1x1024xf32>,
        %cst_62 = arith.constant 0x7F800000 : f32
        %98 = vector.broadcast %cst_62 : f32 to vector<1x1024xf32>
        %c0_63 = arith.constant 0 : index
        %c0_64 = arith.constant 0 : index
        %c0_65 = arith.constant 0 : index
        %99 = vector.load %arg19[%c0_63, %c0_64, %c0_65] : memref<1x1x1024xf32, #tpu.memory_space<vmem>>, vector<1x1x1024xf32>
        %100 = vector.shape_cast %99 : vector<1x1x1024xf32> to vector<1x1024xf32>
        %101 = vector.shape_cast %98 : vector<1x1024xf32> to vector<1x1x1024xf32>
        tpu.vector_store %arg19[%c0_63, %c0_64, %c0_65], %101 {strides = array<i32>} : memref<1x1x1024xf32, #tpu.memory_space<vmem>>, vector<1x1x1024xf32>,
      } else {
      }
      %c0_15 = arith.constant 0 : index
      %c0_16 = arith.constant 0 : index
      %41 = vector.load %arg14[%c0_15, %c0_16] : memref<1x64xf32, #tpu.memory_space<vmem>>, vector<1x64xf32>
      %42 = vector.broadcast %41 : vector<1x64xf32> to vector<16x64xf32>
      %43 = arith.mulf %42, %26 : vector<16x64xf32>
      %c0_17 = arith.constant 0 : index
      %c0_18 = arith.constant 0 : index
      %44 = vector.load %arg15[%c0_17, %c0_18] : memref<1x64xf32, #tpu.memory_space<vmem>>, vector<1x64xf32>
      %45 = vector.broadcast %44 : vector<1x64xf32> to vector<16x64xf32>
      %46 = arith.addf %43, %45 : vector<16x64xf32>
      %cst = arith.constant 0.000000e+00 : f32
      %47 = vector.broadcast %cst : f32 to vector<16x64xf32>
      %48 = arith.maximumf %46, %47 : vector<16x64xf32>
      %c0_19 = arith.constant 0 : index
      %c0_20 = arith.constant 0 : index
      %49 = vector.load %arg6[%c0_19, %c0_20] : memref<64x128xf32, #tpu.memory_space<vmem>>, vector<64x128xf32>
      %cst_21 = arith.constant dense<0.000000e+00> : vector<16x128xf32>
      %50 = tpu.matmul %48, %49, %cst_21 {dimension_numbers = #tpu.dot_dimension_numbers<[1], [0], [0], [1], [0, 0, 1, 1], [], []>} : vector<16x64xf32>, vector<64x128xf32>, vector<16x128xf32> -> vector<16x128xf32>
      %c0_22 = arith.constant 0 : index
      %c0_23 = arith.constant 0 : index
      %51 = vector.load %arg7[%c0_22, %c0_23] : memref<1x128xf32, #tpu.memory_space<vmem>>, vector<1x128xf32>
      %52 = vector.broadcast %51 : vector<1x128xf32> to vector<16x128xf32>
      %53 = arith.addf %50, %52 : vector<16x128xf32>
      %c0_24 = arith.constant 0 : index
      %c0_25 = arith.constant 0 : index
      %54 = vector.load %arg24[%c0_24, %c0_25] : memref<1x128xf32, #tpu.memory_space<vmem>>, vector<1x128xf32>
      %55 = vector.broadcast %54 : vector<1x128xf32> to vector<16x128xf32>
      %56 = arith.mulf %55, %53 : vector<16x128xf32>
      %c0_26 = arith.constant 0 : index
      %c0_27 = arith.constant 0 : index
      %57 = vector.load %arg25[%c0_26, %c0_27] : memref<1x128xf32, #tpu.memory_space<vmem>>, vector<1x128xf32>
      %58 = vector.broadcast %57 : vector<1x128xf32> to vector<16x128xf32>
      %59 = arith.addf %56, %58 : vector<16x128xf32>
      %cst_28 = arith.constant 0.000000e+00 : f32
      %60 = vector.broadcast %cst_28 : f32 to vector<16x128xf32>
      %61 = arith.maximumf %59, %60 : vector<16x128xf32>
      %c0_29 = arith.constant 0 : index
      %c0_30 = arith.constant 0 : index
      %62 = vector.load %arg8[%c0_29, %c0_30] : memref<128x1024xf32, #tpu.memory_space<vmem>>, vector<128x1024xf32>
      %cst_31 = arith.constant dense<0.000000e+00> : vector<16x1024xf32>
      %63 = tpu.matmul %61, %62, %cst_31 {dimension_numbers = #tpu.dot_dimension_numbers<[1], [0], [0], [1], [0, 0, 1, 1], [], []>} : vector<16x128xf32>, vector<128x1024xf32>, vector<16x1024xf32> -> vector<16x1024xf32>
      %c0_32 = arith.constant 0 : index
      %c0_33 = arith.constant 0 : index
      %64 = vector.load %arg9[%c0_32, %c0_33] : memref<1x1024xf32, #tpu.memory_space<vmem>>, vector<1x1024xf32>
      %65 = vector.broadcast %64 : vector<1x1024xf32> to vector<16x1024xf32>
      %66 = arith.addf %63, %65 : vector<16x1024xf32>
      %c0_34 = arith.constant 0 : index
      %c0_35 = arith.constant 0 : index
      %67 = vector.load %arg16[%c0_34, %c0_35] : memref<1x1024xf32, #tpu.memory_space<vmem>>, vector<1x1024xf32>
      %cst_36 = arith.constant dense<0.000000e+00> : vector<1024xf32>
      %68 = vector.multi_reduction <add>, %66, %cst_36 [0] : vector<16x1024xf32> to vector<1024xf32>
      %69 = vector.shape_cast %68 : vector<1024xf32> to vector<1x1024xf32>
      %70 = arith.addf %67, %69 : vector<1x1024xf32>
      %c0_37 = arith.constant 0 : index
      %c0_38 = arith.constant 0 : index
      %71 = vector.load %arg16[%c0_37, %c0_38] : memref<1x1024xf32, #tpu.memory_space<vmem>>, vector<1x1024xf32>
      tpu.vector_store %arg16[%c0_37, %c0_38], %70 {strides = array<i32>} : memref<1x1024xf32, #tpu.memory_space<vmem>>, vector<1x1024xf32>,
      %c0_39 = arith.constant 0 : index
      %c0_40 = arith.constant 0 : index
      %72 = vector.load %arg17[%c0_39, %c0_40] : memref<1x1024xf32, #tpu.memory_space<vmem>>, vector<1x1024xf32>
      %73 = arith.mulf %66, %66 : vector<16x1024xf32>
      %cst_41 = arith.constant dense<0.000000e+00> : vector<1024xf32>
      %74 = vector.multi_reduction <add>, %73, %cst_41 [0] : vector<16x1024xf32> to vector<1024xf32>
      %75 = vector.shape_cast %74 : vector<1024xf32> to vector<1x1024xf32>
      %76 = arith.addf %72, %75 : vector<1x1024xf32>
      %c0_42 = arith.constant 0 : index
      %c0_43 = arith.constant 0 : index
      %77 = vector.load %arg17[%c0_42, %c0_43] : memref<1x1024xf32, #tpu.memory_space<vmem>>, vector<1x1024xf32>
      tpu.vector_store %arg17[%c0_42, %c0_43], %76 {strides = array<i32>} : memref<1x1024xf32, #tpu.memory_space<vmem>>, vector<1x1024xf32>,
      %c0_44 = arith.constant 0 : index
      %c0_45 = arith.constant 0 : index
      %c0_46 = arith.constant 0 : index
      %78 = vector.load %arg18[%c0_44, %c0_45, %c0_46] : memref<1x1x1024xf32, #tpu.memory_space<vmem>>, vector<1x1x1024xf32>
      %79 = vector.shape_cast %78 : vector<1x1x1024xf32> to vector<1x1024xf32>
      %cst_47 = arith.constant dense<0xFF800000> : vector<1024xf32>
      %80 = vector.multi_reduction <maximumf>, %66, %cst_47 [0] : vector<16x1024xf32> to vector<1024xf32>
      %81 = vector.shape_cast %80 : vector<1024xf32> to vector<1x1024xf32>
      %82 = arith.maximumf %79, %81 : vector<1x1024xf32>
      %c0_48 = arith.constant 0 : index
      %c0_49 = arith.constant 0 : index
      %c0_50 = arith.constant 0 : index
      %83 = vector.load %arg18[%c0_48, %c0_49, %c0_50] : memref<1x1x1024xf32, #tpu.memory_space<vmem>>, vector<1x1x1024xf32>
      %84 = vector.shape_cast %83 : vector<1x1x1024xf32> to vector<1x1024xf32>
      %85 = vector.shape_cast %82 : vector<1x1024xf32> to vector<1x1x1024xf32>
      tpu.vector_store %arg18[%c0_48, %c0_49, %c0_50], %85 {strides = array<i32>} : memref<1x1x1024xf32, #tpu.memory_space<vmem>>, vector<1x1x1024xf32>,
      %c0_51 = arith.constant 0 : index
      %c0_52 = arith.constant 0 : index
      %c0_53 = arith.constant 0 : index
      %86 = vector.load %arg19[%c0_51, %c0_52, %c0_53] : memref<1x1x1024xf32, #tpu.memory_space<vmem>>, vector<1x1x1024xf32>
      %87 = vector.shape_cast %86 : vector<1x1x1024xf32> to vector<1x1024xf32>
      %cst_54 = arith.constant dense<0x7F800000> : vector<1024xf32>
      %88 = vector.multi_reduction <minimumf>, %66, %cst_54 [0] : vector<16x1024xf32> to vector<1024xf32>
      %89 = vector.shape_cast %88 : vector<1024xf32> to vector<1x1024xf32>
      %90 = arith.minimumf %87, %89 : vector<1x1024xf32>
      %c0_55 = arith.constant 0 : index
      %c0_56 = arith.constant 0 : index
      %c0_57 = arith.constant 0 : index
      %91 = vector.load %arg19[%c0_55, %c0_56, %c0_57] : memref<1x1x1024xf32, #tpu.memory_space<vmem>>, vector<1x1x1024xf32>
      %92 = vector.shape_cast %91 : vector<1x1x1024xf32> to vector<1x1024xf32>
      %93 = vector.shape_cast %90 : vector<1x1024xf32> to vector<1x1x1024xf32>
      tpu.vector_store %arg19[%c0_55, %c0_56, %c0_57], %93 {strides = array<i32>} : memref<1x1x1024xf32, #tpu.memory_space<vmem>>, vector<1x1x1024xf32>,
    } else {
    }
    return
  }
  func.func @transform_0(%arg0: i32, %arg1: i32, %arg2: i32) -> (i32, i32, i32) {
    %c0_i32 = arith.constant 0 : i32
    %c0_i32_0 = arith.constant 0 : i32
    return %arg1, %arg2, %c0_i32 : i32, i32, i32
  }
  func.func @transform_1(%arg0: i32, %arg1: i32, %arg2: i32) -> (i32, i32, i32) {
    %c0_i32 = arith.constant 0 : i32
    %c0_i32_0 = arith.constant 0 : i32
    %c0_i32_1 = arith.constant 0 : i32
    return %arg1, %c0_i32, %c0_i32_0 : i32, i32, i32
  }
  func.func @transform_2(%arg0: i32, %arg1: i32, %arg2: i32) -> (i32, i32) {
    %c0_i32 = arith.constant 0 : i32
    %c0_i32_0 = arith.constant 0 : i32
    %c0_i32_1 = arith.constant 0 : i32
    return %c0_i32, %c0_i32_0 : i32, i32
  }
  func.func @transform_3(%arg0: i32, %arg1: i32, %arg2: i32) -> (i32, i32) {
    %c0_i32 = arith.constant 0 : i32
    %c0_i32_0 = arith.constant 0 : i32
    %c0_i32_1 = arith.constant 0 : i32
    return %c0_i32, %c0_i32_0 : i32, i32
  }
  func.func @transform_4(%arg0: i32, %arg1: i32, %arg2: i32) -> (i32, i32) {
    %c0_i32 = arith.constant 0 : i32
    %c0_i32_0 = arith.constant 0 : i32
    %c0_i32_1 = arith.constant 0 : i32
    return %c0_i32, %c0_i32_0 : i32, i32
  }
  func.func @transform_5(%arg0: i32, %arg1: i32, %arg2: i32) -> (i32, i32) {
    %c0_i32 = arith.constant 0 : i32
    %c0_i32_0 = arith.constant 0 : i32
    %c0_i32_1 = arith.constant 0 : i32
    return %c0_i32, %c0_i32_0 : i32, i32
  }
  func.func @transform_6(%arg0: i32, %arg1: i32, %arg2: i32) -> (i32, i32) {
    %c0_i32 = arith.constant 0 : i32
    %c0_i32_0 = arith.constant 0 : i32
    %c0_i32_1 = arith.constant 0 : i32
    return %c0_i32, %c0_i32_0 : i32, i32
  }
  func.func @transform_7(%arg0: i32, %arg1: i32, %arg2: i32) -> (i32, i32) {
    %c0_i32 = arith.constant 0 : i32
    %c0_i32_0 = arith.constant 0 : i32
    %c0_i32_1 = arith.constant 0 : i32
    return %c0_i32, %c0_i32_0 : i32, i32
  }
  func.func @transform_8(%arg0: i32, %arg1: i32, %arg2: i32) -> (i32, i32) {
    %c0_i32 = arith.constant 0 : i32
    %c0_i32_0 = arith.constant 0 : i32
    %c0_i32_1 = arith.constant 0 : i32
    return %c0_i32, %c0_i32_0 : i32, i32
  }
  func.func @transform_9(%arg0: i32, %arg1: i32, %arg2: i32) -> (i32, i32) {
    %c0_i32 = arith.constant 0 : i32
    %c0_i32_0 = arith.constant 0 : i32
    %c0_i32_1 = arith.constant 0 : i32
    return %c0_i32, %c0_i32_0 : i32, i32
  }
  func.func @transform_10(%arg0: i32, %arg1: i32, %arg2: i32) -> (i32, i32) {
    %c0_i32 = arith.constant 0 : i32
    %c0_i32_0 = arith.constant 0 : i32
    %c0_i32_1 = arith.constant 0 : i32
    return %c0_i32, %c0_i32_0 : i32, i32
  }
  func.func @transform_11(%arg0: i32, %arg1: i32, %arg2: i32) -> (i32, i32) {
    %c0_i32 = arith.constant 0 : i32
    %c0_i32_0 = arith.constant 0 : i32
    %c0_i32_1 = arith.constant 0 : i32
    return %c0_i32, %c0_i32_0 : i32, i32
  }
  func.func @transform_12(%arg0: i32, %arg1: i32, %arg2: i32) -> (i32, i32) {
    %c0_i32 = arith.constant 0 : i32
    %c0_i32_0 = arith.constant 0 : i32
    %c0_i32_1 = arith.constant 0 : i32
    return %c0_i32, %c0_i32_0 : i32, i32
  }
  func.func @transform_13(%arg0: i32, %arg1: i32, %arg2: i32) -> (i32, i32) {
    %c0_i32 = arith.constant 0 : i32
    %c0_i32_0 = arith.constant 0 : i32
    %c0_i32_1 = arith.constant 0 : i32
    return %c0_i32, %c0_i32_0 : i32, i32
  }
  func.func @transform_14(%arg0: i32, %arg1: i32, %arg2: i32) -> (i32, i32) {
    %c0_i32 = arith.constant 0 : i32
    %c0_i32_0 = arith.constant 0 : i32
    %c0_i32_1 = arith.constant 0 : i32
    return %c0_i32, %c0_i32_0 : i32, i32
  }
  func.func @transform_15(%arg0: i32, %arg1: i32, %arg2: i32) -> (i32, i32, i32) {
    %c0_i32 = arith.constant 0 : i32
    %c0_i32_0 = arith.constant 0 : i32
    %c0_i32_1 = arith.constant 0 : i32
    return %arg1, %c0_i32, %c0_i32_0 : i32, i32, i32
  }
  func.func @transform_16(%arg0: i32, %arg1: i32, %arg2: i32) -> (i32, i32, i32) {
    %c0_i32 = arith.constant 0 : i32
    %c0_i32_0 = arith.constant 0 : i32
    %c0_i32_1 = arith.constant 0 : i32
    return %arg1, %c0_i32, %c0_i32_0 : i32, i32, i32
  }
}

module attributes {stable_mosaic.version = 11 : i64} {
  func.func @_chain_stats_kernel(%arg0: i32, %arg1: i32, %arg2: i32, %arg3: memref<1x16x3xf32, #tpu.memory_space<vmem>>, %arg4: memref<1x3x64xf32, #tpu.memory_space<vmem>>, %arg5: memref<1x64xf32, #tpu.memory_space<vmem>>, %arg6: memref<64x128xf32, #tpu.memory_space<vmem>>, %arg7: memref<1x128xf32, #tpu.memory_space<vmem>>, %arg8: memref<128x1024xf32, #tpu.memory_space<vmem>>, %arg9: memref<1x1024xf32, #tpu.memory_space<vmem>>, %arg10: memref<1x64xf32, #tpu.memory_space<vmem>>, %arg11: memref<1x64xf32, #tpu.memory_space<vmem>>, %arg12: memref<1x128xf32, #tpu.memory_space<vmem>>, %arg13: memref<1x128xf32, #tpu.memory_space<vmem>>, %arg14: memref<1x64xf32, #tpu.memory_space<vmem>>, %arg15: memref<1x64xf32, #tpu.memory_space<vmem>>, %arg16: memref<1x1024xf32, #tpu.memory_space<vmem>>, %arg17: memref<1x1024xf32, #tpu.memory_space<vmem>>, %arg18: memref<1x1x1024xf32, #tpu.memory_space<vmem>>, %arg19: memref<1x1x1024xf32, #tpu.memory_space<vmem>>, %arg20: memref<1x64xf32, #tpu.memory_space<vmem>>, %arg21: memref<1x64xf32, #tpu.memory_space<vmem>>, %arg22: memref<1x128xf32, #tpu.memory_space<vmem>>, %arg23: memref<1x128xf32, #tpu.memory_space<vmem>>, %arg24: memref<1x128xf32, #tpu.memory_space<vmem>>, %arg25: memref<1x128xf32, #tpu.memory_space<vmem>>) attributes {dimension_semantics = [#tpu.dimension_semantics<arbitrary>, #tpu.dimension_semantics<arbitrary>, #tpu.dimension_semantics<arbitrary>], iteration_bounds = array<i64: 3, 2, 1>, scalar_prefetch = 0 : i64, scratch_operands = 6 : i64, tpu.core_type = #tpu.core_type<tc>, window_params = [{transform_indices = @transform_0, window_bounds = array<i64: 1, 16, 3>}, {transform_indices = @transform_1, window_bounds = array<i64: 1, 3, 64>}, {pipeline_mode = #tpu.pipeline_mode<synchronous>, transform_indices = @transform_2, window_bounds = array<i64: 1, 64>}, {pipeline_mode = #tpu.pipeline_mode<synchronous>, transform_indices = @transform_3, window_bounds = array<i64: 64, 128>}, {pipeline_mode = #tpu.pipeline_mode<synchronous>, transform_indices = @transform_4, window_bounds = array<i64: 1, 128>}, {pipeline_mode = #tpu.pipeline_mode<synchronous>, transform_indices = @transform_5, window_bounds = array<i64: 128, 1024>}, {pipeline_mode = #tpu.pipeline_mode<synchronous>, transform_indices = @transform_6, window_bounds = array<i64: 1, 1024>}, {pipeline_mode = #tpu.pipeline_mode<synchronous>, transform_indices = @transform_7, window_bounds = array<i64: 1, 64>}, {pipeline_mode = #tpu.pipeline_mode<synchronous>, transform_indices = @transform_8, window_bounds = array<i64: 1, 64>}, {pipeline_mode = #tpu.pipeline_mode<synchronous>, transform_indices = @transform_9, window_bounds = array<i64: 1, 128>}, {pipeline_mode = #tpu.pipeline_mode<synchronous>, transform_indices = @transform_10, window_bounds = array<i64: 1, 128>}, {pipeline_mode = #tpu.pipeline_mode<synchronous>, transform_indices = @transform_11, window_bounds = array<i64: 1, 64>}, {pipeline_mode = #tpu.pipeline_mode<synchronous>, transform_indices = @transform_12, window_bounds = array<i64: 1, 64>}, {pipeline_mode = #tpu.pipeline_mode<synchronous>, transform_indices = @transform_13, window_bounds = array<i64: 1, 1024>}, {pipeline_mode = #tpu.pipeline_mode<synchronous>, transform_indices = @transform_14, window_bounds = array<i64: 1, 1024>}, {transform_indices = @transform_15, window_bounds = array<i64: 1, 1, 1024>}, {transform_indices = @transform_16, window_bounds = array<i64: 1, 1, 1024>}]} {
    %c0_i32 = arith.constant 0 : i32
    %0 = arith.cmpi eq, %arg1, %c0_i32 : i32
    %c0_i32_0 = arith.constant 0 : i32
    %1 = arith.cmpi eq, %arg2, %c0_i32_0 : i32
    %2 = arith.andi %0, %1 : i1
    %c0 = arith.constant 0 : index
    %c0_1 = arith.constant 0 : index
    %c0_2 = arith.constant 0 : index
    %3 = vector.load %arg3[%c0, %c0_1, %c0_2] : memref<1x16x3xf32, #tpu.memory_space<vmem>>, vector<1x16x3xf32>
    %4 = vector.shape_cast %3 : vector<1x16x3xf32> to vector<16x3xf32>
    %c0_3 = arith.constant 0 : index
    %c0_4 = arith.constant 0 : index
    %c0_5 = arith.constant 0 : index
    %5 = vector.load %arg4[%c0_3, %c0_4, %c0_5] : memref<1x3x64xf32, #tpu.memory_space<vmem>>, vector<1x3x64xf32>
    %6 = vector.shape_cast %5 : vector<1x3x64xf32> to vector<3x64xf32>
    %c0_6 = arith.constant 0 : index
    %c0_7 = arith.constant 0 : index
    %7 = vector.load %arg5[%c0_6, %c0_7] : memref<1x64xf32, #tpu.memory_space<vmem>>, vector<1x64xf32>
    %8 = vector.extract_strided_slice %4 {offsets = [0, 0], sizes = [16, 1], strides = [1, 1]} : vector<16x3xf32> to vector<16x1xf32>
    %9 = vector.extract_strided_slice %6 {offsets = [0, 0], sizes = [1, 64], strides = [1, 1]} : vector<3x64xf32> to vector<1x64xf32>
    %10 = vector.broadcast %8 : vector<16x1xf32> to vector<16x64xf32>
    %11 = vector.broadcast %9 : vector<1x64xf32> to vector<16x64xf32>
    %12 = arith.mulf %10, %11 : vector<16x64xf32>
    %13 = vector.extract_strided_slice %4 {offsets = [0, 1], sizes = [16, 1], strides = [1, 1]} : vector<16x3xf32> to vector<16x1xf32>
    %14 = vector.extract_strided_slice %6 {offsets = [1, 0], sizes = [1, 64], strides = [1, 1]} : vector<3x64xf32> to vector<1x64xf32>
    %15 = vector.broadcast %13 : vector<16x1xf32> to vector<16x64xf32>
    %16 = vector.broadcast %14 : vector<1x64xf32> to vector<16x64xf32>
    %17 = arith.mulf %15, %16 : vector<16x64xf32>
    %18 = arith.addf %12, %17 : vector<16x64xf32>
    %19 = vector.extract_strided_slice %4 {offsets = [0, 2], sizes = [16, 1], strides = [1, 1]} : vector<16x3xf32> to vector<16x1xf32>
    %20 = vector.extract_strided_slice %6 {offsets = [2, 0], sizes = [1, 64], strides = [1, 1]} : vector<3x64xf32> to vector<1x64xf32>
    %21 = vector.broadcast %19 : vector<16x1xf32> to vector<16x64xf32>
    %22 = vector.broadcast %20 : vector<1x64xf32> to vector<16x64xf32>
    %23 = arith.mulf %21, %22 : vector<16x64xf32>
    %24 = arith.addf %18, %23 : vector<16x64xf32>
    %25 = vector.broadcast %7 : vector<1x64xf32> to vector<16x64xf32>
    %26 = arith.addf %24, %25 : vector<16x64xf32>
    %c0_i32_8 = arith.constant 0 : i32
    %27 = arith.cmpi eq, %arg0, %c0_i32_8 : i32
    %28 = arith.extui %27 : i1 to i32
    %c0_i32_9 = arith.constant 0 : i32
    %29 = arith.cmpi ne, %28, %c0_i32_9 : i32
    scf.if %29 {
      %36 = arith.extui %2 : i1 to i32
      %c0_i32_12 = arith.constant 0 : i32
      %37 = arith.cmpi ne, %36, %c0_i32_12 : i32
      scf.if %37 {
        %cst_22 = arith.constant 0.000000e+00 : f32
        %49 = vector.broadcast %cst_22 : f32 to vector<1x64xf32>
        %c0_23 = arith.constant 0 : index
        %c0_24 = arith.constant 0 : index
        %50 = vector.load %arg20[%c0_23, %c0_24] : memref<1x64xf32, #tpu.memory_space<vmem>>, vector<1x64xf32>
        tpu.vector_store %arg20[%c0_23, %c0_24], %49 {strides = array<i32>} : memref<1x64xf32, #tpu.memory_space<vmem>>, vector<1x64xf32>,
        %cst_25 = arith.constant 0.000000e+00 : f32
        %51 = vector.broadcast %cst_25 : f32 to vector<1x64xf32>
        %c0_26 = arith.constant 0 : index
        %c0_27 = arith.constant 0 : index
        %52 = vector.load %arg21[%c0_26, %c0_27] : memref<1x64xf32, #tpu.memory_space<vmem>>, vector<1x64xf32>
        tpu.vector_store %arg21[%c0_26, %c0_27], %51 {strides = array<i32>} : memref<1x64xf32, #tpu.memory_space<vmem>>, vector<1x64xf32>,
      } else {
      }
      %c0_13 = arith.constant 0 : index
      %c0_14 = arith.constant 0 : index
      %38 = vector.load %arg20[%c0_13, %c0_14] : memref<1x64xf32, #tpu.memory_space<vmem>>, vector<1x64xf32>
      %cst = arith.constant dense<0.000000e+00> : vector<64xf32>
      %39 = vector.multi_reduction <add>, %26, %cst [0] : vector<16x64xf32> to vector<64xf32>
      %40 = vector.shape_cast %39 : vector<64xf32> to vector<1x64xf32>
      %41 = arith.addf %38, %40 : vector<1x64xf32>
      %c0_15 = arith.constant 0 : index
      %c0_16 = arith.constant 0 : index
      %42 = vector.load %arg20[%c0_15, %c0_16] : memref<1x64xf32, #tpu.memory_space<vmem>>, vector<1x64xf32>
      tpu.vector_store %arg20[%c0_15, %c0_16], %41 {strides = array<i32>} : memref<1x64xf32, #tpu.memory_space<vmem>>, vector<1x64xf32>,
      %c0_17 = arith.constant 0 : index
      %c0_18 = arith.constant 0 : index
      %43 = vector.load %arg21[%c0_17, %c0_18] : memref<1x64xf32, #tpu.memory_space<vmem>>, vector<1x64xf32>
      %44 = arith.mulf %26, %26 : vector<16x64xf32>
      %cst_19 = arith.constant dense<0.000000e+00> : vector<64xf32>
      %45 = vector.multi_reduction <add>, %44, %cst_19 [0] : vector<16x64xf32> to vector<64xf32>
      %46 = vector.shape_cast %45 : vector<64xf32> to vector<1x64xf32>
      %47 = arith.addf %43, %46 : vector<1x64xf32>
      %c0_20 = arith.constant 0 : index
      %c0_21 = arith.constant 0 : index
      %48 = vector.load %arg21[%c0_20, %c0_21] : memref<1x64xf32, #tpu.memory_space<vmem>>, vector<1x64xf32>
      tpu.vector_store %arg21[%c0_20, %c0_21], %47 {strides = array<i32>} : memref<1x64xf32, #tpu.memory_space<vmem>>, vector<1x64xf32>,
    } else {
    }
    %c1_i32 = arith.constant 1 : i32
    %30 = arith.cmpi eq, %arg0, %c1_i32 : i32
    %31 = arith.extui %30 : i1 to i32
    %c0_i32_10 = arith.constant 0 : i32
    %32 = arith.cmpi ne, %31, %c0_i32_10 : i32
    scf.if %32 {
      %36 = arith.extui %2 : i1 to i32
      %c0_i32_12 = arith.constant 0 : i32
      %37 = arith.cmpi ne, %36, %c0_i32_12 : i32
      scf.if %37 {
        %c0_32 = arith.constant 0 : index
        %c0_33 = arith.constant 0 : index
        %62 = vector.load %arg20[%c0_32, %c0_33] : memref<1x64xf32, #tpu.memory_space<vmem>>, vector<1x64xf32>
        %cst_34 = arith.constant 3.125000e-02 : f32
        %63 = vector.broadcast %cst_34 : f32 to vector<1x64xf32>
        %64 = arith.mulf %62, %63 : vector<1x64xf32>
        %c0_35 = arith.constant 0 : index
        %c0_36 = arith.constant 0 : index
        %65 = vector.load %arg21[%c0_35, %c0_36] : memref<1x64xf32, #tpu.memory_space<vmem>>, vector<1x64xf32>
        %cst_37 = arith.constant 3.125000e-02 : f32
        %66 = vector.broadcast %cst_37 : f32 to vector<1x64xf32>
        %67 = arith.mulf %65, %66 : vector<1x64xf32>
        %68 = arith.mulf %64, %64 : vector<1x64xf32>
        %69 = arith.subf %67, %68 : vector<1x64xf32>
        %cst_38 = arith.constant 0.000000e+00 : f32
        %70 = vector.broadcast %cst_38 : f32 to vector<1x64xf32>
        %71 = arith.maximumf %69, %70 : vector<1x64xf32>
        %c0_39 = arith.constant 0 : index
        %c0_40 = arith.constant 0 : index
        %72 = vector.load %arg10[%c0_39, %c0_40] : memref<1x64xf32, #tpu.memory_space<vmem>>, vector<1x64xf32>
        %cst_41 = arith.constant 9.99999974E-6 : f32
        %73 = vector.broadcast %cst_41 : f32 to vector<1x64xf32>
        %74 = arith.addf %71, %73 : vector<1x64xf32>
        %75 = math.rsqrt %74 : vector<1x64xf32>
        %76 = arith.mulf %72, %75 : vector<1x64xf32>
        %c0_42 = arith.constant 0 : index
        %c0_43 = arith.constant 0 : index
        %77 = vector.load %arg14[%c0_42, %c0_43] : memref<1x64xf32, #tpu.memory_space<vmem>>, vector<1x64xf32>
        tpu.vector_store %arg14[%c0_42, %c0_43], %76 {strides = array<i32>} : memref<1x64xf32, #tpu.memory_space<vmem>>, vector<1x64xf32>,
        %c0_44 = arith.constant 0 : index
        %c0_45 = arith.constant 0 : index
        %78 = vector.load %arg11[%c0_44, %c0_45] : memref<1x64xf32, #tpu.memory_space<vmem>>, vector<1x64xf32>
        %79 = arith.mulf %76, %64 : vector<1x64xf32>
        %80 = arith.subf %78, %79 : vector<1x64xf32>
        %c0_46 = arith.constant 0 : index
        %c0_47 = arith.constant 0 : index
        %81 = vector.load %arg15[%c0_46, %c0_47] : memref<1x64xf32, #tpu.memory_space<vmem>>, vector<1x64xf32>
        tpu.vector_store %arg15[%c0_46, %c0_47], %80 {strides = array<i32>} : memref<1x64xf32, #tpu.memory_space<vmem>>, vector<1x64xf32>,
        %cst_48 = arith.constant 0.000000e+00 : f32
        %82 = vector.broadcast %cst_48 : f32 to vector<1x128xf32>
        %c0_49 = arith.constant 0 : index
        %c0_50 = arith.constant 0 : index
        %83 = vector.load %arg22[%c0_49, %c0_50] : memref<1x128xf32, #tpu.memory_space<vmem>>, vector<1x128xf32>
        tpu.vector_store %arg22[%c0_49, %c0_50], %82 {strides = array<i32>} : memref<1x128xf32, #tpu.memory_space<vmem>>, vector<1x128xf32>,
        %cst_51 = arith.constant 0.000000e+00 : f32
        %84 = vector.broadcast %cst_51 : f32 to vector<1x128xf32>
        %c0_52 = arith.constant 0 : index
        %c0_53 = arith.constant 0 : index
        %85 = vector.load %arg23[%c0_52, %c0_53] : memref<1x128xf32, #tpu.memory_space<vmem>>, vector<1x128xf32>
        tpu.vector_store %arg23[%c0_52, %c0_53], %84 {strides = array<i32>} : memref<1x128xf32, #tpu.memory_space<vmem>>, vector<1x128xf32>,
      } else {
      }
      %c0_13 = arith.constant 0 : index
      %c0_14 = arith.constant 0 : index
      %38 = vector.load %arg14[%c0_13, %c0_14] : memref<1x64xf32, #tpu.memory_space<vmem>>, vector<1x64xf32>
      %39 = vector.broadcast %38 : vector<1x64xf32> to vector<16x64xf32>
      %40 = arith.mulf %39, %26 : vector<16x64xf32>
      %c0_15 = arith.constant 0 : index
      %c0_16 = arith.constant 0 : index
      %41 = vector.load %arg15[%c0_15, %c0_16] : memref<1x64xf32, #tpu.memory_space<vmem>>, vector<1x64xf32>
      %42 = vector.broadcast %41 : vector<1x64xf32> to vector<16x64xf32>
      %43 = arith.addf %40, %42 : vector<16x64xf32>
      %cst = arith.constant 0.000000e+00 : f32
      %44 = vector.broadcast %cst : f32 to vector<16x64xf32>
      %45 = arith.maximumf %43, %44 : vector<16x64xf32>
      %c0_17 = arith.constant 0 : index
      %c0_18 = arith.constant 0 : index
      %46 = vector.load %arg6[%c0_17, %c0_18] : memref<64x128xf32, #tpu.memory_space<vmem>>, vector<64x128xf32>
      %cst_19 = arith.constant dense<0.000000e+00> : vector<16x128xf32>
      %47 = tpu.matmul %45, %46, %cst_19 {dimension_numbers = #tpu.dot_dimension_numbers<[1], [0], [0], [1], [0, 0, 1, 1], [], []>} : vector<16x64xf32>, vector<64x128xf32>, vector<16x128xf32> -> vector<16x128xf32>
      %c0_20 = arith.constant 0 : index
      %c0_21 = arith.constant 0 : index
      %48 = vector.load %arg7[%c0_20, %c0_21] : memref<1x128xf32, #tpu.memory_space<vmem>>, vector<1x128xf32>
      %49 = vector.broadcast %48 : vector<1x128xf32> to vector<16x128xf32>
      %50 = arith.addf %47, %49 : vector<16x128xf32>
      %c0_22 = arith.constant 0 : index
      %c0_23 = arith.constant 0 : index
      %51 = vector.load %arg22[%c0_22, %c0_23] : memref<1x128xf32, #tpu.memory_space<vmem>>, vector<1x128xf32>
      %cst_24 = arith.constant dense<0.000000e+00> : vector<128xf32>
      %52 = vector.multi_reduction <add>, %50, %cst_24 [0] : vector<16x128xf32> to vector<128xf32>
      %53 = vector.shape_cast %52 : vector<128xf32> to vector<1x128xf32>
      %54 = arith.addf %51, %53 : vector<1x128xf32>
      %c0_25 = arith.constant 0 : index
      %c0_26 = arith.constant 0 : index
      %55 = vector.load %arg22[%c0_25, %c0_26] : memref<1x128xf32, #tpu.memory_space<vmem>>, vector<1x128xf32>
      tpu.vector_store %arg22[%c0_25, %c0_26], %54 {strides = array<i32>} : memref<1x128xf32, #tpu.memory_space<vmem>>, vector<1x128xf32>,
      %c0_27 = arith.constant 0 : index
      %c0_28 = arith.constant 0 : index
      %56 = vector.load %arg23[%c0_27, %c0_28] : memref<1x128xf32, #tpu.memory_space<vmem>>, vector<1x128xf32>
      %57 = arith.mulf %50, %50 : vector<16x128xf32>
      %cst_29 = arith.constant dense<0.000000e+00> : vector<128xf32>
      %58 = vector.multi_reduction <add>, %57, %cst_29 [0] : vector<16x128xf32> to vector<128xf32>
      %59 = vector.shape_cast %58 : vector<128xf32> to vector<1x128xf32>
      %60 = arith.addf %56, %59 : vector<1x128xf32>
      %c0_30 = arith.constant 0 : index
      %c0_31 = arith.constant 0 : index
      %61 = vector.load %arg23[%c0_30, %c0_31] : memref<1x128xf32, #tpu.memory_space<vmem>>, vector<1x128xf32>
      tpu.vector_store %arg23[%c0_30, %c0_31], %60 {strides = array<i32>} : memref<1x128xf32, #tpu.memory_space<vmem>>, vector<1x128xf32>,
    } else {
    }
    %c2_i32 = arith.constant 2 : i32
    %33 = arith.cmpi eq, %arg0, %c2_i32 : i32
    %34 = arith.extui %33 : i1 to i32
    %c0_i32_11 = arith.constant 0 : i32
    %35 = arith.cmpi ne, %34, %c0_i32_11 : i32
    scf.if %35 {
      %36 = arith.extui %2 : i1 to i32
      %c0_i32_12 = arith.constant 0 : i32
      %37 = arith.cmpi ne, %36, %c0_i32_12 : i32
      scf.if %37 {
        %c0_58 = arith.constant 0 : index
        %c0_59 = arith.constant 0 : index
        %94 = vector.load %arg22[%c0_58, %c0_59] : memref<1x128xf32, #tpu.memory_space<vmem>>, vector<1x128xf32>
        %cst_60 = arith.constant 3.125000e-02 : f32
        %95 = vector.broadcast %cst_60 : f32 to vector<1x128xf32>
        %96 = arith.mulf %94, %95 : vector<1x128xf32>
        %c0_61 = arith.constant 0 : index
        %c0_62 = arith.constant 0 : index
        %97 = vector.load %arg23[%c0_61, %c0_62] : memref<1x128xf32, #tpu.memory_space<vmem>>, vector<1x128xf32>
        %cst_63 = arith.constant 3.125000e-02 : f32
        %98 = vector.broadcast %cst_63 : f32 to vector<1x128xf32>
        %99 = arith.mulf %97, %98 : vector<1x128xf32>
        %100 = arith.mulf %96, %96 : vector<1x128xf32>
        %101 = arith.subf %99, %100 : vector<1x128xf32>
        %cst_64 = arith.constant 0.000000e+00 : f32
        %102 = vector.broadcast %cst_64 : f32 to vector<1x128xf32>
        %103 = arith.maximumf %101, %102 : vector<1x128xf32>
        %c0_65 = arith.constant 0 : index
        %c0_66 = arith.constant 0 : index
        %104 = vector.load %arg12[%c0_65, %c0_66] : memref<1x128xf32, #tpu.memory_space<vmem>>, vector<1x128xf32>
        %cst_67 = arith.constant 9.99999974E-6 : f32
        %105 = vector.broadcast %cst_67 : f32 to vector<1x128xf32>
        %106 = arith.addf %103, %105 : vector<1x128xf32>
        %107 = math.rsqrt %106 : vector<1x128xf32>
        %108 = arith.mulf %104, %107 : vector<1x128xf32>
        %c0_68 = arith.constant 0 : index
        %c0_69 = arith.constant 0 : index
        %109 = vector.load %arg24[%c0_68, %c0_69] : memref<1x128xf32, #tpu.memory_space<vmem>>, vector<1x128xf32>
        tpu.vector_store %arg24[%c0_68, %c0_69], %108 {strides = array<i32>} : memref<1x128xf32, #tpu.memory_space<vmem>>, vector<1x128xf32>,
        %c0_70 = arith.constant 0 : index
        %c0_71 = arith.constant 0 : index
        %110 = vector.load %arg13[%c0_70, %c0_71] : memref<1x128xf32, #tpu.memory_space<vmem>>, vector<1x128xf32>
        %c0_72 = arith.constant 0 : index
        %c0_73 = arith.constant 0 : index
        %111 = vector.load %arg24[%c0_72, %c0_73] : memref<1x128xf32, #tpu.memory_space<vmem>>, vector<1x128xf32>
        %112 = arith.mulf %111, %96 : vector<1x128xf32>
        %113 = arith.subf %110, %112 : vector<1x128xf32>
        %c0_74 = arith.constant 0 : index
        %c0_75 = arith.constant 0 : index
        %114 = vector.load %arg25[%c0_74, %c0_75] : memref<1x128xf32, #tpu.memory_space<vmem>>, vector<1x128xf32>
        tpu.vector_store %arg25[%c0_74, %c0_75], %113 {strides = array<i32>} : memref<1x128xf32, #tpu.memory_space<vmem>>, vector<1x128xf32>,
        %cst_76 = arith.constant 0.000000e+00 : f32
        %115 = vector.broadcast %cst_76 : f32 to vector<1x1024xf32>
        %c0_77 = arith.constant 0 : index
        %c0_78 = arith.constant 0 : index
        %116 = vector.load %arg16[%c0_77, %c0_78] : memref<1x1024xf32, #tpu.memory_space<vmem>>, vector<1x1024xf32>
        tpu.vector_store %arg16[%c0_77, %c0_78], %115 {strides = array<i32>} : memref<1x1024xf32, #tpu.memory_space<vmem>>, vector<1x1024xf32>,
        %cst_79 = arith.constant 0.000000e+00 : f32
        %117 = vector.broadcast %cst_79 : f32 to vector<1x1024xf32>
        %c0_80 = arith.constant 0 : index
        %c0_81 = arith.constant 0 : index
        %118 = vector.load %arg17[%c0_80, %c0_81] : memref<1x1024xf32, #tpu.memory_space<vmem>>, vector<1x1024xf32>
        tpu.vector_store %arg17[%c0_80, %c0_81], %117 {strides = array<i32>} : memref<1x1024xf32, #tpu.memory_space<vmem>>, vector<1x1024xf32>,
      } else {
      }
      %c0_i32_13 = arith.constant 0 : i32
      %38 = arith.cmpi eq, %arg2, %c0_i32_13 : i32
      %39 = arith.extui %38 : i1 to i32
      %c0_i32_14 = arith.constant 0 : i32
      %40 = arith.cmpi ne, %39, %c0_i32_14 : i32
      scf.if %40 {
        %cst_58 = arith.constant 0xFF800000 : f32
        %94 = vector.broadcast %cst_58 : f32 to vector<1x1024xf32>
        %c0_59 = arith.constant 0 : index
        %c0_60 = arith.constant 0 : index
        %c0_61 = arith.constant 0 : index
        %95 = vector.load %arg18[%c0_59, %c0_60, %c0_61] : memref<1x1x1024xf32, #tpu.memory_space<vmem>>, vector<1x1x1024xf32>
        %96 = vector.shape_cast %95 : vector<1x1x1024xf32> to vector<1x1024xf32>
        %97 = vector.shape_cast %94 : vector<1x1024xf32> to vector<1x1x1024xf32>
        tpu.vector_store %arg18[%c0_59, %c0_60, %c0_61], %97 {strides = array<i32>} : memref<1x1x1024xf32, #tpu.memory_space<vmem>>, vector<1x1x1024xf32>,
        %cst_62 = arith.constant 0x7F800000 : f32
        %98 = vector.broadcast %cst_62 : f32 to vector<1x1024xf32>
        %c0_63 = arith.constant 0 : index
        %c0_64 = arith.constant 0 : index
        %c0_65 = arith.constant 0 : index
        %99 = vector.load %arg19[%c0_63, %c0_64, %c0_65] : memref<1x1x1024xf32, #tpu.memory_space<vmem>>, vector<1x1x1024xf32>
        %100 = vector.shape_cast %99 : vector<1x1x1024xf32> to vector<1x1024xf32>
        %101 = vector.shape_cast %98 : vector<1x1024xf32> to vector<1x1x1024xf32>
        tpu.vector_store %arg19[%c0_63, %c0_64, %c0_65], %101 {strides = array<i32>} : memref<1x1x1024xf32, #tpu.memory_space<vmem>>, vector<1x1x1024xf32>,
      } else {
      }
      %c0_15 = arith.constant 0 : index
      %c0_16 = arith.constant 0 : index
      %41 = vector.load %arg14[%c0_15, %c0_16] : memref<1x64xf32, #tpu.memory_space<vmem>>, vector<1x64xf32>
      %42 = vector.broadcast %41 : vector<1x64xf32> to vector<16x64xf32>
      %43 = arith.mulf %42, %26 : vector<16x64xf32>
      %c0_17 = arith.constant 0 : index
      %c0_18 = arith.constant 0 : index
      %44 = vector.load %arg15[%c0_17, %c0_18] : memref<1x64xf32, #tpu.memory_space<vmem>>, vector<1x64xf32>
      %45 = vector.broadcast %44 : vector<1x64xf32> to vector<16x64xf32>
      %46 = arith.addf %43, %45 : vector<16x64xf32>
      %cst = arith.constant 0.000000e+00 : f32
      %47 = vector.broadcast %cst : f32 to vector<16x64xf32>
      %48 = arith.maximumf %46, %47 : vector<16x64xf32>
      %c0_19 = arith.constant 0 : index
      %c0_20 = arith.constant 0 : index
      %49 = vector.load %arg6[%c0_19, %c0_20] : memref<64x128xf32, #tpu.memory_space<vmem>>, vector<64x128xf32>
      %cst_21 = arith.constant dense<0.000000e+00> : vector<16x128xf32>
      %50 = tpu.matmul %48, %49, %cst_21 {dimension_numbers = #tpu.dot_dimension_numbers<[1], [0], [0], [1], [0, 0, 1, 1], [], []>} : vector<16x64xf32>, vector<64x128xf32>, vector<16x128xf32> -> vector<16x128xf32>
      %c0_22 = arith.constant 0 : index
      %c0_23 = arith.constant 0 : index
      %51 = vector.load %arg7[%c0_22, %c0_23] : memref<1x128xf32, #tpu.memory_space<vmem>>, vector<1x128xf32>
      %52 = vector.broadcast %51 : vector<1x128xf32> to vector<16x128xf32>
      %53 = arith.addf %50, %52 : vector<16x128xf32>
      %c0_24 = arith.constant 0 : index
      %c0_25 = arith.constant 0 : index
      %54 = vector.load %arg24[%c0_24, %c0_25] : memref<1x128xf32, #tpu.memory_space<vmem>>, vector<1x128xf32>
      %55 = vector.broadcast %54 : vector<1x128xf32> to vector<16x128xf32>
      %56 = arith.mulf %55, %53 : vector<16x128xf32>
      %c0_26 = arith.constant 0 : index
      %c0_27 = arith.constant 0 : index
      %57 = vector.load %arg25[%c0_26, %c0_27] : memref<1x128xf32, #tpu.memory_space<vmem>>, vector<1x128xf32>
      %58 = vector.broadcast %57 : vector<1x128xf32> to vector<16x128xf32>
      %59 = arith.addf %56, %58 : vector<16x128xf32>
      %cst_28 = arith.constant 0.000000e+00 : f32
      %60 = vector.broadcast %cst_28 : f32 to vector<16x128xf32>
      %61 = arith.maximumf %59, %60 : vector<16x128xf32>
      %c0_29 = arith.constant 0 : index
      %c0_30 = arith.constant 0 : index
      %62 = vector.load %arg8[%c0_29, %c0_30] : memref<128x1024xf32, #tpu.memory_space<vmem>>, vector<128x1024xf32>
      %cst_31 = arith.constant dense<0.000000e+00> : vector<16x1024xf32>
      %63 = tpu.matmul %61, %62, %cst_31 {dimension_numbers = #tpu.dot_dimension_numbers<[1], [0], [0], [1], [0, 0, 1, 1], [], []>} : vector<16x128xf32>, vector<128x1024xf32>, vector<16x1024xf32> -> vector<16x1024xf32>
      %c0_32 = arith.constant 0 : index
      %c0_33 = arith.constant 0 : index
      %64 = vector.load %arg9[%c0_32, %c0_33] : memref<1x1024xf32, #tpu.memory_space<vmem>>, vector<1x1024xf32>
      %65 = vector.broadcast %64 : vector<1x1024xf32> to vector<16x1024xf32>
      %66 = arith.addf %63, %65 : vector<16x1024xf32>
      %c0_34 = arith.constant 0 : index
      %c0_35 = arith.constant 0 : index
      %67 = vector.load %arg16[%c0_34, %c0_35] : memref<1x1024xf32, #tpu.memory_space<vmem>>, vector<1x1024xf32>
      %cst_36 = arith.constant dense<0.000000e+00> : vector<1024xf32>
      %68 = vector.multi_reduction <add>, %66, %cst_36 [0] : vector<16x1024xf32> to vector<1024xf32>
      %69 = vector.shape_cast %68 : vector<1024xf32> to vector<1x1024xf32>
      %70 = arith.addf %67, %69 : vector<1x1024xf32>
      %c0_37 = arith.constant 0 : index
      %c0_38 = arith.constant 0 : index
      %71 = vector.load %arg16[%c0_37, %c0_38] : memref<1x1024xf32, #tpu.memory_space<vmem>>, vector<1x1024xf32>
      tpu.vector_store %arg16[%c0_37, %c0_38], %70 {strides = array<i32>} : memref<1x1024xf32, #tpu.memory_space<vmem>>, vector<1x1024xf32>,
      %c0_39 = arith.constant 0 : index
      %c0_40 = arith.constant 0 : index
      %72 = vector.load %arg17[%c0_39, %c0_40] : memref<1x1024xf32, #tpu.memory_space<vmem>>, vector<1x1024xf32>
      %73 = arith.mulf %66, %66 : vector<16x1024xf32>
      %cst_41 = arith.constant dense<0.000000e+00> : vector<1024xf32>
      %74 = vector.multi_reduction <add>, %73, %cst_41 [0] : vector<16x1024xf32> to vector<1024xf32>
      %75 = vector.shape_cast %74 : vector<1024xf32> to vector<1x1024xf32>
      %76 = arith.addf %72, %75 : vector<1x1024xf32>
      %c0_42 = arith.constant 0 : index
      %c0_43 = arith.constant 0 : index
      %77 = vector.load %arg17[%c0_42, %c0_43] : memref<1x1024xf32, #tpu.memory_space<vmem>>, vector<1x1024xf32>
      tpu.vector_store %arg17[%c0_42, %c0_43], %76 {strides = array<i32>} : memref<1x1024xf32, #tpu.memory_space<vmem>>, vector<1x1024xf32>,
      %c0_44 = arith.constant 0 : index
      %c0_45 = arith.constant 0 : index
      %c0_46 = arith.constant 0 : index
      %78 = vector.load %arg18[%c0_44, %c0_45, %c0_46] : memref<1x1x1024xf32, #tpu.memory_space<vmem>>, vector<1x1x1024xf32>
      %79 = vector.shape_cast %78 : vector<1x1x1024xf32> to vector<1x1024xf32>
      %cst_47 = arith.constant dense<0xFF800000> : vector<1024xf32>
      %80 = vector.multi_reduction <maximumf>, %66, %cst_47 [0] : vector<16x1024xf32> to vector<1024xf32>
      %81 = vector.shape_cast %80 : vector<1024xf32> to vector<1x1024xf32>
      %82 = arith.maximumf %79, %81 : vector<1x1024xf32>
      %c0_48 = arith.constant 0 : index
      %c0_49 = arith.constant 0 : index
      %c0_50 = arith.constant 0 : index
      %83 = vector.load %arg18[%c0_48, %c0_49, %c0_50] : memref<1x1x1024xf32, #tpu.memory_space<vmem>>, vector<1x1x1024xf32>
      %84 = vector.shape_cast %83 : vector<1x1x1024xf32> to vector<1x1024xf32>
      %85 = vector.shape_cast %82 : vector<1x1024xf32> to vector<1x1x1024xf32>
      tpu.vector_store %arg18[%c0_48, %c0_49, %c0_50], %85 {strides = array<i32>} : memref<1x1x1024xf32, #tpu.memory_space<vmem>>, vector<1x1x1024xf32>,
      %c0_51 = arith.constant 0 : index
      %c0_52 = arith.constant 0 : index
      %c0_53 = arith.constant 0 : index
      %86 = vector.load %arg19[%c0_51, %c0_52, %c0_53] : memref<1x1x1024xf32, #tpu.memory_space<vmem>>, vector<1x1x1024xf32>
      %87 = vector.shape_cast %86 : vector<1x1x1024xf32> to vector<1x1024xf32>
      %cst_54 = arith.constant dense<0x7F800000> : vector<1024xf32>
      %88 = vector.multi_reduction <minimumf>, %66, %cst_54 [0] : vector<16x1024xf32> to vector<1024xf32>
      %89 = vector.shape_cast %88 : vector<1024xf32> to vector<1x1024xf32>
      %90 = arith.minimumf %87, %89 : vector<1x1024xf32>
      %c0_55 = arith.constant 0 : index
      %c0_56 = arith.constant 0 : index
      %c0_57 = arith.constant 0 : index
      %91 = vector.load %arg19[%c0_55, %c0_56, %c0_57] : memref<1x1x1024xf32, #tpu.memory_space<vmem>>, vector<1x1x1024xf32>
      %92 = vector.shape_cast %91 : vector<1x1x1024xf32> to vector<1x1024xf32>
      %93 = vector.shape_cast %90 : vector<1x1024xf32> to vector<1x1x1024xf32>
      tpu.vector_store %arg19[%c0_55, %c0_56, %c0_57], %93 {strides = array<i32>} : memref<1x1x1024xf32, #tpu.memory_space<vmem>>, vector<1x1x1024xf32>,
    } else {
    }
    return
  }
  func.func @transform_0(%arg0: i32, %arg1: i32, %arg2: i32) -> (i32, i32, i32) {
    %c0_i32 = arith.constant 0 : i32
    %c0_i32_0 = arith.constant 0 : i32
    return %arg1, %arg2, %c0_i32 : i32, i32, i32
  }
  func.func @transform_1(%arg0: i32, %arg1: i32, %arg2: i32) -> (i32, i32, i32) {
    %c0_i32 = arith.constant 0 : i32
    %c0_i32_0 = arith.constant 0 : i32
    %c0_i32_1 = arith.constant 0 : i32
    return %arg1, %c0_i32, %c0_i32_0 : i32, i32, i32
  }
  func.func @transform_2(%arg0: i32, %arg1: i32, %arg2: i32) -> (i32, i32) {
    %c0_i32 = arith.constant 0 : i32
    %c0_i32_0 = arith.constant 0 : i32
    %c0_i32_1 = arith.constant 0 : i32
    return %c0_i32, %c0_i32_0 : i32, i32
  }
  func.func @transform_3(%arg0: i32, %arg1: i32, %arg2: i32) -> (i32, i32) {
    %c0_i32 = arith.constant 0 : i32
    %c0_i32_0 = arith.constant 0 : i32
    %c0_i32_1 = arith.constant 0 : i32
    return %c0_i32, %c0_i32_0 : i32, i32
  }
  func.func @transform_4(%arg0: i32, %arg1: i32, %arg2: i32) -> (i32, i32) {
    %c0_i32 = arith.constant 0 : i32
    %c0_i32_0 = arith.constant 0 : i32
    %c0_i32_1 = arith.constant 0 : i32
    return %c0_i32, %c0_i32_0 : i32, i32
  }
  func.func @transform_5(%arg0: i32, %arg1: i32, %arg2: i32) -> (i32, i32) {
    %c0_i32 = arith.constant 0 : i32
    %c0_i32_0 = arith.constant 0 : i32
    %c0_i32_1 = arith.constant 0 : i32
    return %c0_i32, %c0_i32_0 : i32, i32
  }
  func.func @transform_6(%arg0: i32, %arg1: i32, %arg2: i32) -> (i32, i32) {
    %c0_i32 = arith.constant 0 : i32
    %c0_i32_0 = arith.constant 0 : i32
    %c0_i32_1 = arith.constant 0 : i32
    return %c0_i32, %c0_i32_0 : i32, i32
  }
  func.func @transform_7(%arg0: i32, %arg1: i32, %arg2: i32) -> (i32, i32) {
    %c0_i32 = arith.constant 0 : i32
    %c0_i32_0 = arith.constant 0 : i32
    %c0_i32_1 = arith.constant 0 : i32
    return %c0_i32, %c0_i32_0 : i32, i32
  }
  func.func @transform_8(%arg0: i32, %arg1: i32, %arg2: i32) -> (i32, i32) {
    %c0_i32 = arith.constant 0 : i32
    %c0_i32_0 = arith.constant 0 : i32
    %c0_i32_1 = arith.constant 0 : i32
    return %c0_i32, %c0_i32_0 : i32, i32
  }
  func.func @transform_9(%arg0: i32, %arg1: i32, %arg2: i32) -> (i32, i32) {
    %c0_i32 = arith.constant 0 : i32
    %c0_i32_0 = arith.constant 0 : i32
    %c0_i32_1 = arith.constant 0 : i32
    return %c0_i32, %c0_i32_0 : i32, i32
  }
  func.func @transform_10(%arg0: i32, %arg1: i32, %arg2: i32) -> (i32, i32) {
    %c0_i32 = arith.constant 0 : i32
    %c0_i32_0 = arith.constant 0 : i32
    %c0_i32_1 = arith.constant 0 : i32
    return %c0_i32, %c0_i32_0 : i32, i32
  }
  func.func @transform_11(%arg0: i32, %arg1: i32, %arg2: i32) -> (i32, i32) {
    %c0_i32 = arith.constant 0 : i32
    %c0_i32_0 = arith.constant 0 : i32
    %c0_i32_1 = arith.constant 0 : i32
    return %c0_i32, %c0_i32_0 : i32, i32
  }
  func.func @transform_12(%arg0: i32, %arg1: i32, %arg2: i32) -> (i32, i32) {
    %c0_i32 = arith.constant 0 : i32
    %c0_i32_0 = arith.constant 0 : i32
    %c0_i32_1 = arith.constant 0 : i32
    return %c0_i32, %c0_i32_0 : i32, i32
  }
  func.func @transform_13(%arg0: i32, %arg1: i32, %arg2: i32) -> (i32, i32) {
    %c0_i32 = arith.constant 0 : i32
    %c0_i32_0 = arith.constant 0 : i32
    %c0_i32_1 = arith.constant 0 : i32
    return %c0_i32, %c0_i32_0 : i32, i32
  }
  func.func @transform_14(%arg0: i32, %arg1: i32, %arg2: i32) -> (i32, i32) {
    %c0_i32 = arith.constant 0 : i32
    %c0_i32_0 = arith.constant 0 : i32
    %c0_i32_1 = arith.constant 0 : i32
    return %c0_i32, %c0_i32_0 : i32, i32
  }
  func.func @transform_15(%arg0: i32, %arg1: i32, %arg2: i32) -> (i32, i32, i32) {
    %c0_i32 = arith.constant 0 : i32
    %c0_i32_0 = arith.constant 0 : i32
    %c0_i32_1 = arith.constant 0 : i32
    return %arg1, %c0_i32, %c0_i32_0 : i32, i32, i32
  }
  func.func @transform_16(%arg0: i32, %arg1: i32, %arg2: i32) -> (i32, i32, i32) {
    %c0_i32 = arith.constant 0 : i32
    %c0_i32_0 = arith.constant 0 : i32
    %c0_i32_1 = arith.constant 0 : i32
    return %arg1, %c0_i32, %c0_i32_0 : i32, i32, i32
  }
}

module attributes {stable_mosaic.version = 11 : i64} {
  func.func @_apply_kernel(%arg0: i32, %arg1: i32, %arg2: memref<1x16x3xf32, #tpu.memory_space<vmem>>, %arg3: memref<1x3x64xf32, #tpu.memory_space<vmem>>, %arg4: memref<1x64xf32, #tpu.memory_space<vmem>>, %arg5: memref<1x1x1024xf32, #tpu.memory_space<vmem>>, %arg6: memref<1x16x1088xf32, #tpu.memory_space<vmem>>) attributes {dimension_semantics = [#tpu.dimension_semantics<parallel>, #tpu.dimension_semantics<parallel>], iteration_bounds = array<i64: 2, 1>, scalar_prefetch = 0 : i64, scratch_operands = 0 : i64, tpu.core_type = #tpu.core_type<tc>, window_params = [{transform_indices = @transform_0, window_bounds = array<i64: 1, 16, 3>}, {transform_indices = @transform_1, window_bounds = array<i64: 1, 3, 64>}, {pipeline_mode = #tpu.pipeline_mode<synchronous>, transform_indices = @transform_2, window_bounds = array<i64: 1, 64>}, {transform_indices = @transform_3, window_bounds = array<i64: 1, 1, 1024>}, {transform_indices = @transform_4, window_bounds = array<i64: 1, 16, 1088>}]} {
    %c0 = arith.constant 0 : index
    %c0_0 = arith.constant 0 : index
    %c0_1 = arith.constant 0 : index
    %0 = vector.load %arg2[%c0, %c0_0, %c0_1] : memref<1x16x3xf32, #tpu.memory_space<vmem>>, vector<1x16x3xf32>
    %1 = vector.shape_cast %0 : vector<1x16x3xf32> to vector<16x3xf32>
    %c0_2 = arith.constant 0 : index
    %c0_3 = arith.constant 0 : index
    %c0_4 = arith.constant 0 : index
    %2 = vector.load %arg3[%c0_2, %c0_3, %c0_4] : memref<1x3x64xf32, #tpu.memory_space<vmem>>, vector<1x3x64xf32>
    %3 = vector.shape_cast %2 : vector<1x3x64xf32> to vector<3x64xf32>
    %c0_5 = arith.constant 0 : index
    %c0_6 = arith.constant 0 : index
    %4 = vector.load %arg4[%c0_5, %c0_6] : memref<1x64xf32, #tpu.memory_space<vmem>>, vector<1x64xf32>
    %5 = vector.extract_strided_slice %1 {offsets = [0, 0], sizes = [16, 1], strides = [1, 1]} : vector<16x3xf32> to vector<16x1xf32>
    %6 = vector.extract_strided_slice %3 {offsets = [0, 0], sizes = [1, 64], strides = [1, 1]} : vector<3x64xf32> to vector<1x64xf32>
    %7 = vector.broadcast %5 : vector<16x1xf32> to vector<16x64xf32>
    %8 = vector.broadcast %6 : vector<1x64xf32> to vector<16x64xf32>
    %9 = arith.mulf %7, %8 : vector<16x64xf32>
    %10 = vector.extract_strided_slice %1 {offsets = [0, 1], sizes = [16, 1], strides = [1, 1]} : vector<16x3xf32> to vector<16x1xf32>
    %11 = vector.extract_strided_slice %3 {offsets = [1, 0], sizes = [1, 64], strides = [1, 1]} : vector<3x64xf32> to vector<1x64xf32>
    %12 = vector.broadcast %10 : vector<16x1xf32> to vector<16x64xf32>
    %13 = vector.broadcast %11 : vector<1x64xf32> to vector<16x64xf32>
    %14 = arith.mulf %12, %13 : vector<16x64xf32>
    %15 = arith.addf %9, %14 : vector<16x64xf32>
    %16 = vector.extract_strided_slice %1 {offsets = [0, 2], sizes = [16, 1], strides = [1, 1]} : vector<16x3xf32> to vector<16x1xf32>
    %17 = vector.extract_strided_slice %3 {offsets = [2, 0], sizes = [1, 64], strides = [1, 1]} : vector<3x64xf32> to vector<1x64xf32>
    %18 = vector.broadcast %16 : vector<16x1xf32> to vector<16x64xf32>
    %19 = vector.broadcast %17 : vector<1x64xf32> to vector<16x64xf32>
    %20 = arith.mulf %18, %19 : vector<16x64xf32>
    %21 = arith.addf %15, %20 : vector<16x64xf32>
    %22 = vector.broadcast %4 : vector<1x64xf32> to vector<16x64xf32>
    %23 = arith.addf %21, %22 : vector<16x64xf32>
    %cst = arith.constant 0.000000e+00 : f32
    %24 = vector.broadcast %cst : f32 to vector<16x64xf32>
    %25 = arith.maximumf %23, %24 : vector<16x64xf32>
    %c0_7 = arith.constant 0 : index
    %c0_8 = arith.constant 0 : index
    %c0_9 = arith.constant 0 : index
    %26 = vector.load %arg5[%c0_7, %c0_8, %c0_9] : memref<1x1x1024xf32, #tpu.memory_space<vmem>>, vector<1x1x1024xf32>
    %27 = vector.shape_cast %26 : vector<1x1x1024xf32> to vector<1x1024xf32>
    %28 = vector.shape_cast %27 : vector<1x1024xf32> to vector<1x1024xf32>
    %29 = vector.broadcast %28 : vector<1x1024xf32> to vector<16x1024xf32>
    %c0_10 = arith.constant 0 : index
    %c0_11 = arith.constant 0 : index
    %c0_12 = arith.constant 0 : index
    %30 = vector.load %arg6[%c0_10, %c0_11, %c0_12] : memref<1x16x1088xf32, #tpu.memory_space<vmem>>, vector<1x16x1024xf32>
    %31 = vector.shape_cast %30 : vector<1x16x1024xf32> to vector<16x1024xf32>
    %32 = vector.shape_cast %29 : vector<16x1024xf32> to vector<1x16x1024xf32>
    tpu.vector_store %arg6[%c0_10, %c0_11, %c0_12], %32 {strides = array<i32>} : memref<1x16x1088xf32, #tpu.memory_space<vmem>>, vector<1x16x1024xf32>,
    %c0_13 = arith.constant 0 : index
    %c0_14 = arith.constant 0 : index
    %c1024 = arith.constant 1024 : index
    %33 = vector.load %arg6[%c0_13, %c0_14, %c1024] : memref<1x16x1088xf32, #tpu.memory_space<vmem>>, vector<1x16x64xf32>
    %34 = vector.shape_cast %33 : vector<1x16x64xf32> to vector<16x64xf32>
    %35 = vector.shape_cast %25 : vector<16x64xf32> to vector<1x16x64xf32>
    tpu.vector_store %arg6[%c0_13, %c0_14, %c1024], %35 {strides = array<i32>} : memref<1x16x1088xf32, #tpu.memory_space<vmem>>, vector<1x16x64xf32>,
    return
  }
  func.func @transform_0(%arg0: i32, %arg1: i32) -> (i32, i32, i32) {
    %c0_i32 = arith.constant 0 : i32
    %c0_i32_0 = arith.constant 0 : i32
    return %arg0, %arg1, %c0_i32 : i32, i32, i32
  }
  func.func @transform_1(%arg0: i32, %arg1: i32) -> (i32, i32, i32) {
    %c0_i32 = arith.constant 0 : i32
    %c0_i32_0 = arith.constant 0 : i32
    %c0_i32_1 = arith.constant 0 : i32
    return %arg0, %c0_i32, %c0_i32_0 : i32, i32, i32
  }
  func.func @transform_2(%arg0: i32, %arg1: i32) -> (i32, i32) {
    %c0_i32 = arith.constant 0 : i32
    %c0_i32_0 = arith.constant 0 : i32
    %c0_i32_1 = arith.constant 0 : i32
    return %c0_i32, %c0_i32_0 : i32, i32
  }
  func.func @transform_3(%arg0: i32, %arg1: i32) -> (i32, i32, i32) {
    %c0_i32 = arith.constant 0 : i32
    %c0_i32_0 = arith.constant 0 : i32
    %c0_i32_1 = arith.constant 0 : i32
    return %arg0, %c0_i32, %c0_i32_0 : i32, i32, i32
  }
  func.func @transform_4(%arg0: i32, %arg1: i32) -> (i32, i32, i32) {
    %c0_i32 = arith.constant 0 : i32
    %c0_i32_0 = arith.constant 0 : i32
    return %arg0, %arg1, %c0_i32 : i32, i32, i32
  }
}

</mosaic_0001>

<bundles_post_ra>
// kernel: pointnet_base.7
= control target key start
LH: loop header
LB: loop body
LE: loop exit
PB: predicated region body
PF: predicated region fallthrough
CT: control target
= control target key end

     0   :  { %9 = vsyncpa [#allocation3], 0  ;;  %s844_s0 = inlined_call_operand.vmem [shape: f32[2,16,3], index: 0, kind: input, shape index: {}]   ;;  %s845_s1 = inlined_call_operand.vmem [shape: f32[2,3,64], index: 1, kind: input, shape index: {}]   ;;  %s846_s2 = inlined_call_operand.vmem [shape: f32[1,64], index: 2, kind: input, shape index: {}]   ;;  %s847_s3 = inlined_call_operand.vmem [shape: f32[2,1,1024], index: 3, kind: input, shape index: {}]   ;;  %s848_s4 = inlined_call_operand.hbm [shape: f32[2,16,1088], index: 4, kind: output, shape index: {}]  }
   0x1   :  { %11 = vsyncpa [#allocation3 + $0x1], 0  ;;  %s695_s15 = smov 0   ;;  %s697_s16 = smov 0  }
   0x2   :  { %s699_s17 = smov 0   ;;  %s701_s18 = smov 0  }
   0x3   :  { %s703_s19 = smov 0   ;;  %s705_s20 = smov 0  }
   0x4 LB: > { %s504_s21 = sadd.s32 4294967295, %s662_s20   ;;  %s505_s22 = sadd.s32 4294967294, %s662_s20   ;;  %s662_s20 = sphi %s705_s20, %s17_s20   ;;  %s658_s19 = sphi %s703_s19, %s855_s19   ;;  %s654_s18 = sphi %s701_s18, %s854_s18   ;;  %s650_s17 = sphi %s699_s17, %s853_s17   ;;  %s646_s16 = sphi %s697_s16, %s852_s16   ;;  %s642_s15 = sphi %s695_s15, %s851_s15  }
   0x5   : > { %s29_s23 = sadd.s32 1, %s658_s19  ;;  %s139_s24 = sadd.s32 1, %s650_s17 }
   0x6   : > { %p31_p0 = scmp.ge.s32.totalorder %s29_s23, 2  ;;  %p149_p1 = scmp.ne.s32.totalorder %s650_s17, %s646_s16 }
   0x7   : > { %p150_p2 = scmp.eq.s32.totalorder %s504_s21, 1  ;;  %p155_p3 = scmp.ne.s32.totalorder %s646_s16, %s642_s15 }
   0x8   : > { %s857_s23 = smov (%p31_p0, %s29_s23), 0  ;;  %p156_p5 = scmp.eq.s32.totalorder %s505_s22, 1 }
   0x9   : > { %p735_p4 = por %p150_p2, %p149_p1  ;;  %s134_s26 = ssub.s32 %s658_s19, %s857_s23 }
   0xa   : > { %p508_p6 = scmp.ge.s32.totalorder %s662_s20, 1  ;;  %p137_p7 = scmp.eq.s32.totalorder %s134_s26, 0 }
   0xb   : > { %p742_p8 = por %p156_p5, %p155_p3  ;;  %p204_p9 = scmp.lt.s32.totalorder %s662_s20, 3 }
   0xc   : > { %s748_s28 = scalar_select %p137_p7, %s650_s17, %s139_s24  }
   0xd   : > { %p205_p10 = pnand %p508_p6, %p204_p9 }
   0xe   : > { %p243_p11 = scmp.lt.s32.totalorder (!%p205_p10), %s654_s18, 1  ;;  %v275_v0 = vlaneseq (!%p205_p10)  ;;  %s239_s29 = sand.u32 (!%p205_p10), 1, %s646_s16   ;;  %v664_v1 = vmov (!%p205_p10), 1   ;;  %v665_v2 = vmov (!%p205_p10), 0   ;;  %v666_v25 = vmov (!%p205_p10), 2  }
   0xf   : > { %208 = sbr.rel (%p205_p10) target bundleno = 187 (0xbb), region = 36  ;;  %581 = vset.pattern.permute.xlu1 (!%p205_p10), %v664_v1  ;;  %580 = vset.pattern.permute.xlu0 (!%p205_p10), %v665_v2  ;;  %v513_v41 = vld [vmem:[%s846_s2] ss:$0 sm:$0xff] (!%p205_p10)  ;;  %vm381_vm0 = vcmask (!%p205_p10), 523264   ;;  %s667_s12 = smov (!%p205_p10), [#allocation2]  }
  0x10   : > { %s518_s30 = smul.u32 (!%p205_p10), 144, %s239_s29  ;;  %v276_v3 = vshrl.u32 (!%p205_p10), %v275_v0, 7 }
  0x12   : > { %v339_v4 = vsub.s32 (!%p205_p10), 3, %v276_v3  ;;  %v343_v5 = vsub.s32 (!%p205_p10), 4, %v276_v3  ;;  %v347_v6 = vsub.s32 (!%p205_p10), 5, %v276_v3  ;;  %v351_v7 = vsub.s32 (!%p205_p10), 6, %v276_v3  ;;  %s764_s26 = scalar_lea.vmem (!%p205_p10), [#allocation2], %s518_s30 }
  0x13   : > { %v355_v8 = vsub.s32 (!%p205_p10), 7, %v276_v3  ;;  %v291_v9 = vsub.s32 (!%p205_p10), 1, %v276_v3  ;;  %v277_v10 = vsub.s32 (!%p205_p10), 0, %v276_v3  ;;  %v307_v24 = vsub.s32 (!%p205_p10), 2, %v276_v3 }
  0x16   : > { %s244_s5 = scalar_select %p243_p11, %s654_s18, 1 }
  0x18   : > { %s517_s6 = sshll.u32 %s244_s5, 4  ;;  %s512_s7 = sshll.u32 %s244_s5, 3 }
  0x19   : > { %s250_s10 = scalar_lea.vmem %s844_s0, %s517_s6  ;;  %s259_s13 = scalar_lea.vmem %s847_s3, %s512_s7 }
  0x1a   : > { %v261_v11 = vld [vmem:[%s250_s10] sm:$0xff]  ;;  %s511_s14 = sshll.u32 %s244_s5, 2  ;;  %v262_v18 = vld [vmem:[%s250_s10 + $0x8] sm:$0xff]  ;;  %s519_s6 = smul.u32 2304, %s654_s18 }
  0x1b   : > { %v323_v12 = vld [vmem:[%s259_s13] sm:$0xff]  ;;  %282 = vperm.xlu1 %581, %v261_v11   ;;  %s255_s24 = scalar_lea.vmem %s845_s1, %s511_s14  ;;  %267 = vperm.xlu0 %580, %v261_v11   ;;  %s401_s7 = sshll.u32 %s764_s26, 4  ;;  %s792_s7 = int_to_ptr.vmem [resolvable:$true] %s401_s7 }
  0x1c   : > { %v340_v13 = vrot.slane %v323_v12, %v339_v4  ;;  %v344_v14 = vrot.slane %v323_v12, %v343_v5  ;;  %v348_v15 = vrot.slane %v323_v12, %v347_v6  ;;  %v352_v16 = vrot.slane %v323_v12, %v351_v7  ;;  %v263_v19 = vld [vmem:[%s255_s24] sm:$0x7]  ;;  %s790_s10 = scalar_lea.hbm %s848_s4, %s519_s6  ;;  %s798_s18 = scalar_lea.sflag [#allocation3], %s239_s29 }
  0x1d   : > { %v356_v17 = vrot.slane %v323_v12, %v355_v8  ;;  %v332_v20 = vrot.slane %v323_v12, %v291_v9  ;;  %v328_v21 = vrot.slane %v323_v12, %v277_v10  ;;  %v292_v22 = vrot.slane %v263_v19, %v291_v9  ;;  %s584_s11 = scalar_lea.vmem %s792_s7, 2304  ;;  %s588_s13 = sshll.u32 %s667_s12, 4  ;;  %s589_s13 = int_to_ptr.vmem [resolvable:$false] %s588_s13 }
  0x1e   : > { %368 = vst [vmem:[%s764_s26 + $0x18] sm:$0xff] %v340_v13  ;;  %369 = vst [vmem:[%s764_s26 + $0x20] sm:$0xff] %v344_v14  ;;  %v278_v23 = vrot.slane %v263_v19, %v277_v10  ;;  %v308_v26 = vrot.slane %v263_v19, %v307_v24  ;;  %v336_v27 = vrot.slane %v323_v12, %v307_v24  ;;  %p585_p12 = scmp.ne.s32.totalorder %s792_s7, %s584_s11  ;;  %s590_s14 = scalar_lea.vmem %s589_s13, 4608 }
  0x1f   : > { %370 = vst [vmem:[%s764_s26 + $0x28] sm:$0xff] %v348_v15  ;;  %371 = vst [vmem:[%s764_s26 + $0x30] sm:$0xff] %v352_v16  ;;  %286 = vperm.xlu1 %581, %v262_v18   ;;  %272 = vperm.xlu0 %580, %v262_v18   ;;  %p591_p1 = scmp.lt.s32.totalorder %s792_s7, %s589_s13  ;;  %p592_p2 = scmp.lt.s32.totalorder %s590_s14, %s584_s11 }
  0x20   : > { %376 = vst [vmem:[%s764_s26 + $0x60] sm:$0xff] %v340_v13  ;;  %377 = vst [vmem:[%s764_s26 + $0x68] sm:$0xff] %v344_v14  ;;  %p586_p13 = pnand %p585_p12, %p735_p4 }
  0x21   : > { %378 = vst [vmem:[%s764_s26 + $0x70] sm:$0xff] %v348_v15  ;;  %379 = vst [vmem:[%s764_s26 + $0x78] sm:$0xff] %v352_v16  ;;  %p593_p3 = por %p592_p2, %p591_p1 }
  0x22   : > { %372 = vst [vmem:[%s764_s26 + $0x38] sm:$0xff] %v356_v17  ;;  %380 = vst [vmem:[%s764_s26 + $0x80] sm:$0xff] %v356_v17  ;;  %p587_p0 = pneg %p586_p13 }
  0x23   : > { %366 = vst [vmem:[%s764_s26 + $0x8] sm:$0xff] %v332_v20  ;;  %374 = vst [vmem:[%s764_s26 + $0x50] sm:$0xff] %v332_v20  ;;  %583 = vset.pattern.permute.xlu1 %v666_v25  ;;  %582 = vset.pattern.permute.xlu0 %v666_v25 }
  0x24   : > { %365 = vst [vmem:[%s764_s26] sm:$0xff] %v328_v21  ;;  %373 = vst [vmem:[%s764_s26 + $0x48] sm:$0xff] %v328_v21  ;;  %302 = vperm.xlu1 %583, %v262_v18   ;;  %298 = vperm.xlu0 %582, %v261_v11   ;;  %p594_p5 = pnand %p593_p3, %p587_p0 }
  0x25   : > { %367 = vst [vmem:[%s764_s26 + $0x10] sm:$0xff] %v336_v27  ;;  %375 = vst [vmem:[%s764_s26 + $0x58] sm:$0xff] %v336_v27 }
  0x9a   : > { %v283_v28 = vpop.permute.xlu1 %282  ;;  %v268_v30 = vpop.permute.xlu0 %267 }
  0x9b   : > { %v293_v29 = vmul.f32 %v292_v22, %v283_v28  ;;  %v279_v31 = vmul.f32 %v278_v23, %v268_v30 }
  0x9d   : > { %v295_v32 = vadd.f32 %v293_v29, %v279_v31 }
  0x9e   : > { %v287_v33 = vpop.permute.xlu1 %286  ;;  %v273_v35 = vpop.permute.xlu0 %272 }
  0x9f   : > { %v294_v34 = vmul.f32 %v292_v22, %v287_v33  ;;  %v280_v36 = vmul.f32 %v278_v23, %v273_v35 }
  0xa1   : > { %v296_v37 = vadd.f32 %v294_v34, %v280_v36 }
  0xa3   : > { %v303_v38 = vpop.permute.xlu1 %302  ;;  %v299_v40 = vpop.permute.xlu0 %298 }
  0xa4   : > { %v310_v39 = vmul.f32 %v308_v26, %v303_v38  ;;  %v309_v42 = vmul.f32 %v308_v26, %v299_v40 }
  0xa6   : > { %v312_v43 = vadd.f32 %v310_v39, %v296_v37  ;;  %v311_v44 = vadd.f32 %v309_v42, %v295_v32 }
  0xa8   : > { %v320_v45 = vadd.f32 %v513_v41, %v312_v43  ;;  %v319_v46 = vadd.f32 %v513_v41, %v311_v44 }
  0xaa   : > { %v322_v47 = vmax.f32 %v320_v45, 0.0  ;;  %v321_v48 = vmax.f32 %v319_v46, 0.0 }
  0xac   : > { %383 = vst.msk [vmem:[%s764_s26 + $0x88] sm:$0xff] %vm381_vm0, %v322_v47  ;;  %382 = vst.msk [vmem:[%s764_s26 + $0x40] sm:$0xff] %vm381_vm0, %v321_v48 }
  0xad   : > { %597 = shalt.err (!%p594_p5)
}
  0xae   : > { %s598_s29 = scalar_lea.hbm %s790_s10, 2304  ;;  %s602_s24 = scalar_lea.hbm %s848_s4, 4608 }
  0xaf   : > { %p599_p6 = scmp.ne.s32.totalorder %s790_s10, %s598_s29  ;;  %p603_p10 = scmp.lt.u32.totalorder %s790_s10, %s848_s4 }
  0xb0   : > { %p604_p11 = scmp.lt.u32.totalorder %s602_s24, %s598_s29  ;;  %p606_p13 = scmp.lt.u32.totalorder %s598_s29, %s790_s10 }
  0xb1   : > { %p600_p7 = pnand %p599_p6, %p735_p4 }
  0xb2   : > { %p605_p12 = por %p604_p11, %p603_p10 }
  0xb3   : > { %p601_p9 = pneg %p600_p7 }
  0xb4   : > { %p607_p0 = por %p606_p13, %p605_p12 }
  0xb6   : > { %p608_p1 = pnand %p607_p0, %p601_p9 }
  0xb8   : > { %611 = shalt.err (!%p608_p1)
}
  0xb9   : > { %s668_s5 = smov 1152   ;;  %s669_s6 = smov 72  }
  0xba   : > { %520 = dma.vmem_to_hbm [thread:$0]  (%p735_p4), %s792_s7, 2304, %s790_s10, %s798_s18, %s668_s5, %s668_s5, %s669_s6  }
  0xbb PF: > { %p526_p2 = scmp.ge.s32.totalorder %s662_s20, 2  ;;  %s416_s8 = sand.u32 1, %s642_s15  }
  0xbc   : > { %s417_s9 = scalar_lea.sflag [#allocation3], %s416_s8 }
  0xbd   : > { %p523_p3 = pnand %p526_p2, %p742_p8 }
  0xbf   : > { %637 = dma.done.wait (!%p523_p3), %s417_s9, 2304  }
  0xc0   : > { %639 = vsyncadd (!%p523_p3), %s417_s9, 4294964992  ;;  %s17_s20 = sadd.s32 1, %s662_s20   ;;  %s851_s15 = smov %s646_s16 }
  0xc1   : > { %p14_p5 = scmp.ge.s32.totalorder %s17_s20, 4   ;;  %s852_s16 = smov %s650_s17 }
  0xc2   : > { %s853_s17 = smov %s748_s28  ;;  %s854_s18 = smov %s658_s19 }
  0xc3   : > { %s855_s19 = smov %s857_s23  ;;  %16 = sbr.rel (!%p14_p5) target bundleno = 4 (0x4), region = 77 }
  0xca   :  { %422 = vsyncpa [#allocation3], 1 }
  0xcb   :  { %424 = vsyncpa [#allocation3 + $0x1], 1 }

// kernel: pointnet_base.4
= control target key start
LH: loop header
LB: loop body
LE: loop exit
PB: predicated region body
PF: predicated region fallthrough
CT: control target
= control target key end

     0   :  { %s3900_s0 = inlined_call_operand.vmem [shape: f32[2,16,3], index: 0, kind: input, shape index: {}]   ;;  %s3901_s1 = inlined_call_operand.vmem [shape: f32[2,3,64], index: 1, kind: input, shape index: {}]   ;;  %s3902_s2 = inlined_call_operand.hbm [shape: f32[1,64], index: 2, kind: input, shape index: {}]   ;;  %s3903_s3 = inlined_call_operand.hbm [shape: f32[64,128], index: 3, kind: input, shape index: {}]   ;;  %s3904_s4 = inlined_call_operand.hbm [shape: f32[1,128], index: 4, kind: input, shape index: {}]   ;;  %s3905_s5 = inlined_call_operand.hbm [shape: f32[128,1024], index: 5, kind: input, shape index: {}]   ;;  %s3906_s6 = inlined_call_operand.hbm [shape: f32[1,1024], index: 6, kind: input, shape index: {}]   ;;  %s3907_s7 = inlined_call_operand.hbm [shape: f32[1,64], index: 7, kind: input, shape index: {}]   ;;  %s3908_s8 = inlined_call_operand.hbm [shape: f32[1,64], index: 8, kind: input, shape index: {}]   ;;  %s3909_s9 = inlined_call_operand.hbm [shape: f32[1,128], index: 9, kind: input, shape index: {}]   ;;  %s3910_s10 = inlined_call_operand.hbm [shape: f32[1,128], index: 10, kind: input, shape index: {}]   ;;  %s3911_s11 = inlined_call_operand.hbm [shape: f32[1,64], index: 11, kind: output, shape index: {0}]   ;;  %s3912_s12 = inlined_call_operand.hbm [shape: f32[1,64], index: 12, kind: output, shape index: {1}]   ;;  %s3913_s13 = inlined_call_operand.vmem [shape: f32[1,1024], index: 13, kind: output, shape index: {2}]   ;;  %s3914_s14 = inlined_call_operand.vmem [shape: f32[1,1024], index: 14, kind: output, shape index: {3}]   ;;  %s3915_s15 = inlined_call_operand.vmem [shape: f32[2,1,1024], index: 15, kind: output, shape index: {4}]   ;;  %s3916_s16 = inlined_call_operand.vmem [shape: f32[2,1,1024], index: 16, kind: output, shape index: {5}]  }
   0x1   :  { %3926 = sst [smem:[#allocation35_spill]] %s3900_s0 }
   0x2   :  { %3927 = sst [smem:[#allocation36_spill]] %s3901_s1 }
   0x3   :  { %3928 = sst [smem:[#allocation37_spill]] %s3903_s3 }
   0x4   :  { %3929 = sst [smem:[#allocation38_spill]] %s3911_s11 }
   0x5   :  { %3930 = sst [smem:[#allocation39_spill]] %s3912_s12 }
   0x6   :  { %3931 = sst [smem:[#allocation40_spill]] %s3913_s13 }
   0x7   :  { %3932 = sst [smem:[#allocation41_spill]] %s3914_s14 }
   0x8   :  { %3933 = sst [smem:[#allocation42_spill]] %s3916_s16 }
   0x9   :  { %22 = vsyncpa [#allocation9], 0 }
   0xa   :  { %23 = vsyncpa [#allocation12], 0 }
   0xb   :  { %24 = vsyncpa [#allocation15], 0 }
   0xc   :  { %25 = vsyncpa [#allocation18], 0 }
   0xd   :  { %26 = vsyncpa [#allocation21], 0 }
   0xe   :  { %27 = vsyncpa [#allocation10], 0 }
   0xf   :  { %28 = vsyncpa [#allocation25], 0  ;;  %s3265_s21 = smov 0   ;;  %s3267_s22 = smov 0  }
  0x10   :  { %s3269_s23 = smov 0   ;;  %s3271_s24 = smov 0  }
  0x11   :  { %s3273_s25 = smov 0  }
  0x12 LB: > { %3934 = sst [smem:[#allocation33_spill]] %s3143_s22  ;;  %s3157_s26 = smov [#allocation11]   ;;  %s3155_s25 = sphi %s3273_s25, %s34_s25   ;;  %s3151_s24 = sphi %s3271_s24, %s3964_s24   ;;  %s3147_s23 = sphi %s3269_s23, %s3963_s23   ;;  %s3143_s22 = sphi %s3267_s22, %s3962_s22   ;;  %s3139_s21 = sphi %s3265_s21, %s3961_s21  }
  0x13   : > { %3935 = sst [smem:[#allocation34_spill]] %s3155_s25  ;;  %s460_s27 = sshll.u32 %s3157_s26, 4  ;;  %s3299_s27 = int_to_ptr.vmem [resolvable:$true] %s460_s27 }
  0x14   : > { %s3917_s28 = sadd.s32 4294967295, %s3155_s25   ;;  %p2349_p0 = scmp.ge.s32.totalorder %s3155_s25, 1 }
  0x15   : > { %p437_p1 = scmp.lt.s32.totalorder %s3155_s25, 7  ;;  %p3295_p2 = scmp.eq.s32.totalorder %s3917_s28, 0 }
  0x16   : > { %s3158_s0 = smov [#allocation14]   ;;  %s3159_s19 = smov [#allocation17]  }
  0x17   : > { %s3936_s29 = scalar_select %p3295_p2, 1, 0 }
  0x18   : > { %p3301_p3 = pnand %p2349_p0, %p437_p1  ;;  %s484_s17 = sshll.u32 %s3158_s0, 4  ;;  %s3307_s17 = int_to_ptr.vmem [resolvable:$true] %s484_s17 }
  0x19   : > { %s3315_s20 = sshll.u32 %s3159_s19, 4  ;;  %s3939_s3 = sld [smem:[#allocation37_spill]]  ;;  %s510_s20 = int_to_ptr.vmem [resolvable:$true] %s3315_s20 }
  0x1a   : > { %s3937_s30 = scalar_select %p3301_p3, 1, 0 }
  0x1b   : > { %p2662_p4 = pneg %p3301_p3 }
  0x1d   : > { %p3311_p5 = pnand %p3295_p2, %p2662_p4 }
  0x1f   : > { %s2785_s12 = scalar_lea.hbm %s3939_s3, 1024  ;;  %p3325_p7 = pneg %p3311_p5 }
  0x20   : > { %p2786_p6 = scmp.ne.s32.totalorder %s3939_s3, %s2785_s12  ;;  %p2792_p10 = scmp.lt.u32.totalorder %s2785_s12, %s3939_s3 }
  0x22   : > { %p2788_p8 = pnand %p3325_p7, %p2786_p6 }
  0x24   : > { %p2789_p9 = pneg %p2788_p8 }
  0x26   : > { %p2794_p11 = pnand %p2792_p10, %p2789_p9 }
  0x28   : > { %2797 = shalt.err (!%p2794_p11)
}
  0x29   : > { %s2798_s11 = scalar_lea.vmem %s3299_s27, 1024  ;;  %p2806_p1 = scmp.lt.s32.totalorder %s3299_s27, %s3299_s27 }
  0x2a   : > { %p2799_p12 = scmp.ne.s32.totalorder %s3299_s27, %s2798_s11  ;;  %p2807_p4 = scmp.lt.s32.totalorder %s2798_s11, %s2798_s11 }
  0x2c   : > { %p2801_p13 = pnand %p2799_p12, %p3325_p7  ;;  %p2808_p6 = por %p2807_p4, %p2806_p1 }
  0x2e   : > { %p2802_p0 = pneg %p2801_p13 }
  0x30   : > { %p2809_p8 = pnand %p2808_p6, %p2802_p0 }
  0x32   : > { %2812 = shalt.err (!%p2809_p8)
}
  0x33   : > { %s3160_s25 = smov 128   ;;  %s3161_s12 = smov 8  }
  0x34   : > { %2668 = dma.hbm_to_vmem [thread:$0]  (!%p3311_p5), %s3939_s3, 1024, %s3299_s27, [#allocation12], %s3160_s25, %s3160_s25, %s3161_s12  }
  0x35   : > { %s2813_s13 = scalar_lea.hbm %s3905_s5, 16384 }
  0x36   : > { %p2814_p9 = scmp.ne.s32.totalorder %s3905_s5, %s2813_s13  ;;  %p2820_p12 = scmp.lt.u32.totalorder %s2813_s13, %s3905_s5 }
  0x38   : > { %p2816_p10 = pnand %p2814_p9, %p3325_p7 }
  0x3a   : > { %p2817_p11 = pneg %p2816_p10 }
  0x3c   : > { %p2822_p13 = pnand %p2820_p12, %p2817_p11 }
  0x3e   : > { %2825 = shalt.err (!%p2822_p13)
}
  0x3f   : > { %s2826_s27 = scalar_lea.vmem %s3307_s17, 16384  ;;  %p2834_p6 = scmp.lt.s32.totalorder %s3307_s17, %s3307_s17 }
  0x40   : > { %p2827_p0 = scmp.ne.s32.totalorder %s3307_s17, %s2826_s27  ;;  %p2835_p8 = scmp.lt.s32.totalorder %s2826_s27, %s2826_s27 }
  0x42   : > { %p2829_p1 = pnand %p2827_p0, %p3325_p7  ;;  %p2836_p9 = por %p2835_p8, %p2834_p6 }
  0x44   : > { %p2830_p4 = pneg %p2829_p1 }
  0x46   : > { %p2837_p10 = pnand %p2836_p9, %p2830_p4 }
  0x48   : > { %2840 = shalt.err (!%p2837_p10)
}
  0x49   : > { %s3162_s1 = smov 1024   ;;  %s3163_s13 = smov 64  }
  0x4a   : > { %2674 = dma.hbm_to_vmem [thread:$0]  (!%p3311_p5), %s3905_s5, 16384, %s3307_s17, [#allocation15], %s3162_s1, %s3162_s1, %s3163_s13  }
  0x4b   : > { %s3164_s25 = smov [#allocation20]   ;;  %s2841_s26 = scalar_lea.hbm %s3907_s7, 16 }
  0x4c   : > { %s531_s12 = sshll.u32 %s3164_s25, 4  ;;  %p2842_p11 = scmp.ne.s32.totalorder %s3907_s7, %s2841_s26  ;;  %s532_s12 = int_to_ptr.vmem [resolvable:$true] %s531_s12 }
  0x4d   : > { %p2848_p0 = scmp.lt.u32.totalorder %s2841_s26, %s3907_s7 }
  0x4e   : > { %p2844_p12 = pnand %p2842_p11, %p3325_p7 }
  0x50   : > { %p2845_p13 = pneg %p2844_p12 }
  0x52   : > { %p2850_p1 = pnand %p2848_p0, %p2845_p13 }
  0x54   : > { %2853 = shalt.err (!%p2850_p1)
}
  0x55   : > { %s2854_s17 = scalar_lea.vmem %s510_s20, 16  ;;  %s2861_s1 = scalar_lea.vmem %s510_s20, 32 }
  0x56   : > { %p2855_p4 = scmp.ne.s32.totalorder %s510_s20, %s2854_s17  ;;  %p2862_p9 = scmp.lt.s32.totalorder %s510_s20, %s510_s20 }
  0x57   : > { %p2863_p10 = scmp.lt.s32.totalorder %s2861_s1, %s2854_s17 }
  0x58   : > { %p2857_p6 = pnand %p2855_p4, %p3325_p7 }
  0x59   : > { %p2864_p2 = por %p2863_p10, %p2862_p9 }
  0x5a   : > { %p2858_p8 = pneg %p2857_p6 }
  0x5c   : > { %p2865_p3 = pnand %p2864_p2, %p2858_p8 }
  0x5e   : > { %2868 = shalt.err (!%p2865_p3)
}
  0x5f   : > { %2680 = dma.hbm_to_vmem [thread:$0]  (!%p3311_p5), %s3907_s7, 16, %s510_s20, [#allocation18]  }
  0x60   : > { %s2869_s25 = scalar_lea.hbm %s3909_s9, 16 }
  0x61   : > { %p2870_p11 = scmp.ne.s32.totalorder %s3909_s9, %s2869_s25  ;;  %p2876_p3 = scmp.lt.u32.totalorder %s2869_s25, %s3909_s9 }
  0x63   : > { %p2872_p12 = pnand %p2870_p11, %p3325_p7 }
  0x65   : > { %p2873_p2 = pneg %p2872_p12 }
  0x67   : > { %p2878_p13 = pnand %p2876_p3, %p2873_p2 }
  0x69   : > { %2881 = shalt.err (!%p2878_p13)
}
  0x6a   : > { %s2882_s11 = scalar_lea.vmem %s532_s12, 16  ;;  %s2889_s20 = scalar_lea.vmem %s532_s12, 32 }
  0x6b   : > { %p2883_p0 = scmp.ne.s32.totalorder %s532_s12, %s2882_s11  ;;  %p2890_p6 = scmp.lt.s32.totalorder %s532_s12, %s532_s12 }
  0x6c   : > { %p2891_p8 = scmp.lt.s32.totalorder %s2889_s20, %s2882_s11 }
  0x6d   : > { %p2885_p1 = pnand %p2883_p0, %p3325_p7 }
  0x6e   : > { %p2892_p9 = por %p2891_p8, %p2890_p6 }
  0x6f   : > { %p2886_p4 = pneg %p2885_p1 }
  0x71   : > { %p2893_p10 = pnand %p2892_p9, %p2886_p4 }
  0x73   : > { %2896 = shalt.err (!%p2893_p10)
}
  0x74   : > { %2686 = dma.hbm_to_vmem [thread:$0]  (!%p3311_p5), %s3909_s9, 16, %s532_s12, [#allocation21]  }
  0x75   : > { %s49_s1 = sadd.s32 1, %s3147_s23  ;;  %s53_s13 = sadd.s32 1, %s3151_s24 }
  0x76   : > { %p51_p11 = scmp.ge.s32.totalorder %s49_s1, 2  ;;  %s3165_s16 = smov [#allocation8]  }
  0x77   : > { %s450_s3 = sshll.u32 %s3165_s16, 4  ;;  %s3166_s22 = smov [#allocation13]   ;;  %s451_s3 = int_to_ptr.vmem [resolvable:$true] %s450_s3 }
  0x78   : > { %s3966_s1 = smov (%p51_p11, %s49_s1), 0  ;;  %s3968_s13 = smov (!%p51_p11, %s53_s13), %s3151_s24 }
  0x79   : > { %s474_s25 = sshll.u32 %s3166_s22, 4  ;;  %s2897_s26 = scalar_lea.hbm %s3902_s2, 16  ;;  %s475_s25 = int_to_ptr.vmem [resolvable:$true] %s474_s25 }
  0x7a   : > { %p2898_p2 = scmp.ne.s32.totalorder %s3902_s2, %s2897_s26  ;;  %p2904_p0 = scmp.lt.u32.totalorder %s2897_s26, %s3902_s2 }
  0x7c   : > { %p2900_p3 = pnand %p2898_p2, %p3325_p7 }
  0x7e   : > { %p2901_p13 = pneg %p2900_p3 }
  0x80   : > { %p2906_p1 = pnand %p2904_p0, %p2901_p13 }
  0x82   : > { %2909 = shalt.err (!%p2906_p1)
}
  0x83   : > { %s2910_s27 = scalar_lea.vmem %s451_s3, 16  ;;  %s2917_s17 = scalar_lea.vmem %s451_s3, 32 }
  0x84   : > { %p2911_p4 = scmp.ne.s32.totalorder %s451_s3, %s2910_s27  ;;  %p2918_p9 = scmp.lt.s32.totalorder %s451_s3, %s451_s3 }
  0x85   : > { %p2919_p10 = scmp.lt.s32.totalorder %s2917_s17, %s2910_s27 }
  0x86   : > { %p2913_p6 = pnand %p2911_p4, %p3325_p7 }
  0x87   : > { %p2920_p11 = por %p2919_p10, %p2918_p9 }
  0x88   : > { %p2914_p8 = pneg %p2913_p6 }
  0x8a   : > { %p2921_p12 = pnand %p2920_p11, %p2914_p8 }
  0x8c   : > { %2924 = shalt.err (!%p2921_p12)
}
  0x8d   : > { %2665 = dma.hbm_to_vmem [thread:$0]  (!%p3311_p5), %s3902_s2, 16, %s451_s3, [#allocation9]  }
  0x8e   : > { %p3941_p2 = scmp.ge.s32.totalorder %s3968_s13, 3  ;;  %s2925_s26 = scalar_lea.hbm %s3904_s4, 16 }
  0x8f   : > { %p2926_p3 = scmp.ne.s32.totalorder %s3904_s4, %s2925_s26  ;;  %p2932_p0 = scmp.lt.u32.totalorder %s2925_s26, %s3904_s4 }
  0x90   : > { %s3970_s13 = smov (%p3941_p2, %s3968_s13), 0 }
  0x91   : > { %p2928_p12 = pnand %p2926_p3, %p3325_p7 }
  0x93   : > { %p2929_p13 = pneg %p2928_p12 }
  0x95   : > { %p2934_p1 = pnand %p2932_p0, %p2929_p13 }
  0x97   : > { %2937 = shalt.err (!%p2934_p1)
}
  0x98   : > { %s2938_s3 = scalar_lea.vmem %s475_s25, 16  ;;  %s2945_s27 = scalar_lea.vmem %s475_s25, 32 }
  0x99   : > { %p2939_p4 = scmp.ne.s32.totalorder %s475_s25, %s2938_s3  ;;  %p2946_p9 = scmp.lt.s32.totalorder %s475_s25, %s475_s25 }
  0x9a   : > { %p2947_p10 = scmp.lt.s32.totalorder %s2945_s27, %s2938_s3 }
  0x9b   : > { %p2941_p6 = pnand %p2939_p4, %p3325_p7 }
  0x9c   : > { %p2948_p11 = por %p2947_p10, %p2946_p9 }
  0x9d   : > { %p2942_p8 = pneg %p2941_p6 }
  0x9f   : > { %p2949_p2 = pnand %p2948_p11, %p2942_p8 }
  0xa1   : > { %2952 = shalt.err (!%p2949_p2)
}
  0xa2   : > { %2671 = dma.hbm_to_vmem [thread:$0]  (!%p3311_p5), %s3904_s4, 16, %s475_s25, [#allocation12]  }
  0xa3   : > { %s3167_s22 = smov [#allocation16]   ;;  %s3168_s28 = smov [#allocation19]  }
  0xa4   : > { %s498_s14 = sshll.u32 %s3167_s22, 4  ;;  %s520_s26 = sshll.u32 %s3168_s28, 4  ;;  %s499_s14 = int_to_ptr.vmem [resolvable:$true] %s498_s14  ;;  %s521_s26 = int_to_ptr.vmem [resolvable:$true] %s520_s26 }
  0xa5   : > { %s2953_s12 = scalar_lea.hbm %s3906_s6, 128 }
  0xa6   : > { %p2954_p3 = scmp.ne.s32.totalorder %s3906_s6, %s2953_s12  ;;  %p2960_p0 = scmp.lt.u32.totalorder %s2953_s12, %s3906_s6 }
  0xa8   : > { %p2956_p12 = pnand %p2954_p3, %p3325_p7 }
  0xaa   : > { %p2957_p13 = pneg %p2956_p12 }
  0xac   : > { %p2962_p1 = pnand %p2960_p0, %p2957_p13 }
  0xae   : > { %2965 = shalt.err (!%p2962_p1)
}
  0xaf   : > { %s2966_s25 = scalar_lea.vmem %s499_s14, 128  ;;  %p2974_p9 = scmp.lt.s32.totalorder %s499_s14, %s499_s14 }
  0xb0   : > { %p2967_p4 = scmp.ne.s32.totalorder %s499_s14, %s2966_s25  ;;  %p2975_p10 = scmp.lt.s32.totalorder %s2966_s25, %s2966_s25 }
  0xb2   : > { %p2969_p6 = pnand %p2967_p4, %p3325_p7  ;;  %p2976_p11 = por %p2975_p10, %p2974_p9 }
  0xb4   : > { %p2970_p8 = pneg %p2969_p6 }
  0xb6   : > { %p2977_p2 = pnand %p2976_p11, %p2970_p8 }
  0xb8   : > { %2980 = shalt.err (!%p2977_p2)
}
  0xb9   : > { %2677 = dma.hbm_to_vmem [thread:$0]  (!%p3311_p5), %s3906_s6, 128, %s499_s14, [#allocation15]  }
  0xba   : > { %s2981_s11 = scalar_lea.hbm %s3908_s8, 16 }
  0xbb   : > { %p2982_p3 = scmp.ne.s32.totalorder %s3908_s8, %s2981_s11  ;;  %p2988_p0 = scmp.lt.u32.totalorder %s2981_s11, %s3908_s8 }
  0xbd   : > { %p2984_p12 = pnand %p2982_p3, %p3325_p7 }
  0xbf   : > { %p2985_p13 = pneg %p2984_p12 }
  0xc1   : > { %p2990_p1 = pnand %p2988_p0, %p2985_p13 }
  0xc3   : > { %2993 = shalt.err (!%p2990_p1)
}
  0xc4   : > { %s2994_s17 = scalar_lea.vmem %s521_s26, 16  ;;  %s3001_s14 = scalar_lea.vmem %s521_s26, 32 }
  0xc5   : > { %p2995_p4 = scmp.ne.s32.totalorder %s521_s26, %s2994_s17  ;;  %p3002_p9 = scmp.lt.s32.totalorder %s521_s26, %s521_s26 }
  0xc6   : > { %p3003_p10 = scmp.lt.s32.totalorder %s3001_s14, %s2994_s17 }
  0xc7   : > { %p2997_p6 = pnand %p2995_p4, %p3325_p7 }
  0xc8   : > { %p3004_p11 = por %p3003_p10, %p3002_p9 }
  0xc9   : > { %p2998_p8 = pneg %p2997_p6 }
  0xcb   : > { %p3005_p2 = pnand %p3004_p11, %p2998_p8 }
  0xcd   : > { %3008 = shalt.err (!%p3005_p2)
}
  0xce   : > { %2683 = dma.hbm_to_vmem [thread:$0]  (!%p3311_p5), %s3908_s8, 16, %s521_s26, [#allocation18]  }
  0xcf   : > { %s3169_s22 = smov [#allocation22]   ;;  %s3009_s12 = scalar_lea.hbm %s3910_s10, 16 }
  0xd0   : > { %s542_s28 = sshll.u32 %s3169_s22, 4  ;;  %p3010_p3 = scmp.ne.s32.totalorder %s3910_s10, %s3009_s12  ;;  %s543_s28 = int_to_ptr.vmem [resolvable:$true] %s542_s28 }
  0xd1   : > { %p3016_p0 = scmp.lt.u32.totalorder %s3009_s12, %s3910_s10 }
  0xd2   : > { %p3012_p12 = pnand %p3010_p3, %p3325_p7 }
  0xd4   : > { %p3013_p13 = pneg %p3012_p12 }
  0xd6   : > { %p3018_p1 = pnand %p3016_p0, %p3013_p13 }
  0xd8   : > { %3021 = shalt.err (!%p3018_p1)
}
  0xd9   : > { %s3022_s26 = scalar_lea.vmem %s543_s28, 16  ;;  %s3029_s14 = scalar_lea.vmem %s543_s28, 32 }
  0xda   : > { %p3023_p4 = scmp.ne.s32.totalorder %s543_s28, %s3022_s26  ;;  %p3030_p9 = scmp.lt.s32.totalorder %s543_s28, %s543_s28 }
  0xdb   : > { %p3031_p10 = scmp.lt.s32.totalorder %s3029_s14, %s3022_s26 }
  0xdc   : > { %p3025_p6 = pnand %p3023_p4, %p3325_p7 }
  0xdd   : > { %p3032_p11 = por %p3031_p10, %p3030_p9 }
  0xde   : > { %p3026_p8 = pneg %p3025_p6 }
  0xe0   : > { %p3033_p2 = pnand %p3032_p11, %p3026_p8 }
  0xe2   : > { %3036 = shalt.err (!%p3033_p2)
}
  0xe3   : > { %2689 = dma.hbm_to_vmem [thread:$0]  (!%p3311_p5), %s3910_s10, 16, %s543_s28, [#allocation21]  }
  0xe4   : > { %p3942_p3 = scmp.ne.s32.totalorder %s3937_s30, 0 }
  0xe5   : > { %p3943_p12 = scmp.ne.s32.totalorder (!%p3942_p3), %s3936_s29, 0 }
  0xe6   : > { %575 = sbr.rel (%p3942_p3) target bundleno = 1375 (0x55f), region = 64 }
  0xed   : > { %3110 = dma.done.wait (%p3943_p12), [#allocation9], 16  }
  0xee   : > { %3112 = vsyncadd (%p3943_p12), [#allocation9], 4294967280 }
  0xef   : > { %3114 = dma.done.wait (%p3943_p12), [#allocation12], 1040  }
  0xf0   : > { %3116 = vsyncadd (%p3943_p12), [#allocation12], 4294966256 }
  0xf1   : > { %3118 = dma.done.wait (%p3943_p12), [#allocation15], 16512  }
  0xf2   : > { %3120 = vsyncadd (%p3943_p12), [#allocation15], 4294950784 }
  0xf3   : > { %3122 = dma.done.wait (%p3943_p12), [#allocation18], 32  }
  0xf4   : > { %3124 = vsyncadd (%p3943_p12), [#allocation18], 4294967264 }
  0xf5   : > { %3126 = dma.done.wait (%p3943_p12), [#allocation21], 32  }
  0xf6   : > { %3128 = vsyncadd (%p3943_p12), [#allocation21], 4294967264  ;;  %p669_p5 = scmp.lt.s32.totalorder %s3139_s21, 1  ;;  %v3170_v0 = vmov 1   ;;  %v3171_v1 = vmov 0   ;;  %s3944_s19 = sld [smem:[#allocation35_spill]]  ;;  %v708_v5 = vlaneseq }
  0xf7   : > { %2778 = vset.pattern.permute.xlu1 %v3170_v0  ;;  %2777 = vset.pattern.permute.xlu0 %v3171_v1  ;;  %s3945_s17 = sld [smem:[#allocation42_spill]]  ;;  %v3172_v4 = vmov 2   ;;  %p690_p7 = scmp.eq.s32.totalorder %s3139_s21, 0  ;;  %v2376_v28 = vld [vmem:[#allocation8] ss:$0 sm:$0xff] }
  0xf8   : > { %s670_s30 = scalar_select %p669_p5, %s3139_s21, 1  ;;  %v3542_v6 = vshrl.u32 %v708_v5, 7 }
  0xfa   : > { %s2398_s18 = sshll.u32 %s670_s30, 4  ;;  %s2373_s0 = sshll.u32 %s670_s30, 3  ;;  %v724_v7 = vsub.s32 1, %v3542_v6  ;;  %v710_v8 = vsub.s32 0, %v3542_v6  ;;  %v740_v12 = vsub.s32 2, %v3542_v6 }
  0xfb   : > { %s3534_s29 = scalar_lea.vmem %s3915_s15, %s2373_s0  ;;  %s2372_s14 = sshll.u32 %s670_s30, 2 }
  0xfc   : > { %s676_s11 = scalar_lea.vmem %s3944_s19, %s2398_s18  ;;  %s3946_s18 = sld [smem:[#allocation36_spill]] }
  0xfd   : > { %s3539_s26 = scalar_lea.vmem %s3945_s17, %s2373_s0  ;;  %v694_v2 = vld [vmem:[%s676_s11] sm:$0xff]  ;;  %v695_v3 = vld [vmem:[%s676_s11 + $0x8] sm:$0xff]  ;;  %s3947_s30 = sld [smem:[#allocation33_spill]] }
  0xfe   : > { %715 = vperm.xlu1 %2778, %v694_v2   ;;  %700 = vperm.xlu0 %2777, %v694_v2  }
 0x102   : > { %719 = vperm.xlu1 %2778, %v695_v3   ;;  %705 = vperm.xlu0 %2777, %v695_v3   ;;  %s681_s0 = scalar_lea.vmem %s3946_s18, %s2372_s14 }
 0x103   : > { %v696_v9 = vld [vmem:[%s681_s0] sm:$0x7]  ;;  %p2377_p13 = scmp.ne.s32.totalorder %s3947_s30, 0 }
 0x104   : > { %v725_v13 = vrot.slane %v696_v9, %v724_v7  ;;  %v711_v14 = vrot.slane %v696_v9, %v710_v8  ;;  %v741_v17 = vrot.slane %v696_v9, %v740_v12 }
 0x106   : > { %2780 = vset.pattern.permute.xlu1 %v3172_v4  ;;  %2779 = vset.pattern.permute.xlu0 %v3172_v4 }
 0x107   : > { %735 = vperm.xlu1 %2780, %v695_v3   ;;  %731 = vperm.xlu0 %2779, %v694_v2  }
 0x17d   : > { %v716_v10 = vpop.permute.xlu1 %715  ;;  %v701_v11 = vpop.permute.xlu0 %700 }
 0x17e   : > { %v726_v18 = vmul.f32 %v725_v13, %v716_v10  ;;  %v712_v19 = vmul.f32 %v711_v14, %v701_v11 }
 0x180   : > { %v728_v24 = vadd.f32 %v726_v18, %v712_v19 }
 0x181   : > { %v720_v15 = vpop.permute.xlu1 %719  ;;  %v706_v16 = vpop.permute.xlu0 %705 }
 0x182   : > { %v727_v20 = vmul.f32 %v725_v13, %v720_v15  ;;  %v713_v21 = vmul.f32 %v711_v14, %v706_v16 }
 0x184   : > { %v729_v25 = vadd.f32 %v727_v20, %v713_v21 }
 0x185   : > { %757 = sbr.rel (%p2377_p13) target bundleno = 423 (0x1a7), region = 104 }
 0x186   : > { %v736_v22 = vpop.permute.xlu1 %735  ;;  %v732_v23 = vpop.permute.xlu0 %731 }
 0x187   : > { %v743_v26 = vmul.f32 %v741_v17, %v736_v22  ;;  %v742_v27 = vmul.f32 %v741_v17, %v732_v23 }
 0x189   : > { %v745_v29 = vadd.f32 %v743_v26, %v729_v25  ;;  %v744_v30 = vadd.f32 %v742_v27, %v728_v24 }
 0x18b   : > { %v3556_v31 = vadd.f32 %v2376_v28, %v745_v29  ;;  %v3558_v32 = vadd.f32 %v2376_v28, %v744_v30 }
 0x18c   : > { %759 = sbr.rel (!%p690_p7) target bundleno = 403 (0x193), region = 108  ;;  %vm760_vm0 = vcmask (%p690_p7), 516096   ;;  %v3173_v33 = vmov (%p690_p7), 0.0  }
 0x18d   : > { %761 = vst.msk [vmem:[#allocation2] sm:$0x1] (%p690_p7), %vm760_vm0, %v3173_v33  ;;  %762 = vst.msk [vmem:[#allocation3] sm:$0x1] (%p690_p7), %vm760_vm0, %v3173_v33 }
 0x193 PF: > { %vm764_vm1 = vcmask 523264   ;;  %v778_v34 = vmul.f32 %v3558_v32, %v3558_v32  ;;  %v779_v35 = vmul.f32 %v3556_v31, %v3556_v31  ;;  %vm775_vm2 = vcmask 516096  }
 0x194   : > { %v765_v36 = vsel %vm764_vm1, %v3558_v32, 0.0  ;;  %v766_v37 = vsel %vm764_vm1, %v3556_v31, 0.0  ;;  %v763_v51 = vld [vmem:[#allocation2] sm:$0x1]  ;;  %v777_v54 = vld [vmem:[#allocation3] sm:$0x1] }
 0x195   : > { %v767_v38 = vadd.f32 %v766_v37, %v765_v36  ;;  %v780_v39 = vsel %vm764_vm1, %v778_v34, 0.0  ;;  %v781_v40 = vsel %vm764_vm1, %v779_v35, 0.0 }
 0x196   : > { %v782_v41 = vadd.f32 %v781_v40, %v780_v39 }
 0x197   : > { %v768_v42 = vrot.slane %v767_v38, 4 }
 0x198   : > { %v783_v43 = vrot.slane %v782_v41, 4 }
 0x199   : > { %v769_v44 = vadd.f32 %v768_v42, %v767_v38 }
 0x19a   : > { %v784_v45 = vadd.f32 %v783_v43, %v782_v41 }
 0x19b   : > { %v770_v46 = vrot.slane %v769_v44, 2 }
 0x19c   : > { %v785_v47 = vrot.slane %v784_v45, 2 }
 0x19d   : > { %v771_v48 = vadd.f32 %v770_v46, %v769_v44 }
 0x19e   : > { %v786_v49 = vadd.f32 %v785_v47, %v784_v45 }
 0x19f   : > { %v772_v50 = vrot.slane %v771_v48, 1 }
 0x1a0   : > { %v787_v52 = vrot.slane %v786_v49, 1 }
 0x1a1   : > { %v773_v53 = vadd.f32 %v772_v50, %v771_v48 }
 0x1a2   : > { %v788_v55 = vadd.f32 %v787_v52, %v786_v49 }
 0x1a3   : > { %v774_v56 = vadd.f32 %v773_v53, %v763_v51 }
 0x1a4   : > { %v789_v57 = vadd.f32 %v788_v55, %v777_v54 }
 0x1a5   : > { %776 = vst.msk [vmem:[#allocation2] sm:$0x1] %vm775_vm2, %v774_v56 }
 0x1a6   : > { %790 = vst.msk [vmem:[#allocation3] sm:$0x1] %vm775_vm2, %v789_v57 }
 0x1a7 PF: > { %s3948_s22 = sld [smem:[#allocation33_spill]] }
 0x1ad   : > { %p2378_p0 = scmp.ne.s32.totalorder %s3948_s22, 1 }
 0x1af   : > { %794 = sbr.rel (%p2378_p0) target bundleno = 720 (0x2d0), region = 112 }
 0x1b6   : > { %796 = sbr.rel (!%p690_p7) target bundleno = 467 (0x1d3), region = 116  ;;  %v797_v58 = vld [vmem:[#allocation2] sm:$0x1] (%p690_p7)  ;;  %v799_v59 = vld [vmem:[#allocation3] sm:$0x1] (%p690_p7)  ;;  %v3174_v62 = vmov (%p690_p7), 0.0  }
 0x1b7   : > { %v798_v60 = vmul.f32 (%p690_p7), 0.03125, %v797_v58  ;;  %v800_v61 = vmul.f32 (%p690_p7), 0.03125, %v799_v59  ;;  %814 = vst [vmem:[#allocation4] sm:$0x1] (%p690_p7), %v3174_v62  ;;  %815 = vst [vmem:[#allocation5] sm:$0x1] (%p690_p7), %v3174_v62 }
 0x1b8   : > { %v804_v3 = vld [vmem:[#allocation17] sm:$0x1] (%p690_p7)  ;;  %vm808_vm3 = vcmask (%p690_p7), 516096   ;;  %v810_v9 = vld [vmem:[#allocation19] sm:$0x1] (%p690_p7) }
 0x1b9   : > { %v801_v63 = vmul.f32 (%p690_p7), %v798_v60, %v798_v60 }
 0x1bb   : > { %v802_v0 = vsub.f32 (%p690_p7), %v800_v61, %v801_v63 }
 0x1bd   : > { %v803_v1 = vmax.f32 %v802_v0, 0.0 }
 0x1bf   : > { %v805_v2 = vadd.f32 1e-05, %v803_v1 }
 0x1c1   : > { %2781 = vrsqrt.f32 %v805_v2 }
 0x1cb   : > { %v2782_v4 = vpop.eup %2781 }
 0x1cc   : > { %v807_v5 = vmul.f32 %v2782_v4, %v804_v3 }
 0x1ce   : > { %809 = vst.msk [vmem:[#allocation23] sm:$0x1] %vm808_vm3, %v807_v5  ;;  %v811_v10 = vmul.f32 %v807_v5, %v798_v60 }
 0x1d0   : > { %v812_v11 = vsub.f32 %v810_v9, %v811_v10 }
 0x1d2   : > { %813 = vst.msk [vmem:[#allocation24] sm:$0x1] %vm808_vm3, %v812_v11 }
 0x1d3 PF: > { %v836_v13 = vld [vmem:[#allocation11] sm:$0xff]  ;;  %v837_v14 = vld [vmem:[#allocation11 + $0x8] sm:$0xff]  ;;  %v838_v15 = vld [vmem:[#allocation11 + $0x10] sm:$0xff]  ;;  %vm851_vm4 = vcmask 523264  }
 0x1d4   : > { %v2458_v16 = vpack.c.bf16 %v837_v14, %v836_v13  ;;  %v839_v17 = vld [vmem:[#allocation11 + $0x18] sm:$0xff]  ;;  %v840_v19 = vld [vmem:[#allocation11 + $0x20] sm:$0xff]  ;;  %v841_v20 = vld [vmem:[#allocation11 + $0x28] sm:$0xff] }
 0x1d5   : > { %v2462_v18 = vpack.c.bf16 %v839_v17, %v838_v15  ;;  %v2379_v21 = vld [vmem:[#allocation23] ss:$0 sm:$0xff]  ;;  %v2466_v24 = vpack.c.bf16 %v841_v20, %v840_v19  ;;  %v843_v27 = vld [vmem:[#allocation11 + $0x38] sm:$0xff]  ;;  %v2381_v35 = vld [vmem:[#allocation13] ss:$0 sm:$0xff] }
 0x1d6   : > { %2459 = vmatprep.subr.bf16.mxu0 %v2458_v16  ;;  %v823_v22 = vmul.f32 %v2379_v21, %v3558_v32  ;;  %v842_v26 = vld [vmem:[#allocation11 + $0x30] sm:$0xff]  ;;  %v824_v28 = vmul.f32 %v2379_v21, %v3556_v31  ;;  %v933_v53 = vld [vmem:[#allocation4] sm:$0x1]  ;;  %v943_v56 = vld [vmem:[#allocation5] sm:$0x1] }
 0x1d7   : > { %2461 = vmatpush3.bf16.msra.mxu0 %v2458_v16  ;;  %v2470_v30 = vpack.c.bf16 %v843_v27, %v842_v26 }
 0x1d8   : > { %2463 = vmatprep.subr.bf16.mxu0 %v2462_v18 }
 0x1d9   : > { %v2380_v23 = vld [vmem:[#allocation24] ss:$0 sm:$0xff] }
 0x1da   : > { %v832_v25 = vadd.f32 %v2380_v23, %v823_v22  ;;  %v833_v33 = vadd.f32 %v2380_v23, %v824_v28 }
 0x1db   : > { %2465 = vmatpush3.bf16.msra.mxu0 %v2462_v18 }
 0x1dc   : > { %v834_v29 = vmax.f32 %v832_v25, 0.0  ;;  %2467 = vmatprep.subr.bf16.mxu0 %v2466_v24  ;;  %v835_v34 = vmax.f32 %v833_v33, 0.0 }
 0x1de   : > { %2436 = vmatprep.mubr.msk.f32.mxu0 %vm851_vm4, %v834_v29 }
 0x1df   : > { %2469 = vmatpush3.bf16.msra.mxu0 %v2466_v24 }
 0x1e0   : > { %2471 = vmatprep.subr.bf16.mxu0 %v2470_v30 }
 0x1e3   : > { %2473 = vmatpush3.bf16.msra.mxu0 %v2470_v30 }
 0x1e6   : > { %2437 = vmatmul.mubr.msk.f32.vlgmr.msra.gmra.mrb[0].mxu0 %vm851_vm4, %v835_v34 }
 0x2b9   : > { %v2438_v36 = vpop.f32.mrb[0].mxu0 }
 0x2ba   : > { %v930_v37 = vadd.f32 %v2438_v36, %v2381_v35  ;;  %v924_v38 = vpop.f32.mrb[1].mxu0 }
 0x2bb   : > { %v925_v39 = vadd.f32 %v2381_v35, %v924_v38 }
 0x2bc   : > { %v945_v40 = vmul.f32 %v930_v37, %v930_v37 }
 0x2bd   : > { %v934_v41 = vadd.f32 %v930_v37, %v925_v39  ;;  %v944_v42 = vmul.f32 %v925_v39, %v925_v39 }
 0x2bf   : > { %v935_v43 = vrot.slane %v934_v41, 4  ;;  %v946_v44 = vadd.f32 %v945_v40, %v944_v42 }
 0x2c1   : > { %v936_v45 = vadd.f32 %v935_v43, %v934_v41  ;;  %v947_v46 = vrot.slane %v946_v44, 4 }
 0x2c3   : > { %v937_v47 = vrot.slane %v936_v45, 2  ;;  %v948_v48 = vadd.f32 %v947_v46, %v946_v44 }
 0x2c5   : > { %v938_v49 = vadd.f32 %v937_v47, %v936_v45  ;;  %v949_v50 = vrot.slane %v948_v48, 2 }
 0x2c7   : > { %v939_v51 = vrot.slane %v938_v49, 1  ;;  %v950_v52 = vadd.f32 %v949_v50, %v948_v48 }
 0x2c9   : > { %v940_v54 = vadd.f32 %v939_v51, %v938_v49  ;;  %v951_v55 = vrot.slane %v950_v52, 1 }
 0x2cb   : > { %v941_v57 = vadd.f32 %v940_v54, %v933_v53  ;;  %v952_v58 = vadd.f32 %v951_v55, %v950_v52 }
 0x2cd   : > { %942 = vst [vmem:[#allocation4] sm:$0x1] %v941_v57  ;;  %v953_v59 = vadd.f32 %v952_v58, %v943_v56 }
 0x2cf   : > { %954 = vst [vmem:[#allocation5] sm:$0x1] %v953_v59 }
 0x2d0 PF: > { %s3949_s28 = sld [smem:[#allocation33_spill]] }
 0x2d6   : > { %p2384_p1 = scmp.ne.s32.totalorder %s3949_s28, 2 }
 0x2d8   : > { %958 = sbr.rel (%p2384_p1) target bundleno = 1311 (0x51f), region = 120 }
 0x2df   : > { %960 = sbr.rel (!%p690_p7) target bundleno = 772 (0x304), region = 124  ;;  %v961_v60 = vld [vmem:[#allocation4] sm:$0x1] (%p690_p7)  ;;  %v963_v61 = vld [vmem:[#allocation5] sm:$0x1] (%p690_p7)  ;;  %v3175_v0 = vmov (%p690_p7), 0.0  }
 0x2e0   : > { %v962_v62 = vmul.f32 (%p690_p7), 0.03125, %v961_v60  ;;  %v964_v63 = vmul.f32 (%p690_p7), 0.03125, %v963_v61  ;;  %s3950_s12 = sld [smem:[#allocation40_spill]] (%p690_p7)  ;;  %s3951_s27 = sld [smem:[#allocation41_spill]] (%p690_p7)  ;;  %v968_v5 = vld [vmem:[#allocation20] sm:$0x1] (%p690_p7) }
 0x2e1   : > { %v973_v11 = vld [vmem:[#allocation22] sm:$0x1] (%p690_p7) }
 0x2e2   : > { %v965_v1 = vmul.f32 (%p690_p7), %v962_v62, %v962_v62 }
 0x2e4   : > { %v966_v2 = vsub.f32 (%p690_p7), %v964_v63, %v965_v1 }
 0x2e6   : > { %978 = vst [vmem:[%s3950_s12] sm:$0xff] %v3175_v0  ;;  %979 = vst [vmem:[%s3951_s27] sm:$0xff] %v3175_v0  ;;  %v967_v3 = vmax.f32 %v966_v2, 0.0 }
 0x2e8   : > { %v969_v4 = vadd.f32 1e-05, %v967_v3 }
 0x2ea   : > { %2783 = vrsqrt.f32 %v969_v4 }
 0x2f4   : > { %v2784_v9 = vpop.eup %2783 }
 0x2f5   : > { %v971_v10 = vmul.f32 %v2784_v9, %v968_v5 }
 0x2f7   : > { %972 = vst [vmem:[#allocation6] sm:$0x1] %v971_v10 }
 0x2fe   : > { %v974_v13 = vld [vmem:[#allocation6] sm:$0x1] }
 0x2ff   : > { %v975_v14 = vmul.f32 %v974_v13, %v962_v62 }
 0x301   : > { %v976_v15 = vsub.f32 %v973_v11, %v975_v14 }
 0x303   : > { %977 = vst [vmem:[#allocation7] sm:$0x1] %v976_v15 }
 0x304 PF: > { %v1005_v16 = vld [vmem:[#allocation11] sm:$0xff]  ;;  %v1006_v17 = vld [vmem:[#allocation11 + $0x8] sm:$0xff]  ;;  %v1007_v18 = vld [vmem:[#allocation11 + $0x10] sm:$0xff]  ;;  %vm1020_vm5 = vcmask 523264   ;;  %s3952_s14 = sld [smem:[#allocation40_spill]]  ;;  %s3953_s18 = sld [smem:[#allocation41_spill]] }
 0x305   : > { %v2474_v19 = vpack.c.bf16 %v1006_v17, %v1005_v16  ;;  %v1008_v20 = vld [vmem:[#allocation11 + $0x18] sm:$0xff]  ;;  %v1009_v22 = vld [vmem:[#allocation11 + $0x20] sm:$0xff]  ;;  %v1010_v23 = vld [vmem:[#allocation11 + $0x28] sm:$0xff] }
 0x306   : > { %v2478_v21 = vpack.c.bf16 %v1008_v20, %v1007_v18  ;;  %v2385_v24 = vld [vmem:[#allocation23] ss:$0 sm:$0xff]  ;;  %v2386_v26 = vld [vmem:[#allocation24] ss:$0 sm:$0xff]  ;;  %v1123_v27 = vld [vmem:[#allocation14 + $0x8] sm:$0xff]  ;;  %v2482_v33 = vpack.c.bf16 %v1010_v23, %v1009_v22 }
 0x307   : > { %2475 = vmatprep.subr.bf16.mxu0 %v2474_v19  ;;  %v992_v25 = vmul.f32 %v2385_v24, %v3558_v32  ;;  %v1131_v28 = vld [vmem:[#allocation14 + $0x48] sm:$0xff]  ;;  %v1122_v30 = vld [vmem:[#allocation14] sm:$0xff]  ;;  %v1012_v37 = vld [vmem:[#allocation11 + $0x38] sm:$0xff]  ;;  %v993_v41 = vmul.f32 %v2385_v24, %v3556_v31 }
 0x308   : > { %2477 = vmatpush3.bf16.msra.mxu0 %v2474_v19  ;;  %v2490_v29 = vpack.c.bf16 %v1131_v28, %v1123_v27  ;;  %v1011_v34 = vld [vmem:[#allocation11 + $0x30] sm:$0xff]  ;;  %v1130_v36 = vld [vmem:[#allocation14 + $0x40] sm:$0xff]  ;;  %v1125_v48 = vld [vmem:[#allocation14 + $0x18] sm:$0xff] }
 0x309   : > { %2479 = vmatprep.subr.bf16.mxu0 %v2478_v21  ;;  %v1001_v35 = vadd.f32 %v2386_v26, %v992_v25  ;;  %v2492_v38 = vpack.c.bf16 %v1130_v36, %v1122_v30  ;;  %v1139_v39 = vld [vmem:[#allocation14 + $0x88] sm:$0xff]  ;;  %v1138_v43 = vld [vmem:[#allocation14 + $0x80] sm:$0xff]  ;;  %v2486_v47 = vpack.c.bf16 %v1012_v37, %v1011_v34  ;;  %v1133_v50 = vld [vmem:[#allocation14 + $0x58] sm:$0xff]  ;;  %v1002_v31 = vadd.f32 %v2386_v26, %v993_v41 }
 0x30a   : > { %2491 = vmatprep.subr.bf16.mxu1 %v2490_v29  ;;  %v1147_v40 = vld [vmem:[#allocation14 + $0xc8] sm:$0xff]  ;;  %v1146_v44 = vld [vmem:[#allocation14 + $0xc0] sm:$0xff]  ;;  %v1124_v56 = vld [vmem:[#allocation14 + $0x10] sm:$0xff]  ;;  %v2522_v59 = vpack.c.bf16 %v1133_v50, %v1125_v48 }
 0x30b   : > { %v1003_v32 = vmax.f32 %v1001_v35, 0.0  ;;  %v2494_v42 = vpack.c.bf16 %v1147_v40, %v1139_v39  ;;  %2493 = vmatpush1.bf16.msra.mxu1 %v2492_v38  ;;  %v2496_v45 = vpack.c.bf16 %v1146_v44, %v1138_v43  ;;  %v1155_v46 = vld [vmem:[#allocation14 + $0x108] sm:$0xff]  ;;  %v1154_v52 = vld [vmem:[#allocation14 + $0x100] sm:$0xff]  ;;  %v1132_v57 = vld [vmem:[#allocation14 + $0x50] sm:$0xff]  ;;  %v1004_v3 = vmax.f32 %v1002_v31, 0.0 }
 0x30c   : > { %2481 = vmatpush3.bf16.msra.mxu0 %v2478_v21  ;;  %v1163_v49 = vld [vmem:[#allocation14 + $0x148] sm:$0xff]  ;;  %v1162_v53 = vld [vmem:[#allocation14 + $0x140] sm:$0xff]  ;;  %v1141_v60 = vld [vmem:[#allocation14 + $0x98] sm:$0xff]  ;;  %v2524_v4 = vpack.c.bf16 %v1132_v57, %v1124_v56 }
 0x30d   : > { %2483 = vmatprep.subr.bf16.mxu0 %v2482_v33  ;;  %2455 = vmatprep.mubr.msk.f32.mxu0 %vm1020_vm5, %v1003_v32  ;;  %v2498_v51 = vpack.c.bf16 %v1163_v49, %v1155_v46  ;;  %v1171_v54 = vld [vmem:[#allocation14 + $0x188] sm:$0xff]  ;;  %v2500_v58 = vpack.c.bf16 %v1162_v53, %v1154_v52  ;;  %v1170_v62 = vld [vmem:[#allocation14 + $0x180] sm:$0xff]  ;;  %v1149_v0 = vld [vmem:[#allocation14 + $0xd8] sm:$0xff] }
 0x30e   : > { %2495 = vmatprep.subr.bf16.mxu1 %v2494_v42  ;;  %v1179_v55 = vld [vmem:[#allocation14 + $0x1c8] sm:$0xff]  ;;  %v1178_v63 = vld [vmem:[#allocation14 + $0x1c0] sm:$0xff]  ;;  %v1140_v5 = vld [vmem:[#allocation14 + $0x90] sm:$0xff]  ;;  %v2526_v11 = vpack.c.bf16 %v1149_v0, %v1141_v60 }
 0x30f   : > { %2497 = vmatpush1.bf16.msra.mxu1 %v2496_v45  ;;  %v2502_v61 = vpack.c.bf16 %v1179_v55, %v1171_v54  ;;  %v1187_v1 = vld [vmem:[#allocation14 + $0x208] sm:$0xff]  ;;  %v1148_v9 = vld [vmem:[#allocation14 + $0xd0] sm:$0xff]  ;;  %v2504_v10 = vpack.c.bf16 %v1178_v63, %v1170_v62  ;;  %v1157_v13 = vld [vmem:[#allocation14 + $0x118] sm:$0xff] }
 0x310   : > { %2485 = vmatpush3.bf16.msra.mxu0 %v2482_v33  ;;  %2499 = vmatprep.subr.bf16.mxu1 %v2498_v51  ;;  %v1195_v2 = vld [vmem:[#allocation14 + $0x248] sm:$0xff]  ;;  %v1186_v15 = vld [vmem:[#allocation14 + $0x200] sm:$0xff]  ;;  %v1165_v17 = vld [vmem:[#allocation14 + $0x158] sm:$0xff]  ;;  %v2528_v20 = vpack.c.bf16 %v1148_v9, %v1140_v5 }
 0x311   : > { %2487 = vmatprep.subr.bf16.mxu0 %v2486_v47  ;;  %v2506_v14 = vpack.c.bf16 %v1195_v2, %v1187_v1  ;;  %v1194_v16 = vld [vmem:[#allocation14 + $0x240] sm:$0xff]  ;;  %v1203_v18 = vld [vmem:[#allocation14 + $0x288] sm:$0xff]  ;;  %v1156_v21 = vld [vmem:[#allocation14 + $0x110] sm:$0xff]  ;;  %v2530_v23 = vpack.c.bf16 %v1165_v17, %v1157_v13 }
 0x312   : > { %v1211_v19 = vld [vmem:[#allocation14 + $0x2c8] sm:$0xff]  ;;  %v2508_v22 = vpack.c.bf16 %v1194_v16, %v1186_v15  ;;  %v1164_v24 = vld [vmem:[#allocation14 + $0x150] sm:$0xff]  ;;  %v1202_v26 = vld [vmem:[#allocation14 + $0x280] sm:$0xff] }
 0x313   : > { %2501 = vmatpush1.bf16.msra.mxu1 %v2500_v58  ;;  %v2510_v25 = vpack.c.bf16 %v1211_v19, %v1203_v18  ;;  %v1210_v27 = vld [vmem:[#allocation14 + $0x2c0] sm:$0xff]  ;;  %v1173_v28 = vld [vmem:[#allocation14 + $0x198] sm:$0xff]  ;;  %v2532_v30 = vpack.c.bf16 %v1164_v24, %v1156_v21  ;;  %v1172_v35 = vld [vmem:[#allocation14 + $0x190] sm:$0xff]  ;;  %v3176_v18 = vmov 0.0  }
 0x314   : > { %2489 = vmatpush3.bf16.msra.mxu0 %v2486_v47  ;;  %2503 = vmatprep.subr.bf16.mxu1 %v2502_v61  ;;  %v1181_v29 = vld [vmem:[#allocation14 + $0x1d8] sm:$0xff]  ;;  %v2512_v33 = vpack.c.bf16 %v1210_v27, %v1202_v26  ;;  %v1180_v36 = vld [vmem:[#allocation14 + $0x1d0] sm:$0xff]  ;;  %v1219_v49 = vld [vmem:[#allocation14 + $0x308] sm:$0xff] }
 0x315   : > { %2523 = vmatprep.subr.bf16.mxu0 %v2522_v59  ;;  %v2534_v34 = vpack.c.bf16 %v1181_v29, %v1173_v28  ;;  %v1189_v37 = vld [vmem:[#allocation14 + $0x218] sm:$0xff]  ;;  %v2536_v39 = vpack.c.bf16 %v1180_v36, %v1172_v35  ;;  %v1188_v41 = vld [vmem:[#allocation14 + $0x210] sm:$0xff]  ;;  %v1227_v50 = vld [vmem:[#allocation14 + $0x348] sm:$0xff]  ;;  %1356 = vmatprep.mubr.f32.mxu1 %v3176_v18 }
 0x316   : > { %v1197_v38 = vld [vmem:[#allocation14 + $0x258] sm:$0xff]  ;;  %v1196_v32 = vld [vmem:[#allocation14 + $0x250] sm:$0xff]  ;;  %v2514_v52 = vpack.c.bf16 %v1227_v50, %v1219_v49  ;;  %v1218_v31 = vld [vmem:[#allocation14 + $0x300] sm:$0xff] }
 0x317   : > { %2456 = vmatmul.mubr.msk.f32.vlgmr.msra.gmra.mrb[0].mxu0 %vm1020_vm5, %v1004_v3  ;;  %2505 = vmatpush1.bf16.msra.mxu1 %v2504_v10  ;;  %v2538_v40 = vpack.c.bf16 %v1197_v38, %v1189_v37  ;;  %v1205_v42 = vld [vmem:[#allocation14 + $0x298] sm:$0xff]  ;;  %v2540_v44 = vpack.c.bf16 %v1196_v32, %v1188_v41  ;;  %v1204_v46 = vld [vmem:[#allocation14 + $0x290] sm:$0xff]  ;;  %v1226_v54 = vld [vmem:[#allocation14 + $0x340] sm:$0xff] }
 0x318   : > { %2525 = vmatpush1.bf16.msra.mxu0 %v2524_v4  ;;  %2507 = vmatprep.subr.bf16.mxu1 %v2506_v14  ;;  %v1213_v43 = vld [vmem:[#allocation14 + $0x2d8] sm:$0xff]  ;;  %v1212_v47 = vld [vmem:[#allocation14 + $0x2d0] sm:$0xff]  ;;  %v2516_v56 = vpack.c.bf16 %v1226_v54, %v1218_v31  ;;  %v1235_v60 = vld [vmem:[#allocation14 + $0x388] sm:$0xff] }
 0x319   : > { %2527 = vmatprep.subr.bf16.mxu0 %v2526_v11  ;;  %v2542_v45 = vpack.c.bf16 %v1213_v43, %v1205_v42  ;;  %v2544_v48 = vpack.c.bf16 %v1212_v47, %v1204_v46  ;;  %v1221_v51 = vld [vmem:[#allocation14 + $0x318] sm:$0xff]  ;;  %v1220_v57 = vld [vmem:[#allocation14 + $0x310] sm:$0xff]  ;;  %v1243_v61 = vld [vmem:[#allocation14 + $0x3c8] sm:$0xff]  ;;  %1433 = vmatprep.mubr.f32.mxu0 %v3176_v18 }
 0x31a   : > { %v1229_v53 = vld [vmem:[#allocation14 + $0x358] sm:$0xff]  ;;  %v1228_v58 = vld [vmem:[#allocation14 + $0x350] sm:$0xff]  ;;  %v2518_v63 = vpack.c.bf16 %v1243_v61, %v1235_v60  ;;  %v1234_v1 = vld [vmem:[#allocation14 + $0x380] sm:$0xff] }
 0x31b   : > { %2509 = vmatpush1.bf16.msra.mxu1 %v2508_v22  ;;  %v2546_v55 = vpack.c.bf16 %v1229_v53, %v1221_v51  ;;  %v2548_v59 = vpack.c.bf16 %v1228_v58, %v1220_v57  ;;  %v1237_v62 = vld [vmem:[#allocation14 + $0x398] sm:$0xff]  ;;  %v1242_v3 = vld [vmem:[#allocation14 + $0x3c0] sm:$0xff]  ;;  %v1236_v4 = vld [vmem:[#allocation14 + $0x390] sm:$0xff] }
 0x31c   : > { %2529 = vmatpush1.bf16.msra.mxu0 %v2528_v20  ;;  %2511 = vmatprep.subr.bf16.mxu1 %v2510_v25  ;;  %v1245_v0 = vld [vmem:[#allocation14 + $0x3d8] sm:$0xff]  ;;  %v1244_v5 = vld [vmem:[#allocation14 + $0x3d0] sm:$0xff]  ;;  %v2520_v9 = vpack.c.bf16 %v1242_v3, %v1234_v1  ;;  %v1127_v11 = vld [vmem:[#allocation14 + $0x28] sm:$0xff] }
 0x31d   : > { %2531 = vmatprep.subr.bf16.mxu0 %v2530_v23  ;;  %v2550_v2 = vpack.c.bf16 %v1245_v0, %v1237_v62  ;;  %v2552_v10 = vpack.c.bf16 %v1244_v5, %v1236_v4  ;;  %v1135_v13 = vld [vmem:[#allocation14 + $0x68] sm:$0xff]  ;;  %v1129_v14 = vld [vmem:[#allocation14 + $0x38] sm:$0xff]  ;;  %v1126_v26 = vld [vmem:[#allocation14 + $0x20] sm:$0xff] }
 0x31e   : > { %v2554_v15 = vpack.c.bf16 %v1135_v13, %v1127_v11  ;;  %v1137_v16 = vld [vmem:[#allocation14 + $0x78] sm:$0xff]  ;;  %v1134_v29 = vld [vmem:[#allocation14 + $0x60] sm:$0xff]  ;;  %v1151_v36 = vld [vmem:[#allocation14 + $0xe8] sm:$0xff] }
 0x31f   : > { %2513 = vmatpush1.bf16.msra.mxu1 %v2512_v33  ;;  %v2586_v17 = vpack.c.bf16 %v1137_v16, %v1129_v14  ;;  %v2387_v19 = vld [vmem:[#allocation13] ss:$0 sm:$0xff]  ;;  %v2390_v22 = vld [vmem:[#allocation6] ss:$0 sm:$0xff]  ;;  %v2391_v25 = vld [vmem:[#allocation7] ss:$0 sm:$0xff] }
 0x320   : > { %2533 = vmatpush1.bf16.msra.mxu0 %v2532_v30  ;;  %2515 = vmatprep.subr.bf16.mxu1 %v2514_v52  ;;  %v1128_v30 = vld [vmem:[#allocation14 + $0x30] sm:$0xff]  ;;  %v1145_v37 = vld [vmem:[#allocation14 + $0xb8] sm:$0xff]  ;;  %v1142_v41 = vld [vmem:[#allocation14 + $0xa0] sm:$0xff] }
 0x321   : > { %2535 = vmatprep.subr.bf16.mxu0 %v2534_v34  ;;  %v1136_v33 = vld [vmem:[#allocation14 + $0x70] sm:$0xff]  ;;  %v1143_v34 = vld [vmem:[#allocation14 + $0xa8] sm:$0xff]  ;;  %v1153_v38 = vld [vmem:[#allocation14 + $0xf8] sm:$0xff] }
 0x322   : > { %v1150_v32 = vld [vmem:[#allocation14 + $0xe0] sm:$0xff]  ;;  %v1159_v46 = vld [vmem:[#allocation14 + $0x128] sm:$0xff]  ;;  %v2558_v47 = vpack.c.bf16 %v1151_v36, %v1143_v34  ;;  %v1161_v50 = vld [vmem:[#allocation14 + $0x138] sm:$0xff] }
 0x323   : > { %2517 = vmatpush1.bf16.msra.mxu1 %v2516_v56  ;;  %v1167_v49 = vld [vmem:[#allocation14 + $0x168] sm:$0xff]  ;;  %v1169_v51 = vld [vmem:[#allocation14 + $0x178] sm:$0xff]  ;;  %v2560_v52 = vpack.c.bf16 %v1150_v32, %v1142_v41  ;;  %v1158_v31 = vld [vmem:[#allocation14 + $0x120] sm:$0xff] }
 0x324   : > { %2537 = vmatpush1.bf16.msra.mxu0 %v2536_v39  ;;  %2519 = vmatprep.subr.bf16.mxu1 %v2518_v63  ;;  %v2556_v39 = vpack.c.bf16 %v1134_v29, %v1126_v26  ;;  %v1166_v54 = vld [vmem:[#allocation14 + $0x160] sm:$0xff]  ;;  %v2562_v56 = vpack.c.bf16 %v1167_v49, %v1159_v46  ;;  %v2594_v57 = vpack.c.bf16 %v1169_v51, %v1161_v50  ;;  %v1160_v58 = vld [vmem:[#allocation14 + $0x130] sm:$0xff]  ;;  %v1175_v60 = vld [vmem:[#allocation14 + $0x1a8] sm:$0xff] }
 0x325   : > { %2539 = vmatprep.subr.bf16.mxu0 %v2538_v40  ;;  %v2588_v40 = vpack.c.bf16 %v1136_v33, %v1128_v30  ;;  %v1183_v61 = vld [vmem:[#allocation14 + $0x1e8] sm:$0xff]  ;;  %v1177_v62 = vld [vmem:[#allocation14 + $0x1b8] sm:$0xff]  ;;  %v2564_v0 = vpack.c.bf16 %v1166_v54, %v1158_v31  ;;  %v1182_v3 = vld [vmem:[#allocation14 + $0x1e0] sm:$0xff] }
 0x326   : > { %v1185_v63 = vld [vmem:[#allocation14 + $0x1f8] sm:$0xff]  ;;  %v2566_v4 = vpack.c.bf16 %v1183_v61, %v1175_v60  ;;  %v1191_v11 = vld [vmem:[#allocation14 + $0x228] sm:$0xff]  ;;  %v1206_v33 = vld [vmem:[#allocation14 + $0x2a0] sm:$0xff] }
 0x327   : > { %2521 = vmatpush1.bf16.msra.mxu1 %v2520_v9  ;;  %v2598_v5 = vpack.c.bf16 %v1185_v63, %v1177_v62  ;;  %v1176_v9 = vld [vmem:[#allocation14 + $0x1b0] sm:$0xff]  ;;  %v1199_v13 = vld [vmem:[#allocation14 + $0x268] sm:$0xff]  ;;  %v1193_v14 = vld [vmem:[#allocation14 + $0x238] sm:$0xff] }
 0x328   : > { %2541 = vmatpush1.bf16.msra.mxu0 %v2540_v44  ;;  %2555 = vmatprep.subr.bf16.mxu1 %v2554_v15  ;;  %v1144_v44 = vld [vmem:[#allocation14 + $0xb0] sm:$0xff]  ;;  %v1201_v15 = vld [vmem:[#allocation14 + $0x278] sm:$0xff]  ;;  %v1215_v26 = vld [vmem:[#allocation14 + $0x2e8] sm:$0xff] }
 0x329   : > { %2543 = vmatprep.subr.bf16.mxu0 %v2542_v45  ;;  %v1152_v45 = vld [vmem:[#allocation14 + $0xf0] sm:$0xff]  ;;  %v1214_v34 = vld [vmem:[#allocation14 + $0x2e0] sm:$0xff]  ;;  %v1225_v41 = vld [vmem:[#allocation14 + $0x338] sm:$0xff] }
 0x32a   : > { %v2592_v53 = vpack.c.bf16 %v1152_v45, %v1144_v44  ;;  %v1233_v32 = vld [vmem:[#allocation14 + $0x378] sm:$0xff]  ;;  %v1222_v45 = vld [vmem:[#allocation14 + $0x320] sm:$0xff]  ;;  %v1224_v49 = vld [vmem:[#allocation14 + $0x330] sm:$0xff] }
 0x32b   : > { %v1230_v46 = vld [vmem:[#allocation14 + $0x360] sm:$0xff]  ;;  %v1232_v50 = vld [vmem:[#allocation14 + $0x370] sm:$0xff]  ;;  %v1239_v51 = vld [vmem:[#allocation14 + $0x3a8] sm:$0xff] }
 0x32c   : > { %2545 = vmatpush1.bf16.msra.mxu0 %v2544_v48  ;;  %v2590_v48 = vpack.c.bf16 %v1153_v38, %v1145_v37  ;;  %v1208_v37 = vld [vmem:[#allocation14 + $0x2b0] sm:$0xff]  ;;  %v1249_v31 = vld [vmem:[#allocation14 + $0x3f8] sm:$0xff]  ;;  %v2580_v54 = vpack.c.bf16 %v1230_v46, %v1222_v45  ;;  %v1246_v60 = vld [vmem:[#allocation14 + $0x3e0] sm:$0xff] }
 0x32d   : > { %2547 = vmatprep.subr.bf16.mxu0 %v2546_v55  ;;  %v1216_v38 = vld [vmem:[#allocation14 + $0x2f0] sm:$0xff] }
 0x32e   : > { %v2608_v44 = vpack.c.bf16 %v1216_v38, %v1208_v37  ;;  %v1240_v61 = vld [vmem:[#allocation14 + $0x3b0] sm:$0xff] }
 0x32f   : > { %v1248_v62 = vld [vmem:[#allocation14 + $0x3f0] sm:$0xff] }
 0x330   : > { %2549 = vmatpush1.bf16.msra.mxu0 %v2548_v59  ;;  %v1168_v59 = vld [vmem:[#allocation14 + $0x170] sm:$0xff] }
 0x331   : > { %2551 = vmatprep.subr.bf16.mxu0 %v2550_v2  ;;  %v2596_v1 = vpack.c.bf16 %v1168_v59, %v1160_v58  ;;  %v1174_v2 = vld [vmem:[#allocation14 + $0x1a0] sm:$0xff] }
 0x332   : > { %v2568_v16 = vpack.c.bf16 %v1182_v3, %v1174_v2  ;;  %v1266_v2 = vsub.s32 3, %v3542_v6  ;;  %v3177_v3 = vmov 1966171168  }
 0x334   : > { %2553 = vmatpush1.bf16.msra.mxu0 %v2552_v10  ;;  %v1184_v10 = vld [vmem:[#allocation14 + $0x1f0] sm:$0xff] }
 0x335   : > { %2587 = vmatprep.subr.bf16.mxu0 %v2586_v17  ;;  %v2600_v17 = vpack.c.bf16 %v1184_v10, %v1176_v9 }
 0x3ea   : > { %v2457_v20 = vpop.f32.mrb[0].mxu0 }
 0x3eb   : > { %v1099_v21 = vadd.f32 %v2457_v20, %v2387_v19  ;;  %v1093_v23 = vpop.f32.mrb[1].mxu0  ;;  %v1198_v20 = vld [vmem:[#allocation14 + $0x260] sm:$0xff] }
 0x3ec   : > { %v1094_v24 = vadd.f32 %v2387_v19, %v1093_v23  ;;  %v1190_v19 = vld [vmem:[#allocation14 + $0x220] sm:$0xff]  ;;  %v1192_v23 = vld [vmem:[#allocation14 + $0x230] sm:$0xff] }
 0x3ed   : > { %v1110_v27 = vmul.f32 %v2390_v22, %v1099_v21  ;;  %v2570_v21 = vpack.c.bf16 %v1199_v13, %v1191_v11  ;;  %v2572_v29 = vpack.c.bf16 %v1198_v20, %v1190_v19 }
 0x3ee   : > { %v1109_v28 = vmul.f32 %v2390_v22, %v1094_v24  ;;  %v2602_v22 = vpack.c.bf16 %v1201_v15, %v1193_v14  ;;  %v1200_v24 = vld [vmem:[#allocation14 + $0x270] sm:$0xff]  ;;  %v1278_v14 = vsub.s32 6, %v3542_v6  ;;  %v1274_v15 = vsub.s32 5, %v3542_v6 }
 0x3ef   : > { %v1119_v42 = vadd.f32 %v2391_v25, %v1110_v27  ;;  %v1209_v27 = vld [vmem:[#allocation14 + $0x2b8] sm:$0xff]  ;;  %v2604_v30 = vpack.c.bf16 %v1200_v24, %v1192_v23 }
 0x3f0   : > { %v1118_v35 = vadd.f32 %v2391_v25, %v1109_v28  ;;  %v1207_v25 = vld [vmem:[#allocation14 + $0x2a8] sm:$0xff]  ;;  %v1217_v28 = vld [vmem:[#allocation14 + $0x2f8] sm:$0xff] }
 0x3f1   : > { %v3593_v55 = vmax.f32 %v1119_v42, 0.0  ;;  %v2606_v36 = vpack.c.bf16 %v1217_v28, %v1209_v27  ;;  %v2576_v42 = vpack.c.bf16 %v1214_v34, %v1206_v33 }
 0x3f2   : > { %v3589_v43 = vmax.f32 %v1118_v35, 0.0  ;;  %v2574_v35 = vpack.c.bf16 %v1215_v26, %v1207_v25 }
 0x3f4   : > { %1357 = vmatmul.mubr.f32.vlgmr.msra.gmra.mrb[0].mxu1 %v3589_v43  ;;  %1434 = vmatmul.mubr.f32.vlgmr.msra.gmra.mrb[2].mxu0 %v3589_v43 }
 0x3f5   : > { %2557 = vmatpush1.bf16.msra.mxu1 %v2556_v39  ;;  %2589 = vmatpush1.bf16.msra.mxu0 %v2588_v40  ;;  %v1223_v39 = vld [vmem:[#allocation14 + $0x328] sm:$0xff] }
 0x3f6   : > { %1362 = vmatprep.mubr.f32.mxu1 %v3176_v18  ;;  %1439 = vmatprep.mubr.f32.mxu0 %v3176_v18  ;;  %v1231_v40 = vld [vmem:[#allocation14 + $0x368] sm:$0xff] }
 0x3f7   : > { %2559 = vmatprep.subr.bf16.mxu1 %v2558_v47  ;;  %2591 = vmatprep.subr.bf16.mxu0 %v2590_v48  ;;  %v2578_v47 = vpack.c.bf16 %v1231_v40, %v1223_v39  ;;  %v2610_v48 = vpack.c.bf16 %v1233_v32, %v1225_v41 }
 0x3f8   : > { %1363 = vmatmul.mubr.f32.gmra.mrb[2].mxu1 %v3593_v55  ;;  %1440 = vmatmul.mubr.f32.gmra.mrb[4].mxu0 %v3593_v55 }
 0x3f9   : > { %2561 = vmatpush1.bf16.msra.mxu1 %v2560_v52  ;;  %2593 = vmatpush1.bf16.msra.mxu0 %v2592_v53  ;;  %v1247_v52 = vld [vmem:[#allocation14 + $0x3e8] sm:$0xff]  ;;  %v1241_v53 = vld [vmem:[#allocation14 + $0x3b8] sm:$0xff] }
 0x3fa   : > { %2563 = vmatprep.subr.bf16.mxu1 %v2562_v56  ;;  %2595 = vmatprep.subr.bf16.mxu0 %v2594_v57  ;;  %v2612_v56 = vpack.c.bf16 %v1232_v50, %v1224_v49  ;;  %v1238_v57 = vld [vmem:[#allocation14 + $0x3a0] sm:$0xff]  ;;  %v2582_v58 = vpack.c.bf16 %v1247_v52, %v1239_v51  ;;  %v2614_v59 = vpack.c.bf16 %v1249_v31, %v1241_v53 }
 0x3fb   : > { %1510 = vmatprep.mubr.f32.mxu1 %v3176_v18  ;;  %1587 = vmatprep.mubr.f32.mxu0 %v3176_v18  ;;  %v2584_v63 = vpack.c.bf16 %v1246_v60, %v1238_v57 }
 0x3fd   : > { %2565 = vmatpush1.bf16.msra.mxu1 %v2564_v0  ;;  %2597 = vmatpush1.bf16.msra.mxu0 %v2596_v1  ;;  %v2616_v0 = vpack.c.bf16 %v1248_v62, %v1240_v61  ;;  %v1250_v1 = vld [vmem:[#allocation16] sm:$0xff] }
 0x3fe   : > { %2567 = vmatprep.subr.bf16.mxu1 %v2566_v4  ;;  %2599 = vmatprep.subr.bf16.mxu0 %v2598_v5  ;;  %v1670_v4 = vunpack.c.l.s4 %v3177_v3  ;;  %v1255_v5 = vrot.slane %v1250_v1, %v710_v8  ;;  %v1263_v9 = vrot.slane %v1250_v1, %v740_v12  ;;  %v1267_v10 = vrot.slane %v1250_v1, %v1266_v2 }
 0x3ff   : > { %v3627_v25 = vrot.slane %v1250_v1, %v1278_v14  ;;  %v3629_v26 = vrot.slane %v1250_v1, %v1274_v15 }
 0x401   : > { %2569 = vmatpush1.bf16.msra.mxu1 %v2568_v16  ;;  %2601 = vmatpush1.bf16.msra.mxu0 %v2600_v17  ;;  %v1282_v16 = vsub.s32 7, %v3542_v6 }
 0x402   : > { %2571 = vmatprep.subr.bf16.mxu1 %v2570_v21  ;;  %2603 = vmatprep.subr.bf16.mxu0 %v2602_v22 }
 0x403   : > { %v3631_v27 = vrot.slane %v1250_v1, %v1282_v16 }
 0x405   : > { %2573 = vmatpush1.bf16.msra.mxu1 %v2572_v29  ;;  %2605 = vmatpush1.bf16.msra.mxu0 %v2604_v30 }
 0x406   : > { %2575 = vmatprep.subr.bf16.mxu1 %v2574_v35  ;;  %2607 = vmatprep.subr.bf16.mxu0 %v2606_v36 }
 0x409   : > { %2577 = vmatpush1.bf16.msra.mxu1 %v2576_v42  ;;  %2609 = vmatpush1.bf16.msra.mxu0 %v2608_v44 }
 0x40a   : > { %2579 = vmatprep.subr.bf16.mxu1 %v2578_v47  ;;  %2611 = vmatprep.subr.bf16.mxu0 %v2610_v48 }
 0x40d   : > { %2581 = vmatpush1.bf16.msra.mxu1 %v2580_v54  ;;  %2613 = vmatpush1.bf16.msra.mxu0 %v2612_v56 }
 0x40e   : > { %2583 = vmatprep.subr.bf16.mxu1 %v2582_v58  ;;  %2615 = vmatprep.subr.bf16.mxu0 %v2614_v59 }
 0x411   : > { %2585 = vmatpush1.bf16.msra.mxu1 %v2584_v63  ;;  %2617 = vmatpush1.bf16.msra.mxu0 %v2616_v0 }
 0x414   : > { %1511 = vmatmul.mubr.f32.vlgmr.msra.gmra.mrb[4].mxu1 %v3589_v43  ;;  %1588 = vmatmul.mubr.f32.vlgmr.msra.gmra.mrb[6].mxu0 %v3589_v43  ;;  %v1259_v43 = vrot.slane %v1250_v1, %v724_v7 }
 0x415   : > { %1516 = vmatprep.mubr.f32.mxu1 %v3176_v18  ;;  %1593 = vmatprep.mubr.f32.mxu0 %v3176_v18  ;;  %v1671_v18 = vunpack.c.0.s8 %v1670_v4 }
 0x417   : > { %v3623_v7 = vsub.s32 %v1671_v18, %v3542_v6 }
 0x418   : > { %1517 = vmatmul.mubr.f32.gmra.mrb[6].mxu1 %v3593_v55  ;;  %1594 = vmatmul.mubr.f32.gmra.mrb[8].mxu0 %v3593_v55  ;;  %v1270_v55 = vsub.s32 4, %v3542_v6 }
 0x41a   : > { %v3625_v24 = vrot.slane %v1250_v1, %v1270_v55 }
 0x4c7   : > { %v1358_v11 = vpop.f32.mrb[0].mxu1  ;;  %v1435_v13 = vpop.f32.mrb[2].mxu0 }
 0x4c8   : > { %v1359_v17 = vadd.f32 %v1358_v11, %v1255_v5  ;;  %v1436_v8 = vadd.f32 %v1435_v13, %v1263_v9  ;;  %v1360_v19 = vpop.f32.mrb[1].mxu1  ;;  %v1437_v20 = vpop.f32.mrb[3].mxu0 }
 0x4c9   : > { %v3618_v12 = vadd.f32 %v1360_v19, %v1259_v43  ;;  %v3620_v21 = vadd.f32 %v1437_v20, %v1267_v10 }
 0x4ca   : > { %v1718_v28 = vmul.f32 %v1359_v17, %v1359_v17  ;;  %v1720_v29 = vmul.f32 %v1436_v8, %v1436_v8 }
 0x4cb   : > { %v1364_v22 = vpop.f32.mrb[2].mxu1  ;;  %v1441_v23 = vpop.f32.mrb[4].mxu0  ;;  %v3635_v6 = vmul.f32 %v3618_v12, %v3618_v12  ;;  %v3639_v36 = vmul.f32 %v3620_v21, %v3620_v21 }
 0x4cc   : > { %v1365_v30 = vadd.f32 %v1364_v22, %v1255_v5  ;;  %v1442_v33 = vadd.f32 %v1441_v23, %v1263_v9  ;;  %v1366_v34 = vpop.f32.mrb[3].mxu1  ;;  %v1443_v35 = vpop.f32.mrb[5].mxu0 }
 0x4cd   : > { %v3641_v37 = vadd.f32 %v1366_v34, %v1259_v43  ;;  %v3643_v38 = vadd.f32 %v1443_v35, %v1267_v10 }
 0x4ce   : > { %v1601_v39 = vadd.f32 %v1365_v30, %v1359_v17  ;;  %v1726_v40 = vmul.f32 %v1365_v30, %v1365_v30  ;;  %v1851_v41 = vmax.f32 %v1359_v17, %v1365_v30  ;;  %v1968_v32 = vmin.f32 %v1359_v17, %v1365_v30 }
 0x4cf   : > { %v1615_v42 = vadd.f32 %v1442_v33, %v1436_v8  ;;  %v1728_v44 = vmul.f32 %v1442_v33, %v1442_v33  ;;  %v1865_v45 = vmax.f32 %v1436_v8, %v1442_v33  ;;  %v1982_v46 = vmin.f32 %v1436_v8, %v1442_v33 }
 0x4d0   : > { %v1602_v47 = vrot.slane %v1601_v39, 4  ;;  %v1734_v48 = vadd.f32 %v1726_v40, %v1718_v28  ;;  %v1852_v49 = vrot.slane %v1851_v41, 4  ;;  %v1969_v50 = vrot.slane %v1968_v32, 4 }
 0x4d1   : > { %v1616_v51 = vrot.slane %v1615_v42, 4  ;;  %v1748_v52 = vadd.f32 %v1728_v44, %v1720_v29  ;;  %v1866_v53 = vrot.slane %v1865_v45, 4  ;;  %v1983_v31 = vrot.slane %v1982_v46, 4 }
 0x4d2   : > { %v1603_v54 = vadd.f32 %v1602_v47, %v1601_v39  ;;  %v1735_v56 = vrot.slane %v1734_v48, 4  ;;  %v1853_v57 = vmax.f32 %v1851_v41, %v1852_v49  ;;  %v1970_v58 = vmin.f32 %v1968_v32, %v1969_v50 }
 0x4d3   : > { %v1617_v59 = vadd.f32 %v1616_v51, %v1615_v42  ;;  %v1749_v60 = vrot.slane %v1748_v52, 4  ;;  %v1867_v61 = vmax.f32 %v1865_v45, %v1866_v53  ;;  %v1984_v62 = vmin.f32 %v1982_v46, %v1983_v31 }
 0x4d4   : > { %v1604_v63 = vrot.slane %v1603_v54, 2  ;;  %v1736_v0 = vadd.f32 %v1735_v56, %v1734_v48  ;;  %v1854_v1 = vrot.slane %v1853_v57, 2  ;;  %v1971_v2 = vrot.slane %v1970_v58, 2 }
 0x4d5   : > { %v1618_v3 = vrot.slane %v1617_v59, 2  ;;  %v1750_v4 = vadd.f32 %v1749_v60, %v1748_v52  ;;  %v1868_v5 = vrot.slane %v1867_v61, 2  ;;  %v1985_v9 = vrot.slane %v1984_v62, 2 }
 0x4d6   : > { %v1605_v43 = vadd.f32 %v1604_v63, %v1603_v54  ;;  %v1737_v10 = vrot.slane %v1736_v0, 2  ;;  %v1855_v18 = vmax.f32 %v1853_v57, %v1854_v1  ;;  %v1972_v11 = vmin.f32 %v1970_v58, %v1971_v2 }
 0x4d7   : > { %v1619_v13 = vadd.f32 %v1618_v3, %v1617_v59  ;;  %v1751_v55 = vrot.slane %v1750_v4, 2  ;;  %v1869_v14 = vmax.f32 %v1867_v61, %v1868_v5  ;;  %v1986_v15 = vmin.f32 %v1984_v62, %v1985_v9 }
 0x4d8   : > { %v1606_v16 = vrot.slane %v1605_v43, 1  ;;  %v1738_v17 = vadd.f32 %v1737_v10, %v1736_v0  ;;  %v1856_v8 = vrot.slane %v1855_v18, 1  ;;  %v1973_v19 = vrot.slane %v1972_v11, 1 }
 0x4d9   : > { %v1620_v20 = vrot.slane %v1619_v13, 1  ;;  %v1752_v22 = vadd.f32 %v1751_v55, %v1750_v4  ;;  %v1870_v23 = vrot.slane %v1869_v14, 1  ;;  %v1987_v28 = vrot.slane %v1986_v15, 1 }
 0x4da   : > { %v3645_v29 = vadd.f32 %v1606_v16, %v1605_v43  ;;  %v1739_v30 = vrot.slane %v1738_v17, 1  ;;  %v3647_v33 = vmax.f32 %v1855_v18, %v1856_v8  ;;  %v3649_v34 = vmin.f32 %v1972_v11, %v1973_v19 }
 0x4db   : > { %v3651_v35 = vadd.f32 %v1620_v20, %v1619_v13  ;;  %v1753_v39 = vrot.slane %v1752_v22, 1  ;;  %v3653_v40 = vmax.f32 %v1869_v14, %v1870_v23  ;;  %v3655_v41 = vmin.f32 %v1986_v15, %v1987_v28 }
 0x4dc   : > { %v3657_v32 = vadd.f32 %v1739_v30, %v1738_v17  ;;  %v1608_v42 = vadd.f32 %v3641_v37, %v3618_v12  ;;  %v1727_v44 = vmul.f32 %v3641_v37, %v3641_v37  ;;  %v1858_v45 = vmax.f32 %v3618_v12, %v3641_v37 }
 0x4dd   : > { %v3665_v46 = vadd.f32 %v1753_v39, %v1752_v22  ;;  %v1975_v47 = vmin.f32 %v3618_v12, %v3641_v37  ;;  %v1622_v48 = vadd.f32 %v3643_v38, %v3620_v21  ;;  %v1729_v49 = vmul.f32 %v3643_v38, %v3643_v38 }
 0x4de   : > { %v1609_v50 = vrot.slane %v1608_v42, 4  ;;  %v1741_v51 = vadd.f32 %v1727_v44, %v3635_v6  ;;  %v1859_v52 = vrot.slane %v1858_v45, 4  ;;  %v1872_v53 = vmax.f32 %v3620_v21, %v3643_v38 }
 0x4df   : > { %v1976_v31 = vrot.slane %v1975_v47, 4  ;;  %v1623_v54 = vrot.slane %v1622_v48, 4  ;;  %v1755_v56 = vadd.f32 %v1729_v49, %v3639_v36  ;;  %v1989_v12 = vmin.f32 %v3620_v21, %v3643_v38 }
 0x4e0   : > { %v1610_v37 = vadd.f32 %v1609_v50, %v1608_v42  ;;  %v1742_v57 = vrot.slane %v1741_v51, 4  ;;  %v1860_v58 = vmax.f32 %v1858_v45, %v1859_v52  ;;  %v1873_v59 = vrot.slane %v1872_v53, 4 }
 0x4e1   : > { %v1977_v60 = vmin.f32 %v1975_v47, %v1976_v31  ;;  %v1624_v61 = vadd.f32 %v1623_v54, %v1622_v48  ;;  %v1756_v62 = vrot.slane %v1755_v56, 4  ;;  %v1990_v63 = vrot.slane %v1989_v12, 4 }
 0x4e2   : > { %v1611_v6 = vrot.slane %v1610_v37, 2  ;;  %v1743_v0 = vadd.f32 %v1742_v57, %v1741_v51  ;;  %v1861_v1 = vrot.slane %v1860_v58, 2  ;;  %v1874_v2 = vmax.f32 %v1872_v53, %v1873_v59 }
 0x4e3   : > { %v1978_v3 = vrot.slane %v1977_v60, 2  ;;  %v1625_v4 = vrot.slane %v1624_v61, 2  ;;  %v1757_v5 = vadd.f32 %v1756_v62, %v1755_v56  ;;  %v1991_v9 = vmin.f32 %v1989_v12, %v1990_v63 }
 0x4e4   : > { %v1612_v36 = vadd.f32 %v1611_v6, %v1610_v37  ;;  %v1744_v43 = vrot.slane %v1743_v0, 2  ;;  %v1862_v10 = vmax.f32 %v1860_v58, %v1861_v1  ;;  %v1875_v21 = vrot.slane %v1874_v2, 2 }
 0x4e5   : > { %v1979_v38 = vmin.f32 %v1977_v60, %v1978_v3  ;;  %v1626_v18 = vadd.f32 %v1625_v4, %v1624_v61  ;;  %v1758_v11 = vrot.slane %v1757_v5, 2  ;;  %v1992_v13 = vrot.slane %v1991_v9, 2 }
 0x4e6   : > { %v1613_v55 = vrot.slane %v1612_v36, 1  ;;  %v1745_v14 = vadd.f32 %v1744_v43, %v1743_v0  ;;  %v1863_v15 = vrot.slane %v1862_v10, 1  ;;  %v1876_v16 = vmax.f32 %v1874_v2, %v1875_v21 }
 0x4e7   : > { %v1980_v17 = vrot.slane %v1979_v38, 1  ;;  %v1627_v8 = vrot.slane %v1626_v18, 1  ;;  %v1759_v19 = vadd.f32 %v1758_v11, %v1757_v5  ;;  %v1993_v20 = vmin.f32 %v1991_v9, %v1992_v13  ;;  %v1512_v22 = vpop.f32.mrb[4].mxu1  ;;  %v1589_v23 = vpop.f32.mrb[6].mxu0 }
 0x4e8   : > { %v1614_v28 = vadd.f32 %v1613_v55, %v1612_v36  ;;  %v1746_v30 = vrot.slane %v1745_v14, 1  ;;  %v1864_v39 = vmax.f32 %v1862_v10, %v1863_v15  ;;  %v1877_v42 = vrot.slane %v1876_v16, 1  ;;  %v1514_v44 = vpop.f32.mrb[5].mxu1  ;;  %v1591_v45 = vpop.f32.mrb[7].mxu0 }
 0x4e9   : > { %v1981_v47 = vmin.f32 %v1979_v38, %v1980_v17  ;;  %v1628_v48 = vadd.f32 %v1627_v8, %v1626_v18  ;;  %v1760_v49 = vrot.slane %v1759_v19, 1  ;;  %v1994_v50 = vrot.slane %v1993_v20, 1 }
 0x4ea   : > { %v1665_v51 = vcombine.low %v3645_v29, %v1614_v28  ;;  %v1747_v52 = vadd.f32 %v1746_v30, %v1745_v14  ;;  %v1915_v53 = vcombine.low %v3647_v33, %v1864_v39  ;;  %v1878_v31 = vmax.f32 %v1876_v16, %v1877_v42 }
 0x4eb   : > { %v2032_v54 = vcombine.low %v3649_v34, %v1981_v47  ;;  %v1666_v56 = vcombine.low %v3651_v35, %v1628_v48  ;;  %v1761_v12 = vadd.f32 %v1760_v49, %v1759_v19  ;;  %v1995_v37 = vmin.f32 %v1993_v20, %v1994_v50  ;;  %v1518_v57 = vpop.f32.mrb[6].mxu1  ;;  %v1595_v58 = vpop.f32.mrb[8].mxu0 }
 0x4ec   : > { %v3684_v59 = vrot.slane %v1665_v51, %v3623_v7  ;;  %v1798_v60 = vcombine.low %v3657_v32, %v1747_v52  ;;  %v3688_v61 = vrot.slane %v1915_v53, %v3623_v7  ;;  %v1916_v29 = vcombine.low %v3653_v40, %v1878_v31  ;;  %v1520_v33 = vpop.f32.mrb[7].mxu1  ;;  %v1597_v62 = vpop.f32.mrb[9].mxu0 }
 0x4ed   : > { %v3692_v34 = vrot.slane %v2032_v54, %v3623_v7  ;;  %v3695_v35 = vrot.slane %v1666_v56, %v3623_v7  ;;  %v1799_v63 = vcombine.low %v3665_v46, %v1761_v12  ;;  %v2033_v6 = vcombine.low %v3655_v41, %v1995_v37 }
 0x4ee   : > { %v3700_v0 = vrot.slane %v1798_v60, %v3623_v7  ;;  %v3703_v32 = vrot.slane %v1916_v29, %v3623_v7  ;;  %v1513_v40 = vadd.f32 %v1512_v22, %v3625_v24  ;;  %v1590_v1 = vadd.f32 %v1589_v23, %v3627_v25 }
 0x4ef   : > { %v1697_v2 = vcombine.low %v3684_v59, %v3695_v35  ;;  %v3710_v3 = vrot.slane %v1799_v63, %v3623_v7  ;;  %v3713_v46 = vrot.slane %v2033_v6, %v3623_v7  ;;  %v3716_v41 = vadd.f32 %v1514_v44, %v3629_v26  ;;  %v1600_v59 = vld [vmem:[%s3952_s14] sm:$0xff] }
 0x4f0   : > { %v1947_v4 = vcombine.low %v3688_v61, %v3703_v32  ;;  %v3721_v5 = vadd.f32 %v1591_v45, %v3631_v27  ;;  %v1722_v43 = vmul.f32 %v1513_v40, %v1513_v40  ;;  %v1724_v10 = vmul.f32 %v1590_v1, %v1590_v1  ;;  %v1717_v61 = vld [vmem:[%s3953_s18] sm:$0xff] }
 0x4f1   : > { %v1830_v9 = vcombine.low %v3700_v0, %v3710_v3  ;;  %v2064_v36 = vcombine.low %v3692_v34, %v3713_v46  ;;  %v1519_v21 = vadd.f32 %v1518_v57, %v3625_v24  ;;  %v1596_v38 = vadd.f32 %v1595_v58, %v3627_v25 }
 0x4f2   : > { %v3731_v18 = vmul.f32 %v3716_v41, %v3716_v41  ;;  %v3735_v11 = vmul.f32 %v3721_v5, %v3721_v5  ;;  %v3738_v13 = vadd.f32 %v1520_v33, %v3629_v26  ;;  %v3741_v55 = vadd.f32 %v1597_v62, %v3631_v27 }
 0x4f3   : > { %v1629_v14 = vadd.f32 %v1519_v21, %v1513_v40  ;;  %v1730_v15 = vmul.f32 %v1519_v21, %v1519_v21  ;;  %v1879_v16 = vmax.f32 %v1513_v40, %v1519_v21  ;;  %v1996_v24 = vmin.f32 %v1513_v40, %v1519_v21 }
 0x4f4   : > { %v1643_v17 = vadd.f32 %v1596_v38, %v1590_v1  ;;  %v1732_v25 = vmul.f32 %v1596_v38, %v1596_v38  ;;  %v1893_v8 = vmax.f32 %v1590_v1, %v1596_v38  ;;  %v2010_v19 = vmin.f32 %v1590_v1, %v1596_v38 }
 0x4f5   : > { %v1630_v20 = vrot.slane %v1629_v14, 4  ;;  %v1762_v22 = vadd.f32 %v1730_v15, %v1722_v43  ;;  %v1880_v23 = vrot.slane %v1879_v16, 4  ;;  %v1997_v28 = vrot.slane %v1996_v24, 4 }
 0x4f6   : > { %v1644_v30 = vrot.slane %v1643_v17, 4  ;;  %v1776_v39 = vadd.f32 %v1732_v25, %v1724_v10  ;;  %v1894_v42 = vrot.slane %v1893_v8, 4  ;;  %v2011_v26 = vrot.slane %v2010_v19, 4 }
 0x4f7   : > { %v1631_v44 = vadd.f32 %v1630_v20, %v1629_v14  ;;  %v1763_v45 = vrot.slane %v1762_v22, 4  ;;  %v1881_v27 = vmax.f32 %v1879_v16, %v1880_v23  ;;  %v1998_v47 = vmin.f32 %v1996_v24, %v1997_v28 }
 0x4f8   : > { %v1645_v48 = vadd.f32 %v1644_v30, %v1643_v17  ;;  %v1777_v49 = vrot.slane %v1776_v39, 4  ;;  %v1895_v50 = vmax.f32 %v1893_v8, %v1894_v42  ;;  %v2012_v51 = vmin.f32 %v2010_v19, %v2011_v26 }
 0x4f9   : > { %v1632_v52 = vrot.slane %v1631_v44, 2  ;;  %v1764_v53 = vadd.f32 %v1763_v45, %v1762_v22  ;;  %v1882_v31 = vrot.slane %v1881_v27, 2  ;;  %v1999_v54 = vrot.slane %v1998_v47, 2 }
 0x4fa   : > { %v1646_v56 = vrot.slane %v1645_v48, 2  ;;  %v1778_v12 = vadd.f32 %v1777_v49, %v1776_v39  ;;  %v1896_v37 = vrot.slane %v1895_v50, 2  ;;  %v2013_v57 = vrot.slane %v2012_v51, 2 }
 0x4fb   : > { %v1633_v58 = vadd.f32 %v1632_v52, %v1631_v44  ;;  %v1765_v60 = vrot.slane %v1764_v53, 2  ;;  %v1883_v29 = vmax.f32 %v1881_v27, %v1882_v31  ;;  %v2000_v33 = vmin.f32 %v1998_v47, %v1999_v54 }
 0x4fc   : > { %v1647_v62 = vadd.f32 %v1646_v56, %v1645_v48  ;;  %v1779_v63 = vrot.slane %v1778_v12, 2  ;;  %v1897_v6 = vmax.f32 %v1895_v50, %v1896_v37  ;;  %v2014_v40 = vmin.f32 %v2012_v51, %v2013_v57 }
 0x4fd   : > { %v1634_v1 = vrot.slane %v1633_v58, 1  ;;  %v1766_v43 = vadd.f32 %v1765_v60, %v1764_v53  ;;  %v1884_v10 = vrot.slane %v1883_v29, 1  ;;  %v2001_v21 = vrot.slane %v2000_v33, 1 }
 0x4fe   : > { %v1648_v38 = vrot.slane %v1647_v62, 1  ;;  %v1780_v14 = vadd.f32 %v1779_v63, %v1778_v12  ;;  %v1898_v15 = vrot.slane %v1897_v6, 1  ;;  %v2015_v16 = vrot.slane %v2014_v40, 1 }
 0x4ff   : > { %v3743_v24 = vadd.f32 %v1634_v1, %v1633_v58  ;;  %v1767_v17 = vrot.slane %v1766_v43, 1  ;;  %v3745_v25 = vmax.f32 %v1883_v29, %v1884_v10  ;;  %v3747_v8 = vmin.f32 %v2000_v33, %v2001_v21 }
 0x500   : > { %v3749_v19 = vadd.f32 %v1648_v38, %v1647_v62  ;;  %v1781_v20 = vrot.slane %v1780_v14, 1  ;;  %v3751_v22 = vmax.f32 %v1897_v6, %v1898_v15  ;;  %v3753_v23 = vmin.f32 %v2014_v40, %v2015_v16 }
 0x501   : > { %v3755_v28 = vadd.f32 %v1767_v17, %v1766_v43  ;;  %v1636_v30 = vadd.f32 %v3738_v13, %v3716_v41  ;;  %v1731_v39 = vmul.f32 %v3738_v13, %v3738_v13  ;;  %v1886_v42 = vmax.f32 %v3716_v41, %v3738_v13 }
 0x502   : > { %v3763_v26 = vadd.f32 %v1781_v20, %v1780_v14  ;;  %v2003_v44 = vmin.f32 %v3716_v41, %v3738_v13  ;;  %v1650_v45 = vadd.f32 %v3741_v55, %v3721_v5  ;;  %v1733_v27 = vmul.f32 %v3741_v55, %v3741_v55 }
 0x503   : > { %v1637_v47 = vrot.slane %v1636_v30, 4  ;;  %v1769_v48 = vadd.f32 %v1731_v39, %v3731_v18  ;;  %v1887_v49 = vrot.slane %v1886_v42, 4  ;;  %v1900_v50 = vmax.f32 %v3721_v5, %v3741_v55 }
 0x504   : > { %v2004_v51 = vrot.slane %v2003_v44, 4  ;;  %v1651_v52 = vrot.slane %v1650_v45, 4  ;;  %v1783_v53 = vadd.f32 %v1733_v27, %v3735_v11  ;;  %v2017_v41 = vmin.f32 %v3721_v5, %v3741_v55 }
 0x505   : > { %v1638_v13 = vadd.f32 %v1637_v47, %v1636_v30  ;;  %v1770_v31 = vrot.slane %v1769_v48, 4  ;;  %v1888_v54 = vmax.f32 %v1886_v42, %v1887_v49  ;;  %v1901_v56 = vrot.slane %v1900_v50, 4 }
 0x506   : > { %v2005_v12 = vmin.f32 %v2003_v44, %v2004_v51  ;;  %v1652_v37 = vadd.f32 %v1651_v52, %v1650_v45  ;;  %v1784_v57 = vrot.slane %v1783_v53, 4  ;;  %v2018_v58 = vrot.slane %v2017_v41, 4 }
 0x507   : > { %v1639_v18 = vrot.slane %v1638_v13, 2  ;;  %v1771_v60 = vadd.f32 %v1770_v31, %v1769_v48  ;;  %v1889_v29 = vrot.slane %v1888_v54, 2  ;;  %v1902_v33 = vmax.f32 %v1900_v50, %v1901_v56 }
 0x508   : > { %v2006_v62 = vrot.slane %v2005_v12, 2  ;;  %v1653_v63 = vrot.slane %v1652_v37, 2  ;;  %v1785_v6 = vadd.f32 %v1784_v57, %v1783_v53  ;;  %v2019_v40 = vmin.f32 %v2017_v41, %v2018_v58 }
 0x509   : > { %v1640_v11 = vadd.f32 %v1639_v18, %v1638_v13  ;;  %v1772_v1 = vrot.slane %v1771_v60, 2  ;;  %v1890_v43 = vmax.f32 %v1888_v54, %v1889_v29  ;;  %v1903_v5 = vrot.slane %v1902_v33, 2 }
 0x50a   : > { %v2007_v55 = vmin.f32 %v2005_v12, %v2006_v62  ;;  %v1654_v10 = vadd.f32 %v1653_v63, %v1652_v37  ;;  %v1786_v21 = vrot.slane %v1785_v6, 2  ;;  %v2020_v38 = vrot.slane %v2019_v40, 2 }
 0x50b   : > { %v1641_v14 = vrot.slane %v1640_v11, 1  ;;  %v1773_v15 = vadd.f32 %v1772_v1, %v1771_v60  ;;  %v1891_v16 = vrot.slane %v1890_v43, 1  ;;  %v1904_v17 = vmax.f32 %v1902_v33, %v1903_v5 }
 0x50c   : > { %v2008_v20 = vrot.slane %v2007_v55, 1  ;;  %v1655_v30 = vrot.slane %v1654_v10, 1  ;;  %v1787_v39 = vadd.f32 %v1786_v21, %v1785_v6  ;;  %v2021_v42 = vmin.f32 %v2019_v40, %v2020_v38 }
 0x50d   : > { %v1642_v44 = vadd.f32 %v1641_v14, %v1640_v11  ;;  %v1774_v45 = vrot.slane %v1773_v15, 1  ;;  %v1892_v27 = vmax.f32 %v1890_v43, %v1891_v16  ;;  %v1905_v47 = vrot.slane %v1904_v17, 1 }
 0x50e   : > { %v2009_v48 = vmin.f32 %v2007_v55, %v2008_v20  ;;  %v1656_v49 = vadd.f32 %v1655_v30, %v1654_v10  ;;  %v1788_v50 = vrot.slane %v1787_v39, 1  ;;  %v2022_v51 = vrot.slane %v2021_v42, 1 }
 0x50f   : > { %v1667_v52 = vcombine.low %v3743_v24, %v1642_v44  ;;  %v1775_v53 = vadd.f32 %v1774_v45, %v1773_v15  ;;  %v1917_v41 = vcombine.low %v3745_v25, %v1892_v27  ;;  %v1906_v13 = vmax.f32 %v1904_v17, %v1905_v47 }
 0x510   : > { %v2034_v31 = vcombine.low %v3747_v8, %v2009_v48  ;;  %v1668_v54 = vcombine.low %v3749_v19, %v1656_v49  ;;  %v1789_v56 = vadd.f32 %v1788_v50, %v1787_v39  ;;  %v2023_v12 = vmin.f32 %v2021_v42, %v2022_v51 }
 0x511   : > { %v1689_v37 = vrot.slane %v1667_v52, %v3623_v7  ;;  %v1800_v57 = vcombine.low %v3755_v28, %v1775_v53  ;;  %v1939_v58 = vrot.slane %v1917_v41, %v3623_v7  ;;  %v1918_v18 = vcombine.low %v3751_v22, %v1906_v13 }
 0x512   : > { %v2056_v24 = vrot.slane %v2034_v31, %v3623_v7  ;;  %v1696_v60 = vrot.slane %v1668_v54, %v3623_v7  ;;  %v1801_v25 = vcombine.low %v3763_v26, %v1789_v56  ;;  %v2035_v8 = vcombine.low %v3753_v23, %v2023_v12 }
 0x513   : > { %v1822_v19 = vrot.slane %v1800_v57, %v3623_v7  ;;  %v1946_v29 = vrot.slane %v1918_v18, %v3623_v7  ;;  %v1705_v22 = vrot.slane %v1697_v2, %v3623_v7  ;;  %v1838_v23 = vrot.slane %v1830_v9, %v3623_v7 }
 0x514   : > { %v1698_v33 = vcombine.low %v1689_v37, %v1696_v60  ;;  %v1829_v62 = vrot.slane %v1801_v25, %v3623_v7  ;;  %v2063_v28 = vrot.slane %v2035_v8, %v3623_v7  ;;  %v1955_v11 = vrot.slane %v1947_v4, %v3623_v7 }
 0x515   : > { %v1948_v63 = vcombine.low %v1939_v58, %v1946_v29  ;;  %v2072_v2 = vrot.slane %v2064_v36, %v3623_v7 }
 0x516   : > { %v1712_v6 = vrot.slane %v1698_v33, %v3623_v7  ;;  %v1831_v26 = vcombine.low %v1822_v19, %v1829_v62  ;;  %v2065_v40 = vcombine.low %v2056_v24, %v2063_v28 }
 0x517   : > { %v1962_v35 = vrot.slane %v1948_v63, %v3623_v7 }
 0x518   : > { %v1713_v0 = vcombine.low %v1705_v22, %v1712_v6  ;;  %v1845_v3 = vrot.slane %v1831_v26, %v3623_v7  ;;  %v2079_v9 = vrot.slane %v2065_v40, %v3623_v7 }
 0x519   : > { %v1963_v32 = vcombine.low %v1955_v11, %v1962_v35 }
 0x51a   : > { %v1715_v4 = vadd.f32 %v1713_v0, %v1600_v59  ;;  %v1846_v1 = vcombine.low %v1838_v23, %v1845_v3  ;;  %v2080_v43 = vcombine.low %v2072_v2, %v2079_v9 }
 0x51b   : > { %1966 = vst [vmem:[%s3534_s29] sm:$0xff] %v1963_v32 }
 0x51c   : > { %1716 = vst [vmem:[%s3952_s14] sm:$0xff] %v1715_v4  ;;  %v1848_v5 = vadd.f32 %v1846_v1, %v1717_v61  ;;  %2083 = vst [vmem:[%s3539_s26] sm:$0xff] %v2080_v43 }
 0x51e   : > { %1849 = vst [vmem:[%s3953_s18] sm:$0xff] %v1848_v5 }
 0x51f PF: > { %s3954_s19 = sld [smem:[#allocation34_spill]]  ;;  %s3178_s20 = smov [#allocation23]  }
 0x520   : > { %s2099_s3 = sshll.u32 %s3178_s20, 4  ;;  %s3179_s27 = smov [#allocation24]   ;;  %s2100_s3 = int_to_ptr.vmem [resolvable:$true] %s2099_s3 }
 0x521   : > { %s2110_s21 = sshll.u32 %s3179_s27, 4  ;;  %s3037_s29 = scalar_lea.vmem %s2100_s3, 16  ;;  %s3833_s21 = int_to_ptr.vmem [resolvable:$true] %s2110_s21 }
 0x522   : > { %p3038_p6 = scmp.ne.s32.totalorder %s2100_s3, %s3037_s29  ;;  %s3043_s26 = scalar_lea.vmem %s2100_s3, 32 }
 0x523   : > { %p3044_p10 = scmp.lt.s32.totalorder %s2100_s3, %s2100_s3  ;;  %p3045_p11 = scmp.lt.s32.totalorder %s3043_s26, %s3037_s29 }
 0x525   : > { %s3955_s11 = sadd.s32 4294967295, %s3954_s19   ;;  %p3046_p2 = por %p3045_p11, %p3044_p10 }
 0x526   : > { %p3829_p4 = scmp.eq.s32.totalorder %s3955_s11, 5 }
 0x528   : > { %p3039_p8 = pnand %p3038_p6, %p3829_p4 }
 0x52a   : > { %p3040_p9 = pneg %p3039_p8 }
 0x52c   : > { %p3047_p3 = pnand %p3046_p2, %p3040_p9 }
 0x52e   : > { %3050 = shalt.err (!%p3047_p3)
}
 0x52f   : > { %s3957_s25 = sld [smem:[#allocation38_spill]] }
 0x535   : > { %s3958_s16 = smov %s3957_s25  ;;  %s3051_s18 = scalar_lea.hbm %s3957_s25, 16 }
 0x536   : > { %p3052_p12 = scmp.ne.s32.totalorder %s3958_s16, %s3051_s18  ;;  %p3057_p13 = scmp.lt.u32.totalorder %s3051_s18, %s3958_s16 }
 0x538   : > { %p3053_p5 = pnand %p3052_p12, %p3829_p4 }
 0x53a   : > { %p3054_p7 = pneg %p3053_p5 }
 0x53c   : > { %p3059_p0 = pnand %p3057_p13, %p3054_p7 }
 0x53e   : > { %3062 = shalt.err (!%p3059_p0)
}
 0x53f   : > { %2655 = dma.vmem_to_hbm [thread:$0]  (%p3829_p4), %s2100_s3, 16, %s3958_s16, [#allocation10]  }
 0x540   : > { %s3063_s20 = scalar_lea.vmem %s3833_s21, 16  ;;  %s3069_s27 = scalar_lea.vmem %s3833_s21, 32 }
 0x541   : > { %p3064_p1 = scmp.ne.s32.totalorder %s3833_s21, %s3063_s20  ;;  %p3070_p9 = scmp.lt.s32.totalorder %s3833_s21, %s3833_s21 }
 0x542   : > { %p3071_p10 = scmp.lt.s32.totalorder %s3069_s27, %s3063_s20 }
 0x543   : > { %p3065_p6 = pnand %p3064_p1, %p3829_p4 }
 0x544   : > { %p3072_p11 = por %p3071_p10, %p3070_p9 }
 0x545   : > { %p3066_p8 = pneg %p3065_p6 }
 0x547   : > { %p3073_p2 = pnand %p3072_p11, %p3066_p8 }
 0x549   : > { %3076 = shalt.err (!%p3073_p2)
}
 0x54a   : > { %s3959_s17 = sld [smem:[#allocation39_spill]] }
 0x550   : > { %s3077_s14 = scalar_lea.hbm %s3959_s17, 16 }
 0x551   : > { %p3078_p3 = scmp.ne.s32.totalorder %s3959_s17, %s3077_s14  ;;  %p3083_p7 = scmp.lt.u32.totalorder %s3077_s14, %s3959_s17 }
 0x553   : > { %p3079_p12 = pnand %p3078_p3, %p3829_p4 }
 0x555   : > { %p3080_p5 = pneg %p3079_p12 }
 0x557   : > { %p3085_p13 = pnand %p3083_p7, %p3080_p5 }
 0x559   : > { %3088 = shalt.err (!%p3085_p13)
}
 0x55a   : > { %2657 = dma.vmem_to_hbm [thread:$0]  (%p3829_p4), %s3833_s21, 16, %s3959_s17, [#allocation25]  }
 0x55b   : > { %3130 = dma.done.wait (%p3829_p4), [#allocation10], 16  }
 0x55c   : > { %3132 = vsyncadd (%p3829_p4), [#allocation10], 4294967280 }
 0x55d   : > { %3134 = dma.done.wait (%p3829_p4), [#allocation25], 16  }
 0x55e   : > { %3136 = vsyncadd (%p3829_p4), [#allocation25], 4294967280 }
 0x55f PF: > { %s3960_s28 = sld [smem:[#allocation34_spill]]  ;;  %s3961_s21 = smov %s3147_s23 }
 0x560   : > { %s3962_s22 = smov %s3151_s24  ;;  %s3963_s23 = smov %s3966_s1 }
 0x561   : > { %s3964_s24 = smov %s3970_s13 }
 0x565   : > { %s34_s25 = sadd.s32 1, %s3960_s28  }
 0x566   : > { %p31_p0 = scmp.ge.s32.totalorder %s34_s25, 8  }
 0x568   :  { %33 = sbr.rel (!%p31_p0) target bundleno = 18 (0x12), region = 207 }
 0x56f   :  { %2159 = vsyncpa [#allocation9], 1 }
 0x570   :  { %2161 = vsyncpa [#allocation9 + $0x1], 1 }
 0x571   :  { %2162 = vsyncpa [#allocation12], 1 }
 0x572   :  { %2163 = vsyncpa [#allocation15], 1 }
 0x573   :  { %2164 = vsyncpa [#allocation18], 1 }
 0x574   :  { %2165 = vsyncpa [#allocation21], 1 }
 0x575   :  { %2166 = vsyncpa [#allocation10], 1 }
 0x576   :  { %2168 = vsyncpa [#allocation10 + $0x1], 1 }
 0x577   :  { %2169 = vsyncpa [#allocation25], 1 }

// kernel: pointnet_base.6
= control target key start
LH: loop header
LB: loop body
LE: loop exit
PB: predicated region body
PF: predicated region fallthrough
CT: control target
= control target key end

     0   :  { %s2545_s21 = smov 0   ;;  %s2547_s22 = smov 0   ;;  %s3369_s0 = inlined_call_operand.vmem [shape: f32[2,16,3], index: 0, kind: input, shape index: {}]   ;;  %s3370_s1 = inlined_call_operand.vmem [shape: f32[2,3,64], index: 1, kind: input, shape index: {}]   ;;  %s3371_s2 = inlined_call_operand.vmem [shape: f32[1,64], index: 2, kind: input, shape index: {}]   ;;  %s3372_s3 = inlined_call_operand.vmem [shape: f32[64,128], index: 3, kind: input, shape index: {}]   ;;  %s3373_s4 = inlined_call_operand.vmem [shape: f32[1,128], index: 4, kind: input, shape index: {}]   ;;  %s3374_s5 = inlined_call_operand.vmem [shape: f32[128,1024], index: 5, kind: input, shape index: {}]   ;;  %s3375_s6 = inlined_call_operand.vmem [shape: f32[1,1024], index: 6, kind: input, shape index: {}]   ;;  %s3376_s7 = inlined_call_operand.vmem [shape: f32[1,64], index: 7, kind: input, shape index: {}]   ;;  %s3377_s8 = inlined_call_operand.vmem [shape: f32[1,64], index: 8, kind: input, shape index: {}]   ;;  %s3378_s9 = inlined_call_operand.vmem [shape: f32[1,128], index: 9, kind: input, shape index: {}]   ;;  %s3379_s10 = inlined_call_operand.vmem [shape: f32[1,128], index: 10, kind: input, shape index: {}]   ;;  %s3380_s11 = inlined_call_operand.vmem [shape: f32[1,64], index: 11, kind: output, shape index: {0}]   ;;  %s3381_s12 = inlined_call_operand.vmem [shape: f32[1,64], index: 12, kind: output, shape index: {1}]   ;;  %s3382_s13 = inlined_call_operand.vmem [shape: f32[1,1024], index: 13, kind: output, shape index: {2}]   ;;  %s3383_s14 = inlined_call_operand.vmem [shape: f32[1,1024], index: 14, kind: output, shape index: {3}]   ;;  %s3384_s15 = inlined_call_operand.vmem [shape: f32[2,1,1024], index: 15, kind: output, shape index: {4}]   ;;  %s3385_s16 = inlined_call_operand.vmem [shape: f32[2,1,1024], index: 16, kind: output, shape index: {5}]  }
   0x1   :  { %3389 = sst [smem:[#allocation13_spill]] %s3369_s0  ;;  %s2549_s23 = smov 0  }
   0x2   :  { %s2551_s24 = smov 0   ;;  %s2553_s25 = smov 0  }
   0x3 LB: > { %3390 = sst [smem:[#allocation8_spill]] %s2442_s23  ;;  %s42_s26 = sadd.s32 1, %s2442_s23  ;;  %s2450_s25 = sphi %s2553_s25, %s27_s25   ;;  %s2446_s24 = sphi %s2551_s24, %s3400_s24   ;;  %s2442_s23 = sphi %s2549_s23, %s3399_s23   ;;  %s2438_s22 = sphi %s2547_s22, %s3398_s22   ;;  %s2434_s21 = sphi %s2545_s21, %s3397_s21  }
   0x4   : > { %3391 = sst [smem:[#allocation9_spill]] %s2446_s24  ;;  %s46_s27 = sadd.s32 1, %s2446_s24 }
   0x5   : > { %3392 = sst [smem:[#allocation10_spill]] %s2450_s25  ;;  %p44_p0 = scmp.ge.s32.totalorder %s42_s26, 2 }
   0x6   : > { %p2109_p1 = scmp.ge.s32.totalorder %s2450_s25, 1  ;;  %p488_p2 = scmp.lt.s32.totalorder %s2450_s25, 7 }
   0x7   : > { %s3402_s26 = smov (%p44_p0, %s42_s26), 0  ;;  %s3404_s27 = smov (!%p44_p0, %s46_s27), %s2446_s24 }
   0x8   : > { %3393 = sst [smem:[#allocation11_spill]] %s3402_s26  ;;  %p489_p3 = pnand %p2109_p1, %p488_p2 }
   0x9   : > { %p48_p4 = scmp.ge.s32.totalorder %s3404_s27, 3  ;;  %p550_p5 = scmp.lt.s32.totalorder (!%p489_p3), %s2434_s21, 1  ;;  %v2452_v0 = vmov (!%p489_p3), 1   ;;  %v2453_v1 = vmov (!%p489_p3), 0   ;;  %v2454_v4 = vmov (!%p489_p3), 2   ;;  %v589_v5 = vlaneseq (!%p489_p3) }
   0xa   : > { %492 = sbr.rel (%p489_p3) target bundleno = 1067 (0x42b), region = 64  ;;  %2405 = vset.pattern.permute.xlu1 (!%p489_p3), %v2452_v0  ;;  %2404 = vset.pattern.permute.xlu0 (!%p489_p3), %v2453_v1  ;;  %s3395_s18 = sld [smem:[#allocation13_spill]] (!%p489_p3)  ;;  %v2116_v28 = vld [vmem:[%s3371_s2] ss:$0 sm:$0xff] (!%p489_p3) }
   0xb   : > { %s3406_s27 = smov (%p48_p4, %s3404_s27), 0  ;;  %p571_p6 = scmp.eq.s32.totalorder (!%p489_p3), %s2434_s21, 0  ;;  %v2595_v6 = vshrl.u32 (!%p489_p3), %v589_v5, 7 }
   0xc   : > { %3394 = sst [smem:[#allocation12_spill]] %s3406_s27  ;;  %p2117_p7 = scmp.ne.s32.totalorder (!%p489_p3), %s2438_s22, 0 }
   0xd   : > { %v605_v7 = vsub.s32 (!%p489_p3), 1, %v2595_v6  ;;  %v591_v8 = vsub.s32 (!%p489_p3), 0, %v2595_v6  ;;  %v621_v12 = vsub.s32 (!%p489_p3), 2, %v2595_v6 }
  0x11   : > { %s551_s28 = scalar_select %p550_p5, %s2434_s21, 1 }
  0x13   : > { %s2134_s29 = sshll.u32 %s551_s28, 4  ;;  %s2113_s30 = sshll.u32 %s551_s28, 3 }
  0x14   : > { %s557_s19 = scalar_lea.vmem %s3395_s18, %s2134_s29  ;;  %s2587_s27 = scalar_lea.vmem %s3384_s15, %s2113_s30 }
  0x15   : > { %s2592_s25 = scalar_lea.vmem %s3385_s16, %s2113_s30  ;;  %v575_v2 = vld [vmem:[%s557_s19] sm:$0xff]  ;;  %v576_v3 = vld [vmem:[%s557_s19 + $0x8] sm:$0xff]  ;;  %s2112_s26 = sshll.u32 %s551_s28, 2 }
  0x16   : > { %596 = vperm.xlu1 %2405, %v575_v2   ;;  %581 = vperm.xlu0 %2404, %v575_v2   ;;  %s562_s24 = scalar_lea.vmem %s3370_s1, %s2112_s26 }
  0x17   : > { %v577_v9 = vld [vmem:[%s562_s24] sm:$0x7] }
  0x18   : > { %v606_v13 = vrot.slane %v577_v9, %v605_v7  ;;  %v592_v14 = vrot.slane %v577_v9, %v591_v8  ;;  %v622_v17 = vrot.slane %v577_v9, %v621_v12 }
  0x1a   : > { %600 = vperm.xlu1 %2405, %v576_v3   ;;  %586 = vperm.xlu0 %2404, %v576_v3  }
  0x1e   : > { %2407 = vset.pattern.permute.xlu1 %v2454_v4  ;;  %2406 = vset.pattern.permute.xlu0 %v2454_v4 }
  0x1f   : > { %616 = vperm.xlu1 %2407, %v576_v3   ;;  %612 = vperm.xlu0 %2406, %v575_v2  }
  0x95   : > { %v597_v10 = vpop.permute.xlu1 %596  ;;  %v582_v11 = vpop.permute.xlu0 %581 }
  0x96   : > { %v607_v18 = vmul.f32 %v606_v13, %v597_v10  ;;  %v593_v19 = vmul.f32 %v592_v14, %v582_v11 }
  0x98   : > { %v609_v24 = vadd.f32 %v607_v18, %v593_v19 }
  0x99   : > { %v601_v15 = vpop.permute.xlu1 %600  ;;  %v587_v16 = vpop.permute.xlu0 %586 }
  0x9a   : > { %v608_v20 = vmul.f32 %v606_v13, %v601_v15  ;;  %v594_v21 = vmul.f32 %v592_v14, %v587_v16 }
  0x9c   : > { %v610_v25 = vadd.f32 %v608_v20, %v594_v21 }
  0x9d   : > { %638 = sbr.rel (%p2117_p7) target bundleno = 191 (0xbf), region = 68 }
  0x9e   : > { %v617_v22 = vpop.permute.xlu1 %616  ;;  %v613_v23 = vpop.permute.xlu0 %612 }
  0x9f   : > { %v624_v26 = vmul.f32 %v622_v17, %v617_v22  ;;  %v623_v27 = vmul.f32 %v622_v17, %v613_v23 }
  0xa1   : > { %v626_v29 = vadd.f32 %v624_v26, %v610_v25  ;;  %v625_v30 = vadd.f32 %v623_v27, %v609_v24 }
  0xa3   : > { %v2612_v31 = vadd.f32 %v2116_v28, %v626_v29  ;;  %v2614_v32 = vadd.f32 %v2116_v28, %v625_v30 }
  0xa4   : > { %640 = sbr.rel (!%p571_p6) target bundleno = 171 (0xab), region = 72  ;;  %vm641_vm0 = vcmask (%p571_p6), 516096   ;;  %v2455_v33 = vmov (%p571_p6), 0.0  }
  0xa5   : > { %642 = vst.msk [vmem:[#allocation2] sm:$0x1] (%p571_p6), %vm641_vm0, %v2455_v33  ;;  %643 = vst.msk [vmem:[#allocation3] sm:$0x1] (%p571_p6), %vm641_vm0, %v2455_v33 }
  0xab PF: > { %vm645_vm1 = vcmask 523264   ;;  %v659_v34 = vmul.f32 %v2614_v32, %v2614_v32  ;;  %v660_v35 = vmul.f32 %v2612_v31, %v2612_v31  ;;  %vm656_vm2 = vcmask 516096  }
  0xac   : > { %v646_v36 = vsel %vm645_vm1, %v2614_v32, 0.0  ;;  %v647_v37 = vsel %vm645_vm1, %v2612_v31, 0.0  ;;  %v644_v51 = vld [vmem:[#allocation2] sm:$0x1]  ;;  %v658_v54 = vld [vmem:[#allocation3] sm:$0x1] }
  0xad   : > { %v648_v38 = vadd.f32 %v647_v37, %v646_v36  ;;  %v661_v39 = vsel %vm645_vm1, %v659_v34, 0.0  ;;  %v662_v40 = vsel %vm645_vm1, %v660_v35, 0.0 }
  0xae   : > { %v663_v41 = vadd.f32 %v662_v40, %v661_v39 }
  0xaf   : > { %v649_v42 = vrot.slane %v648_v38, 4 }
  0xb0   : > { %v664_v43 = vrot.slane %v663_v41, 4 }
  0xb1   : > { %v650_v44 = vadd.f32 %v649_v42, %v648_v38 }
  0xb2   : > { %v665_v45 = vadd.f32 %v664_v43, %v663_v41 }
  0xb3   : > { %v651_v46 = vrot.slane %v650_v44, 2 }
  0xb4   : > { %v666_v47 = vrot.slane %v665_v45, 2 }
  0xb5   : > { %v652_v48 = vadd.f32 %v651_v46, %v650_v44 }
  0xb6   : > { %v667_v49 = vadd.f32 %v666_v47, %v665_v45 }
  0xb7   : > { %v653_v50 = vrot.slane %v652_v48, 1 }
  0xb8   : > { %v668_v52 = vrot.slane %v667_v49, 1 }
  0xb9   : > { %v654_v53 = vadd.f32 %v653_v50, %v652_v48 }
  0xba   : > { %v669_v55 = vadd.f32 %v668_v52, %v667_v49 }
  0xbb   : > { %v655_v56 = vadd.f32 %v654_v53, %v644_v51 }
  0xbc   : > { %v670_v57 = vadd.f32 %v669_v55, %v658_v54 }
  0xbd   : > { %657 = vst.msk [vmem:[#allocation2] sm:$0x1] %vm656_vm2, %v655_v56 }
  0xbe   : > { %671 = vst.msk [vmem:[#allocation3] sm:$0x1] %vm656_vm2, %v670_v57 }
  0xbf PF: > { %p2118_p8 = scmp.ne.s32.totalorder %s2438_s22, 1 }
  0xc1   : > { %675 = sbr.rel (%p2118_p8) target bundleno = 482 (0x1e2), region = 76 }
  0xc8   : > { %677 = sbr.rel (!%p571_p6) target bundleno = 229 (0xe5), region = 80  ;;  %v678_v58 = vld [vmem:[#allocation2] sm:$0x1] (%p571_p6)  ;;  %v680_v59 = vld [vmem:[#allocation3] sm:$0x1] (%p571_p6)  ;;  %v2456_v62 = vmov (%p571_p6), 0.0  }
  0xc9   : > { %v679_v60 = vmul.f32 (%p571_p6), 0.03125, %v678_v58  ;;  %v681_v61 = vmul.f32 (%p571_p6), 0.03125, %v680_v59  ;;  %695 = vst [vmem:[#allocation4] sm:$0x1] (%p571_p6), %v2456_v62  ;;  %696 = vst [vmem:[#allocation5] sm:$0x1] (%p571_p6), %v2456_v62 }
  0xca   : > { %v685_v3 = vld [vmem:[%s3376_s7] sm:$0x1] (%p571_p6)  ;;  %vm689_vm3 = vcmask (%p571_p6), 516096  }
  0xcb   : > { %v682_v63 = vmul.f32 (%p571_p6), %v679_v60, %v679_v60  ;;  %v691_v9 = vld [vmem:[%s3377_s8] sm:$0x1] (%p571_p6) }
  0xcd   : > { %v683_v0 = vsub.f32 (%p571_p6), %v681_v61, %v682_v63 }
  0xcf   : > { %v684_v1 = vmax.f32 %v683_v0, 0.0 }
  0xd1   : > { %v686_v2 = vadd.f32 1e-05, %v684_v1 }
  0xd3   : > { %2408 = vrsqrt.f32 %v686_v2 }
  0xdd   : > { %v2409_v4 = vpop.eup %2408 }
  0xde   : > { %v688_v5 = vmul.f32 %v2409_v4, %v685_v3 }
  0xe0   : > { %690 = vst.msk [vmem:[%s3380_s11] sm:$0x1] %vm689_vm3, %v688_v5  ;;  %v692_v10 = vmul.f32 %v688_v5, %v679_v60 }
  0xe2   : > { %v693_v11 = vsub.f32 %v691_v9, %v692_v10 }
  0xe4   : > { %694 = vst.msk [vmem:[%s3381_s12] sm:$0x1] %vm689_vm3, %v693_v11 }
  0xe5 PF: > { %v717_v13 = vld [vmem:[%s3372_s3] sm:$0xff]  ;;  %v718_v14 = vld [vmem:[%s3372_s3 + $0x8] sm:$0xff]  ;;  %v719_v15 = vld [vmem:[%s3372_s3 + $0x10] sm:$0xff]  ;;  %vm732_vm4 = vcmask 523264  }
  0xe6   : > { %v2194_v16 = vpack.c.bf16 %v718_v14, %v717_v13  ;;  %v720_v17 = vld [vmem:[%s3372_s3 + $0x18] sm:$0xff]  ;;  %v721_v19 = vld [vmem:[%s3372_s3 + $0x20] sm:$0xff]  ;;  %v722_v20 = vld [vmem:[%s3372_s3 + $0x28] sm:$0xff] }
  0xe7   : > { %v2198_v18 = vpack.c.bf16 %v720_v17, %v719_v15  ;;  %v2119_v21 = vld [vmem:[%s3380_s11] ss:$0 sm:$0xff]  ;;  %v2202_v24 = vpack.c.bf16 %v722_v20, %v721_v19  ;;  %v723_v26 = vld [vmem:[%s3372_s3 + $0x30] sm:$0xff]  ;;  %v724_v27 = vld [vmem:[%s3372_s3 + $0x38] sm:$0xff] }
  0xe8   : > { %2195 = vmatprep.subr.bf16.mxu0 %v2194_v16  ;;  %v704_v22 = vmul.f32 %v2119_v21, %v2614_v32  ;;  %v705_v28 = vmul.f32 %v2119_v21, %v2612_v31  ;;  %v2206_v30 = vpack.c.bf16 %v724_v27, %v723_v26  ;;  %v2121_v35 = vld [vmem:[%s3373_s4] ss:$0 sm:$0xff]  ;;  %v814_v53 = vld [vmem:[#allocation4] sm:$0x1]  ;;  %v824_v56 = vld [vmem:[#allocation5] sm:$0x1] }
  0xe9   : > { %2197 = vmatpush3.bf16.msra.mxu0 %v2194_v16 }
  0xea   : > { %2199 = vmatprep.subr.bf16.mxu0 %v2198_v18 }
  0xeb   : > { %v2120_v23 = vld [vmem:[%s3381_s12] ss:$0 sm:$0xff] }
  0xec   : > { %v713_v25 = vadd.f32 %v2120_v23, %v704_v22  ;;  %v714_v33 = vadd.f32 %v2120_v23, %v705_v28 }
  0xed   : > { %2201 = vmatpush3.bf16.msra.mxu0 %v2198_v18 }
  0xee   : > { %v715_v29 = vmax.f32 %v713_v25, 0.0  ;;  %2203 = vmatprep.subr.bf16.mxu0 %v2202_v24  ;;  %v716_v34 = vmax.f32 %v714_v33, 0.0 }
  0xf0   : > { %2172 = vmatprep.mubr.msk.f32.mxu0 %vm732_vm4, %v715_v29 }
  0xf1   : > { %2205 = vmatpush3.bf16.msra.mxu0 %v2202_v24 }
  0xf2   : > { %2207 = vmatprep.subr.bf16.mxu0 %v2206_v30 }
  0xf5   : > { %2209 = vmatpush3.bf16.msra.mxu0 %v2206_v30 }
  0xf8   : > { %2173 = vmatmul.mubr.msk.f32.vlgmr.msra.gmra.mrb[0].mxu0 %vm732_vm4, %v716_v34 }
 0x1cb   : > { %v2174_v36 = vpop.f32.mrb[0].mxu0 }
 0x1cc   : > { %v811_v37 = vadd.f32 %v2174_v36, %v2121_v35  ;;  %v805_v38 = vpop.f32.mrb[1].mxu0 }
 0x1cd   : > { %v806_v39 = vadd.f32 %v2121_v35, %v805_v38 }
 0x1ce   : > { %v826_v40 = vmul.f32 %v811_v37, %v811_v37 }
 0x1cf   : > { %v815_v41 = vadd.f32 %v811_v37, %v806_v39  ;;  %v825_v42 = vmul.f32 %v806_v39, %v806_v39 }
 0x1d1   : > { %v816_v43 = vrot.slane %v815_v41, 4  ;;  %v827_v44 = vadd.f32 %v826_v40, %v825_v42 }
 0x1d3   : > { %v817_v45 = vadd.f32 %v816_v43, %v815_v41  ;;  %v828_v46 = vrot.slane %v827_v44, 4 }
 0x1d5   : > { %v818_v47 = vrot.slane %v817_v45, 2  ;;  %v829_v48 = vadd.f32 %v828_v46, %v827_v44 }
 0x1d7   : > { %v819_v49 = vadd.f32 %v818_v47, %v817_v45  ;;  %v830_v50 = vrot.slane %v829_v48, 2 }
 0x1d9   : > { %v820_v51 = vrot.slane %v819_v49, 1  ;;  %v831_v52 = vadd.f32 %v830_v50, %v829_v48 }
 0x1db   : > { %v821_v54 = vadd.f32 %v820_v51, %v819_v49  ;;  %v832_v55 = vrot.slane %v831_v52, 1 }
 0x1dd   : > { %v822_v57 = vadd.f32 %v821_v54, %v814_v53  ;;  %v833_v58 = vadd.f32 %v832_v55, %v831_v52 }
 0x1df   : > { %823 = vst [vmem:[#allocation4] sm:$0x1] %v822_v57  ;;  %v834_v59 = vadd.f32 %v833_v58, %v824_v56 }
 0x1e1   : > { %835 = vst [vmem:[#allocation5] sm:$0x1] %v834_v59 }
 0x1e2 PF: > { %p2124_p9 = scmp.ne.s32.totalorder %s2438_s22, 2 }
 0x1e4   : > { %839 = sbr.rel (%p2124_p9) target bundleno = 1067 (0x42b), region = 84 }
 0x1eb   : > { %841 = sbr.rel (!%p571_p6) target bundleno = 528 (0x210), region = 88  ;;  %v842_v60 = vld [vmem:[#allocation4] sm:$0x1] (%p571_p6)  ;;  %v844_v61 = vld [vmem:[#allocation5] sm:$0x1] (%p571_p6)  ;;  %v2457_v0 = vmov (%p571_p6), 0.0  }
 0x1ec   : > { %v843_v62 = vmul.f32 (%p571_p6), 0.03125, %v842_v60  ;;  %v845_v63 = vmul.f32 (%p571_p6), 0.03125, %v844_v61  ;;  %859 = vst [vmem:[%s3382_s13] sm:$0xff] (%p571_p6), %v2457_v0  ;;  %860 = vst [vmem:[%s3383_s14] sm:$0xff] (%p571_p6), %v2457_v0  ;;  %v849_v5 = vld [vmem:[%s3378_s9] sm:$0x1] (%p571_p6) }
 0x1ed   : > { %v854_v11 = vld [vmem:[%s3379_s10] sm:$0x1] (%p571_p6) }
 0x1ee   : > { %v846_v1 = vmul.f32 (%p571_p6), %v843_v62, %v843_v62 }
 0x1f0   : > { %v847_v2 = vsub.f32 (%p571_p6), %v845_v63, %v846_v1 }
 0x1f2   : > { %v848_v3 = vmax.f32 %v847_v2, 0.0 }
 0x1f4   : > { %v850_v4 = vadd.f32 1e-05, %v848_v3 }
 0x1f6   : > { %2410 = vrsqrt.f32 %v850_v4 }
 0x200   : > { %v2411_v9 = vpop.eup %2410 }
 0x201   : > { %v852_v10 = vmul.f32 %v2411_v9, %v849_v5 }
 0x203   : > { %853 = vst [vmem:[#allocation6] sm:$0x1] %v852_v10 }
 0x20a   : > { %v855_v13 = vld [vmem:[#allocation6] sm:$0x1] }
 0x20b   : > { %v856_v14 = vmul.f32 %v855_v13, %v843_v62 }
 0x20d   : > { %v857_v15 = vsub.f32 %v854_v11, %v856_v14 }
 0x20f   : > { %858 = vst [vmem:[#allocation7] sm:$0x1] %v857_v15 }
 0x210 PF: > { %v886_v16 = vld [vmem:[%s3372_s3] sm:$0xff]  ;;  %v887_v17 = vld [vmem:[%s3372_s3 + $0x8] sm:$0xff]  ;;  %v888_v18 = vld [vmem:[%s3372_s3 + $0x10] sm:$0xff]  ;;  %vm901_vm5 = vcmask 523264  }
 0x211   : > { %v2210_v19 = vpack.c.bf16 %v887_v17, %v886_v16  ;;  %v889_v20 = vld [vmem:[%s3372_s3 + $0x18] sm:$0xff]  ;;  %v890_v22 = vld [vmem:[%s3372_s3 + $0x20] sm:$0xff]  ;;  %v891_v23 = vld [vmem:[%s3372_s3 + $0x28] sm:$0xff] }
 0x212   : > { %v2214_v21 = vpack.c.bf16 %v889_v20, %v888_v18  ;;  %v2125_v24 = vld [vmem:[%s3380_s11] ss:$0 sm:$0xff]  ;;  %v1004_v27 = vld [vmem:[%s3374_s5 + $0x8] sm:$0xff]  ;;  %v892_v33 = vld [vmem:[%s3372_s3 + $0x30] sm:$0xff] }
 0x213   : > { %2211 = vmatprep.subr.bf16.mxu0 %v2210_v19  ;;  %v873_v25 = vmul.f32 %v2125_v24, %v2614_v32  ;;  %v2126_v26 = vld [vmem:[%s3381_s12] ss:$0 sm:$0xff]  ;;  %v1012_v28 = vld [vmem:[%s3374_s5 + $0x48] sm:$0xff]  ;;  %v2218_v32 = vpack.c.bf16 %v891_v23, %v890_v22  ;;  %v893_v36 = vld [vmem:[%s3372_s3 + $0x38] sm:$0xff]  ;;  %v874_v40 = vmul.f32 %v2125_v24, %v2612_v31 }
 0x214   : > { %2213 = vmatpush3.bf16.msra.mxu0 %v2210_v19  ;;  %v2226_v29 = vpack.c.bf16 %v1012_v28, %v1004_v27  ;;  %v1003_v30 = vld [vmem:[%s3374_s5] sm:$0xff]  ;;  %v1020_v38 = vld [vmem:[%s3374_s5 + $0x88] sm:$0xff]  ;;  %v2222_v47 = vpack.c.bf16 %v893_v36, %v892_v33  ;;  %v1006_v31 = vld [vmem:[%s3374_s5 + $0x18] sm:$0xff] }
 0x215   : > { %2215 = vmatprep.subr.bf16.mxu0 %v2214_v21  ;;  %v882_v34 = vadd.f32 %v2126_v26, %v873_v25  ;;  %v1011_v35 = vld [vmem:[%s3374_s5 + $0x40] sm:$0xff]  ;;  %v1028_v39 = vld [vmem:[%s3374_s5 + $0xc8] sm:$0xff]  ;;  %v1014_v49 = vld [vmem:[%s3374_s5 + $0x58] sm:$0xff]  ;;  %v883_v53 = vadd.f32 %v2126_v26, %v874_v40 }
 0x216   : > { %2227 = vmatprep.subr.bf16.mxu1 %v2226_v29  ;;  %v2228_v37 = vpack.c.bf16 %v1011_v35, %v1003_v30  ;;  %v2230_v42 = vpack.c.bf16 %v1028_v39, %v1020_v38  ;;  %v1019_v43 = vld [vmem:[%s3374_s5 + $0x80] sm:$0xff]  ;;  %v1036_v46 = vld [vmem:[%s3374_s5 + $0x108] sm:$0xff]  ;;  %v1005_v56 = vld [vmem:[%s3374_s5 + $0x10] sm:$0xff]  ;;  %v2258_v59 = vpack.c.bf16 %v1014_v49, %v1006_v31 }
 0x217   : > { %v884_v41 = vmax.f32 %v882_v34, 0.0  ;;  %v1027_v44 = vld [vmem:[%s3374_s5 + $0xc0] sm:$0xff]  ;;  %v1044_v48 = vld [vmem:[%s3374_s5 + $0x148] sm:$0xff]  ;;  %v1013_v57 = vld [vmem:[%s3374_s5 + $0x50] sm:$0xff]  ;;  %v885_v3 = vmax.f32 %v883_v53, 0.0 }
 0x218   : > { %2217 = vmatpush3.bf16.msra.mxu0 %v2214_v21  ;;  %2229 = vmatpush1.bf16.msra.mxu1 %v2228_v37  ;;  %v2232_v45 = vpack.c.bf16 %v1027_v44, %v1019_v43  ;;  %v2234_v50 = vpack.c.bf16 %v1044_v48, %v1036_v46  ;;  %v1035_v51 = vld [vmem:[%s3374_s5 + $0x100] sm:$0xff]  ;;  %v1052_v54 = vld [vmem:[%s3374_s5 + $0x188] sm:$0xff]  ;;  %v1022_v60 = vld [vmem:[%s3374_s5 + $0x98] sm:$0xff]  ;;  %v2260_v4 = vpack.c.bf16 %v1013_v57, %v1005_v56 }
 0x219   : > { %2219 = vmatprep.subr.bf16.mxu0 %v2218_v32  ;;  %2191 = vmatprep.mubr.msk.f32.mxu0 %vm901_vm5, %v884_v41  ;;  %v1043_v52 = vld [vmem:[%s3374_s5 + $0x140] sm:$0xff]  ;;  %v1060_v55 = vld [vmem:[%s3374_s5 + $0x1c8] sm:$0xff]  ;;  %v1030_v0 = vld [vmem:[%s3374_s5 + $0xd8] sm:$0xff] }
 0x21a   : > { %2231 = vmatprep.subr.bf16.mxu1 %v2230_v42  ;;  %v2236_v58 = vpack.c.bf16 %v1043_v52, %v1035_v51  ;;  %v2238_v61 = vpack.c.bf16 %v1060_v55, %v1052_v54  ;;  %v1051_v62 = vld [vmem:[%s3374_s5 + $0x180] sm:$0xff]  ;;  %v1068_v1 = vld [vmem:[%s3374_s5 + $0x208] sm:$0xff]  ;;  %v1021_v5 = vld [vmem:[%s3374_s5 + $0x90] sm:$0xff]  ;;  %v2262_v11 = vpack.c.bf16 %v1030_v0, %v1022_v60 }
 0x21b   : > { %v1059_v63 = vld [vmem:[%s3374_s5 + $0x1c0] sm:$0xff]  ;;  %v1076_v2 = vld [vmem:[%s3374_s5 + $0x248] sm:$0xff]  ;;  %v1029_v9 = vld [vmem:[%s3374_s5 + $0xd0] sm:$0xff] }
 0x21c   : > { %2221 = vmatpush3.bf16.msra.mxu0 %v2218_v32  ;;  %2233 = vmatpush1.bf16.msra.mxu1 %v2232_v45  ;;  %v2240_v10 = vpack.c.bf16 %v1059_v63, %v1051_v62  ;;  %v1038_v13 = vld [vmem:[%s3374_s5 + $0x118] sm:$0xff]  ;;  %v2242_v14 = vpack.c.bf16 %v1076_v2, %v1068_v1  ;;  %v1067_v15 = vld [vmem:[%s3374_s5 + $0x200] sm:$0xff]  ;;  %v1084_v18 = vld [vmem:[%s3374_s5 + $0x288] sm:$0xff]  ;;  %v2264_v20 = vpack.c.bf16 %v1029_v9, %v1021_v5 }
 0x21d   : > { %2223 = vmatprep.subr.bf16.mxu0 %v2222_v47  ;;  %2235 = vmatprep.subr.bf16.mxu1 %v2234_v50  ;;  %v1075_v16 = vld [vmem:[%s3374_s5 + $0x240] sm:$0xff]  ;;  %v1046_v17 = vld [vmem:[%s3374_s5 + $0x158] sm:$0xff]  ;;  %v1092_v19 = vld [vmem:[%s3374_s5 + $0x2c8] sm:$0xff] }
 0x21e   : > { %v1037_v21 = vld [vmem:[%s3374_s5 + $0x110] sm:$0xff]  ;;  %v2244_v22 = vpack.c.bf16 %v1075_v16, %v1067_v15  ;;  %v2266_v23 = vpack.c.bf16 %v1046_v17, %v1038_v13  ;;  %v2246_v25 = vpack.c.bf16 %v1092_v19, %v1084_v18  ;;  %v1083_v26 = vld [vmem:[%s3374_s5 + $0x280] sm:$0xff]  ;;  %v1054_v28 = vld [vmem:[%s3374_s5 + $0x198] sm:$0xff]  ;;  %v2458_v18 = vmov 0.0  }
 0x21f   : > { %v1045_v24 = vld [vmem:[%s3374_s5 + $0x150] sm:$0xff]  ;;  %v1091_v27 = vld [vmem:[%s3374_s5 + $0x2c0] sm:$0xff]  ;;  %v1062_v29 = vld [vmem:[%s3374_s5 + $0x1d8] sm:$0xff]  ;;  %1237 = vmatprep.mubr.f32.mxu1 %v2458_v18 }
 0x220   : > { %2225 = vmatpush3.bf16.msra.mxu0 %v2222_v47  ;;  %2237 = vmatpush1.bf16.msra.mxu1 %v2236_v58  ;;  %v2268_v30 = vpack.c.bf16 %v1045_v24, %v1037_v21  ;;  %v2248_v32 = vpack.c.bf16 %v1091_v27, %v1083_v26  ;;  %v2270_v33 = vpack.c.bf16 %v1062_v29, %v1054_v28  ;;  %v1053_v34 = vld [vmem:[%s3374_s5 + $0x190] sm:$0xff]  ;;  %v1070_v36 = vld [vmem:[%s3374_s5 + $0x218] sm:$0xff]  ;;  %v1100_v48 = vld [vmem:[%s3374_s5 + $0x308] sm:$0xff] }
 0x221   : > { %2259 = vmatprep.subr.bf16.mxu0 %v2258_v59  ;;  %2239 = vmatprep.subr.bf16.mxu1 %v2238_v61  ;;  %v1061_v35 = vld [vmem:[%s3374_s5 + $0x1d0] sm:$0xff]  ;;  %v1078_v37 = vld [vmem:[%s3374_s5 + $0x258] sm:$0xff]  ;;  %v1108_v49 = vld [vmem:[%s3374_s5 + $0x348] sm:$0xff] }
 0x222   : > { %v2272_v38 = vpack.c.bf16 %v1061_v35, %v1053_v34  ;;  %v2274_v39 = vpack.c.bf16 %v1078_v37, %v1070_v36  ;;  %v1069_v40 = vld [vmem:[%s3374_s5 + $0x210] sm:$0xff]  ;;  %v1086_v42 = vld [vmem:[%s3374_s5 + $0x298] sm:$0xff]  ;;  %v2250_v51 = vpack.c.bf16 %v1108_v49, %v1100_v48  ;;  %v1099_v53 = vld [vmem:[%s3374_s5 + $0x300] sm:$0xff] }
 0x223   : > { %2192 = vmatmul.mubr.msk.f32.vlgmr.msra.gmra.mrb[0].mxu0 %vm901_vm5, %v885_v3  ;;  %v1077_v41 = vld [vmem:[%s3374_s5 + $0x250] sm:$0xff]  ;;  %v1094_v43 = vld [vmem:[%s3374_s5 + $0x2d8] sm:$0xff]  ;;  %v1107_v54 = vld [vmem:[%s3374_s5 + $0x340] sm:$0xff] }
 0x224   : > { %2261 = vmatpush1.bf16.msra.mxu0 %v2260_v4  ;;  %2241 = vmatpush1.bf16.msra.mxu1 %v2240_v10  ;;  %v2276_v44 = vpack.c.bf16 %v1077_v41, %v1069_v40  ;;  %v2278_v45 = vpack.c.bf16 %v1094_v43, %v1086_v42  ;;  %v1085_v46 = vld [vmem:[%s3374_s5 + $0x290] sm:$0xff]  ;;  %v1102_v50 = vld [vmem:[%s3374_s5 + $0x318] sm:$0xff]  ;;  %v2252_v56 = vpack.c.bf16 %v1107_v54, %v1099_v53  ;;  %v1116_v60 = vld [vmem:[%s3374_s5 + $0x388] sm:$0xff] }
 0x225   : > { %2263 = vmatprep.subr.bf16.mxu0 %v2262_v11  ;;  %2243 = vmatprep.subr.bf16.mxu1 %v2242_v14  ;;  %v1093_v47 = vld [vmem:[%s3374_s5 + $0x2d0] sm:$0xff]  ;;  %v1110_v52 = vld [vmem:[%s3374_s5 + $0x358] sm:$0xff]  ;;  %v1124_v61 = vld [vmem:[%s3374_s5 + $0x3c8] sm:$0xff] }
 0x226   : > { %v2280_v31 = vpack.c.bf16 %v1093_v47, %v1085_v46  ;;  %v2282_v55 = vpack.c.bf16 %v1110_v52, %v1102_v50  ;;  %v1101_v57 = vld [vmem:[%s3374_s5 + $0x310] sm:$0xff]  ;;  %v1118_v62 = vld [vmem:[%s3374_s5 + $0x398] sm:$0xff]  ;;  %v2254_v63 = vpack.c.bf16 %v1124_v61, %v1116_v60  ;;  %v1115_v1 = vld [vmem:[%s3374_s5 + $0x380] sm:$0xff]  ;;  %1314 = vmatprep.mubr.f32.mxu0 %v2458_v18 }
 0x227   : > { %v1109_v58 = vld [vmem:[%s3374_s5 + $0x350] sm:$0xff]  ;;  %v1126_v0 = vld [vmem:[%s3374_s5 + $0x3d8] sm:$0xff]  ;;  %v1123_v3 = vld [vmem:[%s3374_s5 + $0x3c0] sm:$0xff] }
 0x228   : > { %2265 = vmatpush1.bf16.msra.mxu0 %v2264_v20  ;;  %2245 = vmatpush1.bf16.msra.mxu1 %v2244_v22  ;;  %v2284_v59 = vpack.c.bf16 %v1109_v58, %v1101_v57  ;;  %v2286_v2 = vpack.c.bf16 %v1126_v0, %v1118_v62  ;;  %v1117_v4 = vld [vmem:[%s3374_s5 + $0x390] sm:$0xff]  ;;  %v2256_v9 = vpack.c.bf16 %v1123_v3, %v1115_v1  ;;  %v1008_v11 = vld [vmem:[%s3374_s5 + $0x28] sm:$0xff]  ;;  %v1010_v14 = vld [vmem:[%s3374_s5 + $0x38] sm:$0xff] }
 0x229   : > { %2267 = vmatprep.subr.bf16.mxu0 %v2266_v23  ;;  %2247 = vmatprep.subr.bf16.mxu1 %v2246_v25  ;;  %v1125_v5 = vld [vmem:[%s3374_s5 + $0x3d0] sm:$0xff]  ;;  %v1016_v13 = vld [vmem:[%s3374_s5 + $0x68] sm:$0xff]  ;;  %v1018_v16 = vld [vmem:[%s3374_s5 + $0x78] sm:$0xff] }
 0x22a   : > { %v2288_v10 = vpack.c.bf16 %v1125_v5, %v1117_v4  ;;  %v2290_v15 = vpack.c.bf16 %v1016_v13, %v1008_v11  ;;  %v2322_v17 = vpack.c.bf16 %v1018_v16, %v1010_v14  ;;  %v2127_v19 = vld [vmem:[%s3373_s4] ss:$0 sm:$0xff]  ;;  %v2130_v22 = vld [vmem:[#allocation6] ss:$0 sm:$0xff]  ;;  %v2131_v25 = vld [vmem:[#allocation7] ss:$0 sm:$0xff] }
 0x22b   : > { %v1007_v26 = vld [vmem:[%s3374_s5 + $0x20] sm:$0xff]  ;;  %v1032_v35 = vld [vmem:[%s3374_s5 + $0xe8] sm:$0xff]  ;;  %v1026_v36 = vld [vmem:[%s3374_s5 + $0xb8] sm:$0xff] }
 0x22c   : > { %2269 = vmatpush1.bf16.msra.mxu0 %v2268_v30  ;;  %2249 = vmatpush1.bf16.msra.mxu1 %v2248_v32  ;;  %v1015_v29 = vld [vmem:[%s3374_s5 + $0x60] sm:$0xff]  ;;  %v1009_v30 = vld [vmem:[%s3374_s5 + $0x30] sm:$0xff]  ;;  %v1034_v37 = vld [vmem:[%s3374_s5 + $0xf8] sm:$0xff] }
 0x22d   : > { %2271 = vmatprep.subr.bf16.mxu0 %v2270_v33  ;;  %2251 = vmatprep.subr.bf16.mxu1 %v2250_v51  ;;  %v1017_v32 = vld [vmem:[%s3374_s5 + $0x70] sm:$0xff]  ;;  %v1024_v33 = vld [vmem:[%s3374_s5 + $0xa8] sm:$0xff]  ;;  %v1023_v40 = vld [vmem:[%s3374_s5 + $0xa0] sm:$0xff] }
 0x22e   : > { %v1031_v41 = vld [vmem:[%s3374_s5 + $0xe0] sm:$0xff]  ;;  %v1040_v46 = vld [vmem:[%s3374_s5 + $0x128] sm:$0xff]  ;;  %v2294_v47 = vpack.c.bf16 %v1032_v35, %v1024_v33  ;;  %v1042_v49 = vld [vmem:[%s3374_s5 + $0x138] sm:$0xff] }
 0x22f   : > { %v1048_v48 = vld [vmem:[%s3374_s5 + $0x168] sm:$0xff]  ;;  %v1050_v50 = vld [vmem:[%s3374_s5 + $0x178] sm:$0xff]  ;;  %v2296_v51 = vpack.c.bf16 %v1031_v41, %v1023_v40  ;;  %v1039_v53 = vld [vmem:[%s3374_s5 + $0x120] sm:$0xff] }
 0x230   : > { %2273 = vmatpush1.bf16.msra.mxu0 %v2272_v38  ;;  %2253 = vmatpush1.bf16.msra.mxu1 %v2252_v56  ;;  %v2292_v38 = vpack.c.bf16 %v1015_v29, %v1007_v26  ;;  %v1047_v54 = vld [vmem:[%s3374_s5 + $0x160] sm:$0xff]  ;;  %v2298_v56 = vpack.c.bf16 %v1048_v48, %v1040_v46  ;;  %v2330_v57 = vpack.c.bf16 %v1050_v50, %v1042_v49  ;;  %v1041_v58 = vld [vmem:[%s3374_s5 + $0x130] sm:$0xff]  ;;  %v1056_v60 = vld [vmem:[%s3374_s5 + $0x1a8] sm:$0xff] }
 0x231   : > { %2275 = vmatprep.subr.bf16.mxu0 %v2274_v39  ;;  %2255 = vmatprep.subr.bf16.mxu1 %v2254_v63  ;;  %v2324_v39 = vpack.c.bf16 %v1017_v32, %v1009_v30  ;;  %v1064_v61 = vld [vmem:[%s3374_s5 + $0x1e8] sm:$0xff]  ;;  %v1058_v62 = vld [vmem:[%s3374_s5 + $0x1b8] sm:$0xff]  ;;  %v2300_v0 = vpack.c.bf16 %v1047_v54, %v1039_v53  ;;  %v1063_v3 = vld [vmem:[%s3374_s5 + $0x1e0] sm:$0xff] }
 0x232   : > { %v1066_v63 = vld [vmem:[%s3374_s5 + $0x1f8] sm:$0xff]  ;;  %v2302_v4 = vpack.c.bf16 %v1064_v61, %v1056_v60  ;;  %v1072_v11 = vld [vmem:[%s3374_s5 + $0x228] sm:$0xff]  ;;  %v1087_v32 = vld [vmem:[%s3374_s5 + $0x2a0] sm:$0xff] }
 0x233   : > { %v2334_v5 = vpack.c.bf16 %v1066_v63, %v1058_v62  ;;  %v1080_v13 = vld [vmem:[%s3374_s5 + $0x268] sm:$0xff]  ;;  %v1074_v14 = vld [vmem:[%s3374_s5 + $0x238] sm:$0xff]  ;;  %v1095_v33 = vld [vmem:[%s3374_s5 + $0x2e0] sm:$0xff] }
 0x234   : > { %2277 = vmatpush1.bf16.msra.mxu0 %v2276_v44  ;;  %2257 = vmatpush1.bf16.msra.mxu1 %v2256_v9  ;;  %v1025_v44 = vld [vmem:[%s3374_s5 + $0xb0] sm:$0xff]  ;;  %v1096_v26 = vld [vmem:[%s3374_s5 + $0x2e8] sm:$0xff]  ;;  %v1106_v40 = vld [vmem:[%s3374_s5 + $0x338] sm:$0xff] }
 0x235   : > { %2279 = vmatprep.subr.bf16.mxu0 %v2278_v45  ;;  %2291 = vmatprep.subr.bf16.mxu1 %v2290_v15  ;;  %v1033_v45 = vld [vmem:[%s3374_s5 + $0xf0] sm:$0xff]  ;;  %v1082_v15 = vld [vmem:[%s3374_s5 + $0x278] sm:$0xff]  ;;  %v1111_v46 = vld [vmem:[%s3374_s5 + $0x360] sm:$0xff] }
 0x236   : > { %v2328_v52 = vpack.c.bf16 %v1033_v45, %v1025_v44  ;;  %v1057_v9 = vld [vmem:[%s3374_s5 + $0x1b0] sm:$0xff]  ;;  %v1114_v41 = vld [vmem:[%s3374_s5 + $0x378] sm:$0xff]  ;;  %v1103_v45 = vld [vmem:[%s3374_s5 + $0x320] sm:$0xff] }
 0x237   : > { %v1105_v48 = vld [vmem:[%s3374_s5 + $0x330] sm:$0xff]  ;;  %v1120_v50 = vld [vmem:[%s3374_s5 + $0x3a8] sm:$0xff]  ;;  %v1130_v53 = vld [vmem:[%s3374_s5 + $0x3f8] sm:$0xff]  ;;  %v2316_v54 = vpack.c.bf16 %v1111_v46, %v1103_v45 }
 0x238   : > { %2281 = vmatpush1.bf16.msra.mxu0 %v2280_v31  ;;  %v2326_v31 = vpack.c.bf16 %v1034_v37, %v1026_v36  ;;  %v1089_v36 = vld [vmem:[%s3374_s5 + $0x2b0] sm:$0xff]  ;;  %v1127_v60 = vld [vmem:[%s3374_s5 + $0x3e0] sm:$0xff] }
 0x239   : > { %2283 = vmatprep.subr.bf16.mxu0 %v2282_v55  ;;  %v1097_v37 = vld [vmem:[%s3374_s5 + $0x2f0] sm:$0xff] }
 0x23a   : > { %v2344_v44 = vpack.c.bf16 %v1097_v37, %v1089_v36  ;;  %v1113_v49 = vld [vmem:[%s3374_s5 + $0x370] sm:$0xff] }
 0x23b   : > { %v1121_v61 = vld [vmem:[%s3374_s5 + $0x3b0] sm:$0xff] }
 0x23c   : > { %2285 = vmatpush1.bf16.msra.mxu0 %v2284_v59  ;;  %v1049_v59 = vld [vmem:[%s3374_s5 + $0x170] sm:$0xff] }
 0x23d   : > { %2287 = vmatprep.subr.bf16.mxu0 %v2286_v2  ;;  %v2332_v1 = vpack.c.bf16 %v1049_v59, %v1041_v58  ;;  %v1055_v2 = vld [vmem:[%s3374_s5 + $0x1a0] sm:$0xff]  ;;  %v1129_v62 = vld [vmem:[%s3374_s5 + $0x3f0] sm:$0xff] }
 0x23e   : > { %v2304_v16 = vpack.c.bf16 %v1063_v3, %v1055_v2  ;;  %v1147_v2 = vsub.s32 3, %v2595_v6  ;;  %v2459_v3 = vmov 1966171168  }
 0x240   : > { %2289 = vmatpush1.bf16.msra.mxu0 %v2288_v10  ;;  %v1065_v10 = vld [vmem:[%s3374_s5 + $0x1f0] sm:$0xff] }
 0x241   : > { %2323 = vmatprep.subr.bf16.mxu0 %v2322_v17  ;;  %v2336_v17 = vpack.c.bf16 %v1065_v10, %v1057_v9 }
 0x2f6   : > { %v2193_v20 = vpop.f32.mrb[0].mxu0 }
 0x2f7   : > { %v980_v21 = vadd.f32 %v2193_v20, %v2127_v19  ;;  %v974_v23 = vpop.f32.mrb[1].mxu0  ;;  %v1079_v20 = vld [vmem:[%s3374_s5 + $0x260] sm:$0xff] }
 0x2f8   : > { %v975_v24 = vadd.f32 %v2127_v19, %v974_v23  ;;  %v1071_v19 = vld [vmem:[%s3374_s5 + $0x220] sm:$0xff]  ;;  %v1073_v23 = vld [vmem:[%s3374_s5 + $0x230] sm:$0xff] }
 0x2f9   : > { %v991_v27 = vmul.f32 %v2130_v22, %v980_v21  ;;  %v2306_v21 = vpack.c.bf16 %v1080_v13, %v1072_v11  ;;  %v2308_v29 = vpack.c.bf16 %v1079_v20, %v1071_v19  ;;  %v1151_v13 = vsub.s32 4, %v2595_v6 }
 0x2fa   : > { %v990_v28 = vmul.f32 %v2130_v22, %v975_v24  ;;  %v2338_v22 = vpack.c.bf16 %v1082_v15, %v1074_v14  ;;  %v1081_v24 = vld [vmem:[%s3374_s5 + $0x270] sm:$0xff]  ;;  %v1159_v14 = vsub.s32 6, %v2595_v6  ;;  %v1155_v15 = vsub.s32 5, %v2595_v6 }
 0x2fb   : > { %v1000_v42 = vadd.f32 %v2131_v25, %v991_v27  ;;  %v1090_v27 = vld [vmem:[%s3374_s5 + $0x2b8] sm:$0xff]  ;;  %v2340_v30 = vpack.c.bf16 %v1081_v24, %v1073_v23 }
 0x2fc   : > { %v999_v34 = vadd.f32 %v2131_v25, %v990_v28  ;;  %v1088_v25 = vld [vmem:[%s3374_s5 + $0x2a8] sm:$0xff]  ;;  %v1098_v28 = vld [vmem:[%s3374_s5 + $0x2f8] sm:$0xff] }
 0x2fd   : > { %v2991_v55 = vmax.f32 %v1000_v42, 0.0  ;;  %v2342_v35 = vpack.c.bf16 %v1098_v28, %v1090_v27  ;;  %v2312_v42 = vpack.c.bf16 %v1095_v33, %v1087_v32 }
 0x2fe   : > { %v2963_v43 = vmax.f32 %v999_v34, 0.0  ;;  %v2310_v34 = vpack.c.bf16 %v1096_v26, %v1088_v25 }
 0x300   : > { %1238 = vmatmul.mubr.f32.vlgmr.msra.gmra.mrb[0].mxu1 %v2963_v43  ;;  %1315 = vmatmul.mubr.f32.vlgmr.msra.gmra.mrb[2].mxu0 %v2963_v43 }
 0x301   : > { %2293 = vmatpush1.bf16.msra.mxu1 %v2292_v38  ;;  %2325 = vmatpush1.bf16.msra.mxu0 %v2324_v39  ;;  %v1104_v38 = vld [vmem:[%s3374_s5 + $0x328] sm:$0xff] }
 0x302   : > { %1243 = vmatprep.mubr.f32.mxu1 %v2458_v18  ;;  %1320 = vmatprep.mubr.f32.mxu0 %v2458_v18  ;;  %v1112_v39 = vld [vmem:[%s3374_s5 + $0x368] sm:$0xff] }
 0x303   : > { %2295 = vmatprep.subr.bf16.mxu1 %v2294_v47  ;;  %2327 = vmatprep.subr.bf16.mxu0 %v2326_v31  ;;  %v2314_v47 = vpack.c.bf16 %v1112_v39, %v1104_v38  ;;  %v2346_v31 = vpack.c.bf16 %v1114_v41, %v1106_v40 }
 0x304   : > { %1244 = vmatmul.mubr.f32.gmra.mrb[2].mxu1 %v2991_v55  ;;  %1321 = vmatmul.mubr.f32.gmra.mrb[4].mxu0 %v2991_v55 }
 0x305   : > { %2297 = vmatpush1.bf16.msra.mxu1 %v2296_v51  ;;  %2329 = vmatpush1.bf16.msra.mxu0 %v2328_v52  ;;  %v1128_v51 = vld [vmem:[%s3374_s5 + $0x3e8] sm:$0xff]  ;;  %v1122_v52 = vld [vmem:[%s3374_s5 + $0x3b8] sm:$0xff] }
 0x306   : > { %2299 = vmatprep.subr.bf16.mxu1 %v2298_v56  ;;  %2331 = vmatprep.subr.bf16.mxu0 %v2330_v57  ;;  %v2348_v56 = vpack.c.bf16 %v1113_v49, %v1105_v48  ;;  %v1119_v57 = vld [vmem:[%s3374_s5 + $0x3a0] sm:$0xff]  ;;  %v2318_v58 = vpack.c.bf16 %v1128_v51, %v1120_v50  ;;  %v2350_v59 = vpack.c.bf16 %v1130_v53, %v1122_v52 }
 0x307   : > { %1391 = vmatprep.mubr.f32.mxu1 %v2458_v18  ;;  %1468 = vmatprep.mubr.f32.mxu0 %v2458_v18  ;;  %v2320_v63 = vpack.c.bf16 %v1127_v60, %v1119_v57 }
 0x309   : > { %2301 = vmatpush1.bf16.msra.mxu1 %v2300_v0  ;;  %2333 = vmatpush1.bf16.msra.mxu0 %v2332_v1  ;;  %v2352_v0 = vpack.c.bf16 %v1129_v62, %v1121_v61  ;;  %v1131_v1 = vld [vmem:[%s3375_s6] sm:$0xff] }
 0x30a   : > { %2303 = vmatprep.subr.bf16.mxu1 %v2302_v4  ;;  %2335 = vmatprep.subr.bf16.mxu0 %v2334_v5  ;;  %v1551_v4 = vunpack.c.l.s4 %v2459_v3  ;;  %v1136_v5 = vrot.slane %v1131_v1, %v591_v8  ;;  %v1148_v9 = vrot.slane %v1131_v1, %v1147_v2  ;;  %v3152_v24 = vrot.slane %v1131_v1, %v1151_v13 }
 0x30b   : > { %v3154_v25 = vrot.slane %v1131_v1, %v1159_v14  ;;  %v3156_v26 = vrot.slane %v1131_v1, %v1155_v15 }
 0x30c   : > { %v1552_v10 = vunpack.c.0.s8 %v1551_v4 }
 0x30d   : > { %2305 = vmatpush1.bf16.msra.mxu1 %v2304_v16  ;;  %2337 = vmatpush1.bf16.msra.mxu0 %v2336_v17  ;;  %v1163_v16 = vsub.s32 7, %v2595_v6 }
 0x30e   : > { %2307 = vmatprep.subr.bf16.mxu1 %v2306_v21  ;;  %2339 = vmatprep.subr.bf16.mxu0 %v2338_v22 }
 0x30f   : > { %v3158_v27 = vrot.slane %v1131_v1, %v1163_v16 }
 0x311   : > { %2309 = vmatpush1.bf16.msra.mxu1 %v2308_v29  ;;  %2341 = vmatpush1.bf16.msra.mxu0 %v2340_v30 }
 0x312   : > { %2311 = vmatprep.subr.bf16.mxu1 %v2310_v34  ;;  %2343 = vmatprep.subr.bf16.mxu0 %v2342_v35 }
 0x315   : > { %2313 = vmatpush1.bf16.msra.mxu1 %v2312_v42  ;;  %2345 = vmatpush1.bf16.msra.mxu0 %v2344_v44 }
 0x316   : > { %2315 = vmatprep.subr.bf16.mxu1 %v2314_v47  ;;  %2347 = vmatprep.subr.bf16.mxu0 %v2346_v31 }
 0x319   : > { %2317 = vmatpush1.bf16.msra.mxu1 %v2316_v54  ;;  %2349 = vmatpush1.bf16.msra.mxu0 %v2348_v56 }
 0x31a   : > { %2319 = vmatprep.subr.bf16.mxu1 %v2318_v58  ;;  %2351 = vmatprep.subr.bf16.mxu0 %v2350_v59 }
 0x31d   : > { %2321 = vmatpush1.bf16.msra.mxu1 %v2320_v63  ;;  %2353 = vmatpush1.bf16.msra.mxu0 %v2352_v0 }
 0x320   : > { %1392 = vmatmul.mubr.f32.vlgmr.msra.gmra.mrb[4].mxu1 %v2963_v43  ;;  %1469 = vmatmul.mubr.f32.vlgmr.msra.gmra.mrb[6].mxu0 %v2963_v43  ;;  %v1144_v43 = vrot.slane %v1131_v1, %v621_v12 }
 0x321   : > { %1397 = vmatprep.mubr.f32.mxu1 %v2458_v18  ;;  %1474 = vmatprep.mubr.f32.mxu0 %v2458_v18  ;;  %v1140_v18 = vrot.slane %v1131_v1, %v605_v7  ;;  %v3150_v7 = vsub.s32 %v1552_v10, %v2595_v6 }
 0x324   : > { %1398 = vmatmul.mubr.f32.gmra.mrb[6].mxu1 %v2991_v55  ;;  %1475 = vmatmul.mubr.f32.gmra.mrb[8].mxu0 %v2991_v55 }
 0x3d3   : > { %v1239_v55 = vpop.f32.mrb[0].mxu1  ;;  %v1316_v11 = vpop.f32.mrb[2].mxu0 }
 0x3d4   : > { %v1240_v17 = vadd.f32 %v1239_v55, %v1136_v5  ;;  %v1317_v8 = vadd.f32 %v1316_v11, %v1144_v43  ;;  %v1241_v19 = vpop.f32.mrb[1].mxu1  ;;  %v1318_v20 = vpop.f32.mrb[3].mxu0 }
 0x3d5   : > { %v3145_v12 = vadd.f32 %v1241_v19, %v1140_v18  ;;  %v3147_v21 = vadd.f32 %v1318_v20, %v1148_v9 }
 0x3d6   : > { %v1599_v28 = vmul.f32 %v1240_v17, %v1240_v17  ;;  %v1601_v29 = vmul.f32 %v1317_v8, %v1317_v8 }
 0x3d7   : > { %v1245_v22 = vpop.f32.mrb[2].mxu1  ;;  %v1322_v23 = vpop.f32.mrb[4].mxu0  ;;  %v3162_v6 = vmul.f32 %v3145_v12, %v3145_v12  ;;  %v3166_v35 = vmul.f32 %v3147_v21, %v3147_v21 }
 0x3d8   : > { %v1246_v30 = vadd.f32 %v1245_v22, %v1136_v5  ;;  %v1323_v32 = vadd.f32 %v1322_v23, %v1144_v43  ;;  %v1247_v33 = vpop.f32.mrb[3].mxu1  ;;  %v1324_v34 = vpop.f32.mrb[5].mxu0 }
 0x3d9   : > { %v3168_v36 = vadd.f32 %v1247_v33, %v1140_v18  ;;  %v3170_v37 = vadd.f32 %v1324_v34, %v1148_v9 }
 0x3da   : > { %v1482_v38 = vadd.f32 %v1246_v30, %v1240_v17  ;;  %v1607_v39 = vmul.f32 %v1246_v30, %v1246_v30  ;;  %v1732_v40 = vmax.f32 %v1240_v17, %v1246_v30  ;;  %v1849_v41 = vmin.f32 %v1240_v17, %v1246_v30 }
 0x3db   : > { %v1496_v42 = vadd.f32 %v1323_v32, %v1317_v8  ;;  %v1609_v44 = vmul.f32 %v1323_v32, %v1323_v32  ;;  %v1746_v45 = vmax.f32 %v1317_v8, %v1323_v32  ;;  %v1863_v46 = vmin.f32 %v1317_v8, %v1323_v32 }
 0x3dc   : > { %v1483_v47 = vrot.slane %v1482_v38, 4  ;;  %v1615_v31 = vadd.f32 %v1607_v39, %v1599_v28  ;;  %v1733_v48 = vrot.slane %v1732_v40, 4  ;;  %v1850_v49 = vrot.slane %v1849_v41, 4 }
 0x3dd   : > { %v1497_v50 = vrot.slane %v1496_v42, 4  ;;  %v1629_v51 = vadd.f32 %v1609_v44, %v1601_v29  ;;  %v1747_v52 = vrot.slane %v1746_v45, 4  ;;  %v1864_v53 = vrot.slane %v1863_v46, 4 }
 0x3de   : > { %v1484_v54 = vadd.f32 %v1483_v47, %v1482_v38  ;;  %v1616_v56 = vrot.slane %v1615_v31, 4  ;;  %v1734_v57 = vmax.f32 %v1732_v40, %v1733_v48  ;;  %v1851_v58 = vmin.f32 %v1849_v41, %v1850_v49 }
 0x3df   : > { %v1498_v59 = vadd.f32 %v1497_v50, %v1496_v42  ;;  %v1630_v60 = vrot.slane %v1629_v51, 4  ;;  %v1748_v61 = vmax.f32 %v1746_v45, %v1747_v52  ;;  %v1865_v62 = vmin.f32 %v1863_v46, %v1864_v53 }
 0x3e0   : > { %v1485_v63 = vrot.slane %v1484_v54, 2  ;;  %v1617_v0 = vadd.f32 %v1616_v56, %v1615_v31  ;;  %v1735_v1 = vrot.slane %v1734_v57, 2  ;;  %v1852_v2 = vrot.slane %v1851_v58, 2 }
 0x3e1   : > { %v1499_v3 = vrot.slane %v1498_v59, 2  ;;  %v1631_v4 = vadd.f32 %v1630_v60, %v1629_v51  ;;  %v1749_v5 = vrot.slane %v1748_v61, 2  ;;  %v1866_v43 = vrot.slane %v1865_v62, 2 }
 0x3e2   : > { %v1486_v18 = vadd.f32 %v1485_v63, %v1484_v54  ;;  %v1618_v9 = vrot.slane %v1617_v0, 2  ;;  %v1736_v10 = vmax.f32 %v1734_v57, %v1735_v1  ;;  %v1853_v55 = vmin.f32 %v1851_v58, %v1852_v2 }
 0x3e3   : > { %v1500_v11 = vadd.f32 %v1499_v3, %v1498_v59  ;;  %v1632_v13 = vrot.slane %v1631_v4, 2  ;;  %v1750_v14 = vmax.f32 %v1748_v61, %v1749_v5  ;;  %v1867_v15 = vmin.f32 %v1865_v62, %v1866_v43 }
 0x3e4   : > { %v1487_v16 = vrot.slane %v1486_v18, 1  ;;  %v1619_v17 = vadd.f32 %v1618_v9, %v1617_v0  ;;  %v1737_v8 = vrot.slane %v1736_v10, 1  ;;  %v1854_v19 = vrot.slane %v1853_v55, 1 }
 0x3e5   : > { %v1501_v20 = vrot.slane %v1500_v11, 1  ;;  %v1633_v22 = vadd.f32 %v1632_v13, %v1631_v4  ;;  %v1751_v23 = vrot.slane %v1750_v14, 1  ;;  %v1868_v28 = vrot.slane %v1867_v15, 1 }
 0x3e6   : > { %v3172_v29 = vadd.f32 %v1487_v16, %v1486_v18  ;;  %v1620_v30 = vrot.slane %v1619_v17, 1  ;;  %v3174_v32 = vmax.f32 %v1736_v10, %v1737_v8  ;;  %v3176_v33 = vmin.f32 %v1853_v55, %v1854_v19 }
 0x3e7   : > { %v3178_v34 = vadd.f32 %v1501_v20, %v1500_v11  ;;  %v1634_v38 = vrot.slane %v1633_v22, 1  ;;  %v3180_v39 = vmax.f32 %v1750_v14, %v1751_v23  ;;  %v3182_v40 = vmin.f32 %v1867_v15, %v1868_v28 }
 0x3e8   : > { %v3184_v41 = vadd.f32 %v1620_v30, %v1619_v17  ;;  %v1489_v42 = vadd.f32 %v3168_v36, %v3145_v12  ;;  %v1608_v44 = vmul.f32 %v3168_v36, %v3168_v36  ;;  %v1739_v45 = vmax.f32 %v3145_v12, %v3168_v36 }
 0x3e9   : > { %v3192_v46 = vadd.f32 %v1634_v38, %v1633_v22  ;;  %v1856_v47 = vmin.f32 %v3145_v12, %v3168_v36  ;;  %v1503_v31 = vadd.f32 %v3170_v37, %v3147_v21  ;;  %v1610_v48 = vmul.f32 %v3170_v37, %v3170_v37 }
 0x3ea   : > { %v1490_v49 = vrot.slane %v1489_v42, 4  ;;  %v1622_v50 = vadd.f32 %v1608_v44, %v3162_v6  ;;  %v1740_v51 = vrot.slane %v1739_v45, 4  ;;  %v1753_v52 = vmax.f32 %v3147_v21, %v3170_v37 }
 0x3eb   : > { %v1857_v53 = vrot.slane %v1856_v47, 4  ;;  %v1504_v54 = vrot.slane %v1503_v31, 4  ;;  %v1636_v56 = vadd.f32 %v1610_v48, %v3166_v35  ;;  %v1870_v12 = vmin.f32 %v3147_v21, %v3170_v37 }
 0x3ec   : > { %v1491_v36 = vadd.f32 %v1490_v49, %v1489_v42  ;;  %v1623_v57 = vrot.slane %v1622_v50, 4  ;;  %v1741_v58 = vmax.f32 %v1739_v45, %v1740_v51  ;;  %v1754_v59 = vrot.slane %v1753_v52, 4 }
 0x3ed   : > { %v1858_v60 = vmin.f32 %v1856_v47, %v1857_v53  ;;  %v1505_v61 = vadd.f32 %v1504_v54, %v1503_v31  ;;  %v1637_v62 = vrot.slane %v1636_v56, 4  ;;  %v1871_v63 = vrot.slane %v1870_v12, 4 }
 0x3ee   : > { %v1492_v6 = vrot.slane %v1491_v36, 2  ;;  %v1624_v0 = vadd.f32 %v1623_v57, %v1622_v50  ;;  %v1742_v1 = vrot.slane %v1741_v58, 2  ;;  %v1755_v2 = vmax.f32 %v1753_v52, %v1754_v59 }
 0x3ef   : > { %v1859_v3 = vrot.slane %v1858_v60, 2  ;;  %v1506_v4 = vrot.slane %v1505_v61, 2  ;;  %v1638_v5 = vadd.f32 %v1637_v62, %v1636_v56  ;;  %v1872_v43 = vmin.f32 %v1870_v12, %v1871_v63 }
 0x3f0   : > { %v1493_v35 = vadd.f32 %v1492_v6, %v1491_v36  ;;  %v1625_v18 = vrot.slane %v1624_v0, 2  ;;  %v1743_v9 = vmax.f32 %v1741_v58, %v1742_v1  ;;  %v1756_v21 = vrot.slane %v1755_v2, 2 }
 0x3f1   : > { %v1860_v37 = vmin.f32 %v1858_v60, %v1859_v3  ;;  %v1507_v10 = vadd.f32 %v1506_v4, %v1505_v61  ;;  %v1639_v55 = vrot.slane %v1638_v5, 2  ;;  %v1873_v11 = vrot.slane %v1872_v43, 2 }
 0x3f2   : > { %v1494_v13 = vrot.slane %v1493_v35, 1  ;;  %v1626_v14 = vadd.f32 %v1625_v18, %v1624_v0  ;;  %v1744_v15 = vrot.slane %v1743_v9, 1  ;;  %v1757_v16 = vmax.f32 %v1755_v2, %v1756_v21 }
 0x3f3   : > { %v1861_v17 = vrot.slane %v1860_v37, 1  ;;  %v1508_v8 = vrot.slane %v1507_v10, 1  ;;  %v1640_v19 = vadd.f32 %v1639_v55, %v1638_v5  ;;  %v1874_v20 = vmin.f32 %v1872_v43, %v1873_v11  ;;  %v1393_v22 = vpop.f32.mrb[4].mxu1  ;;  %v1470_v23 = vpop.f32.mrb[6].mxu0 }
 0x3f4   : > { %v1495_v28 = vadd.f32 %v1494_v13, %v1493_v35  ;;  %v1627_v30 = vrot.slane %v1626_v14, 1  ;;  %v1745_v38 = vmax.f32 %v1743_v9, %v1744_v15  ;;  %v1758_v42 = vrot.slane %v1757_v16, 1  ;;  %v1395_v44 = vpop.f32.mrb[5].mxu1  ;;  %v1472_v45 = vpop.f32.mrb[7].mxu0 }
 0x3f5   : > { %v1862_v47 = vmin.f32 %v1860_v37, %v1861_v17  ;;  %v1509_v31 = vadd.f32 %v1508_v8, %v1507_v10  ;;  %v1641_v48 = vrot.slane %v1640_v19, 1  ;;  %v1875_v49 = vrot.slane %v1874_v20, 1 }
 0x3f6   : > { %v1546_v50 = vcombine.low %v3172_v29, %v1495_v28  ;;  %v1628_v51 = vadd.f32 %v1627_v30, %v1626_v14  ;;  %v1796_v52 = vcombine.low %v3174_v32, %v1745_v38  ;;  %v1759_v53 = vmax.f32 %v1757_v16, %v1758_v42 }
 0x3f7   : > { %v1913_v54 = vcombine.low %v3176_v33, %v1862_v47  ;;  %v1547_v56 = vcombine.low %v3178_v34, %v1509_v31  ;;  %v1642_v12 = vadd.f32 %v1641_v48, %v1640_v19  ;;  %v1876_v36 = vmin.f32 %v1874_v20, %v1875_v49  ;;  %v1399_v57 = vpop.f32.mrb[6].mxu1  ;;  %v1476_v58 = vpop.f32.mrb[8].mxu0 }
 0x3f8   : > { %v3211_v59 = vrot.slane %v1546_v50, %v3150_v7  ;;  %v1679_v60 = vcombine.low %v3184_v41, %v1628_v51  ;;  %v3215_v61 = vrot.slane %v1796_v52, %v3150_v7  ;;  %v1797_v29 = vcombine.low %v3180_v39, %v1759_v53  ;;  %v1401_v32 = vpop.f32.mrb[7].mxu1  ;;  %v1478_v62 = vpop.f32.mrb[9].mxu0 }
 0x3f9   : > { %v3219_v33 = vrot.slane %v1913_v54, %v3150_v7  ;;  %v3222_v34 = vrot.slane %v1547_v56, %v3150_v7  ;;  %v1680_v63 = vcombine.low %v3192_v46, %v1642_v12  ;;  %v1914_v6 = vcombine.low %v3182_v40, %v1876_v36 }
 0x3fa   : > { %v3227_v0 = vrot.slane %v1679_v60, %v3150_v7  ;;  %v3230_v41 = vrot.slane %v1797_v29, %v3150_v7  ;;  %v1394_v39 = vadd.f32 %v1393_v22, %v3152_v24  ;;  %v1471_v1 = vadd.f32 %v1470_v23, %v3154_v25 }
 0x3fb   : > { %v1578_v2 = vcombine.low %v3211_v59, %v3222_v34  ;;  %v3237_v3 = vrot.slane %v1680_v63, %v3150_v7  ;;  %v3240_v46 = vrot.slane %v1914_v6, %v3150_v7  ;;  %v3243_v40 = vadd.f32 %v1395_v44, %v3156_v26  ;;  %v1481_v59 = vld [vmem:[%s3382_s13] sm:$0xff] }
 0x3fc   : > { %v1828_v4 = vcombine.low %v3215_v61, %v3230_v41  ;;  %v3248_v5 = vadd.f32 %v1472_v45, %v3158_v27  ;;  %v1603_v18 = vmul.f32 %v1394_v39, %v1394_v39  ;;  %v1605_v9 = vmul.f32 %v1471_v1, %v1471_v1  ;;  %v1598_v61 = vld [vmem:[%s3383_s14] sm:$0xff] }
 0x3fd   : > { %v1711_v43 = vcombine.low %v3227_v0, %v3237_v3  ;;  %v1945_v35 = vcombine.low %v3219_v33, %v3240_v46  ;;  %v1400_v21 = vadd.f32 %v1399_v57, %v3152_v24  ;;  %v1477_v37 = vadd.f32 %v1476_v58, %v3154_v25 }
 0x3fe   : > { %v3258_v10 = vmul.f32 %v3243_v40, %v3243_v40  ;;  %v3262_v55 = vmul.f32 %v3248_v5, %v3248_v5  ;;  %v3265_v11 = vadd.f32 %v1401_v32, %v3156_v26  ;;  %v3268_v13 = vadd.f32 %v1478_v62, %v3158_v27 }
 0x3ff   : > { %v1510_v14 = vadd.f32 %v1400_v21, %v1394_v39  ;;  %v1611_v15 = vmul.f32 %v1400_v21, %v1400_v21  ;;  %v1760_v16 = vmax.f32 %v1394_v39, %v1400_v21  ;;  %v1877_v24 = vmin.f32 %v1394_v39, %v1400_v21 }
 0x400   : > { %v1524_v17 = vadd.f32 %v1477_v37, %v1471_v1  ;;  %v1613_v25 = vmul.f32 %v1477_v37, %v1477_v37  ;;  %v1774_v8 = vmax.f32 %v1471_v1, %v1477_v37  ;;  %v1891_v19 = vmin.f32 %v1471_v1, %v1477_v37 }
 0x401   : > { %v1511_v20 = vrot.slane %v1510_v14, 4  ;;  %v1643_v22 = vadd.f32 %v1611_v15, %v1603_v18  ;;  %v1761_v23 = vrot.slane %v1760_v16, 4  ;;  %v1878_v28 = vrot.slane %v1877_v24, 4 }
 0x402   : > { %v1525_v30 = vrot.slane %v1524_v17, 4  ;;  %v1657_v38 = vadd.f32 %v1613_v25, %v1605_v9  ;;  %v1775_v42 = vrot.slane %v1774_v8, 4  ;;  %v1892_v26 = vrot.slane %v1891_v19, 4 }
 0x403   : > { %v1512_v44 = vadd.f32 %v1511_v20, %v1510_v14  ;;  %v1644_v45 = vrot.slane %v1643_v22, 4  ;;  %v1762_v27 = vmax.f32 %v1760_v16, %v1761_v23  ;;  %v1879_v47 = vmin.f32 %v1877_v24, %v1878_v28 }
 0x404   : > { %v1526_v31 = vadd.f32 %v1525_v30, %v1524_v17  ;;  %v1658_v48 = vrot.slane %v1657_v38, 4  ;;  %v1776_v49 = vmax.f32 %v1774_v8, %v1775_v42  ;;  %v1893_v50 = vmin.f32 %v1891_v19, %v1892_v26 }
 0x405   : > { %v1513_v51 = vrot.slane %v1512_v44, 2  ;;  %v1645_v52 = vadd.f32 %v1644_v45, %v1643_v22  ;;  %v1763_v53 = vrot.slane %v1762_v27, 2  ;;  %v1880_v54 = vrot.slane %v1879_v47, 2 }
 0x406   : > { %v1527_v56 = vrot.slane %v1526_v31, 2  ;;  %v1659_v12 = vadd.f32 %v1658_v48, %v1657_v38  ;;  %v1777_v36 = vrot.slane %v1776_v49, 2  ;;  %v1894_v57 = vrot.slane %v1893_v50, 2 }
 0x407   : > { %v1514_v58 = vadd.f32 %v1513_v51, %v1512_v44  ;;  %v1646_v60 = vrot.slane %v1645_v52, 2  ;;  %v1764_v29 = vmax.f32 %v1762_v27, %v1763_v53  ;;  %v1881_v32 = vmin.f32 %v1879_v47, %v1880_v54 }
 0x408   : > { %v1528_v62 = vadd.f32 %v1527_v56, %v1526_v31  ;;  %v1660_v63 = vrot.slane %v1659_v12, 2  ;;  %v1778_v6 = vmax.f32 %v1776_v49, %v1777_v36  ;;  %v1895_v39 = vmin.f32 %v1893_v50, %v1894_v57 }
 0x409   : > { %v1515_v1 = vrot.slane %v1514_v58, 1  ;;  %v1647_v18 = vadd.f32 %v1646_v60, %v1645_v52  ;;  %v1765_v9 = vrot.slane %v1764_v29, 1  ;;  %v1882_v21 = vrot.slane %v1881_v32, 1 }
 0x40a   : > { %v1529_v37 = vrot.slane %v1528_v62, 1  ;;  %v1661_v14 = vadd.f32 %v1660_v63, %v1659_v12  ;;  %v1779_v15 = vrot.slane %v1778_v6, 1  ;;  %v1896_v16 = vrot.slane %v1895_v39, 1 }
 0x40b   : > { %v3270_v24 = vadd.f32 %v1515_v1, %v1514_v58  ;;  %v1648_v17 = vrot.slane %v1647_v18, 1  ;;  %v3272_v25 = vmax.f32 %v1764_v29, %v1765_v9  ;;  %v3274_v8 = vmin.f32 %v1881_v32, %v1882_v21 }
 0x40c   : > { %v3276_v19 = vadd.f32 %v1529_v37, %v1528_v62  ;;  %v1662_v20 = vrot.slane %v1661_v14, 1  ;;  %v3278_v22 = vmax.f32 %v1778_v6, %v1779_v15  ;;  %v3280_v23 = vmin.f32 %v1895_v39, %v1896_v16 }
 0x40d   : > { %v3282_v28 = vadd.f32 %v1648_v17, %v1647_v18  ;;  %v1517_v30 = vadd.f32 %v3265_v11, %v3243_v40  ;;  %v1612_v38 = vmul.f32 %v3265_v11, %v3265_v11  ;;  %v1767_v42 = vmax.f32 %v3243_v40, %v3265_v11 }
 0x40e   : > { %v3290_v26 = vadd.f32 %v1662_v20, %v1661_v14  ;;  %v1884_v44 = vmin.f32 %v3243_v40, %v3265_v11  ;;  %v1531_v45 = vadd.f32 %v3268_v13, %v3248_v5  ;;  %v1614_v27 = vmul.f32 %v3268_v13, %v3268_v13 }
 0x40f   : > { %v1518_v47 = vrot.slane %v1517_v30, 4  ;;  %v1650_v31 = vadd.f32 %v1612_v38, %v3258_v10  ;;  %v1768_v48 = vrot.slane %v1767_v42, 4  ;;  %v1781_v49 = vmax.f32 %v3248_v5, %v3268_v13 }
 0x410   : > { %v1885_v50 = vrot.slane %v1884_v44, 4  ;;  %v1532_v51 = vrot.slane %v1531_v45, 4  ;;  %v1664_v52 = vadd.f32 %v1614_v27, %v3262_v55  ;;  %v1898_v40 = vmin.f32 %v3248_v5, %v3268_v13 }
 0x411   : > { %v1519_v11 = vadd.f32 %v1518_v47, %v1517_v30  ;;  %v1651_v53 = vrot.slane %v1650_v31, 4  ;;  %v1769_v54 = vmax.f32 %v1767_v42, %v1768_v48  ;;  %v1782_v56 = vrot.slane %v1781_v49, 4 }
 0x412   : > { %v1886_v12 = vmin.f32 %v1884_v44, %v1885_v50  ;;  %v1533_v36 = vadd.f32 %v1532_v51, %v1531_v45  ;;  %v1665_v57 = vrot.slane %v1664_v52, 4  ;;  %v1899_v58 = vrot.slane %v1898_v40, 4 }
 0x413   : > { %v1520_v10 = vrot.slane %v1519_v11, 2  ;;  %v1652_v60 = vadd.f32 %v1651_v53, %v1650_v31  ;;  %v1770_v29 = vrot.slane %v1769_v54, 2  ;;  %v1783_v32 = vmax.f32 %v1781_v49, %v1782_v56 }
 0x414   : > { %v1887_v62 = vrot.slane %v1886_v12, 2  ;;  %v1534_v63 = vrot.slane %v1533_v36, 2  ;;  %v1666_v6 = vadd.f32 %v1665_v57, %v1664_v52  ;;  %v1900_v39 = vmin.f32 %v1898_v40, %v1899_v58 }
 0x415   : > { %v1521_v55 = vadd.f32 %v1520_v10, %v1519_v11  ;;  %v1653_v1 = vrot.slane %v1652_v60, 2  ;;  %v1771_v18 = vmax.f32 %v1769_v54, %v1770_v29  ;;  %v1784_v5 = vrot.slane %v1783_v32, 2 }
 0x416   : > { %v1888_v13 = vmin.f32 %v1886_v12, %v1887_v62  ;;  %v1535_v9 = vadd.f32 %v1534_v63, %v1533_v36  ;;  %v1667_v21 = vrot.slane %v1666_v6, 2  ;;  %v1901_v37 = vrot.slane %v1900_v39, 2 }
 0x417   : > { %v1522_v14 = vrot.slane %v1521_v55, 1  ;;  %v1654_v15 = vadd.f32 %v1653_v1, %v1652_v60  ;;  %v1772_v16 = vrot.slane %v1771_v18, 1  ;;  %v1785_v17 = vmax.f32 %v1783_v32, %v1784_v5 }
 0x418   : > { %v1889_v20 = vrot.slane %v1888_v13, 1  ;;  %v1536_v30 = vrot.slane %v1535_v9, 1  ;;  %v1668_v38 = vadd.f32 %v1667_v21, %v1666_v6  ;;  %v1902_v42 = vmin.f32 %v1900_v39, %v1901_v37 }
 0x419   : > { %v1523_v44 = vadd.f32 %v1522_v14, %v1521_v55  ;;  %v1655_v45 = vrot.slane %v1654_v15, 1  ;;  %v1773_v27 = vmax.f32 %v1771_v18, %v1772_v16  ;;  %v1786_v47 = vrot.slane %v1785_v17, 1 }
 0x41a   : > { %v1890_v31 = vmin.f32 %v1888_v13, %v1889_v20  ;;  %v1537_v48 = vadd.f32 %v1536_v30, %v1535_v9  ;;  %v1669_v49 = vrot.slane %v1668_v38, 1  ;;  %v1903_v50 = vrot.slane %v1902_v42, 1 }
 0x41b   : > { %v1548_v51 = vcombine.low %v3270_v24, %v1523_v44  ;;  %v1656_v52 = vadd.f32 %v1655_v45, %v1654_v15  ;;  %v1798_v40 = vcombine.low %v3272_v25, %v1773_v27  ;;  %v1787_v11 = vmax.f32 %v1785_v17, %v1786_v47 }
 0x41c   : > { %v1915_v53 = vcombine.low %v3274_v8, %v1890_v31  ;;  %v1549_v54 = vcombine.low %v3276_v19, %v1537_v48  ;;  %v1670_v56 = vadd.f32 %v1669_v49, %v1668_v38  ;;  %v1904_v12 = vmin.f32 %v1902_v42, %v1903_v50 }
 0x41d   : > { %v1570_v36 = vrot.slane %v1548_v51, %v3150_v7  ;;  %v1681_v57 = vcombine.low %v3282_v28, %v1656_v52  ;;  %v1820_v58 = vrot.slane %v1798_v40, %v3150_v7  ;;  %v1799_v10 = vcombine.low %v3278_v22, %v1787_v11 }
 0x41e   : > { %v1937_v24 = vrot.slane %v1915_v53, %v3150_v7  ;;  %v1577_v60 = vrot.slane %v1549_v54, %v3150_v7  ;;  %v1682_v25 = vcombine.low %v3290_v26, %v1670_v56  ;;  %v1916_v8 = vcombine.low %v3280_v23, %v1904_v12 }
 0x41f   : > { %v1703_v19 = vrot.slane %v1681_v57, %v3150_v7  ;;  %v1827_v29 = vrot.slane %v1799_v10, %v3150_v7  ;;  %v1586_v22 = vrot.slane %v1578_v2, %v3150_v7  ;;  %v1719_v23 = vrot.slane %v1711_v43, %v3150_v7 }
 0x420   : > { %v1579_v32 = vcombine.low %v1570_v36, %v1577_v60  ;;  %v1710_v62 = vrot.slane %v1682_v25, %v3150_v7  ;;  %v1944_v28 = vrot.slane %v1916_v8, %v3150_v7  ;;  %v1836_v55 = vrot.slane %v1828_v4, %v3150_v7 }
 0x421   : > { %v1829_v63 = vcombine.low %v1820_v58, %v1827_v29  ;;  %v1953_v2 = vrot.slane %v1945_v35, %v3150_v7 }
 0x422   : > { %v1593_v6 = vrot.slane %v1579_v32, %v3150_v7  ;;  %v1712_v26 = vcombine.low %v1703_v19, %v1710_v62  ;;  %v1946_v39 = vcombine.low %v1937_v24, %v1944_v28 }
 0x423   : > { %v1843_v34 = vrot.slane %v1829_v63, %v3150_v7 }
 0x424   : > { %v1594_v0 = vcombine.low %v1586_v22, %v1593_v6  ;;  %v1726_v3 = vrot.slane %v1712_v26, %v3150_v7  ;;  %v1960_v43 = vrot.slane %v1946_v39, %v3150_v7 }
 0x425   : > { %v1844_v41 = vcombine.low %v1836_v55, %v1843_v34 }
 0x426   : > { %v1596_v4 = vadd.f32 %v1594_v0, %v1481_v59  ;;  %v1727_v1 = vcombine.low %v1719_v23, %v1726_v3  ;;  %v1961_v18 = vcombine.low %v1953_v2, %v1960_v43 }
 0x427   : > { %1847 = vst [vmem:[%s2587_s27] sm:$0xff] %v1844_v41 }
 0x428   : > { %1597 = vst [vmem:[%s3382_s13] sm:$0xff] %v1596_v4  ;;  %v1729_v5 = vadd.f32 %v1727_v1, %v1598_v61  ;;  %1964 = vst [vmem:[%s2592_s25] sm:$0xff] %v1961_v18 }
 0x42a   : > { %1730 = vst [vmem:[%s3383_s14] sm:$0xff] %v1729_v5 }
 0x42b PF: > { %s3396_s26 = sld [smem:[#allocation10_spill]]  ;;  %s3397_s21 = sld [smem:[#allocation8_spill]] }
 0x42c   : > { %s3398_s22 = sld [smem:[#allocation9_spill]]  ;;  %s3399_s23 = sld [smem:[#allocation11_spill]] }
 0x42d   : > { %s3400_s24 = sld [smem:[#allocation12_spill]] }
 0x431   : > { %s27_s25 = sadd.s32 1, %s3396_s26  }
 0x432   : > { %p24_p10 = scmp.ge.s32.totalorder %s27_s25, 8  }
 0x434   :  { %26 = sbr.rel (!%p24_p10) target bundleno = 3 (0x3), region = 169 }

// kernel: pointnet_base.5
= control target key start
LH: loop header
LB: loop body
LE: loop exit
PB: predicated region body
PF: predicated region fallthrough
CT: control target
= control target key end

     0   :  { %16 = vsyncpa [#allocation3], 0  ;;  %s3241_s0 = inlined_call_operand.vmem [shape: f32[2,1024], index: 0, kind: input, shape index: {}]   ;;  %s3242_s1 = inlined_call_operand.hbm [shape: f32[1024,512], index: 1, kind: input, shape index: {}]   ;;  %s3243_s2 = inlined_call_operand.hbm [shape: f32[1,512], index: 2, kind: input, shape index: {}]   ;;  %s3244_s3 = inlined_call_operand.hbm [shape: f32[1,512], index: 3, kind: input, shape index: {}]   ;;  %s3245_s4 = inlined_call_operand.hbm [shape: f32[1,512], index: 4, kind: input, shape index: {}]   ;;  %s3246_s5 = inlined_call_operand.hbm [shape: f32[512,256], index: 5, kind: input, shape index: {}]   ;;  %s3247_s6 = inlined_call_operand.hbm [shape: f32[1,256], index: 6, kind: input, shape index: {}]   ;;  %s3248_s7 = inlined_call_operand.hbm [shape: f32[1,256], index: 7, kind: input, shape index: {}]   ;;  %s3249_s8 = inlined_call_operand.hbm [shape: f32[1,256], index: 8, kind: input, shape index: {}]   ;;  %s3250_s9 = inlined_call_operand.vmem [shape: f32[256,9], index: 9, kind: input, shape index: {}]   ;;  %s3251_s10 = inlined_call_operand.vmem [shape: f32[1,9], index: 10, kind: input, shape index: {}]   ;;  %s3252_s11 = inlined_call_operand.vmem [shape: f32[2,9], index: 11, kind: output, shape index: {}]  }
   0x1   :  { %17 = vsyncpa [#allocation5], 0 }
   0x2   :  { %18 = vsyncpa [#allocation8], 0 }
   0x3   :  { %19 = vsyncpa [#allocation11], 0 }
   0x4   :  { %20 = vsyncpa [#allocation14], 0  ;;  %s2840_s17 = smov [#allocation4]   ;;  %s2841_s19 = smov [#allocation7]  }
   0x5   :  { %s41_s18 = sshll.u32 %s2840_s17, 4  ;;  %s61_s20 = sshll.u32 %s2841_s19, 4  ;;  %s42_s18 = int_to_ptr.vmem [resolvable:$true] %s41_s18  ;;  %s62_s20 = int_to_ptr.vmem [resolvable:$true] %s61_s20 }
   0x6   :  { %s2654_s23 = scalar_lea.hbm %s3243_s2, 64 }
   0x7   :  { %p2655_p0 = scmp.ne.s32.totalorder %s3243_s2, %s2654_s23  ;;  %p2658_p1 = scmp.lt.u32.totalorder %s2654_s23, %s3243_s2 }
   0x9   :  { %p2660_p2 = pnand %p2658_p1, %p2655_p0 }
   0xb   :  { %2663 = shalt.err (!%p2660_p2)
}
   0xc   :  { %s2664_s28 = scalar_lea.vmem %s42_s18, 64  ;;  %p2669_p4 = scmp.lt.s32.totalorder %s42_s18, %s42_s18 }
   0xd   :  { %p2665_p3 = scmp.ne.s32.totalorder %s42_s18, %s2664_s28  ;;  %p2670_p5 = scmp.lt.s32.totalorder %s2664_s28, %s2664_s28 }
   0xf   :  { %p2671_p6 = por %p2670_p5, %p2669_p4 }
  0x11   :  { %p2672_p7 = pnand %p2671_p6, %p2665_p3 }
  0x13   :  { %2675 = shalt.err (!%p2672_p7)
}
  0x14   :  { %44 = dma.hbm_to_vmem [thread:$0]  %s3243_s2, 64, %s42_s18, [#allocation5]  }
  0x15   :  { %s2676_s14 = scalar_lea.hbm %s3245_s4, 64 }
  0x16   :  { %p2677_p8 = scmp.ne.s32.totalorder %s3245_s4, %s2676_s14  ;;  %p2680_p9 = scmp.lt.u32.totalorder %s2676_s14, %s3245_s4 }
  0x18   :  { %p2682_p10 = pnand %p2680_p9, %p2677_p8 }
  0x1a   :  { %2685 = shalt.err (!%p2682_p10)
}
  0x1b   :  { %s2686_s21 = scalar_lea.vmem %s62_s20, 64  ;;  %p2691_p12 = scmp.lt.s32.totalorder %s62_s20, %s62_s20 }
  0x1c   :  { %p2687_p11 = scmp.ne.s32.totalorder %s62_s20, %s2686_s21  ;;  %p2692_p13 = scmp.lt.s32.totalorder %s2686_s21, %s2686_s21 }
  0x1e   :  { %p2693_p0 = por %p2692_p13, %p2691_p12 }
  0x20   :  { %p2694_p1 = pnand %p2693_p0, %p2687_p11 }
  0x22   :  { %2697 = shalt.err (!%p2694_p1)
}
  0x23   :  { %64 = dma.hbm_to_vmem [thread:$0]  %s3245_s4, 64, %s62_s20, [#allocation8]  }
  0x24   :  { %s2842_s22 = smov [#allocation10]   ;;  %s2843_s24 = smov [#allocation2]  }
  0x25   :  { %s83_s23 = sshll.u32 %s2842_s22, 4  ;;  %s28_s25 = sshll.u32 %s2843_s24, 4  ;;  %s84_s23 = int_to_ptr.vmem [resolvable:$true] %s83_s23  ;;  %s2937_s25 = int_to_ptr.vmem [resolvable:$true] %s28_s25 }
  0x26   :  { %s2698_s28 = scalar_lea.hbm %s3247_s6, 32 }
  0x27   :  { %p2699_p2 = scmp.ne.s32.totalorder %s3247_s6, %s2698_s28  ;;  %p2702_p3 = scmp.lt.u32.totalorder %s2698_s28, %s3247_s6 }
  0x29   :  { %p2704_p4 = pnand %p2702_p3, %p2699_p2 }
  0x2b   :  { %2707 = shalt.err (!%p2704_p4)
}
  0x2c   :  { %s2708_s4 = scalar_lea.vmem %s84_s23, 32  ;;  %p2713_p6 = scmp.lt.s32.totalorder %s84_s23, %s84_s23 }
  0x2d   :  { %p2709_p5 = scmp.ne.s32.totalorder %s84_s23, %s2708_s4  ;;  %p2714_p7 = scmp.lt.s32.totalorder %s2708_s4, %s2708_s4 }
  0x2f   :  { %p2715_p8 = por %p2714_p7, %p2713_p6 }
  0x31   :  { %p2716_p9 = pnand %p2715_p8, %p2709_p5 }
  0x33   :  { %2719 = shalt.err (!%p2716_p9)
}
  0x34   :  { %86 = dma.hbm_to_vmem [thread:$0]  %s3247_s6, 32, %s84_s23, [#allocation11]  }
  0x35   :  { %s2720_s17 = scalar_lea.hbm %s3242_s1, 65536 }
  0x36   :  { %p2721_p10 = scmp.ne.s32.totalorder %s3242_s1, %s2720_s17  ;;  %p2724_p11 = scmp.lt.u32.totalorder %s2720_s17, %s3242_s1 }
  0x38   :  { %p2726_p12 = pnand %p2724_p11, %p2721_p10 }
  0x3a   :  { %2729 = shalt.err (!%p2726_p12)
}
  0x3b   :  { %s2730_s22 = scalar_lea.vmem %s2937_s25, 65536  ;;  %p2735_p0 = scmp.lt.s32.totalorder %s2937_s25, %s2937_s25 }
  0x3c   :  { %p2731_p13 = scmp.ne.s32.totalorder %s2937_s25, %s2730_s22  ;;  %p2736_p1 = scmp.lt.s32.totalorder %s2730_s22, %s2730_s22 }
  0x3e   :  { %p2737_p2 = por %p2736_p1, %p2735_p0 }
  0x40   :  { %p2738_p3 = pnand %p2737_p2, %p2731_p13 }
  0x42   :  { %2741 = shalt.err (!%p2738_p3)
}
  0x43   :  { %s2844_s6 = smov 512   ;;  %s2845_s23 = smov 32  }
  0x44   :  { %34 = dma.hbm_to_vmem [thread:$0]  %s3242_s1, 65536, %s2937_s25, [#allocation3], %s2844_s6, %s2844_s6, %s2845_s23  }
  0x45   :  { %s2846_s27 = smov [#allocation6]   ;;  %s2847_s29 = smov [#allocation9]  }
  0x46   :  { %s51_s28 = sshll.u32 %s2846_s27, 4  ;;  %s70_s30 = sshll.u32 %s2847_s29, 4  ;;  %s52_s28 = int_to_ptr.vmem [resolvable:$true] %s51_s28  ;;  %s2968_s30 = int_to_ptr.vmem [resolvable:$true] %s70_s30 }
  0x47   :  { %s2742_s4 = scalar_lea.hbm %s3244_s3, 64 }
  0x48   :  { %p2743_p4 = scmp.ne.s32.totalorder %s3244_s3, %s2742_s4  ;;  %p2746_p5 = scmp.lt.u32.totalorder %s2742_s4, %s3244_s3 }
  0x4a   :  { %p2748_p6 = pnand %p2746_p5, %p2743_p4 }
  0x4c   :  { %2751 = shalt.err (!%p2748_p6)
}
  0x4d   :  { %s2752_s1 = scalar_lea.vmem %s52_s28, 64  ;;  %p2757_p8 = scmp.lt.s32.totalorder %s52_s28, %s52_s28 }
  0x4e   :  { %p2753_p7 = scmp.ne.s32.totalorder %s52_s28, %s2752_s1  ;;  %p2758_p9 = scmp.lt.s32.totalorder %s2752_s1, %s2752_s1 }
  0x50   :  { %p2759_p10 = por %p2758_p9, %p2757_p8 }
  0x52   :  { %p2760_p11 = pnand %p2759_p10, %p2753_p7 }
  0x54   :  { %2763 = shalt.err (!%p2760_p11)
}
  0x55   :  { %54 = dma.hbm_to_vmem [thread:$0]  %s3244_s3, 64, %s52_s28, [#allocation5]  }
  0x56   :  { %s2764_s2 = scalar_lea.hbm %s3246_s5, 16384 }
  0x57   :  { %p2765_p12 = scmp.ne.s32.totalorder %s3246_s5, %s2764_s2  ;;  %p2768_p13 = scmp.lt.u32.totalorder %s2764_s2, %s3246_s5 }
  0x59   :  { %p2770_p0 = pnand %p2768_p13, %p2765_p12 }
  0x5b   :  { %2773 = shalt.err (!%p2770_p0)
}
  0x5c   :  { %s2774_s24 = scalar_lea.vmem %s2968_s30, 16384  ;;  %p2779_p2 = scmp.lt.s32.totalorder %s2968_s30, %s2968_s30 }
  0x5d   :  { %p2775_p1 = scmp.ne.s32.totalorder %s2968_s30, %s2774_s24  ;;  %p2780_p3 = scmp.lt.s32.totalorder %s2774_s24, %s2774_s24 }
  0x5f   :  { %p2781_p4 = por %p2780_p3, %p2779_p2 }
  0x61   :  { %p2782_p5 = pnand %p2781_p4, %p2775_p1 }
  0x63   :  { %2785 = shalt.err (!%p2782_p5)
}
  0x64   :  { %s2848_s3 = smov 256   ;;  %s2849_s26 = smov 16  }
  0x65   :  { %76 = dma.hbm_to_vmem [thread:$0]  %s3246_s5, 16384, %s2968_s30, [#allocation8], %s2848_s3, %s2848_s3, %s2849_s26  }
  0x66   :  { %s2850_s29 = smov [#allocation12]   ;;  %s2851_s13 = smov [#allocation13]  }
  0x67   :  { %s93_s12 = sshll.u32 %s2850_s29, 4  ;;  %s103_s4 = sshll.u32 %s2851_s13, 4  ;;  %s94_s12 = int_to_ptr.vmem [resolvable:$true] %s93_s12  ;;  %s104_s4 = int_to_ptr.vmem [resolvable:$true] %s103_s4 }
  0x68   :  { %s2786_s15 = scalar_lea.hbm %s3248_s7, 32 }
  0x69   :  { %p2787_p6 = scmp.ne.s32.totalorder %s3248_s7, %s2786_s15  ;;  %p2790_p7 = scmp.lt.u32.totalorder %s2786_s15, %s3248_s7 }
  0x6b   :  { %p2792_p8 = pnand %p2790_p7, %p2787_p6 }
  0x6d   :  { %2795 = shalt.err (!%p2792_p8)
}
  0x6e   :  { %s2796_s5 = scalar_lea.vmem %s94_s12, 32  ;;  %p2801_p10 = scmp.lt.s32.totalorder %s94_s12, %s94_s12 }
  0x6f   :  { %p2797_p9 = scmp.ne.s32.totalorder %s94_s12, %s2796_s5  ;;  %p2802_p11 = scmp.lt.s32.totalorder %s2796_s5, %s2796_s5 }
  0x71   :  { %p2803_p12 = por %p2802_p11, %p2801_p10 }
  0x73   :  { %p2804_p13 = pnand %p2803_p12, %p2797_p9 }
  0x75   :  { %2807 = shalt.err (!%p2804_p13)
}
  0x76   :  { %96 = dma.hbm_to_vmem [thread:$0]  %s3248_s7, 32, %s94_s12, [#allocation11]  }
  0x77   :  { %s2808_s18 = scalar_lea.hbm %s3249_s8, 32 }
  0x78   :  { %p2809_p0 = scmp.ne.s32.totalorder %s3249_s8, %s2808_s18  ;;  %p2812_p1 = scmp.lt.u32.totalorder %s2808_s18, %s3249_s8 }
  0x7a   :  { %p2814_p2 = pnand %p2812_p1, %p2809_p0 }
  0x7c   :  { %2817 = shalt.err (!%p2814_p2)
}
  0x7d   :  { %s2818_s3 = scalar_lea.vmem %s104_s4, 32  ;;  %p2823_p4 = scmp.lt.s32.totalorder %s104_s4, %s104_s4 }
  0x7e   :  { %p2819_p3 = scmp.ne.s32.totalorder %s104_s4, %s2818_s3  ;;  %p2824_p5 = scmp.lt.s32.totalorder %s2818_s3, %s2818_s3 }
  0x80   :  { %p2825_p6 = por %p2824_p5, %p2823_p4 }
  0x82   :  { %p2826_p7 = pnand %p2825_p6, %p2819_p3 }
  0x84   :  { %2829 = shalt.err (!%p2826_p7)
}
  0x85   :  { %106 = dma.hbm_to_vmem [thread:$0]  %s3249_s8, 32, %s104_s4, [#allocation14]  }
  0x86   :  { %2830 = dma.done.wait [#allocation3], 65536  }
  0x87   :  { %2831 = vsyncadd [#allocation3], 4294901760 }
  0x88   :  { %2832 = dma.done.wait [#allocation5], 128  }
  0x89   :  { %2833 = vsyncadd [#allocation5], 4294967168 }
  0x8a   :  { %2834 = dma.done.wait [#allocation8], 16448  }
  0x8b   :  { %2835 = vsyncadd [#allocation8], 4294950848 }
  0x8c   :  { %2836 = dma.done.wait [#allocation11], 64  }
  0x8d   :  { %2837 = vsyncadd [#allocation11], 4294967232 }
  0x8e   :  { %2838 = dma.done.wait [#allocation14], 32  }
  0x8f   :  { %2839 = vsyncadd [#allocation14], 4294967264  ;;  %v138_v0 = vld [vmem:[#allocation2 + $0x8] sm:$0xff]  ;;  %v137_v5 = vld [vmem:[#allocation2] sm:$0xff]  ;;  %vm1285_vm0 = vcmask 1041408   ;;  %vm1888_vm1 = vcmask 66560  }
  0x90   :  { %v142_v1 = vld [vmem:[#allocation2 + $0x28] sm:$0xff]  ;;  %v141_v6 = vld [vmem:[#allocation2 + $0x20] sm:$0xff] }
  0x91   :  { %v266_v2 = vld [vmem:[#allocation2 + $0x408] sm:$0xff]  ;;  %v1935_v3 = vpack.c.bf16 %v142_v1, %v138_v0  ;;  %v1937_v8 = vpack.c.bf16 %v141_v6, %v137_v5  ;;  %v265_v9 = vld [vmem:[#allocation2 + $0x400] sm:$0xff] }
  0x92   :  { %v270_v4 = vld [vmem:[#allocation2 + $0x428] sm:$0xff]  ;;  %v269_v10 = vld [vmem:[#allocation2 + $0x420] sm:$0xff] }
  0x93   :  { %v1999_v7 = vpack.c.bf16 %v270_v4, %v266_v2  ;;  %v146_v11 = vld [vmem:[#allocation2 + $0x48] sm:$0xff]  ;;  %1936 = vmatprep.subr.bf16.mxu1 %v1935_v3  ;;  %v2001_v12 = vpack.c.bf16 %v269_v10, %v265_v9  ;;  %v145_v18 = vld [vmem:[#allocation2 + $0x40] sm:$0xff] }
  0x94   :  { %v150_v13 = vld [vmem:[#allocation2 + $0x68] sm:$0xff]  ;;  %1938 = vmatpush1.bf16.msra.mxu1 %v1937_v8  ;;  %v149_v19 = vld [vmem:[#allocation2 + $0x60] sm:$0xff] }
  0x95   :  { %v274_v14 = vld [vmem:[#allocation2 + $0x448] sm:$0xff]  ;;  %2000 = vmatprep.subr.bf16.mxu0 %v1999_v7  ;;  %v1939_v16 = vpack.c.bf16 %v150_v13, %v146_v11  ;;  %v273_v20 = vld [vmem:[#allocation2 + $0x440] sm:$0xff]  ;;  %v1941_v21 = vpack.c.bf16 %v149_v19, %v145_v18 }
  0x96   :  { %v278_v15 = vld [vmem:[#allocation2 + $0x468] sm:$0xff]  ;;  %2002 = vmatpush1.bf16.msra.mxu0 %v2001_v12  ;;  %v277_v22 = vld [vmem:[#allocation2 + $0x460] sm:$0xff] }
  0x97   :  { %v2003_v17 = vpack.c.bf16 %v278_v15, %v274_v14  ;;  %v154_v23 = vld [vmem:[#allocation2 + $0x88] sm:$0xff]  ;;  %1940 = vmatprep.subr.bf16.mxu1 %v1939_v16  ;;  %v2005_v25 = vpack.c.bf16 %v277_v22, %v273_v20  ;;  %v153_v29 = vld [vmem:[#allocation2 + $0x80] sm:$0xff] }
  0x98   :  { %v158_v24 = vld [vmem:[#allocation2 + $0xa8] sm:$0xff]  ;;  %v157_v31 = vld [vmem:[#allocation2 + $0xa0] sm:$0xff]  ;;  %1942 = vmatpush1.bf16.msra.mxu1 %v1941_v21 }
  0x99   :  { %2004 = vmatprep.subr.bf16.mxu0 %v2003_v17  ;;  %v1943_v26 = vpack.c.bf16 %v158_v24, %v154_v23  ;;  %v282_v27 = vld [vmem:[#allocation2 + $0x488] sm:$0xff]  ;;  %v281_v32 = vld [vmem:[#allocation2 + $0x480] sm:$0xff]  ;;  %v1945_v34 = vpack.c.bf16 %v157_v31, %v153_v29 }
  0x9a   :  { %v286_v28 = vld [vmem:[#allocation2 + $0x4a8] sm:$0xff]  ;;  %v285_v33 = vld [vmem:[#allocation2 + $0x4a0] sm:$0xff]  ;;  %2006 = vmatpush1.bf16.msra.mxu0 %v2005_v25 }
  0x9b   :  { %v2007_v30 = vpack.c.bf16 %v286_v28, %v282_v27  ;;  %v162_v35 = vld [vmem:[#allocation2 + $0xc8] sm:$0xff]  ;;  %1944 = vmatprep.subr.bf16.mxu1 %v1943_v26  ;;  %v2009_v38 = vpack.c.bf16 %v285_v33, %v281_v32  ;;  %v161_v41 = vld [vmem:[#allocation2 + $0xc0] sm:$0xff] }
  0x9c   :  { %v166_v36 = vld [vmem:[#allocation2 + $0xe8] sm:$0xff]  ;;  %v165_v42 = vld [vmem:[#allocation2 + $0xe0] sm:$0xff]  ;;  %1946 = vmatpush1.bf16.msra.mxu1 %v1945_v34 }
  0x9d   :  { %v290_v37 = vld [vmem:[#allocation2 + $0x4c8] sm:$0xff]  ;;  %v1947_v39 = vpack.c.bf16 %v166_v36, %v162_v35  ;;  %2008 = vmatprep.subr.bf16.mxu0 %v2007_v30  ;;  %v289_v44 = vld [vmem:[#allocation2 + $0x4c0] sm:$0xff]  ;;  %v1949_v50 = vpack.c.bf16 %v165_v42, %v161_v41 }
  0x9e   :  { %v294_v40 = vld [vmem:[#allocation2 + $0x4e8] sm:$0xff]  ;;  %v293_v45 = vld [vmem:[#allocation2 + $0x4e0] sm:$0xff]  ;;  %2010 = vmatpush1.bf16.msra.mxu0 %v2009_v38 }
  0x9f   :  { %v2011_v43 = vpack.c.bf16 %v294_v40, %v290_v37  ;;  %v170_v46 = vld [vmem:[#allocation2 + $0x108] sm:$0xff]  ;;  %1948 = vmatprep.subr.bf16.mxu1 %v1947_v39  ;;  %v2013_v51 = vpack.c.bf16 %v293_v45, %v289_v44  ;;  %v169_v53 = vld [vmem:[#allocation2 + $0x100] sm:$0xff] }
  0xa0   :  { %v174_v47 = vld [vmem:[#allocation2 + $0x128] sm:$0xff]  ;;  %v173_v54 = vld [vmem:[#allocation2 + $0x120] sm:$0xff]  ;;  %1950 = vmatpush1.bf16.msra.mxu1 %v1949_v50 }
  0xa1   :  { %v298_v48 = vld [vmem:[#allocation2 + $0x508] sm:$0xff]  ;;  %v1951_v52 = vpack.c.bf16 %v174_v47, %v170_v46  ;;  %v297_v55 = vld [vmem:[#allocation2 + $0x500] sm:$0xff]  ;;  %2012 = vmatprep.subr.bf16.mxu0 %v2011_v43  ;;  %v1953_v62 = vpack.c.bf16 %v173_v54, %v169_v53  ;;  %v651_v46 = vlaneseq  ;;  %v2852_v47 = vmov 1983009808  }
  0xa2   :  { %v302_v49 = vld [vmem:[#allocation2 + $0x528] sm:$0xff]  ;;  %v301_v57 = vld [vmem:[#allocation2 + $0x520] sm:$0xff]  ;;  %2014 = vmatpush1.bf16.msra.mxu0 %v2013_v51 }
  0xa3   :  { %v2015_v56 = vpack.c.bf16 %v302_v49, %v298_v48  ;;  %v178_v58 = vld [vmem:[#allocation2 + $0x148] sm:$0xff]  ;;  %1952 = vmatprep.subr.bf16.mxu1 %v1951_v52  ;;  %v2017_v63 = vpack.c.bf16 %v301_v57, %v297_v55  ;;  %v177_v1 = vld [vmem:[#allocation2 + $0x140] sm:$0xff]  ;;  %v675_v48 = vunpack.c.l.s4 %v2852_v47 }
  0xa4   :  { %v182_v59 = vld [vmem:[#allocation2 + $0x168] sm:$0xff]  ;;  %v181_v2 = vld [vmem:[#allocation2 + $0x160] sm:$0xff]  ;;  %1954 = vmatpush1.bf16.msra.mxu1 %v1953_v62 }
  0xa5   :  { %v306_v60 = vld [vmem:[#allocation2 + $0x548] sm:$0xff]  ;;  %v1955_v0 = vpack.c.bf16 %v182_v59, %v178_v58  ;;  %v305_v3 = vld [vmem:[#allocation2 + $0x540] sm:$0xff]  ;;  %2016 = vmatprep.subr.bf16.mxu0 %v2015_v56  ;;  %v1957_v10 = vpack.c.bf16 %v181_v2, %v177_v1  ;;  %v676_v62 = vunpack.c.0.s8 %v675_v48 }
  0xa6   :  { %v310_v61 = vld [vmem:[#allocation2 + $0x568] sm:$0xff]  ;;  %v309_v5 = vld [vmem:[#allocation2 + $0x560] sm:$0xff]  ;;  %2018 = vmatpush1.bf16.msra.mxu0 %v2017_v63 }
  0xa7   :  { %v2019_v4 = vpack.c.bf16 %v310_v61, %v306_v60  ;;  %v186_v6 = vld [vmem:[#allocation2 + $0x188] sm:$0xff]  ;;  %1956 = vmatprep.subr.bf16.mxu1 %v1955_v0  ;;  %v2021_v11 = vpack.c.bf16 %v309_v5, %v305_v3  ;;  %v185_v13 = vld [vmem:[#allocation2 + $0x180] sm:$0xff]  ;;  %v3023_v61 = vshrl.u32 %v651_v46, 7 }
  0xa8   :  { %v190_v7 = vld [vmem:[#allocation2 + $0x1a8] sm:$0xff]  ;;  %v189_v14 = vld [vmem:[#allocation2 + $0x1a0] sm:$0xff]  ;;  %1958 = vmatpush1.bf16.msra.mxu1 %v1957_v10 }
  0xa9   :  { %v314_v8 = vld [vmem:[#allocation2 + $0x588] sm:$0xff]  ;;  %v1959_v12 = vpack.c.bf16 %v190_v7, %v186_v6  ;;  %v313_v15 = vld [vmem:[#allocation2 + $0x580] sm:$0xff]  ;;  %2020 = vmatprep.subr.bf16.mxu0 %v2019_v4  ;;  %v1961_v22 = vpack.c.bf16 %v189_v14, %v185_v13 }
  0xaa   :  { %v318_v9 = vld [vmem:[#allocation2 + $0x5a8] sm:$0xff]  ;;  %v317_v17 = vld [vmem:[#allocation2 + $0x5a0] sm:$0xff]  ;;  %2022 = vmatpush1.bf16.msra.mxu0 %v2021_v11  ;;  %v3026_v11 = vsub.s32 %v676_v62, %v3023_v61 }
  0xab   :  { %v2023_v16 = vpack.c.bf16 %v318_v9, %v314_v8  ;;  %v194_v18 = vld [vmem:[#allocation2 + $0x1c8] sm:$0xff]  ;;  %1960 = vmatprep.subr.bf16.mxu1 %v1959_v12  ;;  %v2025_v23 = vpack.c.bf16 %v317_v17, %v313_v15  ;;  %v193_v25 = vld [vmem:[#allocation2 + $0x1c0] sm:$0xff] }
  0xac   :  { %v198_v19 = vld [vmem:[#allocation2 + $0x1e8] sm:$0xff]  ;;  %v197_v26 = vld [vmem:[#allocation2 + $0x1e0] sm:$0xff]  ;;  %1962 = vmatpush1.bf16.msra.mxu1 %v1961_v22 }
  0xad   :  { %v322_v20 = vld [vmem:[#allocation2 + $0x5c8] sm:$0xff]  ;;  %v1963_v24 = vpack.c.bf16 %v198_v19, %v194_v18  ;;  %v321_v27 = vld [vmem:[#allocation2 + $0x5c0] sm:$0xff]  ;;  %2024 = vmatprep.subr.bf16.mxu0 %v2023_v16  ;;  %v1965_v34 = vpack.c.bf16 %v197_v26, %v193_v25 }
  0xae   :  { %v326_v21 = vld [vmem:[#allocation2 + $0x5e8] sm:$0xff]  ;;  %v325_v29 = vld [vmem:[#allocation2 + $0x5e0] sm:$0xff]  ;;  %2026 = vmatpush1.bf16.msra.mxu0 %v2025_v23 }
  0xaf   :  { %v2027_v28 = vpack.c.bf16 %v326_v21, %v322_v20  ;;  %v202_v30 = vld [vmem:[#allocation2 + $0x208] sm:$0xff]  ;;  %1964 = vmatprep.subr.bf16.mxu1 %v1963_v24  ;;  %v2029_v35 = vpack.c.bf16 %v325_v29, %v321_v27  ;;  %v201_v37 = vld [vmem:[#allocation2 + $0x200] sm:$0xff] }
  0xb0   :  { %v206_v31 = vld [vmem:[#allocation2 + $0x228] sm:$0xff]  ;;  %v205_v38 = vld [vmem:[#allocation2 + $0x220] sm:$0xff]  ;;  %1966 = vmatpush1.bf16.msra.mxu1 %v1965_v34 }
  0xb1   :  { %v330_v32 = vld [vmem:[#allocation2 + $0x608] sm:$0xff]  ;;  %v1967_v36 = vpack.c.bf16 %v206_v31, %v202_v30  ;;  %v329_v39 = vld [vmem:[#allocation2 + $0x600] sm:$0xff]  ;;  %2028 = vmatprep.subr.bf16.mxu0 %v2027_v28  ;;  %v1969_v49 = vpack.c.bf16 %v205_v38, %v201_v37 }
  0xb2   :  { %v334_v33 = vld [vmem:[#allocation2 + $0x628] sm:$0xff]  ;;  %v333_v41 = vld [vmem:[#allocation2 + $0x620] sm:$0xff]  ;;  %2030 = vmatpush1.bf16.msra.mxu0 %v2029_v35 }
  0xb3   :  { %v2031_v40 = vpack.c.bf16 %v334_v33, %v330_v32  ;;  %v210_v42 = vld [vmem:[#allocation2 + $0x248] sm:$0xff]  ;;  %1968 = vmatprep.subr.bf16.mxu1 %v1967_v36  ;;  %v2033_v50 = vpack.c.bf16 %v333_v41, %v329_v39  ;;  %v209_v52 = vld [vmem:[#allocation2 + $0x240] sm:$0xff] }
  0xb4   :  { %v214_v43 = vld [vmem:[#allocation2 + $0x268] sm:$0xff]  ;;  %v213_v53 = vld [vmem:[#allocation2 + $0x260] sm:$0xff]  ;;  %1970 = vmatpush1.bf16.msra.mxu1 %v1969_v49 }
  0xb5   :  { %v338_v44 = vld [vmem:[#allocation2 + $0x648] sm:$0xff]  ;;  %v1971_v51 = vpack.c.bf16 %v214_v43, %v210_v42  ;;  %v337_v54 = vld [vmem:[#allocation2 + $0x640] sm:$0xff]  ;;  %2032 = vmatprep.subr.bf16.mxu0 %v2031_v40  ;;  %v1973_v63 = vpack.c.bf16 %v213_v53, %v209_v52 }
  0xb6   :  { %v342_v45 = vld [vmem:[#allocation2 + $0x668] sm:$0xff]  ;;  %v341_v56 = vld [vmem:[#allocation2 + $0x660] sm:$0xff]  ;;  %2034 = vmatpush1.bf16.msra.mxu0 %v2033_v50 }
  0xb7   :  { %v2035_v55 = vpack.c.bf16 %v342_v45, %v338_v44  ;;  %v218_v57 = vld [vmem:[#allocation2 + $0x288] sm:$0xff]  ;;  %1972 = vmatprep.subr.bf16.mxu1 %v1971_v51  ;;  %v2037_v0 = vpack.c.bf16 %v341_v56, %v337_v54  ;;  %v217_v2 = vld [vmem:[#allocation2 + $0x280] sm:$0xff] }
  0xb8   :  { %v222_v58 = vld [vmem:[#allocation2 + $0x2a8] sm:$0xff]  ;;  %v221_v3 = vld [vmem:[#allocation2 + $0x2a0] sm:$0xff]  ;;  %1974 = vmatpush1.bf16.msra.mxu1 %v1973_v63 }
  0xb9   :  { %v346_v59 = vld [vmem:[#allocation2 + $0x688] sm:$0xff]  ;;  %v1975_v1 = vpack.c.bf16 %v222_v58, %v218_v57  ;;  %v345_v4 = vld [vmem:[#allocation2 + $0x680] sm:$0xff]  ;;  %2036 = vmatprep.subr.bf16.mxu0 %v2035_v55  ;;  %v1977_v12 = vpack.c.bf16 %v221_v3, %v217_v2 }
  0xba   :  { %v350_v60 = vld [vmem:[#allocation2 + $0x6a8] sm:$0xff]  ;;  %v349_v6 = vld [vmem:[#allocation2 + $0x6a0] sm:$0xff]  ;;  %2038 = vmatpush1.bf16.msra.mxu0 %v2037_v0 }
  0xbb   :  { %v2039_v5 = vpack.c.bf16 %v350_v60, %v346_v59  ;;  %v226_v7 = vld [vmem:[#allocation2 + $0x2c8] sm:$0xff]  ;;  %v225_v13 = vld [vmem:[#allocation2 + $0x2c0] sm:$0xff]  ;;  %1976 = vmatprep.subr.bf16.mxu1 %v1975_v1  ;;  %v2041_v14 = vpack.c.bf16 %v349_v6, %v345_v4 }
  0xbc   :  { %v230_v8 = vld [vmem:[#allocation2 + $0x2e8] sm:$0xff]  ;;  %v229_v16 = vld [vmem:[#allocation2 + $0x2e0] sm:$0xff]  ;;  %1978 = vmatpush1.bf16.msra.mxu1 %v1977_v12  ;;  %v140_v12 = vld [vmem:[#allocation2 + $0x18] sm:$0xff] }
  0xbd   :  { %v354_v9 = vld [vmem:[#allocation2 + $0x6c8] sm:$0xff]  ;;  %v1979_v15 = vpack.c.bf16 %v230_v8, %v226_v7  ;;  %v353_v17 = vld [vmem:[#allocation2 + $0x6c0] sm:$0xff]  ;;  %2040 = vmatprep.subr.bf16.mxu0 %v2039_v5  ;;  %v1981_v27 = vpack.c.bf16 %v229_v16, %v225_v13  ;;  %v144_v13 = vld [vmem:[#allocation2 + $0x38] sm:$0xff] }
  0xbe   :  { %v358_v10 = vld [vmem:[#allocation2 + $0x6e8] sm:$0xff]  ;;  %v357_v18 = vld [vmem:[#allocation2 + $0x6e0] sm:$0xff]  ;;  %2042 = vmatpush1.bf16.msra.mxu0 %v2041_v14 }
  0xbf   :  { %v2043_v19 = vpack.c.bf16 %v358_v10, %v354_v9  ;;  %v234_v20 = vld [vmem:[#allocation2 + $0x308] sm:$0xff]  ;;  %v135_v22 = vld [vmem:[%s3241_s0] sm:$0xff]  ;;  %v2045_v28 = vpack.c.bf16 %v357_v18, %v353_v17  ;;  %1980 = vmatprep.subr.bf16.mxu1 %v1979_v15  ;;  %v2191_v18 = vpack.c.bf16 %v144_v13, %v140_v12  ;;  %v180_v13 = vld [vmem:[#allocation2 + $0x158] sm:$0xff] }
  0xc0   :  { %v238_v21 = vld [vmem:[#allocation2 + $0x328] sm:$0xff]  ;;  %v3032_v25 = vrot.slane %v135_v22, %v3026_v11  ;;  %v673_v26 = vcombine.high %v135_v22, %v135_v22  ;;  %v233_v30 = vld [vmem:[#allocation2 + $0x300] sm:$0xff]  ;;  %1982 = vmatpush1.bf16.msra.mxu1 %v1981_v27 }
  0xc1   :  { %v362_v23 = vld [vmem:[#allocation2 + $0x708] sm:$0xff]  ;;  %v1983_v29 = vpack.c.bf16 %v238_v21, %v234_v20  ;;  %v237_v31 = vld [vmem:[#allocation2 + $0x320] sm:$0xff]  ;;  %2044 = vmatprep.subr.bf16.mxu0 %v2043_v19  ;;  %v139_v20 = vld [vmem:[#allocation2 + $0x10] sm:$0xff] }
  0xc2   :  { %v366_v24 = vld [vmem:[#allocation2 + $0x728] sm:$0xff]  ;;  %v361_v32 = vld [vmem:[#allocation2 + $0x700] sm:$0xff]  ;;  %v3036_v33 = vcombine.high %v3032_v25, %v3032_v25  ;;  %v3039_v34 = vrot.slane %v673_v26, %v3026_v11  ;;  %v1985_v42 = vpack.c.bf16 %v237_v31, %v233_v30  ;;  %2046 = vmatpush1.bf16.msra.mxu0 %v2045_v28  ;;  %v143_v21 = vld [vmem:[#allocation2 + $0x30] sm:$0xff] }
  0xc3   :  { %v2047_v35 = vpack.c.bf16 %v366_v24, %v362_v23  ;;  %v365_v36 = vld [vmem:[#allocation2 + $0x720] sm:$0xff]  ;;  %v242_v37 = vld [vmem:[#allocation2 + $0x348] sm:$0xff]  ;;  %1984 = vmatprep.subr.bf16.mxu1 %v1983_v29  ;;  %v148_v24 = vld [vmem:[#allocation2 + $0x58] sm:$0xff]  ;;  %v2193_v29 = vpack.c.bf16 %v143_v21, %v139_v20 }
  0xc4   :  { %v246_v38 = vld [vmem:[#allocation2 + $0x368] sm:$0xff]  ;;  %779 = vmatprep.mubr.f32.mxu1 %v3036_v33  ;;  %v3044_v41 = vcombine.high %v3039_v34, %v3039_v34  ;;  %v2049_v43 = vpack.c.bf16 %v365_v36, %v361_v32  ;;  %v241_v45 = vld [vmem:[#allocation2 + $0x340] sm:$0xff]  ;;  %1986 = vmatpush1.bf16.msra.mxu1 %v1985_v42  ;;  %v152_v26 = vld [vmem:[#allocation2 + $0x78] sm:$0xff] }
  0xc5   :  { %v370_v39 = vld [vmem:[#allocation2 + $0x748] sm:$0xff]  ;;  %v1987_v44 = vpack.c.bf16 %v246_v38, %v242_v37  ;;  %v245_v46 = vld [vmem:[#allocation2 + $0x360] sm:$0xff]  ;;  %2048 = vmatprep.subr.bf16.mxu0 %v2047_v35  ;;  %v2195_v31 = vpack.c.bf16 %v152_v26, %v148_v24  ;;  %v147_v35 = vld [vmem:[#allocation2 + $0x50] sm:$0xff] }
  0xc6   :  { %v374_v40 = vld [vmem:[#allocation2 + $0x768] sm:$0xff]  ;;  %v369_v47 = vld [vmem:[#allocation2 + $0x740] sm:$0xff]  ;;  %850 = vmatprep.mubr.f32.mxu0 %v3044_v41  ;;  %v1989_v54 = vpack.c.bf16 %v245_v46, %v241_v45  ;;  %2050 = vmatpush1.bf16.msra.mxu0 %v2049_v43  ;;  %v151_v36 = vld [vmem:[#allocation2 + $0x70] sm:$0xff] }
  0xc7   :  { %v2051_v48 = vpack.c.bf16 %v374_v40, %v370_v39  ;;  %v373_v49 = vld [vmem:[#allocation2 + $0x760] sm:$0xff]  ;;  %v250_v50 = vld [vmem:[#allocation2 + $0x388] sm:$0xff]  ;;  %1988 = vmatprep.subr.bf16.mxu1 %v1987_v44  ;;  %v156_v39 = vld [vmem:[#allocation2 + $0x98] sm:$0xff]  ;;  %v2197_v44 = vpack.c.bf16 %v151_v36, %v147_v35 }
  0xc8   :  { %v254_v51 = vld [vmem:[#allocation2 + $0x3a8] sm:$0xff]  ;;  %v2053_v55 = vpack.c.bf16 %v373_v49, %v369_v47  ;;  %v249_v57 = vld [vmem:[#allocation2 + $0x380] sm:$0xff]  ;;  %1990 = vmatpush1.bf16.msra.mxu1 %v1989_v54  ;;  %v160_v40 = vld [vmem:[#allocation2 + $0xb8] sm:$0xff] }
  0xc9   :  { %v378_v52 = vld [vmem:[#allocation2 + $0x788] sm:$0xff]  ;;  %v1991_v56 = vpack.c.bf16 %v254_v51, %v250_v50  ;;  %v253_v58 = vld [vmem:[#allocation2 + $0x3a0] sm:$0xff]  ;;  %2052 = vmatprep.subr.bf16.mxu0 %v2051_v48  ;;  %v2199_v46 = vpack.c.bf16 %v160_v40, %v156_v39  ;;  %v155_v48 = vld [vmem:[#allocation2 + $0x90] sm:$0xff] }
  0xca   :  { %v382_v53 = vld [vmem:[#allocation2 + $0x7a8] sm:$0xff]  ;;  %v377_v59 = vld [vmem:[#allocation2 + $0x780] sm:$0xff]  ;;  %v1993_v3 = vpack.c.bf16 %v253_v58, %v249_v57  ;;  %2054 = vmatpush1.bf16.msra.mxu0 %v2053_v55  ;;  %v159_v49 = vld [vmem:[#allocation2 + $0xb0] sm:$0xff] }
  0xcb   :  { %v2055_v60 = vpack.c.bf16 %v382_v53, %v378_v52  ;;  %v381_v62 = vld [vmem:[#allocation2 + $0x7a0] sm:$0xff]  ;;  %v258_v63 = vld [vmem:[#allocation2 + $0x3c8] sm:$0xff]  ;;  %1992 = vmatprep.subr.bf16.mxu1 %v1991_v56  ;;  %v164_v52 = vld [vmem:[#allocation2 + $0xd8] sm:$0xff]  ;;  %v2201_v56 = vpack.c.bf16 %v159_v49, %v155_v48 }
  0xcc   :  { %v262_v0 = vld [vmem:[#allocation2 + $0x3e8] sm:$0xff]  ;;  %v2057_v4 = vpack.c.bf16 %v381_v62, %v377_v59  ;;  %v257_v6 = vld [vmem:[#allocation2 + $0x3c0] sm:$0xff]  ;;  %1994 = vmatpush1.bf16.msra.mxu1 %v1993_v3  ;;  %v168_v53 = vld [vmem:[#allocation2 + $0xf8] sm:$0xff] }
  0xcd   :  { %v386_v1 = vld [vmem:[#allocation2 + $0x7c8] sm:$0xff]  ;;  %v1995_v5 = vpack.c.bf16 %v262_v0, %v258_v63  ;;  %v261_v7 = vld [vmem:[#allocation2 + $0x3e0] sm:$0xff]  ;;  %2056 = vmatprep.subr.bf16.mxu0 %v2055_v60  ;;  %v2203_v58 = vpack.c.bf16 %v168_v53, %v164_v52  ;;  %v163_v60 = vld [vmem:[#allocation2 + $0xd0] sm:$0xff] }
  0xce   :  { %v390_v2 = vld [vmem:[#allocation2 + $0x7e8] sm:$0xff]  ;;  %v385_v8 = vld [vmem:[#allocation2 + $0x7c0] sm:$0xff]  ;;  %v1997_v16 = vpack.c.bf16 %v261_v7, %v257_v6  ;;  %2058 = vmatpush1.bf16.msra.mxu0 %v2057_v4  ;;  %v167_v62 = vld [vmem:[#allocation2 + $0xf0] sm:$0xff] }
  0xcf   :  { %v2059_v9 = vpack.c.bf16 %v390_v2, %v386_v1  ;;  %v389_v10 = vld [vmem:[#allocation2 + $0x7e0] sm:$0xff]  ;;  %v394_v14 = vld [vmem:[#allocation2 + $0x808] sm:$0xff]  ;;  %1996 = vmatprep.subr.bf16.mxu1 %v1995_v5  ;;  %v172_v1 = vld [vmem:[#allocation2 + $0x118] sm:$0xff] }
  0xd0   :  { %v398_v15 = vld [vmem:[#allocation2 + $0x828] sm:$0xff]  ;;  %v2061_v17 = vpack.c.bf16 %v389_v10, %v385_v8  ;;  %v393_v19 = vld [vmem:[#allocation2 + $0x800] sm:$0xff]  ;;  %1998 = vmatpush1.bf16.msra.mxu1 %v1997_v16  ;;  %v176_v2 = vld [vmem:[#allocation2 + $0x138] sm:$0xff] }
  0xd1   :  { %2060 = vmatprep.subr.bf16.mxu0 %v2059_v9  ;;  %v2063_v22 = vpack.c.bf16 %v398_v15, %v394_v14  ;;  %v397_v23 = vld [vmem:[#allocation2 + $0x820] sm:$0xff]  ;;  %v402_v27 = vld [vmem:[#allocation2 + $0x848] sm:$0xff]  ;;  %2192 = vmatprep.subr.bf16.mxu1 %v2191_v18  ;;  %v2207_v6 = vpack.c.bf16 %v176_v2, %v172_v1  ;;  %v171_v8 = vld [vmem:[#allocation2 + $0x110] sm:$0xff] }
  0xd2   :  { %v406_v28 = vld [vmem:[#allocation2 + $0x868] sm:$0xff]  ;;  %2062 = vmatpush1.bf16.msra.mxu0 %v2061_v17  ;;  %v2065_v30 = vpack.c.bf16 %v397_v23, %v393_v19  ;;  %v401_v32 = vld [vmem:[#allocation2 + $0x840] sm:$0xff]  ;;  %v175_v9 = vld [vmem:[#allocation2 + $0x130] sm:$0xff] }
  0xd3   :  { %2064 = vmatprep.subr.bf16.mxu0 %v2063_v22  ;;  %v2067_v37 = vpack.c.bf16 %v406_v28, %v402_v27  ;;  %v405_v38 = vld [vmem:[#allocation2 + $0x860] sm:$0xff]  ;;  %780 = vmatmul.mubr.f32.vlgmr.msra.gmra.mrb[0].mxu1 %v3032_v25  ;;  %v410_v42 = vld [vmem:[#allocation2 + $0x888] sm:$0xff]  ;;  %v184_v14 = vld [vmem:[#allocation2 + $0x178] sm:$0xff]  ;;  %v2209_v17 = vpack.c.bf16 %v175_v9, %v171_v8 }
  0xd4   :  { %v414_v43 = vld [vmem:[#allocation2 + $0x8a8] sm:$0xff]  ;;  %2194 = vmatpush1.bf16.msra.mxu1 %v2193_v29  ;;  %v2069_v45 = vpack.c.bf16 %v405_v38, %v401_v32  ;;  %v409_v47 = vld [vmem:[#allocation2 + $0x880] sm:$0xff]  ;;  %1063 = vmatprep.mubr.f32.mxu1 %v3036_v33  ;;  %v2205_v33 = vpack.c.bf16 %v167_v62, %v163_v60  ;;  %v2211_v19 = vpack.c.bf16 %v184_v14, %v180_v13  ;;  %v179_v21 = vld [vmem:[#allocation2 + $0x150] sm:$0xff] }
  0xd5   :  { %851 = vmatmul.mubr.f32.vlgmr.msra.gmra.mrb[0].mxu0 %v3039_v34  ;;  %2196 = vmatprep.subr.bf16.mxu1 %v2195_v31  ;;  %v2071_v50 = vpack.c.bf16 %v414_v43, %v410_v42  ;;  %v413_v51 = vld [vmem:[#allocation2 + $0x8a0] sm:$0xff]  ;;  %v418_v54 = vld [vmem:[#allocation2 + $0x8c8] sm:$0xff]  ;;  %v183_v22 = vld [vmem:[#allocation2 + $0x170] sm:$0xff] }
  0xd6   :  { %2066 = vmatpush1.bf16.msra.mxu0 %v2065_v30  ;;  %v422_v55 = vld [vmem:[#allocation2 + $0x8e8] sm:$0xff]  ;;  %v2073_v57 = vpack.c.bf16 %v413_v51, %v409_v47  ;;  %v417_v59 = vld [vmem:[#allocation2 + $0x8c0] sm:$0xff]  ;;  %v188_v26 = vld [vmem:[#allocation2 + $0x198] sm:$0xff]  ;;  %v2213_v30 = vpack.c.bf16 %v183_v22, %v179_v21 }
  0xd7   :  { %2068 = vmatprep.subr.bf16.mxu0 %v2067_v37  ;;  %v2075_v63 = vpack.c.bf16 %v422_v55, %v418_v54  ;;  %v421_v0 = vld [vmem:[#allocation2 + $0x8e0] sm:$0xff]  ;;  %v426_v3 = vld [vmem:[#allocation2 + $0x908] sm:$0xff]  ;;  %v192_v27 = vld [vmem:[#allocation2 + $0x1b8] sm:$0xff] }
  0xd8   :  { %2198 = vmatpush1.bf16.msra.mxu1 %v2197_v44  ;;  %v430_v4 = vld [vmem:[#allocation2 + $0x928] sm:$0xff]  ;;  %v2077_v5 = vpack.c.bf16 %v421_v0, %v417_v59  ;;  %v425_v7 = vld [vmem:[#allocation2 + $0x900] sm:$0xff]  ;;  %v2215_v35 = vpack.c.bf16 %v192_v27, %v188_v26  ;;  %v187_v36 = vld [vmem:[#allocation2 + $0x190] sm:$0xff] }
  0xd9   :  { %2200 = vmatprep.subr.bf16.mxu1 %v2199_v46  ;;  %v2079_v10 = vpack.c.bf16 %v430_v4, %v426_v3  ;;  %v429_v12 = vld [vmem:[#allocation2 + $0x920] sm:$0xff]  ;;  %v434_v15 = vld [vmem:[#allocation2 + $0x948] sm:$0xff]  ;;  %v191_v37 = vld [vmem:[#allocation2 + $0x1b0] sm:$0xff] }
  0xda   :  { %2070 = vmatpush1.bf16.msra.mxu0 %v2069_v45  ;;  %v438_v16 = vld [vmem:[#allocation2 + $0x968] sm:$0xff]  ;;  %v2081_v18 = vpack.c.bf16 %v429_v12, %v425_v7  ;;  %v433_v20 = vld [vmem:[#allocation2 + $0x940] sm:$0xff]  ;;  %v196_v42 = vld [vmem:[#allocation2 + $0x1d8] sm:$0xff]  ;;  %v2217_v47 = vpack.c.bf16 %v191_v37, %v187_v36 }
  0xdb   :  { %2072 = vmatprep.subr.bf16.mxu0 %v2071_v50  ;;  %v2083_v23 = vpack.c.bf16 %v438_v16, %v434_v15  ;;  %v437_v24 = vld [vmem:[#allocation2 + $0x960] sm:$0xff]  ;;  %v442_v28 = vld [vmem:[#allocation2 + $0x988] sm:$0xff]  ;;  %v200_v43 = vld [vmem:[#allocation2 + $0x1f8] sm:$0xff] }
  0xdc   :  { %2202 = vmatpush1.bf16.msra.mxu1 %v2201_v56  ;;  %v446_v29 = vld [vmem:[#allocation2 + $0x9a8] sm:$0xff]  ;;  %v441_v31 = vld [vmem:[#allocation2 + $0x980] sm:$0xff]  ;;  %v2085_v32 = vpack.c.bf16 %v437_v24, %v433_v20  ;;  %v2219_v50 = vpack.c.bf16 %v200_v43, %v196_v42  ;;  %v195_v52 = vld [vmem:[#allocation2 + $0x1d0] sm:$0xff] }
  0xdd   :  { %2204 = vmatprep.subr.bf16.mxu1 %v2203_v58  ;;  %v3053_v38 = vld [vmem:[%s3241_s0 + $0x8] sm:$0xff]  ;;  %v2087_v39 = vpack.c.bf16 %v446_v29, %v442_v28  ;;  %v445_v40 = vld [vmem:[#allocation2 + $0x9a0] sm:$0xff]  ;;  %v199_v53 = vld [vmem:[#allocation2 + $0x1f0] sm:$0xff] }
  0xde   :  { %2074 = vmatpush1.bf16.msra.mxu0 %v2073_v57  ;;  %v3057_v44 = vrot.slane %v3053_v38, %v3026_v11  ;;  %v450_v45 = vld [vmem:[#allocation2 + $0x9c8] sm:$0xff]  ;;  %v2089_v49 = vpack.c.bf16 %v445_v40, %v441_v31  ;;  %v449_v51 = vld [vmem:[#allocation2 + $0x9c0] sm:$0xff]  ;;  %v204_v56 = vld [vmem:[#allocation2 + $0x218] sm:$0xff]  ;;  %v2221_v60 = vpack.c.bf16 %v199_v53, %v195_v52 }
  0xdf   :  { %2076 = vmatprep.subr.bf16.mxu0 %v2075_v63  ;;  %v454_v46 = vld [vmem:[#allocation2 + $0x9e8] sm:$0xff]  ;;  %v453_v55 = vld [vmem:[#allocation2 + $0x9e0] sm:$0xff]  ;;  %v208_v57 = vld [vmem:[#allocation2 + $0x238] sm:$0xff] }
  0xe0   :  { %2206 = vmatpush1.bf16.msra.mxu1 %v2205_v33  ;;  %v3061_v48 = vcombine.high %v3057_v44, %v3057_v44  ;;  %v2091_v54 = vpack.c.bf16 %v454_v46, %v450_v45  ;;  %v458_v58 = vld [vmem:[#allocation2 + $0xa08] sm:$0xff]  ;;  %v2093_v62 = vpack.c.bf16 %v453_v55, %v449_v51  ;;  %v2223_v63 = vpack.c.bf16 %v208_v57, %v204_v56  ;;  %v457_v0 = vld [vmem:[#allocation2 + $0xa00] sm:$0xff]  ;;  %v203_v1 = vld [vmem:[#allocation2 + $0x210] sm:$0xff] }
  0xe1   :  { %2208 = vmatprep.subr.bf16.mxu1 %v2207_v6  ;;  %v462_v59 = vld [vmem:[#allocation2 + $0xa28] sm:$0xff]  ;;  %v207_v2 = vld [vmem:[#allocation2 + $0x230] sm:$0xff]  ;;  %v461_v4 = vld [vmem:[#allocation2 + $0xa20] sm:$0xff] }
  0xe2   :  { %2078 = vmatpush1.bf16.msra.mxu0 %v2077_v5  ;;  %921 = vmatprep.mubr.f32.mxu0 %v3061_v48  ;;  %v2095_v3 = vpack.c.bf16 %v462_v59, %v458_v58  ;;  %v212_v33 = vld [vmem:[#allocation2 + $0x258] sm:$0xff]  ;;  %v466_v6 = vld [vmem:[#allocation2 + $0xa48] sm:$0xff]  ;;  %v2225_v8 = vpack.c.bf16 %v207_v2, %v203_v1  ;;  %v2097_v9 = vpack.c.bf16 %v461_v4, %v457_v0  ;;  %v465_v12 = vld [vmem:[#allocation2 + $0xa40] sm:$0xff] }
  0xe3   :  { %2080 = vmatprep.subr.bf16.mxu0 %v2079_v10  ;;  %v216_v5 = vld [vmem:[#allocation2 + $0x278] sm:$0xff]  ;;  %v470_v7 = vld [vmem:[#allocation2 + $0xa68] sm:$0xff]  ;;  %v211_v13 = vld [vmem:[#allocation2 + $0x250] sm:$0xff] }
  0xe4   :  { %2210 = vmatpush1.bf16.msra.mxu1 %v2209_v17  ;;  %v2227_v10 = vpack.c.bf16 %v216_v5, %v212_v33  ;;  %v215_v14 = vld [vmem:[#allocation2 + $0x270] sm:$0xff]  ;;  %v2099_v15 = vpack.c.bf16 %v470_v7, %v466_v6  ;;  %v469_v16 = vld [vmem:[#allocation2 + $0xa60] sm:$0xff]  ;;  %v220_v17 = vld [vmem:[#allocation2 + $0x298] sm:$0xff] }
  0xe5   :  { %2212 = vmatprep.subr.bf16.mxu1 %v2211_v19  ;;  %v474_v19 = vld [vmem:[#allocation2 + $0xa88] sm:$0xff]  ;;  %v2229_v21 = vpack.c.bf16 %v215_v14, %v211_v13  ;;  %v2101_v22 = vpack.c.bf16 %v469_v16, %v465_v12  ;;  %v473_v24 = vld [vmem:[#allocation2 + $0xa80] sm:$0xff]  ;;  %v219_v26 = vld [vmem:[#allocation2 + $0x290] sm:$0xff] }
  0xe6   :  { %2082 = vmatpush1.bf16.msra.mxu0 %v2081_v18  ;;  %v224_v18 = vld [vmem:[#allocation2 + $0x2b8] sm:$0xff]  ;;  %v478_v20 = vld [vmem:[#allocation2 + $0xaa8] sm:$0xff]  ;;  %v223_v27 = vld [vmem:[#allocation2 + $0x2b0] sm:$0xff] }
  0xe7   :  { %2084 = vmatprep.subr.bf16.mxu0 %v2083_v23  ;;  %v2231_v23 = vpack.c.bf16 %v224_v18, %v220_v17  ;;  %v2103_v28 = vpack.c.bf16 %v478_v20, %v474_v19  ;;  %v477_v29 = vld [vmem:[#allocation2 + $0xaa0] sm:$0xff]  ;;  %v232_v31 = vld [vmem:[#allocation2 + $0x2f8] sm:$0xff]  ;;  %v2233_v36 = vpack.c.bf16 %v223_v27, %v219_v26  ;;  %v227_v42 = vld [vmem:[#allocation2 + $0x2d0] sm:$0xff] }
  0xe8   :  { %2214 = vmatpush1.bf16.msra.mxu1 %v2213_v30  ;;  %v228_v30 = vld [vmem:[#allocation2 + $0x2d8] sm:$0xff]  ;;  %v2105_v37 = vpack.c.bf16 %v477_v29, %v473_v24  ;;  %v481_v40 = vld [vmem:[#allocation2 + $0xac0] sm:$0xff]  ;;  %v231_v43 = vld [vmem:[#allocation2 + $0x2f0] sm:$0xff] }
  0xe9   :  { %2216 = vmatprep.subr.bf16.mxu1 %v2215_v35  ;;  %v486_v35 = vld [vmem:[#allocation2 + $0xae8] sm:$0xff]  ;;  %v485_v46 = vld [vmem:[#allocation2 + $0xae0] sm:$0xff]  ;;  %v2237_v52 = vpack.c.bf16 %v231_v43, %v227_v42  ;;  %v235_v56 = vld [vmem:[#allocation2 + $0x310] sm:$0xff] }
  0xea   :  { %2086 = vmatpush1.bf16.msra.mxu0 %v2085_v32  ;;  %v482_v32 = vld [vmem:[#allocation2 + $0xac8] sm:$0xff]  ;;  %v2109_v53 = vpack.c.bf16 %v485_v46, %v481_v40  ;;  %v489_v55 = vld [vmem:[#allocation2 + $0xb00] sm:$0xff]  ;;  %v239_v57 = vld [vmem:[#allocation2 + $0x330] sm:$0xff] }
  0xeb   :  { %2088 = vmatprep.subr.bf16.mxu0 %v2087_v39  ;;  %v2235_v39 = vpack.c.bf16 %v232_v31, %v228_v30  ;;  %v2107_v45 = vpack.c.bf16 %v486_v35, %v482_v32  ;;  %v494_v51 = vld [vmem:[#allocation2 + $0xb28] sm:$0xff]  ;;  %v493_v59 = vld [vmem:[#allocation2 + $0xb20] sm:$0xff]  ;;  %v2241_v1 = vpack.c.bf16 %v239_v57, %v235_v56  ;;  %v243_v33 = vld [vmem:[#allocation2 + $0x350] sm:$0xff] }
  0xec   :  { %2218 = vmatpush1.bf16.msra.mxu1 %v2217_v47  ;;  %v236_v47 = vld [vmem:[#allocation2 + $0x318] sm:$0xff]  ;;  %v502_v0 = vld [vmem:[#allocation2 + $0xb68] sm:$0xff]  ;;  %v2113_v2 = vpack.c.bf16 %v493_v59, %v489_v55  ;;  %v497_v4 = vld [vmem:[#allocation2 + $0xb40] sm:$0xff] }
  0xed   :  { %2220 = vmatprep.subr.bf16.mxu1 %v2219_v50  ;;  %v490_v50 = vld [vmem:[#allocation2 + $0xb08] sm:$0xff]  ;;  %v247_v5 = vld [vmem:[#allocation2 + $0x370] sm:$0xff]  ;;  %v501_v7 = vld [vmem:[#allocation2 + $0xb60] sm:$0xff] }
  0xee   :  { %2090 = vmatpush1.bf16.msra.mxu0 %v2089_v49  ;;  %v240_v49 = vld [vmem:[#allocation2 + $0x338] sm:$0xff]  ;;  %v2111_v58 = vpack.c.bf16 %v494_v51, %v490_v50  ;;  %v510_v12 = vld [vmem:[#allocation2 + $0xba8] sm:$0xff]  ;;  %v2245_v13 = vpack.c.bf16 %v247_v5, %v243_v33  ;;  %v2117_v14 = vpack.c.bf16 %v501_v7, %v497_v4  ;;  %v505_v16 = vld [vmem:[#allocation2 + $0xb80] sm:$0xff] }
  0xef   :  { %2092 = vmatprep.subr.bf16.mxu0 %v2091_v54  ;;  %v2239_v54 = vpack.c.bf16 %v240_v49, %v236_v47  ;;  %v251_v17 = vld [vmem:[#allocation2 + $0x390] sm:$0xff]  ;;  %v509_v20 = vld [vmem:[#allocation2 + $0xba0] sm:$0xff]  ;;  %v518_v24 = vld [vmem:[#allocation2 + $0xbe8] sm:$0xff] }
  0xf0   :  { %2222 = vmatpush1.bf16.msra.mxu1 %v2221_v60  ;;  %v244_v60 = vld [vmem:[#allocation2 + $0x358] sm:$0xff]  ;;  %v255_v18 = vld [vmem:[#allocation2 + $0x3b0] sm:$0xff]  ;;  %v2121_v27 = vpack.c.bf16 %v509_v20, %v505_v16  ;;  %v513_v29 = vld [vmem:[#allocation2 + $0xbc0] sm:$0xff] }
  0xf1   :  { %2224 = vmatprep.subr.bf16.mxu1 %v2223_v63  ;;  %v498_v63 = vld [vmem:[#allocation2 + $0xb48] sm:$0xff]  ;;  %v2249_v26 = vpack.c.bf16 %v255_v18, %v251_v17  ;;  %v259_v30 = vld [vmem:[#allocation2 + $0x3d0] sm:$0xff]  ;;  %v517_v35 = vld [vmem:[#allocation2 + $0xbe0] sm:$0xff] }
  0xf2   :  { %2094 = vmatpush1.bf16.msra.mxu0 %v2093_v62  ;;  %v248_v62 = vld [vmem:[#allocation2 + $0x378] sm:$0xff]  ;;  %v2115_v6 = vpack.c.bf16 %v502_v0, %v498_v63  ;;  %v263_v31 = vld [vmem:[#allocation2 + $0x3f0] sm:$0xff]  ;;  %v522_v40 = vld [vmem:[#allocation2 + $0xc08] sm:$0xff] }
  0xf3   :  { %2096 = vmatprep.subr.bf16.mxu0 %v2095_v3  ;;  %v2243_v3 = vpack.c.bf16 %v248_v62, %v244_v60  ;;  %v526_v42 = vld [vmem:[#allocation2 + $0xc28] sm:$0xff]  ;;  %v2253_v43 = vpack.c.bf16 %v263_v31, %v259_v30  ;;  %v521_v47 = vld [vmem:[#allocation2 + $0xc00] sm:$0xff]  ;;  %v267_v49 = vld [vmem:[#allocation2 + $0x410] sm:$0xff] }
  0xf4   :  { %2226 = vmatpush1.bf16.msra.mxu1 %v2225_v8  ;;  %v252_v8 = vld [vmem:[#allocation2 + $0x398] sm:$0xff]  ;;  %v271_v50 = vld [vmem:[#allocation2 + $0x430] sm:$0xff]  ;;  %v2127_v51 = vpack.c.bf16 %v526_v42, %v522_v40  ;;  %v534_v56 = vld [vmem:[#allocation2 + $0xc68] sm:$0xff] }
  0xf5   :  { %2228 = vmatprep.subr.bf16.mxu1 %v2227_v10  ;;  %v506_v10 = vld [vmem:[#allocation2 + $0xb88] sm:$0xff]  ;;  %v2257_v57 = vpack.c.bf16 %v271_v50, %v267_v49  ;;  %v529_v60 = vld [vmem:[#allocation2 + $0xc40] sm:$0xff]  ;;  %v275_v62 = vld [vmem:[#allocation2 + $0x450] sm:$0xff] }
  0xf6   :  { %2098 = vmatpush1.bf16.msra.mxu0 %v2097_v9  ;;  %v256_v9 = vld [vmem:[#allocation2 + $0x3b8] sm:$0xff]  ;;  %v2119_v19 = vpack.c.bf16 %v510_v12, %v506_v10  ;;  %v279_v63 = vld [vmem:[#allocation2 + $0x470] sm:$0xff]  ;;  %v538_v4 = vld [vmem:[#allocation2 + $0xc88] sm:$0xff] }
  0xf7   :  { %2100 = vmatprep.subr.bf16.mxu0 %v2099_v15  ;;  %v2247_v15 = vpack.c.bf16 %v256_v9, %v252_v8  ;;  %v542_v33 = vld [vmem:[#allocation2 + $0xca8] sm:$0xff]  ;;  %v2261_v5 = vpack.c.bf16 %v279_v63, %v275_v62  ;;  %v537_v8 = vld [vmem:[#allocation2 + $0xc80] sm:$0xff]  ;;  %v283_v9 = vld [vmem:[#allocation2 + $0x490] sm:$0xff] }
  0xf8   :  { %2230 = vmatpush1.bf16.msra.mxu1 %v2229_v21  ;;  %v260_v21 = vld [vmem:[#allocation2 + $0x3d8] sm:$0xff]  ;;  %v287_v10 = vld [vmem:[#allocation2 + $0x4b0] sm:$0xff]  ;;  %v2135_v12 = vpack.c.bf16 %v542_v33, %v538_v4  ;;  %v550_v16 = vld [vmem:[#allocation2 + $0xce8] sm:$0xff] }
  0xf9   :  { %2232 = vmatprep.subr.bf16.mxu1 %v2231_v23  ;;  %v514_v23 = vld [vmem:[#allocation2 + $0xbc8] sm:$0xff]  ;;  %v2265_v17 = vpack.c.bf16 %v287_v10, %v283_v9  ;;  %v545_v20 = vld [vmem:[#allocation2 + $0xcc0] sm:$0xff]  ;;  %v308_v40 = vld [vmem:[#allocation2 + $0x558] sm:$0xff] }
  0xfa   :  { %2102 = vmatpush1.bf16.msra.mxu0 %v2101_v22  ;;  %v264_v22 = vld [vmem:[#allocation2 + $0x3f8] sm:$0xff]  ;;  %v2123_v32 = vpack.c.bf16 %v518_v24, %v514_v23  ;;  %v549_v24 = vld [vmem:[#allocation2 + $0xce0] sm:$0xff] }
  0xfb   :  { %2104 = vmatprep.subr.bf16.mxu0 %v2103_v28  ;;  %v2251_v28 = vpack.c.bf16 %v264_v22, %v260_v21  ;;  %v291_v21 = vld [vmem:[#allocation2 + $0x4d0] sm:$0xff]  ;;  %v312_v42 = vld [vmem:[#allocation2 + $0x578] sm:$0xff]  ;;  %v561_v50 = vld [vmem:[#allocation2 + $0xd40] sm:$0xff] }
  0xfc   :  { %2234 = vmatpush1.bf16.msra.mxu1 %v2233_v36  ;;  %v268_v36 = vld [vmem:[#allocation2 + $0x418] sm:$0xff]  ;;  %v295_v22 = vld [vmem:[#allocation2 + $0x4f0] sm:$0xff]  ;;  %v2275_v49 = vpack.c.bf16 %v312_v42, %v308_v40  ;;  %v569_v63 = vld [vmem:[#allocation2 + $0xd80] sm:$0xff] }
  0xfd   :  { %2236 = vmatprep.subr.bf16.mxu1 %v2235_v39  ;;  %v690_v39 = vcombine.high %v3053_v38, %v3053_v38  ;;  %v530_v38 = vld [vmem:[#allocation2 + $0xc48] sm:$0xff]  ;;  %v2269_v30 = vpack.c.bf16 %v295_v22, %v291_v21  ;;  %v324_v4 = vld [vmem:[#allocation2 + $0x5d8] sm:$0xff]  ;;  %v577_v10 = vld [vmem:[#allocation2 + $0xdc0] sm:$0xff] }
  0xfe   :  { %2106 = vmatpush1.bf16.msra.mxu0 %v2105_v37  ;;  %v272_v37 = vld [vmem:[#allocation2 + $0x438] sm:$0xff]  ;;  %v2131_v0 = vpack.c.bf16 %v534_v56, %v530_v38  ;;  %v585_v22 = vld [vmem:[#allocation2 + $0xe00] sm:$0xff] }
  0xff   :  { %2108 = vmatprep.subr.bf16.mxu0 %v2107_v45  ;;  %v2125_v45 = vpack.c.bf16 %v517_v35, %v513_v29  ;;  %v2255_v46 = vpack.c.bf16 %v272_v37, %v268_v36  ;;  %v3067_v55 = vrot.slane %v690_v39, %v3026_v11  ;;  %v558_v29 = vld [vmem:[#allocation2 + $0xd28] sm:$0xff]  ;;  %v299_v35 = vld [vmem:[#allocation2 + $0x510] sm:$0xff]  ;;  %v557_v39 = vld [vmem:[#allocation2 + $0xd20] sm:$0xff] }
 0x100   :  { %2238 = vmatpush1.bf16.msra.mxu1 %v2237_v52  ;;  %v525_v52 = vld [vmem:[#allocation2 + $0xc20] sm:$0xff]  ;;  %v303_v36 = vld [vmem:[#allocation2 + $0x530] sm:$0xff]  ;;  %v316_v38 = vld [vmem:[#allocation2 + $0x598] sm:$0xff] }
 0x101   :  { %2240 = vmatprep.subr.bf16.mxu1 %v2239_v54  ;;  %v280_v54 = vld [vmem:[#allocation2 + $0x478] sm:$0xff]  ;;  %v3071_v11 = vcombine.high %v3067_v55, %v3067_v55  ;;  %v597_v42 = vld [vmem:[#allocation2 + $0xe60] sm:$0xff] }
 0x102   :  { %2110 = vmatpush1.bf16.msra.mxu0 %v2109_v53  ;;  %v276_v53 = vld [vmem:[#allocation2 + $0x458] sm:$0xff] }
 0x103   :  { %2112 = vmatprep.subr.bf16.mxu0 %v2111_v58  ;;  %v2129_v58 = vpack.c.bf16 %v525_v52, %v521_v47  ;;  %v2259_v59 = vpack.c.bf16 %v280_v54, %v276_v53  ;;  %v311_v52 = vld [vmem:[#allocation2 + $0x570] sm:$0xff]  ;;  %v565_v54 = vld [vmem:[#allocation2 + $0xd60] sm:$0xff]  ;;  %v320_v56 = vld [vmem:[#allocation2 + $0x5b8] sm:$0xff] }
 0x104   :  { %2242 = vmatpush1.bf16.msra.mxu1 %v2241_v1  ;;  %v533_v1 = vld [vmem:[#allocation2 + $0xc60] sm:$0xff]  ;;  %v2279_v62 = vpack.c.bf16 %v320_v56, %v316_v38  ;;  %v328_v33 = vld [vmem:[#allocation2 + $0x5f8] sm:$0xff] }
 0x105   :  { %2244 = vmatprep.subr.bf16.mxu1 %v2243_v3  ;;  %v288_v3 = vld [vmem:[#allocation2 + $0x4b8] sm:$0xff]  ;;  %v2283_v9 = vpack.c.bf16 %v328_v33, %v324_v4  ;;  %v605_v56 = vld [vmem:[#allocation2 + $0xea0] sm:$0xff] }
 0x106   :  { %2114 = vmatpush1.bf16.msra.mxu0 %v2113_v2  ;;  %v284_v2 = vld [vmem:[#allocation2 + $0x498] sm:$0xff]  ;;  %v613_v33 = vld [vmem:[#allocation2 + $0xee0] sm:$0xff] }
 0x107   :  { %2116 = vmatprep.subr.bf16.mxu0 %v2115_v6  ;;  %v2133_v6 = vpack.c.bf16 %v533_v1, %v529_v60  ;;  %v2263_v7 = vpack.c.bf16 %v288_v3, %v284_v2  ;;  %v2149_v60 = vpack.c.bf16 %v565_v54, %v561_v50  ;;  %v319_v1 = vld [vmem:[#allocation2 + $0x5b0] sm:$0xff]  ;;  %v573_v3 = vld [vmem:[#allocation2 + $0xda0] sm:$0xff] }
 0x108   :  { %2246 = vmatpush1.bf16.msra.mxu1 %v2245_v13  ;;  %v541_v13 = vld [vmem:[#allocation2 + $0xca0] sm:$0xff]  ;;  %v351_v54 = vld [vmem:[#allocation2 + $0x6b0] sm:$0xff] }
 0x109   :  { %2248 = vmatprep.subr.bf16.mxu1 %v2247_v15  ;;  %v296_v15 = vld [vmem:[#allocation2 + $0x4f8] sm:$0xff]  ;;  %v2137_v18 = vpack.c.bf16 %v541_v13, %v537_v8  ;;  %v2153_v8 = vpack.c.bf16 %v573_v3, %v569_v63  ;;  %v327_v13 = vld [vmem:[#allocation2 + $0x5f0] sm:$0xff] }
 0x10a   :  { %2118 = vmatpush1.bf16.msra.mxu0 %v2117_v14  ;;  %v292_v14 = vld [vmem:[#allocation2 + $0x4d8] sm:$0xff]  ;;  %v359_v3 = vld [vmem:[#allocation2 + $0x6f0] sm:$0xff] }
 0x10b   :  { %2120 = vmatprep.subr.bf16.mxu0 %v2119_v19  ;;  %v2267_v19 = vpack.c.bf16 %v296_v15, %v292_v14  ;;  %v581_v15 = vld [vmem:[#allocation2 + $0xde0] sm:$0xff] }
 0x10c   :  { %2250 = vmatpush1.bf16.msra.mxu1 %v2249_v26  ;;  %v300_v26 = vld [vmem:[#allocation2 + $0x518] sm:$0xff] }
 0x10d   :  { %2252 = vmatprep.subr.bf16.mxu1 %v2251_v28  ;;  %v554_v28 = vld [vmem:[#allocation2 + $0xd08] sm:$0xff] }
 0x10e   :  { %2122 = vmatpush1.bf16.msra.mxu0 %v2121_v27  ;;  %v304_v27 = vld [vmem:[#allocation2 + $0x538] sm:$0xff]  ;;  %v2143_v37 = vpack.c.bf16 %v558_v29, %v554_v28 }
 0x10f   :  { %2124 = vmatprep.subr.bf16.mxu0 %v2123_v32  ;;  %v2271_v31 = vpack.c.bf16 %v304_v27, %v300_v26  ;;  %v553_v32 = vld [vmem:[#allocation2 + $0xd00] sm:$0xff]  ;;  %v340_v28 = vld [vmem:[#allocation2 + $0x658] sm:$0xff] }
 0x110   :  { %2254 = vmatpush1.bf16.msra.mxu1 %v2253_v43  ;;  %v562_v43 = vld [vmem:[#allocation2 + $0xd48] sm:$0xff]  ;;  %v2145_v47 = vpack.c.bf16 %v557_v39, %v553_v32  ;;  %v589_v27 = vld [vmem:[#allocation2 + $0xe20] sm:$0xff]  ;;  %v344_v29 = vld [vmem:[#allocation2 + $0x678] sm:$0xff] }
 0x111   :  { %2256 = vmatprep.subr.bf16.mxu1 %v2255_v46  ;;  %v2273_v46 = vpack.c.bf16 %v303_v36, %v299_v35  ;;  %v2161_v32 = vpack.c.bf16 %v589_v27, %v585_v22  ;;  %v2291_v35 = vpack.c.bf16 %v344_v29, %v340_v28  ;;  %v593_v36 = vld [vmem:[#allocation2 + $0xe40] sm:$0xff]  ;;  %v343_v39 = vld [vmem:[#allocation2 + $0x670] sm:$0xff] }
 0x112   :  { %2126 = vmatpush1.bf16.msra.mxu0 %v2125_v45  ;;  %v566_v45 = vld [vmem:[#allocation2 + $0xd68] sm:$0xff]  ;;  %v2165_v50 = vpack.c.bf16 %v597_v42, %v593_v36  ;;  %v375_v27 = vld [vmem:[#allocation2 + $0x770] sm:$0xff]  ;;  %v629_v29 = vld [vmem:[#allocation2 + $0xf60] sm:$0xff] }
 0x113   :  { %2128 = vmatprep.subr.bf16.mxu0 %v2127_v51  ;;  %1064 = vmatmul.mubr.f32.vlgmr.msra.gmra.mrb[2].mxu1 %v3032_v25  ;;  %v546_v25 = vld [vmem:[#allocation2 + $0xcc8] sm:$0xff]  ;;  %v307_v51 = vld [vmem:[#allocation2 + $0x550] sm:$0xff]  ;;  %v2147_v53 = vpack.c.bf16 %v566_v45, %v562_v43  ;;  %v348_v43 = vld [vmem:[#allocation2 + $0x698] sm:$0xff] }
 0x114   :  { %2258 = vmatpush1.bf16.msra.mxu1 %v2257_v57  ;;  %1134 = vmatprep.mubr.f32.mxu1 %v3044_v41  ;;  %v2139_v23 = vpack.c.bf16 %v550_v16, %v546_v25  ;;  %v2141_v41 = vpack.c.bf16 %v549_v24, %v545_v20  ;;  %v570_v57 = vld [vmem:[#allocation2 + $0xd88] sm:$0xff]  ;;  %v332_v25 = vld [vmem:[#allocation2 + $0x618] sm:$0xff]  ;;  %v2157_v20 = vpack.c.bf16 %v581_v15, %v577_v10  ;;  %v335_v24 = vld [vmem:[#allocation2 + $0x630] sm:$0xff] }
 0x115   :  { %922 = vmatmul.mubr.f32.vlgmr.msra.gmra.mrb[0].mxu0 %v3057_v44  ;;  %2260 = vmatprep.subr.bf16.mxu1 %v2259_v59  ;;  %v2277_v59 = vpack.c.bf16 %v311_v52, %v307_v51  ;;  %v336_v16 = vld [vmem:[#allocation2 + $0x638] sm:$0xff]  ;;  %v601_v52 = vld [vmem:[#allocation2 + $0xe80] sm:$0xff]  ;;  %v367_v15 = vld [vmem:[#allocation2 + $0x730] sm:$0xff] }
 0x116   :  { %2130 = vmatpush1.bf16.msra.mxu0 %v2129_v58  ;;  %992 = vmatprep.mubr.f32.mxu0 %v3071_v11  ;;  %v574_v58 = vld [vmem:[#allocation2 + $0xda8] sm:$0xff]  ;;  %v2287_v21 = vpack.c.bf16 %v336_v16, %v332_v25  ;;  %v352_v45 = vld [vmem:[#allocation2 + $0x6b8] sm:$0xff]  ;;  %v2169_v63 = vpack.c.bf16 %v605_v56, %v601_v52  ;;  %v621_v16 = vld [vmem:[#allocation2 + $0xf20] sm:$0xff] }
 0x117   :  { %2132 = vmatprep.subr.bf16.mxu0 %v2131_v0  ;;  %v315_v0 = vld [vmem:[#allocation2 + $0x590] sm:$0xff]  ;;  %v2151_v2 = vpack.c.bf16 %v574_v58, %v570_v57  ;;  %v2295_v51 = vpack.c.bf16 %v352_v45, %v348_v43  ;;  %v356_v57 = vld [vmem:[#allocation2 + $0x6d8] sm:$0xff]  ;;  %v637_v45 = vld [vmem:[#allocation2 + $0xfa0] sm:$0xff] }
 0x118   :  { %2262 = vmatpush1.bf16.msra.mxu1 %v2261_v5  ;;  %v578_v5 = vld [vmem:[#allocation2 + $0xdc8] sm:$0xff]  ;;  %v360_v58 = vld [vmem:[#allocation2 + $0x6f8] sm:$0xff]  ;;  %v383_v42 = vld [vmem:[#allocation2 + $0x7b0] sm:$0xff] }
 0x119   :  { %2264 = vmatprep.subr.bf16.mxu1 %v2263_v7  ;;  %v2281_v7 = vpack.c.bf16 %v319_v1, %v315_v0  ;;  %v2299_v0 = vpack.c.bf16 %v360_v58, %v356_v57  ;;  %v609_v1 = vld [vmem:[#allocation2 + $0xec0] sm:$0xff]  ;;  %v391_v56 = vld [vmem:[#allocation2 + $0x7f0] sm:$0xff] }
 0x11a   :  { %2134 = vmatpush1.bf16.msra.mxu0 %v2133_v6  ;;  %v582_v6 = vld [vmem:[#allocation2 + $0xde8] sm:$0xff]  ;;  %v2173_v10 = vpack.c.bf16 %v613_v33, %v609_v1  ;;  %v645_v58 = vld [vmem:[#allocation2 + $0xfe0] sm:$0xff]  ;;  %v395_v1 = vld [vmem:[#allocation2 + $0x810] sm:$0xff] }
 0x11b   :  { %2136 = vmatprep.subr.bf16.mxu0 %v2135_v12  ;;  %v323_v12 = vld [vmem:[#allocation2 + $0x5d0] sm:$0xff]  ;;  %v2155_v14 = vpack.c.bf16 %v582_v6, %v578_v5  ;;  %v364_v5 = vld [vmem:[#allocation2 + $0x718] sm:$0xff] }
 0x11c   :  { %2266 = vmatpush1.bf16.msra.mxu1 %v2265_v17  ;;  %v586_v17 = vld [vmem:[#allocation2 + $0xe08] sm:$0xff]  ;;  %v368_v6 = vld [vmem:[#allocation2 + $0x738] sm:$0xff] }
 0x11d   :  { %2268 = vmatprep.subr.bf16.mxu1 %v2267_v19  ;;  %v2285_v19 = vpack.c.bf16 %v327_v13, %v323_v12  ;;  %v2303_v12 = vpack.c.bf16 %v368_v6, %v364_v5  ;;  %v617_v13 = vld [vmem:[#allocation2 + $0xf00] sm:$0xff]  ;;  %v403_v6 = vld [vmem:[#allocation2 + $0x850] sm:$0xff] }
 0x11e   :  { %2138 = vmatpush1.bf16.msra.mxu0 %v2137_v18  ;;  %v590_v18 = vld [vmem:[#allocation2 + $0xe28] sm:$0xff]  ;;  %v2177_v22 = vpack.c.bf16 %v621_v16, %v617_v13  ;;  %v1427_v16 = vld [vmem:[#allocation9 + $0x10] sm:$0xff] }
 0x11f   :  { %2140 = vmatprep.subr.bf16.mxu0 %v2139_v23  ;;  %v331_v23 = vld [vmem:[#allocation2 + $0x610] sm:$0xff]  ;;  %v2159_v26 = vpack.c.bf16 %v590_v18, %v586_v17  ;;  %v372_v17 = vld [vmem:[#allocation2 + $0x758] sm:$0xff]  ;;  %v1428_v13 = vld [vmem:[#allocation9 + $0x18] sm:$0xff] }
 0x120   :  { %2270 = vmatpush1.bf16.msra.mxu1 %v2269_v30  ;;  %v594_v30 = vld [vmem:[#allocation2 + $0xe48] sm:$0xff]  ;;  %v376_v18 = vld [vmem:[#allocation2 + $0x778] sm:$0xff] }
 0x121   :  { %2272 = vmatprep.subr.bf16.mxu1 %v2271_v31  ;;  %v2289_v31 = vpack.c.bf16 %v335_v24, %v331_v23  ;;  %v2307_v23 = vpack.c.bf16 %v376_v18, %v372_v17  ;;  %v625_v24 = vld [vmem:[#allocation2 + $0xf40] sm:$0xff]  ;;  %v1430_v17 = vld [vmem:[#allocation9 + $0x28] sm:$0xff] }
 0x122   :  { %2142 = vmatpush1.bf16.msra.mxu0 %v2141_v41  ;;  %v598_v41 = vld [vmem:[#allocation2 + $0xe68] sm:$0xff]  ;;  %v2181_v36 = vpack.c.bf16 %v629_v29, %v625_v24  ;;  %v420_v24 = vld [vmem:[#allocation2 + $0x8d8] sm:$0xff] }
 0x123   :  { %2144 = vmatprep.subr.bf16.mxu0 %v2143_v37  ;;  %v339_v37 = vld [vmem:[#allocation2 + $0x650] sm:$0xff]  ;;  %v2163_v40 = vpack.c.bf16 %v598_v41, %v594_v30  ;;  %v380_v30 = vld [vmem:[#allocation2 + $0x798] sm:$0xff]  ;;  %v1432_v18 = vld [vmem:[#allocation9 + $0x38] sm:$0xff] }
 0x124   :  { %2274 = vmatpush1.bf16.msra.mxu1 %v2273_v46  ;;  %v602_v46 = vld [vmem:[#allocation2 + $0xe88] sm:$0xff]  ;;  %v384_v41 = vld [vmem:[#allocation2 + $0x7b8] sm:$0xff] }
 0x125   :  { %2276 = vmatprep.subr.bf16.mxu1 %v2275_v49  ;;  %v2293_v49 = vpack.c.bf16 %v343_v39, %v339_v37  ;;  %v2311_v37 = vpack.c.bf16 %v384_v41, %v380_v30  ;;  %v633_v39 = vld [vmem:[#allocation2 + $0xf80] sm:$0xff]  ;;  %v419_v30 = vld [vmem:[#allocation2 + $0x8d0] sm:$0xff] }
 0x126   :  { %2146 = vmatpush1.bf16.msra.mxu0 %v2145_v47  ;;  %v606_v47 = vld [vmem:[#allocation2 + $0xea8] sm:$0xff]  ;;  %v2185_v52 = vpack.c.bf16 %v637_v45, %v633_v39  ;;  %v423_v41 = vld [vmem:[#allocation2 + $0x8f0] sm:$0xff]  ;;  %v436_v39 = vld [vmem:[#allocation2 + $0x958] sm:$0xff] }
 0x127   :  { %2148 = vmatprep.subr.bf16.mxu0 %v2147_v53  ;;  %v347_v53 = vld [vmem:[#allocation2 + $0x690] sm:$0xff]  ;;  %v2167_v38 = vpack.c.bf16 %v606_v47, %v602_v46  ;;  %v388_v46 = vld [vmem:[#allocation2 + $0x7d8] sm:$0xff] }
 0x128   :  { %2278 = vmatpush1.bf16.msra.mxu1 %v2277_v59  ;;  %v610_v59 = vld [vmem:[#allocation2 + $0xec8] sm:$0xff]  ;;  %v392_v47 = vld [vmem:[#allocation2 + $0x7f8] sm:$0xff]  ;;  %v435_v45 = vld [vmem:[#allocation2 + $0x950] sm:$0xff] }
 0x129   :  { %2280 = vmatprep.subr.bf16.mxu1 %v2279_v62  ;;  %v2297_v62 = vpack.c.bf16 %v351_v54, %v347_v53  ;;  %v2315_v53 = vpack.c.bf16 %v392_v47, %v388_v46  ;;  %v641_v54 = vld [vmem:[#allocation2 + $0xfc0] sm:$0xff]  ;;  %v439_v46 = vld [vmem:[#allocation2 + $0x970] sm:$0xff]  ;;  %v444_v47 = vld [vmem:[#allocation2 + $0x998] sm:$0xff] }
 0x12a   :  { %2150 = vmatpush1.bf16.msra.mxu0 %v2149_v60  ;;  %v614_v60 = vld [vmem:[#allocation2 + $0xee8] sm:$0xff] }
 0x12b   :  { %2152 = vmatprep.subr.bf16.mxu0 %v2151_v2  ;;  %v355_v2 = vld [vmem:[#allocation2 + $0x6d0] sm:$0xff]  ;;  %v2171_v4 = vpack.c.bf16 %v614_v60, %v610_v59  ;;  %v396_v59 = vld [vmem:[#allocation2 + $0x818] sm:$0xff] }
 0x12c   :  { %2282 = vmatpush1.bf16.msra.mxu1 %v2281_v7  ;;  %v618_v7 = vld [vmem:[#allocation2 + $0xf08] sm:$0xff]  ;;  %v400_v60 = vld [vmem:[#allocation2 + $0x838] sm:$0xff] }
 0x12d   :  { %2284 = vmatprep.subr.bf16.mxu1 %v2283_v9  ;;  %v2301_v9 = vpack.c.bf16 %v359_v3, %v355_v2  ;;  %v399_v2 = vld [vmem:[#allocation2 + $0x830] sm:$0xff]  ;;  %v404_v3 = vld [vmem:[#allocation2 + $0x858] sm:$0xff] }
 0x12e   :  { %2154 = vmatpush1.bf16.msra.mxu0 %v2153_v8  ;;  %v622_v8 = vld [vmem:[#allocation2 + $0xf28] sm:$0xff]  ;;  %v2321_v33 = vpack.c.bf16 %v399_v2, %v395_v1  ;;  %v459_v1 = vld [vmem:[#allocation2 + $0xa10] sm:$0xff] }
 0x12f   :  { %2156 = vmatprep.subr.bf16.mxu0 %v2155_v14  ;;  %v363_v14 = vld [vmem:[#allocation2 + $0x710] sm:$0xff]  ;;  %v2175_v25 = vpack.c.bf16 %v622_v8, %v618_v7  ;;  %v412_v8 = vld [vmem:[#allocation2 + $0x898] sm:$0xff] }
 0x130   :  { %2286 = vmatpush1.bf16.msra.mxu1 %v2285_v19  ;;  %v626_v19 = vld [vmem:[#allocation2 + $0xf48] sm:$0xff]  ;;  %v407_v7 = vld [vmem:[#allocation2 + $0x870] sm:$0xff] }
 0x131   :  { %2288 = vmatprep.subr.bf16.mxu1 %v2287_v21  ;;  %v2305_v21 = vpack.c.bf16 %v367_v15, %v363_v14  ;;  %v1425_v14 = vld [vmem:[#allocation9] sm:$0xff]  ;;  %v2325_v15 = vpack.c.bf16 %v407_v7, %v403_v6 }
 0x132   :  { %2158 = vmatpush1.bf16.msra.mxu0 %v2157_v20  ;;  %v630_v20 = vld [vmem:[#allocation2 + $0xf68] sm:$0xff]  ;;  %v463_v2 = vld [vmem:[#allocation2 + $0xa30] sm:$0xff] }
 0x133   :  { %2160 = vmatprep.subr.bf16.mxu0 %v2159_v26  ;;  %v371_v26 = vld [vmem:[#allocation2 + $0x750] sm:$0xff]  ;;  %v2179_v28 = vpack.c.bf16 %v630_v20, %v626_v19 }
 0x134   :  { %2290 = vmatpush1.bf16.msra.mxu1 %v2289_v31  ;;  %v634_v31 = vld [vmem:[#allocation2 + $0xf88] sm:$0xff]  ;;  %v415_v20 = vld [vmem:[#allocation2 + $0x8b0] sm:$0xff] }
 0x135   :  { %2292 = vmatprep.subr.bf16.mxu1 %v2291_v35  ;;  %v2309_v35 = vpack.c.bf16 %v375_v27, %v371_v26  ;;  %v424_v26 = vld [vmem:[#allocation2 + $0x8f8] sm:$0xff]  ;;  %v467_v6 = vld [vmem:[#allocation2 + $0xa50] sm:$0xff] }
 0x136   :  { %2162 = vmatpush1.bf16.msra.mxu0 %v2161_v32  ;;  %v638_v32 = vld [vmem:[#allocation2 + $0xfa8] sm:$0xff]  ;;  %v2331_v29 = vpack.c.bf16 %v424_v26, %v420_v24  ;;  %v471_v7 = vld [vmem:[#allocation2 + $0xa70] sm:$0xff]  ;;  %v500_v26 = vld [vmem:[#allocation2 + $0xb58] sm:$0xff] }
 0x137   :  { %2164 = vmatprep.subr.bf16.mxu0 %v2163_v40  ;;  %v379_v40 = vld [vmem:[#allocation2 + $0x790] sm:$0xff]  ;;  %v2183_v43 = vpack.c.bf16 %v638_v32, %v634_v31  ;;  %v428_v31 = vld [vmem:[#allocation2 + $0x918] sm:$0xff] }
 0x138   :  { %2294 = vmatpush1.bf16.msra.mxu1 %v2293_v49  ;;  %v642_v49 = vld [vmem:[#allocation2 + $0xfc8] sm:$0xff]  ;;  %v432_v32 = vld [vmem:[#allocation2 + $0x938] sm:$0xff]  ;;  %v495_v24 = vld [vmem:[#allocation2 + $0xb30] sm:$0xff] }
 0x139   :  { %2296 = vmatprep.subr.bf16.mxu1 %v2295_v51  ;;  %v2313_v51 = vpack.c.bf16 %v383_v42, %v379_v40  ;;  %v440_v40 = vld [vmem:[#allocation2 + $0x978] sm:$0xff] }
 0x13a   :  { %2166 = vmatpush1.bf16.msra.mxu0 %v2165_v50  ;;  %v646_v50 = vld [vmem:[#allocation2 + $0xfe8] sm:$0xff] }
 0x13b   :  { %2168 = vmatprep.subr.bf16.mxu0 %v2167_v38  ;;  %v387_v38 = vld [vmem:[#allocation2 + $0x7d0] sm:$0xff]  ;;  %v2187_v57 = vpack.c.bf16 %v646_v50, %v642_v49  ;;  %v448_v49 = vld [vmem:[#allocation2 + $0x9b8] sm:$0xff]  ;;  %v2341_v50 = vpack.c.bf16 %v439_v46, %v435_v45 }
 0x13c   :  { %2298 = vmatpush1.bf16.msra.mxu1 %v2297_v62  ;;  %v2317_v62 = vpack.c.bf16 %v391_v56, %v387_v38  ;;  %v456_v38 = vld [vmem:[#allocation2 + $0x9f8] sm:$0xff]  ;;  %v515_v45 = vld [vmem:[#allocation2 + $0xbd0] sm:$0xff] }
 0x13d   :  { %2300 = vmatprep.subr.bf16.mxu1 %v2299_v0  ;;  %v2319_v0 = vpack.c.bf16 %v400_v60, %v396_v59  ;;  %v455_v59 = vld [vmem:[#allocation2 + $0x9f0] sm:$0xff]  ;;  %v460_v60 = vld [vmem:[#allocation2 + $0xa18] sm:$0xff] }
 0x13e   :  { %2170 = vmatpush1.bf16.msra.mxu0 %v2169_v63  ;;  %v2189_v63 = vpack.c.bf16 %v645_v58, %v641_v54  ;;  %v452_v54 = vld [vmem:[#allocation2 + $0x9d8] sm:$0xff]  ;;  %v451_v58 = vld [vmem:[#allocation2 + $0x9d0] sm:$0xff] }
 0x13f   :  { %2172 = vmatprep.subr.bf16.mxu0 %v2171_v4  ;;  %v408_v4 = vld [vmem:[#allocation2 + $0x878] sm:$0xff]  ;;  %v519_v46 = vld [vmem:[#allocation2 + $0xbf0] sm:$0xff] }
 0x140   :  { %2302 = vmatpush1.bf16.msra.mxu1 %v2301_v9  ;;  %v2323_v5 = vpack.c.bf16 %v408_v4, %v404_v3  ;;  %v416_v9 = vld [vmem:[#allocation2 + $0x8b8] sm:$0xff] }
 0x141   :  { %2304 = vmatprep.subr.bf16.mxu1 %v2303_v12  ;;  %v1426_v12 = vld [vmem:[#allocation9 + $0x8] sm:$0xff]  ;;  %v2327_v19 = vpack.c.bf16 %v416_v9, %v412_v8 }
 0x142   :  { %2174 = vmatpush1.bf16.msra.mxu0 %v2173_v10  ;;  %v411_v10 = vld [vmem:[#allocation2 + $0x890] sm:$0xff]  ;;  %v468_v3 = vld [vmem:[#allocation2 + $0xa58] sm:$0xff] }
 0x143   :  { %2176 = vmatprep.subr.bf16.mxu0 %v2175_v25  ;;  %v2447_v25 = vpack.c.bf16 %v1428_v13, %v1426_v12  ;;  %v472_v4 = vld [vmem:[#allocation2 + $0xa78] sm:$0xff]  ;;  %v475_v13 = vld [vmem:[#allocation2 + $0xa90] sm:$0xff] }
 0x144   :  { %2306 = vmatpush1.bf16.msra.mxu1 %v2305_v21  ;;  %v2449_v21 = vpack.c.bf16 %v1427_v16, %v1425_v14  ;;  %v476_v8 = vld [vmem:[#allocation2 + $0xa98] sm:$0xff]  ;;  %v479_v14 = vld [vmem:[#allocation2 + $0xab0] sm:$0xff] }
 0x145   :  { %2308 = vmatprep.subr.bf16.mxu1 %v2307_v23  ;;  %v1431_v23 = vld [vmem:[#allocation9 + $0x30] sm:$0xff]  ;;  %v2361_v16 = vpack.c.bf16 %v479_v14, %v475_v13 }
 0x146   :  { %2178 = vmatpush1.bf16.msra.mxu0 %v2177_v22  ;;  %v2451_v22 = vpack.c.bf16 %v1432_v18, %v1430_v17  ;;  %v480_v9 = vld [vmem:[#allocation2 + $0xab8] sm:$0xff]  ;;  %v483_v18 = vld [vmem:[#allocation2 + $0xad0] sm:$0xff] }
 0x147   :  { %2180 = vmatprep.subr.bf16.mxu0 %v2179_v28  ;;  %v2329_v28 = vpack.c.bf16 %v415_v20, %v411_v10  ;;  %v2357_v10 = vpack.c.bf16 %v471_v7, %v467_v6  ;;  %v2359_v12 = vpack.c.bf16 %v480_v9, %v476_v8  ;;  %v492_v20 = vld [vmem:[#allocation2 + $0xb18] sm:$0xff]  ;;  %v547_v6 = vld [vmem:[#allocation2 + $0xcd0] sm:$0xff] }
 0x148   :  { %2310 = vmatpush1.bf16.msra.mxu1 %v2309_v35  ;;  %v2335_v35 = vpack.c.bf16 %v432_v32, %v428_v31  ;;  %v508_v31 = vld [vmem:[#allocation2 + $0xb98] sm:$0xff]  ;;  %v551_v7 = vld [vmem:[#allocation2 + $0xcf0] sm:$0xff] }
 0x149   :  { %2312 = vmatprep.subr.bf16.mxu1 %v2311_v37  ;;  %v431_v37 = vld [vmem:[#allocation2 + $0x930] sm:$0xff]  ;;  %v512_v32 = vld [vmem:[#allocation2 + $0xbb8] sm:$0xff] }
 0x14a   :  { %2182 = vmatpush1.bf16.msra.mxu0 %v2181_v36  ;;  %v427_v36 = vld [vmem:[#allocation2 + $0x910] sm:$0xff]  ;;  %v556_v8 = vld [vmem:[#allocation2 + $0xd18] sm:$0xff] }
 0x14b   :  { %2184 = vmatprep.subr.bf16.mxu0 %v2183_v43  ;;  %v2337_v42 = vpack.c.bf16 %v431_v37, %v427_v36  ;;  %v2339_v43 = vpack.c.bf16 %v440_v40, %v436_v39  ;;  %v507_v36 = vld [vmem:[#allocation2 + $0xb90] sm:$0xff]  ;;  %v516_v39 = vld [vmem:[#allocation2 + $0xbd8] sm:$0xff] }
 0x14c   :  { %2314 = vmatpush1.bf16.msra.mxu1 %v2313_v51  ;;  %v2343_v51 = vpack.c.bf16 %v448_v49, %v444_v47  ;;  %v511_v37 = vld [vmem:[#allocation2 + $0xbb0] sm:$0xff]  ;;  %v520_v40 = vld [vmem:[#allocation2 + $0xbf8] sm:$0xff] }
 0x14d   :  { %2316 = vmatprep.subr.bf16.mxu1 %v2315_v53  ;;  %v447_v53 = vld [vmem:[#allocation2 + $0x9b0] sm:$0xff]  ;;  %v524_v47 = vld [vmem:[#allocation2 + $0xc18] sm:$0xff] }
 0x14e   :  { %2186 = vmatpush1.bf16.msra.mxu0 %v2185_v52  ;;  %v443_v52 = vld [vmem:[#allocation2 + $0x990] sm:$0xff]  ;;  %v528_v49 = vld [vmem:[#allocation2 + $0xc38] sm:$0xff] }
 0x14f   :  { %2188 = vmatprep.subr.bf16.mxu0 %v2187_v57  ;;  %v2345_v56 = vpack.c.bf16 %v447_v53, %v443_v52  ;;  %v2347_v57 = vpack.c.bf16 %v456_v38, %v452_v54  ;;  %v523_v52 = vld [vmem:[#allocation2 + $0xc10] sm:$0xff]  ;;  %v532_v54 = vld [vmem:[#allocation2 + $0xc58] sm:$0xff] }
 0x150   :  { %2318 = vmatpush1.bf16.msra.mxu1 %v2317_v62  ;;  %v464_v62 = vld [vmem:[#allocation2 + $0xa38] sm:$0xff]  ;;  %v527_v53 = vld [vmem:[#allocation2 + $0xc30] sm:$0xff] }
 0x151   :  { %2320 = vmatprep.subr.bf16.mxu1 %v2319_v0  ;;  %v2351_v0 = vpack.c.bf16 %v464_v62, %v460_v60  ;;  %v536_v38 = vld [vmem:[#allocation2 + $0xc78] sm:$0xff] }
 0x152   :  { %2190 = vmatpush1.bf16.msra.mxu0 %v2189_v63  ;;  %v2349_v63 = vpack.c.bf16 %v455_v59, %v451_v58  ;;  %v531_v58 = vld [vmem:[#allocation2 + $0xc50] sm:$0xff]  ;;  %v540_v60 = vld [vmem:[#allocation2 + $0xc98] sm:$0xff] }
 0x153   :  { %1135 = vmatmul.mubr.f32.vlgmr.msra.gmra.mrb[2].mxu1 %v3039_v34  ;;  %v1429_v34 = vld [vmem:[#allocation9 + $0x20] sm:$0xff]  ;;  %2448 = vmatprep.subr.bf16.mxu0 %v2447_v25  ;;  %v488_v25 = vld [vmem:[#allocation2 + $0xaf8] sm:$0xff] }
 0x154   :  { %2322 = vmatpush1.bf16.msra.mxu1 %v2321_v33  ;;  %1205 = vmatprep.mubr.f32.mxu1 %v3061_v48  ;;  %v2453_v27 = vpack.c.bf16 %v1431_v23, %v1429_v34  ;;  %v2333_v48 = vpack.c.bf16 %v423_v41, %v419_v30  ;;  %v2353_v33 = vpack.c.bf16 %v463_v2, %v459_v1  ;;  %v491_v23 = vld [vmem:[#allocation2 + $0xb10] sm:$0xff]  ;;  %v544_v62 = vld [vmem:[#allocation2 + $0xcb8] sm:$0xff] }
 0x155   :  { %993 = vmatmul.mubr.f32.vlgmr.msra.gmra.mrb[0].mxu0 %v3067_v55  ;;  %2324 = vmatprep.subr.bf16.mxu1 %v2323_v5  ;;  %v2355_v5 = vpack.c.bf16 %v472_v4, %v468_v3  ;;  %v499_v30 = vld [vmem:[#allocation2 + $0xb50] sm:$0xff]  ;;  %v548_v3 = vld [vmem:[#allocation2 + $0xcd8] sm:$0xff] }
 0x156   :  { %2450 = vmatpush1.bf16.msra.mxu0 %v2449_v21  ;;  %v496_v21 = vld [vmem:[#allocation2 + $0xb38] sm:$0xff]  ;;  %v503_v41 = vld [vmem:[#allocation2 + $0xb70] sm:$0xff] }
 0x157   :  { %2452 = vmatprep.subr.bf16.mxu0 %v2451_v22  ;;  %v2367_v34 = vpack.c.bf16 %v496_v21, %v492_v20  ;;  %v535_v59 = vld [vmem:[#allocation2 + $0xc70] sm:$0xff]  ;;  %v552_v4 = vld [vmem:[#allocation2 + $0xcf8] sm:$0xff] }
 0x158   :  { %2326 = vmatpush1.bf16.msra.mxu1 %v2325_v15  ;;  %v484_v15 = vld [vmem:[#allocation2 + $0xad8] sm:$0xff]  ;;  %v539_v1 = vld [vmem:[#allocation2 + $0xc90] sm:$0xff] }
 0x159   :  { %2328 = vmatprep.subr.bf16.mxu1 %v2327_v19  ;;  %v2363_v17 = vpack.c.bf16 %v488_v25, %v484_v15  ;;  %v487_v19 = vld [vmem:[#allocation2 + $0xaf0] sm:$0xff]  ;;  %v560_v9 = vld [vmem:[#allocation2 + $0xd38] sm:$0xff] }
 0x15a   :  { %2454 = vmatpush1.bf16.msra.mxu0 %v2453_v27  ;;  %v2365_v22 = vpack.c.bf16 %v487_v19, %v483_v18  ;;  %v504_v27 = vld [vmem:[#allocation2 + $0xb78] sm:$0xff]  ;;  %v543_v2 = vld [vmem:[#allocation2 + $0xcb0] sm:$0xff] }
 0x15b   :  { %v564_v13 = vld [vmem:[#allocation2 + $0xd58] sm:$0xff] }
 0x15c   :  { %2330 = vmatpush1.bf16.msra.mxu1 %v2329_v28  ;;  %v2369_v28 = vpack.c.bf16 %v495_v24, %v491_v23  ;;  %v568_v14 = vld [vmem:[#allocation2 + $0xd78] sm:$0xff] }
 0x15d   :  { %2332 = vmatprep.subr.bf16.mxu1 %v2331_v29  ;;  %v2371_v29 = vpack.c.bf16 %v504_v27, %v500_v26  ;;  %v2403_v25 = vpack.c.bf16 %v568_v14, %v564_v13  ;;  %v572_v18 = vld [vmem:[#allocation2 + $0xd98] sm:$0xff] }
 0x15e   :  { %v576_v19 = vld [vmem:[#allocation2 + $0xdb8] sm:$0xff] }
 0x15f   :  { %v2407_v21 = vpack.c.bf16 %v576_v19, %v572_v18  ;;  %v580_v23 = vld [vmem:[#allocation2 + $0xdd8] sm:$0xff] }
 0x160   :  { %2334 = vmatpush1.bf16.msra.mxu1 %v2333_v48  ;;  %v2373_v48 = vpack.c.bf16 %v503_v41, %v499_v30  ;;  %v584_v26 = vld [vmem:[#allocation2 + $0xdf8] sm:$0xff]  ;;  %v1433_v41 = vld [vmem:[#allocation9 + $0x40] sm:$0xff] }
 0x161   :  { %2336 = vmatprep.subr.bf16.mxu1 %v2335_v35  ;;  %v2375_v35 = vpack.c.bf16 %v512_v32, %v508_v31  ;;  %v1434_v27 = vld [vmem:[#allocation9 + $0x48] sm:$0xff]  ;;  %v1435_v31 = vld [vmem:[#allocation9 + $0x50] sm:$0xff] }
 0x162   :  { %v612_v13 = vld [vmem:[#allocation2 + $0xed8] sm:$0xff] }
 0x163   :  { %v616_v14 = vld [vmem:[#allocation2 + $0xef8] sm:$0xff] }
 0x164   :  { %2338 = vmatpush1.bf16.msra.mxu1 %v2337_v42  ;;  %v2377_v42 = vpack.c.bf16 %v511_v37, %v507_v36  ;;  %v579_v36 = vld [vmem:[#allocation2 + $0xdd0] sm:$0xff]  ;;  %v1451_v18 = vld [vmem:[#allocation9 + $0xd0] sm:$0xff] }
 0x165   :  { %2340 = vmatprep.subr.bf16.mxu1 %v2339_v43  ;;  %v2379_v43 = vpack.c.bf16 %v520_v40, %v516_v39  ;;  %v583_v37 = vld [vmem:[#allocation2 + $0xdf0] sm:$0xff]  ;;  %v588_v39 = vld [vmem:[#allocation2 + $0xe18] sm:$0xff] }
 0x166   :  { %v592_v40 = vld [vmem:[#allocation2 + $0xe38] sm:$0xff] }
 0x168   :  { %2342 = vmatpush1.bf16.msra.mxu1 %v2341_v50  ;;  %v2381_v50 = vpack.c.bf16 %v519_v46, %v515_v45  ;;  %v1437_v46 = vld [vmem:[#allocation9 + $0x60] sm:$0xff] }
 0x169   :  { %2344 = vmatprep.subr.bf16.mxu1 %v2343_v51  ;;  %v2383_v51 = vpack.c.bf16 %v528_v49, %v524_v47  ;;  %v1439_v47 = vld [vmem:[#allocation9 + $0x70] sm:$0xff]  ;;  %v2413_v49 = vpack.c.bf16 %v583_v37, %v579_v36  ;;  %v619_v36 = vld [vmem:[#allocation2 + $0xf10] sm:$0xff] }
 0x16a   :  { %v623_v37 = vld [vmem:[#allocation2 + $0xf30] sm:$0xff] }
 0x16c   :  { %2346 = vmatpush1.bf16.msra.mxu1 %v2345_v56  ;;  %v2385_v56 = vpack.c.bf16 %v527_v53, %v523_v52  ;;  %v587_v52 = vld [vmem:[#allocation2 + $0xe10] sm:$0xff] }
 0x16d   :  { %2348 = vmatprep.subr.bf16.mxu1 %v2347_v57  ;;  %v2387_v57 = vpack.c.bf16 %v536_v38, %v532_v54  ;;  %v591_v53 = vld [vmem:[#allocation2 + $0xe30] sm:$0xff]  ;;  %v596_v54 = vld [vmem:[#allocation2 + $0xe58] sm:$0xff] }
 0x16e   :  { %v600_v38 = vld [vmem:[#allocation2 + $0xe78] sm:$0xff] }
 0x170   :  { %2350 = vmatpush1.bf16.msra.mxu1 %v2349_v63  ;;  %v2389_v63 = vpack.c.bf16 %v535_v59, %v531_v58  ;;  %v1441_v59 = vld [vmem:[#allocation9 + $0x80] sm:$0xff] }
 0x171   :  { %2352 = vmatprep.subr.bf16.mxu1 %v2351_v0  ;;  %v2391_v0 = vpack.c.bf16 %v544_v62, %v540_v60  ;;  %v1443_v60 = vld [vmem:[#allocation9 + $0x90] sm:$0xff]  ;;  %v2417_v62 = vpack.c.bf16 %v591_v53, %v587_v52  ;;  %v627_v52 = vld [vmem:[#allocation2 + $0xf50] sm:$0xff] }
 0x172   :  { %v631_v53 = vld [vmem:[#allocation2 + $0xf70] sm:$0xff] }
 0x174   :  { %2354 = vmatpush1.bf16.msra.mxu1 %v2353_v33  ;;  %v2393_v33 = vpack.c.bf16 %v543_v2, %v539_v1  ;;  %v595_v1 = vld [vmem:[#allocation2 + $0xe50] sm:$0xff] }
 0x175   :  { %2356 = vmatprep.subr.bf16.mxu1 %v2355_v5  ;;  %v2395_v5 = vpack.c.bf16 %v552_v4, %v548_v3  ;;  %v599_v2 = vld [vmem:[#allocation2 + $0xe70] sm:$0xff]  ;;  %v604_v3 = vld [vmem:[#allocation2 + $0xe98] sm:$0xff] }
 0x176   :  { %v608_v4 = vld [vmem:[#allocation2 + $0xeb8] sm:$0xff] }
 0x178   :  { %2358 = vmatpush1.bf16.msra.mxu1 %v2357_v10  ;;  %v2399_v10 = vpack.c.bf16 %v560_v9, %v556_v8  ;;  %v1447_v8 = vld [vmem:[#allocation9 + $0xb0] sm:$0xff]  ;;  %v2421_v9 = vpack.c.bf16 %v599_v2, %v595_v1  ;;  %v635_v1 = vld [vmem:[#allocation2 + $0xf90] sm:$0xff] }
 0x179   :  { %2360 = vmatprep.subr.bf16.mxu1 %v2359_v12  ;;  %v555_v12 = vld [vmem:[#allocation2 + $0xd10] sm:$0xff] }
 0x17a   :  { %v639_v2 = vld [vmem:[#allocation2 + $0xfb0] sm:$0xff] }
 0x17c   :  { %2362 = vmatpush1.bf16.msra.mxu1 %v2361_v16  ;;  %v563_v16 = vld [vmem:[#allocation2 + $0xd50] sm:$0xff] }
 0x17d   :  { %2364 = vmatprep.subr.bf16.mxu1 %v2363_v17  ;;  %v567_v17 = vld [vmem:[#allocation2 + $0xd70] sm:$0xff] }
 0x17e   :  { %v2405_v20 = vpack.c.bf16 %v567_v17, %v563_v16  ;;  %v1449_v17 = vld [vmem:[#allocation9 + $0xc0] sm:$0xff] }
 0x180   :  { %2366 = vmatpush1.bf16.msra.mxu1 %v2365_v22  ;;  %v571_v22 = vld [vmem:[#allocation2 + $0xd90] sm:$0xff] }
 0x181   :  { %2368 = vmatprep.subr.bf16.mxu1 %v2367_v34  ;;  %v575_v34 = vld [vmem:[#allocation2 + $0xdb0] sm:$0xff] }
 0x182   :  { %v2409_v32 = vpack.c.bf16 %v575_v34, %v571_v22  ;;  %v611_v22 = vld [vmem:[#allocation2 + $0xed0] sm:$0xff] }
 0x183   :  { %v615_v34 = vld [vmem:[#allocation2 + $0xef0] sm:$0xff] }
 0x184   :  { %2370 = vmatpush1.bf16.msra.mxu1 %v2369_v28  ;;  %v1436_v28 = vld [vmem:[#allocation9 + $0x58] sm:$0xff] }
 0x185   :  { %2372 = vmatprep.subr.bf16.mxu1 %v2371_v29  ;;  %v2455_v30 = vpack.c.bf16 %v1436_v28, %v1434_v27  ;;  %v1454_v27 = vld [vmem:[#allocation9 + $0xe8] sm:$0xff]  ;;  %v1456_v28 = vld [vmem:[#allocation9 + $0xf8] sm:$0xff] }
 0x187   :  { %2456 = vmatprep.subr.bf16.mxu0 %v2455_v30  ;;  %v2475_v30 = vpack.c.bf16 %v1456_v28, %v1454_v27  ;;  %v1480_v27 = vld [vmem:[#allocation9 + $0x1b8] sm:$0xff] }
 0x188   :  { %2374 = vmatpush1.bf16.msra.mxu1 %v2373_v48  ;;  %v2457_v48 = vpack.c.bf16 %v1435_v31, %v1433_v41  ;;  %v1453_v41 = vld [vmem:[#allocation9 + $0xe0] sm:$0xff]  ;;  %v1455_v31 = vld [vmem:[#allocation9 + $0xf0] sm:$0xff] }
 0x189   :  { %2376 = vmatprep.subr.bf16.mxu1 %v2375_v35  ;;  %v2411_v35 = vpack.c.bf16 %v584_v26, %v580_v23  ;;  %v620_v23 = vld [vmem:[#allocation2 + $0xf18] sm:$0xff] }
 0x18a   :  { %2458 = vmatpush1.bf16.msra.mxu0 %v2457_v48  ;;  %v624_v26 = vld [vmem:[#allocation2 + $0xf38] sm:$0xff]  ;;  %v2477_v48 = vpack.c.bf16 %v1455_v31, %v1453_v41 }
 0x18b   :  { %v1479_v41 = vld [vmem:[#allocation9 + $0x1b0] sm:$0xff] }
 0x18c   :  { %2378 = vmatpush1.bf16.msra.mxu1 %v2377_v42  ;;  %v1438_v42 = vld [vmem:[#allocation9 + $0x68] sm:$0xff] }
 0x18d   :  { %2380 = vmatprep.subr.bf16.mxu1 %v2379_v43  ;;  %v1440_v43 = vld [vmem:[#allocation9 + $0x78] sm:$0xff] }
 0x18e   :  { %v2459_v45 = vpack.c.bf16 %v1440_v43, %v1438_v42  ;;  %v1458_v42 = vld [vmem:[#allocation9 + $0x108] sm:$0xff]  ;;  %v1460_v43 = vld [vmem:[#allocation9 + $0x118] sm:$0xff] }
 0x190   :  { %2382 = vmatpush1.bf16.msra.mxu1 %v2381_v50  ;;  %v2461_v50 = vpack.c.bf16 %v1439_v47, %v1437_v46  ;;  %2460 = vmatprep.subr.bf16.mxu0 %v2459_v45  ;;  %v2479_v45 = vpack.c.bf16 %v1460_v43, %v1458_v42  ;;  %v1457_v46 = vld [vmem:[#allocation9 + $0x100] sm:$0xff]  ;;  %v1459_v47 = vld [vmem:[#allocation9 + $0x110] sm:$0xff]  ;;  %v1488_v42 = vld [vmem:[#allocation9 + $0x1f8] sm:$0xff] }
 0x191   :  { %2384 = vmatprep.subr.bf16.mxu1 %v2383_v51  ;;  %v2415_v51 = vpack.c.bf16 %v592_v40, %v588_v39  ;;  %v628_v39 = vld [vmem:[#allocation2 + $0xf58] sm:$0xff]  ;;  %v1485_v43 = vld [vmem:[#allocation9 + $0x1e0] sm:$0xff] }
 0x192   :  { %2462 = vmatpush1.bf16.msra.mxu0 %v2461_v50  ;;  %v632_v40 = vld [vmem:[#allocation2 + $0xf78] sm:$0xff]  ;;  %v2481_v50 = vpack.c.bf16 %v1459_v47, %v1457_v46 }
 0x193   :  { %1206 = vmatmul.mubr.f32.vlgmr.msra.gmra.mrb[2].mxu1 %v3057_v44  ;;  %v2397_v44 = vpack.c.bf16 %v551_v7, %v547_v6  ;;  %v1445_v7 = vld [vmem:[#allocation9 + $0xa0] sm:$0xff]  ;;  %v1487_v46 = vld [vmem:[#allocation9 + $0x1f0] sm:$0xff]  ;;  %v1490_v47 = vld [vmem:[#allocation9 + $0x208] sm:$0xff] }
 0x194   :  { %2386 = vmatpush1.bf16.msra.mxu1 %v2385_v56  ;;  %1276 = vmatprep.mubr.f32.mxu1 %v3071_v11  ;;  %v559_v11 = vld [vmem:[#allocation2 + $0xd30] sm:$0xff] }
 0x195   :  { %2388 = vmatprep.subr.bf16.mxu1 %v2387_v57  ;;  %v2401_v15 = vpack.c.bf16 %v559_v11, %v555_v12  ;;  %v1442_v56 = vld [vmem:[#allocation9 + $0x88] sm:$0xff]  ;;  %v1444_v57 = vld [vmem:[#allocation9 + $0x98] sm:$0xff] }
 0x196   :  { %v2463_v58 = vpack.c.bf16 %v1444_v57, %v1442_v56  ;;  %v603_v12 = vld [vmem:[#allocation2 + $0xe90] sm:$0xff]  ;;  %v1464_v57 = vld [vmem:[#allocation9 + $0x138] sm:$0xff] }
 0x197   :  { %v607_v11 = vld [vmem:[#allocation2 + $0xeb0] sm:$0xff] }
 0x198   :  { %2390 = vmatpush1.bf16.msra.mxu1 %v2389_v63  ;;  %v2465_v63 = vpack.c.bf16 %v1443_v60, %v1441_v59  ;;  %2464 = vmatprep.subr.bf16.mxu0 %v2463_v58  ;;  %v2425_v19 = vpack.c.bf16 %v607_v11, %v603_v12  ;;  %v1462_v56 = vld [vmem:[#allocation9 + $0x128] sm:$0xff]  ;;  %v1461_v59 = vld [vmem:[#allocation9 + $0x120] sm:$0xff]  ;;  %v1463_v60 = vld [vmem:[#allocation9 + $0x130] sm:$0xff] }
 0x199   :  { %2392 = vmatprep.subr.bf16.mxu1 %v2391_v0  ;;  %v2419_v0 = vpack.c.bf16 %v600_v38, %v596_v54  ;;  %v636_v54 = vld [vmem:[#allocation2 + $0xf98] sm:$0xff]  ;;  %v2483_v58 = vpack.c.bf16 %v1464_v57, %v1462_v56  ;;  %v643_v12 = vld [vmem:[#allocation2 + $0xfd0] sm:$0xff] }
 0x19a   :  { %2466 = vmatpush1.bf16.msra.mxu0 %v2465_v63  ;;  %v640_v38 = vld [vmem:[#allocation2 + $0xfb8] sm:$0xff]  ;;  %v2485_v63 = vpack.c.bf16 %v1463_v60, %v1461_v59  ;;  %v647_v11 = vld [vmem:[#allocation2 + $0xff0] sm:$0xff] }
 0x19c   :  { %2394 = vmatpush1.bf16.msra.mxu1 %v2393_v33  ;;  %v1446_v33 = vld [vmem:[#allocation9 + $0xa8] sm:$0xff] }
 0x19d   :  { %2396 = vmatprep.subr.bf16.mxu1 %v2395_v5  ;;  %v1448_v5 = vld [vmem:[#allocation9 + $0xb8] sm:$0xff] }
 0x19e   :  { %v2467_v6 = vpack.c.bf16 %v1448_v5, %v1446_v33  ;;  %v1466_v33 = vld [vmem:[#allocation9 + $0x148] sm:$0xff]  ;;  %v1468_v5 = vld [vmem:[#allocation9 + $0x158] sm:$0xff] }
 0x1a0   :  { %2398 = vmatpush1.bf16.msra.mxu1 %v2397_v44  ;;  %v2469_v44 = vpack.c.bf16 %v1447_v8, %v1445_v7  ;;  %2468 = vmatprep.subr.bf16.mxu0 %v2467_v6  ;;  %v2487_v6 = vpack.c.bf16 %v1468_v5, %v1466_v33  ;;  %v1465_v7 = vld [vmem:[#allocation9 + $0x140] sm:$0xff]  ;;  %v1467_v8 = vld [vmem:[#allocation9 + $0x150] sm:$0xff] }
 0x1a1   :  { %2400 = vmatprep.subr.bf16.mxu1 %v2399_v10  ;;  %v2423_v10 = vpack.c.bf16 %v608_v4, %v604_v3  ;;  %v644_v3 = vld [vmem:[#allocation2 + $0xfd8] sm:$0xff] }
 0x1a2   :  { %2470 = vmatpush1.bf16.msra.mxu0 %v2469_v44  ;;  %v648_v4 = vld [vmem:[#allocation2 + $0xff8] sm:$0xff]  ;;  %v2489_v44 = vpack.c.bf16 %v1467_v8, %v1465_v7 }
 0x1a4   :  { %2402 = vmatpush1.bf16.msra.mxu1 %v2401_v15  ;;  %v1450_v15 = vld [vmem:[#allocation9 + $0xc8] sm:$0xff] }
 0x1a5   :  { %2404 = vmatprep.subr.bf16.mxu1 %v2403_v25  ;;  %v1452_v25 = vld [vmem:[#allocation9 + $0xd8] sm:$0xff] }
 0x1a6   :  { %v3082_v24 = vpop.f32.mrb[0].mxu1  ;;  %v2471_v16 = vpack.c.bf16 %v1452_v25, %v1450_v15  ;;  %v1469_v25 = vld [vmem:[#allocation9 + $0x160] sm:$0xff] }
 0x1a7   :  { %v3084_v29 = vpop.f32.mrb[1].mxu1 }
 0x1a8   :  { %2406 = vmatpush1.bf16.msra.mxu1 %v2405_v20  ;;  %v2473_v20 = vpack.c.bf16 %v1451_v18, %v1449_v17  ;;  %2472 = vmatprep.subr.bf16.mxu0 %v2471_v16  ;;  %v1471_v16 = vld [vmem:[#allocation9 + $0x170] sm:$0xff]  ;;  %v2445_v17 = vpack.c.bf16 %v647_v11, %v643_v12 }
 0x1a9   :  { %2408 = vmatprep.subr.bf16.mxu1 %v2407_v21  ;;  %v2427_v21 = vpack.c.bf16 %v616_v14, %v612_v13  ;;  %v1470_v13 = vld [vmem:[#allocation9 + $0x168] sm:$0xff]  ;;  %v1472_v14 = vld [vmem:[#allocation9 + $0x178] sm:$0xff]  ;;  %v2493_v18 = vpack.c.bf16 %v1471_v16, %v1469_v25 }
 0x1aa   :  { %2474 = vmatpush1.bf16.msra.mxu0 %v2473_v20  ;;  %v2491_v15 = vpack.c.bf16 %v1472_v14, %v1470_v13  ;;  %v1476_v20 = vld [vmem:[#allocation9 + $0x198] sm:$0xff] }
 0x1ab   :  { %2476 = vmatprep.subr.bf16.mxu0 %v2475_v30  ;;  %v1477_v30 = vld [vmem:[#allocation9 + $0x1a0] sm:$0xff] }
 0x1ac   :  { %2410 = vmatpush1.bf16.msra.mxu1 %v2409_v32  ;;  %v2429_v32 = vpack.c.bf16 %v615_v34, %v611_v22  ;;  %v1473_v22 = vld [vmem:[#allocation9 + $0x180] sm:$0xff]  ;;  %v1475_v34 = vld [vmem:[#allocation9 + $0x190] sm:$0xff]  ;;  %v2501_v31 = vpack.c.bf16 %v1479_v41, %v1477_v30 }
 0x1ad   :  { %2412 = vmatprep.subr.bf16.mxu1 %v2411_v35  ;;  %v2431_v35 = vpack.c.bf16 %v624_v26, %v620_v23  ;;  %v2497_v23 = vpack.c.bf16 %v1475_v34, %v1473_v22  ;;  %v1478_v26 = vld [vmem:[#allocation9 + $0x1a8] sm:$0xff] }
 0x1ae   :  { %2478 = vmatpush1.bf16.msra.mxu0 %v2477_v48  ;;  %v2499_v28 = vpack.c.bf16 %v1480_v27, %v1478_v26  ;;  %v1484_v48 = vld [vmem:[#allocation9 + $0x1d8] sm:$0xff] }
 0x1af   :  { %2480 = vmatprep.subr.bf16.mxu0 %v2479_v45 }
 0x1b0   :  { %2414 = vmatpush1.bf16.msra.mxu1 %v2413_v49  ;;  %v2433_v49 = vpack.c.bf16 %v623_v37, %v619_v36  ;;  %v1481_v36 = vld [vmem:[#allocation9 + $0x1c0] sm:$0xff]  ;;  %v1483_v37 = vld [vmem:[#allocation9 + $0x1d0] sm:$0xff] }
 0x1b1   :  { %2416 = vmatprep.subr.bf16.mxu1 %v2415_v51  ;;  %v2435_v51 = vpack.c.bf16 %v632_v40, %v628_v39  ;;  %v2505_v39 = vpack.c.bf16 %v1483_v37, %v1481_v36  ;;  %v1486_v40 = vld [vmem:[#allocation9 + $0x1e8] sm:$0xff]  ;;  %v3111_v37 = vld [vmem:[#allocation7] sm:$0xf] }
 0x1b2   :  { %2482 = vmatpush1.bf16.msra.mxu0 %v2481_v50  ;;  %v2507_v45 = vpack.c.bf16 %v1488_v42, %v1486_v40 }
 0x1b3   :  { %2484 = vmatprep.subr.bf16.mxu0 %v2483_v58 }
 0x1b4   :  { %2418 = vmatpush1.bf16.msra.mxu1 %v2417_v62  ;;  %v2437_v62 = vpack.c.bf16 %v631_v53, %v627_v52  ;;  %v3090_v52 = vld [vmem:[#allocation4] sm:$0xf]  ;;  %v3093_v53 = vsub.s32 1, %v3023_v61 }
 0x1b5   :  { %2420 = vmatprep.subr.bf16.mxu1 %v2419_v0  ;;  %v2439_v0 = vpack.c.bf16 %v640_v38, %v636_v54 }
 0x1b6   :  { %2486 = vmatpush1.bf16.msra.mxu0 %v2485_v63  ;;  %v658_v38 = vrot.slane %v3090_v52, %v3093_v53 }
 0x1b7   :  { %2488 = vmatprep.subr.bf16.mxu0 %v2487_v6 }
 0x1b8   :  { %2422 = vmatpush1.bf16.msra.mxu1 %v2421_v9  ;;  %v2441_v9 = vpack.c.bf16 %v639_v2, %v635_v1  ;;  %v784_v57 = vadd.f32 %v3084_v29, %v658_v38 }
 0x1b9   :  { %2424 = vmatprep.subr.bf16.mxu1 %v2423_v10  ;;  %v2443_v10 = vpack.c.bf16 %v648_v4, %v644_v3 }
 0x1ba   :  { %2490 = vmatpush1.bf16.msra.mxu0 %v2489_v44 }
 0x1bb   :  { %2492 = vmatprep.subr.bf16.mxu0 %v2491_v15 }
 0x1bc   :  { %2426 = vmatpush1.bf16.msra.mxu1 %v2425_v19  ;;  %v1474_v19 = vld [vmem:[#allocation9 + $0x188] sm:$0xff] }
 0x1bd   :  { %2428 = vmatprep.subr.bf16.mxu1 %v2427_v21  ;;  %v2495_v21 = vpack.c.bf16 %v1476_v20, %v1474_v19 }
 0x1be   :  { %2494 = vmatpush1.bf16.msra.mxu0 %v2493_v18 }
 0x1bf   :  { %2496 = vmatprep.subr.bf16.mxu0 %v2495_v21 }
 0x1c0   :  { %2430 = vmatpush1.bf16.msra.mxu1 %v2429_v32  ;;  %v1482_v32 = vld [vmem:[#allocation9 + $0x1c8] sm:$0xff] }
 0x1c1   :  { %2432 = vmatprep.subr.bf16.mxu1 %v2431_v35  ;;  %v2503_v35 = vpack.c.bf16 %v1484_v48, %v1482_v32  ;;  %v3105_v48 = vld [vmem:[#allocation6] sm:$0xf] }
 0x1c2   :  { %2498 = vmatpush1.bf16.msra.mxu0 %v2497_v23  ;;  %v1367_v36 = vrot.slane %v3105_v48, %v3093_v53 }
 0x1c3   :  { %2500 = vmatprep.subr.bf16.mxu0 %v2499_v28 }
 0x1c4   :  { %2434 = vmatpush1.bf16.msra.mxu1 %v2433_v49  ;;  %v1492_v49 = vld [vmem:[#allocation9 + $0x218] sm:$0xff] }
 0x1c5   :  { %2436 = vmatprep.subr.bf16.mxu1 %v2435_v51  ;;  %v2511_v50 = vpack.c.bf16 %v1492_v49, %v1490_v47  ;;  %v3088_v51 = vsub.s32 0, %v3023_v61 }
 0x1c6   :  { %2502 = vmatpush1.bf16.msra.mxu0 %v2501_v31 }
 0x1c7   :  { %2504 = vmatprep.subr.bf16.mxu0 %v2503_v35  ;;  %v654_v54 = vrot.slane %v3090_v52, %v3088_v51  ;;  %v1363_v35 = vrot.slane %v3105_v48, %v3088_v51  ;;  %v1400_v40 = vrot.slane %v3111_v37, %v3088_v51 }
 0x1c8   :  { %2438 = vmatpush1.bf16.msra.mxu1 %v2437_v62 }
 0x1c9   :  { %2440 = vmatprep.subr.bf16.mxu1 %v2439_v0  ;;  %v782_v56 = vadd.f32 %v3082_v24, %v654_v54  ;;  %v1491_v54 = vld [vmem:[#allocation9 + $0x210] sm:$0xff] }
 0x1ca   :  { %2506 = vmatpush1.bf16.msra.mxu0 %v2505_v39 }
 0x1cb   :  { %2508 = vmatprep.subr.bf16.mxu0 %v2507_v45  ;;  %v1404_v45 = vrot.slane %v3111_v37, %v3093_v53 }
 0x1cc   :  { %2442 = vmatpush1.bf16.msra.mxu1 %v2441_v9 }
 0x1cd   :  { %2444 = vmatprep.subr.bf16.mxu1 %v2443_v10 }
 0x1d0   :  { %2446 = vmatpush1.bf16.msra.mxu1 %v2445_v17 }
 0x1d3   :  { %1277 = vmatmul.mubr.f32.vlgmr.msra.gmra.mrb[2].mxu1 %v3067_v55  ;;  %v2509_v55 = vpack.c.bf16 %v1487_v46, %v1485_v43 }
 0x1d5   :  { %2510 = vmatpush1.bf16.msra.mxu0 %v2509_v55 }
 0x1d6   :  { %2512 = vmatprep.subr.bf16.mxu0 %v2511_v50  ;;  %v1489_v50 = vld [vmem:[#allocation9 + $0x200] sm:$0xff] }
 0x228   :  { %v994_v58 = vpop.f32.mrb[0].mxu0 }
 0x229   :  { %v2608_v59 = vadd.f32 %v994_v58, %v782_v56  ;;  %v996_v60 = vpop.f32.mrb[1].mxu0  ;;  %v1494_v56 = vld [vmem:[#allocation9 + $0x228] sm:$0xff] }
 0x22a   :  { %v2610_v62 = vadd.f32 %v996_v60, %v784_v57  ;;  %v1496_v57 = vld [vmem:[#allocation9 + $0x238] sm:$0xff] }
 0x22b   :  { %v1286_v63 = vsel %vm1285_vm0, %v2608_v59, 0.0 }
 0x22c   :  { %v1287_v0 = vrot.slane %v1286_v63, 4  ;;  %v1293_v1 = vsel %vm1285_vm0, %v2610_v62, 0.0 }
 0x22d   :  { %v1294_v2 = vrot.slane %v1293_v1, 4 }
 0x22e   :  { %v1288_v3 = vadd.f32 %v1287_v0, %v1286_v63  ;;  %v1493_v63 = vld [vmem:[#allocation9 + $0x220] sm:$0xff]  ;;  %v1495_v0 = vld [vmem:[#allocation9 + $0x230] sm:$0xff] }
 0x22f   :  { %v1295_v4 = vadd.f32 %v1294_v2, %v1293_v1  ;;  %v1498_v1 = vld [vmem:[#allocation9 + $0x248] sm:$0xff]  ;;  %v1500_v2 = vld [vmem:[#allocation9 + $0x258] sm:$0xff] }
 0x230   :  { %v1289_v33 = vrot.slane %v1288_v3, 2 }
 0x231   :  { %v1296_v5 = vrot.slane %v1295_v4, 2 }
 0x232   :  { %v1290_v6 = vadd.f32 %v1289_v33, %v1288_v3  ;;  %v2517_v3 = vpack.c.bf16 %v1495_v0, %v1493_v63  ;;  %v1497_v33 = vld [vmem:[#allocation9 + $0x240] sm:$0xff] }
 0x233   :  { %v1297_v7 = vadd.f32 %v1296_v5, %v1295_v4  ;;  %v2519_v4 = vpack.c.bf16 %v1500_v2, %v1498_v1  ;;  %v1499_v5 = vld [vmem:[#allocation9 + $0x250] sm:$0xff]  ;;  %v1533_v1 = vld [vmem:[#allocation9 + $0x360] sm:$0xff] }
 0x234   :  { %v1291_v24 = vrot.slane %v1290_v6, 1  ;;  %v1535_v2 = vld [vmem:[#allocation9 + $0x370] sm:$0xff] }
 0x235   :  { %v1298_v8 = vrot.slane %v1297_v7, 1 }
 0x236   :  { %v1292_v29 = vadd.f32 %v1291_v24, %v1290_v6  ;;  %v1502_v6 = vld [vmem:[#allocation9 + $0x268] sm:$0xff]  ;;  %v2521_v24 = vpack.c.bf16 %v1499_v5, %v1497_v33  ;;  %v2557_v33 = vpack.c.bf16 %v1535_v2, %v1533_v1 }
 0x237   :  { %v1299_v9 = vadd.f32 %v1298_v8, %v1297_v7  ;;  %v1504_v7 = vld [vmem:[#allocation9 + $0x278] sm:$0xff] }
 0x238   :  { %v1315_v44 = vmul.f32 0.5, %v1292_v29  ;;  %v2523_v8 = vpack.c.bf16 %v1504_v7, %v1502_v6  ;;  %v1501_v29 = vld [vmem:[#allocation9 + $0x260] sm:$0xff]  ;;  %v1539_v7 = vld [vmem:[#allocation9 + $0x390] sm:$0xff] }
 0x239   :  { %v1316_v10 = vmul.f32 0.5, %v1299_v9  ;;  %v1503_v9 = vld [vmem:[#allocation9 + $0x270] sm:$0xff]  ;;  %v1537_v6 = vld [vmem:[#allocation9 + $0x380] sm:$0xff] }
 0x23a   :  { %v1319_v12 = vsub.f32 %v2608_v59, %v1315_v44  ;;  %v2513_v59 = vpack.c.bf16 %v1491_v54, %v1489_v50  ;;  %v1506_v44 = vld [vmem:[#allocation9 + $0x288] sm:$0xff]  ;;  %v1527_v50 = vld [vmem:[#allocation9 + $0x330] sm:$0xff] }
 0x23b   :  { %v1320_v11 = vsub.f32 %v2610_v62, %v1316_v10  ;;  %v2515_v62 = vpack.c.bf16 %v1496_v57, %v1494_v56  ;;  %v1508_v10 = vld [vmem:[#allocation9 + $0x298] sm:$0xff]  ;;  %v1530_v54 = vld [vmem:[#allocation9 + $0x348] sm:$0xff] }
 0x23c   :  { %v1323_v13 = vmul.f32 %v1319_v12, %v1319_v12  ;;  %v1380_v39 = vmul.f32 %v1363_v35, %v1319_v12  ;;  %v2525_v12 = vpack.c.bf16 %v1503_v9, %v1501_v29  ;;  %v1522_v35 = vld [vmem:[#allocation9 + $0x308] sm:$0xff]  ;;  %v2561_v29 = vpack.c.bf16 %v1539_v7, %v1537_v6 }
 0x23d   :  { %v1324_v14 = vmul.f32 %v1320_v11, %v1320_v11  ;;  %v1381_v43 = vmul.f32 %v1367_v36, %v1320_v11  ;;  %v2527_v11 = vpack.c.bf16 %v1508_v10, %v1506_v44  ;;  %v1524_v36 = vld [vmem:[#allocation9 + $0x318] sm:$0xff]  ;;  %v1541_v44 = vld [vmem:[#allocation9 + $0x3a0] sm:$0xff]  ;;  %v1543_v10 = vld [vmem:[#allocation9 + $0x3b0] sm:$0xff] }
 0x23e   :  { %v1327_v15 = vsel %vm1285_vm0, %v1323_v13, 0.0  ;;  %v1505_v13 = vld [vmem:[#allocation9 + $0x280] sm:$0xff] }
 0x23f   :  { %v1328_v25 = vrot.slane %v1327_v15, 4  ;;  %v1334_v16 = vsel %vm1285_vm0, %v1324_v14, 0.0  ;;  %v1507_v14 = vld [vmem:[#allocation9 + $0x290] sm:$0xff] }
 0x240   :  { %v1335_v17 = vrot.slane %v1334_v16, 4 }
 0x241   :  { %v1329_v18 = vadd.f32 %v1328_v25, %v1327_v15  ;;  %v1510_v15 = vld [vmem:[#allocation9 + $0x2a8] sm:$0xff]  ;;  %v1512_v25 = vld [vmem:[#allocation9 + $0x2b8] sm:$0xff] }
 0x242   :  { %v1336_v19 = vadd.f32 %v1335_v17, %v1334_v16  ;;  %v2529_v16 = vpack.c.bf16 %v1507_v14, %v1505_v13  ;;  %v2531_v17 = vpack.c.bf16 %v1512_v25, %v1510_v15  ;;  %v2565_v13 = vpack.c.bf16 %v1543_v10, %v1541_v44  ;;  %v1545_v15 = vld [vmem:[#allocation9 + $0x3c0] sm:$0xff]  ;;  %v1547_v25 = vld [vmem:[#allocation9 + $0x3d0] sm:$0xff] }
 0x243   :  { %v1330_v20 = vrot.slane %v1329_v18, 2 }
 0x244   :  { %v1337_v21 = vrot.slane %v1336_v19, 2 }
 0x245   :  { %v1331_v22 = vadd.f32 %v1330_v20, %v1329_v18  ;;  %v1509_v18 = vld [vmem:[#allocation9 + $0x2a0] sm:$0xff]  ;;  %v1514_v20 = vld [vmem:[#allocation9 + $0x2c8] sm:$0xff] }
 0x246   :  { %v1338_v34 = vadd.f32 %v1337_v21, %v1336_v19  ;;  %v1511_v19 = vld [vmem:[#allocation9 + $0x2b0] sm:$0xff]  ;;  %v1516_v21 = vld [vmem:[#allocation9 + $0x2d8] sm:$0xff] }
 0x247   :  { %v1332_v23 = vrot.slane %v1331_v22, 1 }
 0x248   :  { %v1339_v26 = vrot.slane %v1338_v34, 1 }
 0x249   :  { %v1333_v27 = vadd.f32 %v1332_v23, %v1331_v22  ;;  %v2533_v22 = vpack.c.bf16 %v1511_v19, %v1509_v18  ;;  %v1513_v23 = vld [vmem:[#allocation9 + $0x2c0] sm:$0xff]  ;;  %v2569_v18 = vpack.c.bf16 %v1547_v25, %v1545_v15 }
 0x24a   :  { %v1340_v28 = vadd.f32 %v1339_v26, %v1338_v34  ;;  %v2535_v34 = vpack.c.bf16 %v1516_v21, %v1514_v20  ;;  %v1515_v26 = vld [vmem:[#allocation9 + $0x2d0] sm:$0xff]  ;;  %v1549_v20 = vld [vmem:[#allocation9 + $0x3e0] sm:$0xff] }
 0x24b   :  { %v1355_v30 = vmul.f32 0.5, %v1333_v27  ;;  %v1518_v27 = vld [vmem:[#allocation9 + $0x2e8] sm:$0xff]  ;;  %v1551_v21 = vld [vmem:[#allocation9 + $0x3f0] sm:$0xff] }
 0x24c   :  { %v1356_v41 = vmul.f32 0.5, %v1340_v28  ;;  %v1520_v28 = vld [vmem:[#allocation9 + $0x2f8] sm:$0xff] }
 0x24d   :  { %v1384_v31 = vadd.f32 1e-05, %v1355_v30  ;;  %v2537_v30 = vpack.c.bf16 %v1515_v26, %v1513_v23  ;;  %v665_v23 = vsub.s32 3, %v3023_v61 }
 0x24e   :  { %v1385_v32 = vadd.f32 1e-05, %v1356_v41  ;;  %v2539_v41 = vpack.c.bf16 %v1520_v28, %v1518_v27 }
 0x24f   :  { %2642 = vrsqrt.f32 %v1384_v31  ;;  %v1517_v31 = vld [vmem:[#allocation9 + $0x2e0] sm:$0xff]  ;;  %v666_v27 = vrot.slane %v3090_v52, %v665_v23  ;;  %v1412_v25 = vrot.slane %v3111_v37, %v665_v23 }
 0x250   :  { %2644 = vrsqrt.f32 %v1385_v32  ;;  %v1519_v32 = vld [vmem:[#allocation9 + $0x2f0] sm:$0xff] }
 0x259   :  { %v2643_v42 = vpop.eup %2642 }
 0x25a   :  { %v2645_v46 = vpop.eup %2644  ;;  %v1392_v55 = vmul.f32 %v2643_v42, %v1380_v39  ;;  %v2541_v39 = vpack.c.bf16 %v1519_v32, %v1517_v31  ;;  %v1521_v42 = vld [vmem:[#allocation9 + $0x300] sm:$0xff] }
 0x25b   :  { %v1393_v47 = vmul.f32 %v2645_v46, %v1381_v43  ;;  %v1523_v43 = vld [vmem:[#allocation9 + $0x310] sm:$0xff]  ;;  %v1528_v46 = vld [vmem:[#allocation9 + $0x338] sm:$0xff] }
 0x25c   :  { %v1417_v49 = vadd.f32 %v1400_v40, %v1392_v55  ;;  %v2543_v40 = vpack.c.bf16 %v1524_v36, %v1522_v35  ;;  %v2545_v55 = vpack.c.bf16 %v1523_v43, %v1521_v42 }
 0x25d   :  { %v1418_v38 = vadd.f32 %v1404_v45, %v1393_v47  ;;  %v1526_v45 = vld [vmem:[#allocation9 + $0x328] sm:$0xff] }
 0x25e   :  { %v1421_v60 = vmax.f32 %v1417_v49, 0.0  ;;  %v2547_v47 = vpack.c.bf16 %v1528_v46, %v1526_v45  ;;  %v1525_v49 = vld [vmem:[#allocation9 + $0x320] sm:$0xff] }
 0x25f   :  { %v1422_v58 = vmax.f32 %v1418_v38, 0.0  ;;  %v1532_v38 = vld [vmem:[#allocation9 + $0x358] sm:$0xff]  ;;  %v2549_v56 = vpack.c.bf16 %v1527_v50, %v1525_v49 }
 0x260   :  { %v2551_v57 = vpack.c.bf16 %v1532_v38, %v1530_v54 }
 0x261   :  { %1629 = vmatprep.mubr.f32.mxu0 %v1422_v58  ;;  %v1529_v58 = vld [vmem:[#allocation9 + $0x340] sm:$0xff] }
 0x262   :  { %1630 = vmatmul.mubr.f32.vlgmr.msra.gmra.mrb[2].mxu0 %v1421_v60  ;;  %v1534_v60 = vld [vmem:[#allocation9 + $0x368] sm:$0xff] }
 0x263   :  { %2514 = vmatpush1.bf16.msra.mxu0 %v2513_v59  ;;  %v1531_v59 = vld [vmem:[#allocation9 + $0x350] sm:$0xff] }
 0x264   :  { %2516 = vmatprep.subr.bf16.mxu0 %v2515_v62  ;;  %v1536_v62 = vld [vmem:[#allocation9 + $0x378] sm:$0xff]  ;;  %v2553_v63 = vpack.c.bf16 %v1531_v59, %v1529_v58 }
 0x265   :  { %v2555_v0 = vpack.c.bf16 %v1536_v62, %v1534_v60 }
 0x267   :  { %2518 = vmatpush1.bf16.msra.mxu0 %v2517_v3  ;;  %v1538_v3 = vld [vmem:[#allocation9 + $0x388] sm:$0xff] }
 0x268   :  { %2520 = vmatprep.subr.bf16.mxu0 %v2519_v4  ;;  %v1540_v4 = vld [vmem:[#allocation9 + $0x398] sm:$0xff] }
 0x269   :  { %v2559_v5 = vpack.c.bf16 %v1540_v4, %v1538_v3 }
 0x26b   :  { %2522 = vmatpush1.bf16.msra.mxu0 %v2521_v24  ;;  %v1542_v24 = vld [vmem:[#allocation9 + $0x3a8] sm:$0xff] }
 0x26c   :  { %2524 = vmatprep.subr.bf16.mxu0 %v2523_v8  ;;  %v1544_v8 = vld [vmem:[#allocation9 + $0x3b8] sm:$0xff] }
 0x26d   :  { %v2563_v9 = vpack.c.bf16 %v1544_v8, %v1542_v24 }
 0x26f   :  { %2526 = vmatpush1.bf16.msra.mxu0 %v2525_v12  ;;  %v1546_v12 = vld [vmem:[#allocation9 + $0x3c8] sm:$0xff] }
 0x270   :  { %2528 = vmatprep.subr.bf16.mxu0 %v2527_v11  ;;  %v1548_v11 = vld [vmem:[#allocation9 + $0x3d8] sm:$0xff] }
 0x271   :  { %v2567_v14 = vpack.c.bf16 %v1548_v11, %v1546_v12  ;;  %v1375_v12 = vrot.slane %v3105_v48, %v665_v23  ;;  %v1780_v23 = vld [vmem:[%s3250_s9 + $0x8] sm:$0xff] }
 0x273   :  { %2530 = vmatpush1.bf16.msra.mxu0 %v2529_v16  ;;  %v1550_v16 = vld [vmem:[#allocation9 + $0x3e8] sm:$0xff] }
 0x274   :  { %2532 = vmatprep.subr.bf16.mxu0 %v2531_v17  ;;  %v1552_v17 = vld [vmem:[#allocation9 + $0x3f8] sm:$0xff] }
 0x275   :  { %v2571_v19 = vpack.c.bf16 %v1552_v17, %v1550_v16 }
 0x277   :  { %2534 = vmatpush1.bf16.msra.mxu0 %v2533_v22  ;;  %v2573_v22 = vpack.c.bf16 %v1551_v21, %v1549_v20 }
 0x278   :  { %2536 = vmatprep.subr.bf16.mxu0 %v2535_v34  ;;  %v661_v34 = vsub.s32 2, %v3023_v61 }
 0x27a   :  { %v662_v26 = vrot.slane %v3090_v52, %v661_v34  ;;  %v1371_v10 = vrot.slane %v3105_v48, %v661_v34  ;;  %v1795_v48 = vld [vmem:[%s3250_s9 + $0x80] sm:$0xff] }
 0x27b   :  { %2538 = vmatpush1.bf16.msra.mxu0 %v2537_v30 }
 0x27c   :  { %2540 = vmatprep.subr.bf16.mxu0 %v2539_v41 }
 0x27f   :  { %2542 = vmatpush1.bf16.msra.mxu0 %v2541_v39 }
 0x280   :  { %2544 = vmatprep.subr.bf16.mxu0 %v2543_v40 }
 0x283   :  { %2546 = vmatpush1.bf16.msra.mxu0 %v2545_v55 }
 0x284   :  { %2548 = vmatprep.subr.bf16.mxu0 %v2547_v47 }
 0x287   :  { %2550 = vmatpush1.bf16.msra.mxu0 %v2549_v56 }
 0x288   :  { %2552 = vmatprep.subr.bf16.mxu0 %v2551_v57 }
 0x28b   :  { %2554 = vmatpush1.bf16.msra.mxu0 %v2553_v63 }
 0x28c   :  { %2556 = vmatprep.subr.bf16.mxu0 %v2555_v0 }
 0x28f   :  { %2558 = vmatpush1.bf16.msra.mxu0 %v2557_v33 }
 0x290   :  { %2560 = vmatprep.subr.bf16.mxu0 %v2559_v5 }
 0x293   :  { %2562 = vmatpush1.bf16.msra.mxu0 %v2561_v29 }
 0x294   :  { %2564 = vmatprep.subr.bf16.mxu0 %v2563_v9 }
 0x297   :  { %2566 = vmatpush1.bf16.msra.mxu0 %v2565_v13  ;;  %v1408_v13 = vrot.slane %v3111_v37, %v661_v34  ;;  %v1796_v34 = vld [vmem:[%s3250_s9 + $0x88] sm:$0xff]  ;;  %v1779_v37 = vld [vmem:[%s3250_s9] sm:$0xff] }
 0x298   :  { %2568 = vmatprep.subr.bf16.mxu0 %v2567_v14 }
 0x29b   :  { %2570 = vmatpush1.bf16.msra.mxu0 %v2569_v18 }
 0x29c   :  { %2572 = vmatprep.subr.bf16.mxu0 %v2571_v19 }
 0x29f   :  { %2574 = vmatpush1.bf16.msra.mxu0 %v2573_v22 }
 0x2a6   :  { %v1278_v28 = vpop.f32.mrb[2].mxu1 }
 0x2a7   :  { %v2611_v30 = vadd.f32 %v1278_v28, %v662_v26  ;;  %v1280_v41 = vpop.f32.mrb[3].mxu1  ;;  %v2575_v26 = vpack.c.bf16 %v1796_v34, %v1795_v48  ;;  %v1797_v28 = vld [vmem:[%s3250_s9 + $0x90] sm:$0xff] }
 0x2a8   :  { %v2612_v31 = vadd.f32 %v1280_v41, %v666_v27  ;;  %v2577_v27 = vpack.c.bf16 %v1780_v23, %v1779_v37 }
 0x2a9   :  { %v1300_v32 = vsel %vm1285_vm0, %v2611_v30, 0.0  ;;  %2576 = vmatprep.subr.bf16.mxu1 %v2575_v26 }
 0x2aa   :  { %v1301_v35 = vrot.slane %v1300_v32, 4  ;;  %v1307_v36 = vsel %vm1285_vm0, %v2612_v31, 0.0  ;;  %2578 = vmatpush3.bf16.msra.mxu1 %v2577_v27 }
 0x2ab   :  { %v1308_v39 = vrot.slane %v1307_v36, 4 }
 0x2ac   :  { %v1302_v40 = vadd.f32 %v1301_v35, %v1300_v32  ;;  %v1782_v32 = vld [vmem:[%s3250_s9 + $0x18] sm:$0xff] }
 0x2ad   :  { %v1309_v42 = vadd.f32 %v1308_v39, %v1307_v36  ;;  %v1799_v36 = vld [vmem:[%s3250_s9 + $0xa0] sm:$0xff]  ;;  %v1800_v39 = vld [vmem:[%s3250_s9 + $0xa8] sm:$0xff] }
 0x2ae   :  { %v1303_v43 = vrot.slane %v1302_v40, 2 }
 0x2af   :  { %v1310_v45 = vrot.slane %v1309_v42, 2 }
 0x2b0   :  { %v1304_v46 = vadd.f32 %v1303_v43, %v1302_v40  ;;  %v2583_v40 = vpack.c.bf16 %v1800_v39, %v1799_v36  ;;  %v1784_v43 = vld [vmem:[%s3250_s9 + $0x28] sm:$0xff] }
 0x2b1   :  { %v1311_v61 = vadd.f32 %v1310_v45, %v1309_v42  ;;  %v1783_v42 = vld [vmem:[%s3250_s9 + $0x20] sm:$0xff] }
 0x2b2   :  { %v1305_v55 = vrot.slane %v1304_v46, 1  ;;  %v2585_v45 = vpack.c.bf16 %v1784_v43, %v1783_v42 }
 0x2b3   :  { %v1312_v47 = vrot.slane %v1311_v61, 1 }
 0x2b4   :  { %v1306_v49 = vadd.f32 %v1305_v55, %v1304_v46  ;;  %v1801_v46 = vld [vmem:[%s3250_s9 + $0xb0] sm:$0xff] }
 0x2b5   :  { %v1313_v52 = vadd.f32 %v1312_v47, %v1311_v61  ;;  %v1802_v61 = vld [vmem:[%s3250_s9 + $0xb8] sm:$0xff]  ;;  %v1785_v47 = vld [vmem:[%s3250_s9 + $0x30] sm:$0xff] }
 0x2b6   :  { %v1317_v50 = vmul.f32 0.5, %v1306_v49  ;;  %v2587_v55 = vpack.c.bf16 %v1802_v61, %v1801_v46  ;;  %v1786_v49 = vld [vmem:[%s3250_s9 + $0x38] sm:$0xff] }
 0x2b7   :  { %v1318_v54 = vmul.f32 0.5, %v1313_v52  ;;  %v2589_v52 = vpack.c.bf16 %v1786_v49, %v1785_v47 }
 0x2b8   :  { %v1321_v38 = vsub.f32 %v2611_v30, %v1317_v50  ;;  %v1798_v30 = vld [vmem:[%s3250_s9 + $0x98] sm:$0xff]  ;;  %v1803_v50 = vld [vmem:[%s3250_s9 + $0xc0] sm:$0xff] }
 0x2b9   :  { %v1322_v56 = vsub.f32 %v2612_v31, %v1318_v54  ;;  %v2579_v41 = vpack.c.bf16 %v1798_v30, %v1797_v28  ;;  %v1781_v31 = vld [vmem:[%s3250_s9 + $0x10] sm:$0xff]  ;;  %v1804_v54 = vld [vmem:[%s3250_s9 + $0xc8] sm:$0xff] }
 0x2ba   :  { %v1325_v57 = vmul.f32 %v1321_v38, %v1321_v38  ;;  %v1382_v11 = vmul.f32 %v1371_v10, %v1321_v38  ;;  %v2581_v35 = vpack.c.bf16 %v1782_v32, %v1781_v31  ;;  %v2591_v38 = vpack.c.bf16 %v1804_v54, %v1803_v50  ;;  %v1553_v10 = vld [vmem:[#allocation10] sm:$0x3] }
 0x2bb   :  { %v1326_v58 = vmul.f32 %v1322_v56, %v1322_v56  ;;  %v1383_v15 = vmul.f32 %v1375_v12, %v1322_v56  ;;  %2580 = vmatprep.subr.bf16.mxu1 %v2579_v41  ;;  %v1787_v56 = vld [vmem:[%s3250_s9 + $0x40] sm:$0xff]  ;;  %v1558_v12 = vrot.slane %v1553_v10, %v3088_v51 }
 0x2bc   :  { %v1341_v59 = vsel %vm1285_vm0, %v1325_v57, 0.0  ;;  %2582 = vmatpush3.bf16.msra.mxu1 %v2581_v35  ;;  %v1788_v57 = vld [vmem:[%s3250_s9 + $0x48] sm:$0xff] }
 0x2bd   :  { %v1342_v60 = vrot.slane %v1341_v59, 4  ;;  %v1348_v62 = vsel %vm1285_vm0, %v1326_v58, 0.0  ;;  %2584 = vmatprep.subr.bf16.mxu1 %v2583_v40  ;;  %v2593_v58 = vpack.c.bf16 %v1788_v57, %v1787_v56 }
 0x2be   :  { %v1349_v63 = vrot.slane %v1348_v62, 4 }
 0x2bf   :  { %v1343_v0 = vadd.f32 %v1342_v60, %v1341_v59  ;;  %v1805_v59 = vld [vmem:[%s3250_s9 + $0xd0] sm:$0xff]  ;;  %v1806_v60 = vld [vmem:[%s3250_s9 + $0xd8] sm:$0xff] }
 0x2c0   :  { %v1350_v1 = vadd.f32 %v1349_v63, %v1348_v62  ;;  %2586 = vmatpush3.bf16.msra.mxu1 %v2585_v45  ;;  %v2595_v62 = vpack.c.bf16 %v1806_v60, %v1805_v59  ;;  %v1789_v63 = vld [vmem:[%s3250_s9 + $0x50] sm:$0xff]  ;;  %v1707_v60 = vld [vmem:[#allocation12] sm:$0x3] }
 0x2c1   :  { %v1344_v2 = vrot.slane %v1343_v0, 2  ;;  %2588 = vmatprep.subr.bf16.mxu1 %v2587_v55 }
 0x2c2   :  { %v1351_v3 = vrot.slane %v1350_v1, 2 }
 0x2c3   :  { %v1345_v4 = vadd.f32 %v1344_v2, %v1343_v0  ;;  %v1790_v0 = vld [vmem:[%s3250_s9 + $0x58] sm:$0xff]  ;;  %v1807_v2 = vld [vmem:[%s3250_s9 + $0xe0] sm:$0xff] }
 0x2c4   :  { %v1352_v33 = vadd.f32 %v1351_v3, %v1350_v1  ;;  %2590 = vmatpush3.bf16.msra.mxu1 %v2589_v52  ;;  %v2597_v1 = vpack.c.bf16 %v1790_v0, %v1789_v63  ;;  %v1808_v3 = vld [vmem:[%s3250_s9 + $0xe8] sm:$0xff]  ;;  %v1753_v63 = vrot.slane %v1707_v60, %v3093_v53  ;;  %v1708_v0 = vld [vmem:[#allocation13] sm:$0x3] }
 0x2c5   :  { %v1346_v5 = vrot.slane %v1345_v4, 1  ;;  %2592 = vmatprep.subr.bf16.mxu1 %v2591_v38 }
 0x2c6   :  { %v1353_v6 = vrot.slane %v1352_v33, 1 }
 0x2c7   :  { %v1347_v7 = vadd.f32 %v1346_v5, %v1345_v4  ;;  %v2599_v4 = vpack.c.bf16 %v1808_v3, %v1807_v2  ;;  %v1792_v5 = vld [vmem:[%s3250_s9 + $0x68] sm:$0xff]  ;;  %v1768_v2 = vrot.slane %v1708_v0, %v3088_v51 }
 0x2c8   :  { %v1354_v24 = vadd.f32 %v1353_v6, %v1352_v33  ;;  %2594 = vmatpush3.bf16.msra.mxu1 %v2593_v58  ;;  %v1791_v33 = vld [vmem:[%s3250_s9 + $0x60] sm:$0xff] }
 0x2c9   :  { %v1357_v8 = vmul.f32 0.5, %v1347_v7  ;;  %2596 = vmatprep.subr.bf16.mxu1 %v2595_v62  ;;  %v2601_v6 = vpack.c.bf16 %v1792_v5, %v1791_v33  ;;  %v1809_v7 = vld [vmem:[%s3250_s9 + $0xf0] sm:$0xff]  ;;  %v1749_v62 = vrot.slane %v1707_v60, %v3088_v51  ;;  %v1772_v33 = vrot.slane %v1708_v0, %v3093_v53 }
 0x2ca   :  { %v1358_v29 = vmul.f32 0.5, %v1354_v24  ;;  %v1810_v24 = vld [vmem:[%s3250_s9 + $0xf8] sm:$0xff] }
 0x2cb   :  { %v1386_v9 = vadd.f32 1e-05, %v1357_v8  ;;  %v1793_v8 = vld [vmem:[%s3250_s9 + $0x70] sm:$0xff] }
 0x2cc   :  { %v1387_v44 = vadd.f32 1e-05, %v1358_v29  ;;  %2598 = vmatpush3.bf16.msra.mxu1 %v2597_v1  ;;  %v2603_v29 = vpack.c.bf16 %v1810_v24, %v1809_v7 }
 0x2cd   :  { %2646 = vrsqrt.f32 %v1386_v9  ;;  %2600 = vmatprep.subr.bf16.mxu1 %v2599_v4  ;;  %v1794_v9 = vld [vmem:[%s3250_s9 + $0x78] sm:$0xff] }
 0x2ce   :  { %2648 = vrsqrt.f32 %v1387_v44  ;;  %v2605_v44 = vpack.c.bf16 %v1794_v9, %v1793_v8 }
 0x2d0   :  { %2602 = vmatpush3.bf16.msra.mxu1 %v2601_v6 }
 0x2d1   :  { %2604 = vmatprep.subr.bf16.mxu1 %v2603_v29 }
 0x2d4   :  { %2606 = vmatpush3.bf16.msra.mxu1 %v2605_v44 }
 0x2d7   :  { %v2647_v14 = vpop.eup %2646 }
 0x2d8   :  { %v2649_v16 = vpop.eup %2648  ;;  %v1394_v17 = vmul.f32 %v2647_v14, %v1382_v11  ;;  %v1562_v11 = vrot.slane %v1553_v10, %v3093_v53  ;;  %v1899_v10 = vld [vmem:[%s3251_s10] ss:$0 sm:$0xff] }
 0x2d9   :  { %v1395_v18 = vmul.f32 %v2649_v16, %v1383_v15 }
 0x2da   :  { %v1419_v19 = vadd.f32 %v1408_v13, %v1394_v17 }
 0x2db   :  { %v1420_v20 = vadd.f32 %v1412_v25, %v1395_v18 }
 0x2dc   :  { %v1423_v22 = vmax.f32 %v1419_v19, 0.0 }
 0x2dd   :  { %v1424_v21 = vmax.f32 %v1420_v20, 0.0 }
 0x2df   :  { %1700 = vmatprep.mubr.f32.mxu0 %v1424_v21 }
 0x2e0   :  { %1701 = vmatmul.mubr.f32.vlgmr.msra.gmra.mrb[2].mxu0 %v1423_v22 }
 0x3b3   :  { %v1702_v13 = vpop.f32.mrb[2].mxu0 }
 0x3b4   :  { %v2613_v14 = vadd.f32 %v1702_v13, %v1558_v12  ;;  %v1704_v15 = vpop.f32.mrb[3].mxu0 }
 0x3b5   :  { %v2614_v25 = vadd.f32 %v1704_v15, %v1562_v11 }
 0x3b6   :  { %v1709_v16 = vsel %vm1285_vm0, %v2613_v14, 0.0 }
 0x3b7   :  { %v1710_v17 = vrot.slane %v1709_v16, 4  ;;  %v1716_v18 = vsel %vm1285_vm0, %v2614_v25, 0.0 }
 0x3b8   :  { %v1717_v19 = vrot.slane %v1716_v18, 4 }
 0x3b9   :  { %v1711_v20 = vadd.f32 %v1710_v17, %v1709_v16 }
 0x3ba   :  { %v1718_v21 = vadd.f32 %v1717_v19, %v1716_v18 }
 0x3bb   :  { %v1712_v22 = vrot.slane %v1711_v20, 2 }
 0x3bc   :  { %v1719_v48 = vrot.slane %v1718_v21, 2 }
 0x3bd   :  { %v1713_v34 = vadd.f32 %v1712_v22, %v1711_v20 }
 0x3be   :  { %v1720_v26 = vadd.f32 %v1719_v48, %v1718_v21 }
 0x3bf   :  { %v1714_v37 = vrot.slane %v1713_v34, 1 }
 0x3c0   :  { %v1721_v23 = vrot.slane %v1720_v26, 1 }
 0x3c1   :  { %v1715_v27 = vadd.f32 %v1714_v37, %v1713_v34 }
 0x3c2   :  { %v1722_v28 = vadd.f32 %v1721_v23, %v1720_v26 }
 0x3c3   :  { %v1723_v30 = vmul.f32 0.5, %v1715_v27 }
 0x3c4   :  { %v1724_v41 = vmul.f32 0.5, %v1722_v28 }
 0x3c5   :  { %v1725_v31 = vsub.f32 %v2613_v14, %v1723_v30 }
 0x3c6   :  { %v1726_v32 = vsub.f32 %v2614_v25, %v1724_v41 }
 0x3c7   :  { %v1727_v35 = vmul.f32 %v1725_v31, %v1725_v31  ;;  %v1756_v1 = vmul.f32 %v1749_v62, %v1725_v31 }
 0x3c8   :  { %v1728_v36 = vmul.f32 %v1726_v32, %v1726_v32  ;;  %v1757_v4 = vmul.f32 %v1753_v63, %v1726_v32 }
 0x3c9   :  { %v1729_v39 = vsel %vm1285_vm0, %v1727_v35, 0.0 }
 0x3ca   :  { %v1730_v40 = vrot.slane %v1729_v39, 4  ;;  %v1736_v42 = vsel %vm1285_vm0, %v1728_v36, 0.0 }
 0x3cb   :  { %v1737_v43 = vrot.slane %v1736_v42, 4 }
 0x3cc   :  { %v1731_v45 = vadd.f32 %v1730_v40, %v1729_v39 }
 0x3cd   :  { %v1738_v46 = vadd.f32 %v1737_v43, %v1736_v42 }
 0x3ce   :  { %v1732_v61 = vrot.slane %v1731_v45, 2 }
 0x3cf   :  { %v1739_v55 = vrot.slane %v1738_v46, 2 }
 0x3d0   :  { %v1733_v47 = vadd.f32 %v1732_v61, %v1731_v45 }
 0x3d1   :  { %v1740_v49 = vadd.f32 %v1739_v55, %v1738_v46 }
 0x3d2   :  { %v1734_v52 = vrot.slane %v1733_v47, 1 }
 0x3d3   :  { %v1741_v50 = vrot.slane %v1740_v49, 1 }
 0x3d4   :  { %v1735_v54 = vadd.f32 %v1734_v52, %v1733_v47 }
 0x3d5   :  { %v1742_v38 = vadd.f32 %v1741_v50, %v1740_v49 }
 0x3d6   :  { %v1743_v56 = vmul.f32 0.5, %v1735_v54 }
 0x3d7   :  { %v1744_v57 = vmul.f32 0.5, %v1742_v38 }
 0x3d8   :  { %v1758_v58 = vadd.f32 1e-05, %v1743_v56 }
 0x3d9   :  { %v1759_v59 = vadd.f32 1e-05, %v1744_v57 }
 0x3da   :  { %2650 = vrsqrt.f32 %v1758_v58 }
 0x3db   :  { %2652 = vrsqrt.f32 %v1759_v59 }
 0x3e4   :  { %v2651_v3 = vpop.eup %2650 }
 0x3e5   :  { %v2653_v5 = vpop.eup %2652  ;;  %v1762_v6 = vmul.f32 %v2651_v3, %v1756_v1 }
 0x3e6   :  { %v1763_v7 = vmul.f32 %v2653_v5, %v1757_v4 }
 0x3e7   :  { %v1775_v24 = vadd.f32 %v1768_v2, %v1762_v6 }
 0x3e8   :  { %v1776_v8 = vadd.f32 %v1772_v33, %v1763_v7 }
 0x3e9   :  { %v1777_v9 = vmax.f32 %v1775_v24, 0.0 }
 0x3ea   :  { %v1778_v29 = vmax.f32 %v1776_v8, 0.0 }
 0x3ec   :  { %1882 = vmatprep.mubr.f32.mxu1 %v1778_v29 }
 0x3ed   :  { %1883 = vmatmul.mubr.f32.vlgmr.msra.gmra.mrb[4].mxu1 %v1777_v9 }
 0x4c0   :  { %v1932_v44 = vpop.f32.mrb[4].mxu1 }
 0x4c1   :  { %v1933_v12 = vpop.f32.mrb[5].mxu1 }
 0x4c2   :  { %v1934_v51 = vadd.f32 %v1933_v12, %v1932_v44 }
 0x4c4   :  { %v1885_v11 = vadd.f32 %v1934_v51, %v1899_v10 }
 0x4c6   :  { %1889 = vst.msk [vmem:[%s3252_s11] sm:$0x3] %vm1888_vm1, %v1885_v11 }
 0x4c7   :  { %1894 = vsyncpa [#allocation3], 1 }
 0x4c8   :  { %1895 = vsyncpa [#allocation5], 1 }
 0x4c9   :  { %1896 = vsyncpa [#allocation8], 1 }
 0x4ca   :  { %1897 = vsyncpa [#allocation11], 1 }
 0x4cb   :  { %1898 = vsyncpa [#allocation14], 1 }

</bundles_post_ra>
